<compile_context>
chip_gen: v5e
topology: v5e:2x2
jax: 0.10.0
libtpu: 0.0.40
codegen_flags: <defaults>
</compile_context>

<pallas_src>
import functools

import jax
import jax.numpy as jnp
from jax import lax
from jax.experimental import pallas as pl
from jax.experimental.pallas import tpu as pltpu


def _round_up(x, m):
    return (x + m - 1) // m * m


# ----------------------------- Pallas kernels ---------------------------------
def _mm_kernel(p_ref, w_ref, y_ref, *stat_refs, act, stats):
    """y_tile = patches_tile @ W (bf16 in, f32 acc).  Optionally accumulates
    per-channel sum / sum-of-squares across the N grid axis (for GroupNorm) and/or
    applies an activation (used when GroupNorm is disabled, e.g. final Tanh layer)."""
    p = p_ref[0, 0]                       # (tn, Kp)  bf16
    w = w_ref[0]                          # (Kp, Cp)  bf16
    y = jnp.dot(p, w, preferred_element_type=jnp.float32)   # (tn, Cp) f32

    if stats:
        s_ref, ss_ref = stat_refs

        @pl.when(pl.program_id(2) == 0)
        def _():
            s_ref[...] = jnp.zeros_like(s_ref)
            ss_ref[...] = jnp.zeros_like(ss_ref)

        s_ref[0, 0] += jnp.sum(y, axis=0, keepdims=True)      # (1, Cp)
        ss_ref[0, 0] += jnp.sum(y * y, axis=0, keepdims=True)  # (1, Cp)

    if act == "relu":
        y = jnp.maximum(y, 0.0)
    elif act == "tanh":
        y = jnp.tanh(y)
    y_ref[0, 0] = y.astype(y_ref.dtype)


def _norm_act_kernel(y_ref, scale_ref, shift_ref, o_ref, *, act):
    """GroupNorm affine epilogue: out = act(y * scale + shift), per-channel scale/shift."""
    y = y_ref[0, 0].astype(jnp.float32)                 # (tn, Cp)
    o = y * scale_ref[0] + shift_ref[0]                 # (1, Cp) broadcasts
    if act == "relu":
        o = jnp.maximum(o, 0.0)
    elif act == "tanh":
        o = jnp.tanh(o)
    o_ref[0, 0] = o.astype(o_ref.dtype)


_VMEM_LIMIT = 48 * 1024 * 1024  # fits v7x's 64 MiB physical VMEM with headroom


def _mm_call(patches, w, *, tn, act, stats):
    """patches: (P, B, Np, Kp) bf16;  w: (P, Kp, Cp) bf16."""
    P, B, Np, Kp = patches.shape
    Cp = w.shape[-1]
    nN = Np // tn
    kern = functools.partial(_mm_kernel, act=act, stats=stats)

    y_shape = jax.ShapeDtypeStruct((P, B, Np, Cp), jnp.bfloat16)
    y_spec = pl.BlockSpec((1, 1, tn, Cp), lambda p, b, n: (p, b, n, 0))
    if stats:
        out_shape = (y_shape,
                     jax.ShapeDtypeStruct((P, B, 1, Cp), jnp.float32),
                     jax.ShapeDtypeStruct((P, B, 1, Cp), jnp.float32))
        out_specs = (y_spec,
                     pl.BlockSpec((1, 1, 1, Cp), lambda p, b, n: (p, b, 0, 0)),
                     pl.BlockSpec((1, 1, 1, Cp), lambda p, b, n: (p, b, 0, 0)))
        sem = ("parallel", "parallel", "arbitrary")   # stats accumulate across N tiles
    else:
        out_shape = y_shape
        out_specs = y_spec
        sem = ("parallel", "parallel", "parallel")

    return pl.pallas_call(
        kern,
        out_shape=out_shape,
        grid=(P, B, nN),
        in_specs=[
            pl.BlockSpec((1, 1, tn, Kp), lambda p, b, n: (p, b, n, 0)),
            pl.BlockSpec((1, Kp, Cp), lambda p, b, n: (p, 0, 0)),
        ],
        out_specs=out_specs,
        compiler_params=pltpu.CompilerParams(
            dimension_semantics=sem, vmem_limit_bytes=_VMEM_LIMIT),
    )(patches, w)


def _norm_call(y, scale, shift, *, tn, act):
    """y: (P, B, Np, Cp) bf16;  scale/shift: (B, 1, Cp) f32."""
    P, B, Np, Cp = y.shape
    nN = Np // tn
    return pl.pallas_call(
        functools.partial(_norm_act_kernel, act=act),
        out_shape=jax.ShapeDtypeStruct((P, B, Np, Cp), jnp.bfloat16),
        grid=(P, B, nN),
        in_specs=[
            pl.BlockSpec((1, 1, tn, Cp), lambda p, b, n: (p, b, n, 0)),
            pl.BlockSpec((1, 1, Cp), lambda p, b, n: (b, 0, 0)),
            pl.BlockSpec((1, 1, Cp), lambda p, b, n: (b, 0, 0)),
        ],
        out_specs=pl.BlockSpec((1, 1, tn, Cp), lambda p, b, n: (p, b, n, 0)),
        compiler_params=pltpu.CompilerParams(
            dimension_semantics=("parallel", "parallel", "parallel"),
            vmem_limit_bytes=_VMEM_LIMIT),
    )(y, scale, shift)


# ------------------------------ layer glue -------------------------------------
def _fused_matmul_gn_act(patches, wm, gamma, beta, *, gn, act,
                         n_groups=4, eps=1e-5, tn_max=512):
    """patches: (P, B, N, K) bf16;  wm: (P, K, Cout) f32;  gamma/beta: (Cout,) f32.
    Returns (P, B, N, Cout) bf16.  GroupNorm statistics reduce over ALL P*N positions
    per batch element per group (so ConvTranspose phase decomposition normalizes over
    the full upsampled output)."""
    P, B, N, K = patches.shape
    Cout = wm.shape[-1]
    if gn:
        assert Cout % n_groups == 0, "GroupNorm(4, C) requires C % 4 == 0"

    Kp = _round_up(K, 16)                         # sublane-aligned contraction dim (bf16)
    Cp = _round_up(Cout, 128)                     # lane-dense output channels
    tn = min(tn_max, _round_up(N, 16))            # N-tile (rows of the matmul)
    Np = _round_up(N, tn)

    p = jnp.pad(patches, ((0, 0), (0, 0), (0, Np - N), (0, Kp - K)))
    w = jnp.pad(wm, ((0, 0), (0, Kp - K), (0, Cp - Cout))).astype(jnp.bfloat16)

    if not gn:
        y = _mm_call(p, w, tn=tn, act=act, stats=False)
        return y[:, :, :N, :Cout]

    y, s, ss = _mm_call(p, w, tn=tn, act=None, stats=True)

    # --- tiny per-(batch, group) statistics in plain JAX (O(B*C) work) ----------
    cg = Cout // n_groups
    s_c = jnp.sum(s[:, :, 0, :Cout], axis=0)       # (B, Cout), summed over phases
    ss_c = jnp.sum(ss[:, :, 0, :Cout], axis=0)
    cnt = float(P * N * cg)                        # zero-padded rows contribute 0 to sums
    s_g = s_c.reshape(B, n_groups, cg).sum(-1)     # (B, G)
    ss_g = ss_c.reshape(B, n_groups, cg).sum(-1)
    mean = s_g / cnt
    var = jnp.maximum(ss_g / cnt - mean * mean, 0.0)
    rstd = lax.rsqrt(var + eps)
    scale_c = jnp.repeat(rstd, cg, axis=1) * gamma[None, :]            # (B, Cout)
    shift_c = beta[None, :] - jnp.repeat(mean, cg, axis=1) * scale_c
    scale = jnp.pad(scale_c, ((0, 0), (0, Cp - Cout)))[:, None, :]     # (B, 1, Cp)
    shift = jnp.pad(shift_c, ((0, 0), (0, Cp - Cout)))[:, None, :]

    out = _norm_call(y, scale.astype(jnp.float32), shift.astype(jnp.float32),
                     tn=tn, act=act)
    return out[:, :, :N, :Cout]


def _im2col(xp, k, stride):
    """xp: (B, Hp, Wp, Cin) -> ((B, Ho*Wo, k*k*Cin), Ho, Wo) with (ky,kx,cin) order."""
    B, Hp, Wp, Cin = xp.shape
    Ho = (Hp - k) // stride + 1
    Wo = (Wp - k) // stride + 1
    cols = []
    for ky in range(k):
        for kx in range(k):
            cols.append(
                lax.slice(
                    xp,
                    (0, ky, kx, 0),
                    (B, ky + (Ho - 1) * stride + 1, kx + (Wo - 1) * stride + 1, Cin),
                    (1, stride, stride, 1),
                ))
    patches = jnp.concatenate(cols, axis=-1)
    return patches.reshape(B, Ho * Wo, k * k * Cin), Ho, Wo


def conv_gn_act(x, w, gamma, beta, *, stride, pad, gn=True, act="relu"):
    """Conv2d(bias=False) [+ GroupNorm(4)] + activation.  x: (B,H,W,Cin) bf16,
    w: (k,k,Cin,Cout) f32."""
    B = x.shape[0]
    k, _, _, Cout = w.shape
    xp = jnp.pad(x, ((0, 0), (pad, pad), (pad, pad), (0, 0)))
    patches, Ho, Wo = _im2col(xp, k, stride)                 # (B, N, K) bf16
    wm = w.reshape(1, -1, Cout)                              # (1, K, Cout)
    y = _fused_matmul_gn_act(patches[None], wm, gamma, beta, gn=gn, act=act)
    return y[0].reshape(B, Ho, Wo, Cout)


def convT_gn_act(x, wt, gamma, beta):
    """ConvTranspose2d(k=4, s=2, p=1, bias=False) + GroupNorm(4) + ReLU via a 4-phase
    sub-pixel decomposition: four 2x2 convs on the un-upsampled input whose outputs
    interleave to the 2x-resolution output.  wt in PyTorch layout (Cin, Cout, 4, 4).
    Derivation: out[2m+py, 2n+px] = sum_{dy,dx} xpad[m+py+dy, n+px+dx] * wt[:,:,3-py-2dy,3-px-2dx]."""
    B, H, W, Cin = x.shape
    Cout = wt.shape[1]
    xp = jnp.pad(x, ((0, 0), (1, 1), (1, 1), (0, 0)))        # (B, H+2, W+2, Cin)

    patch_list, w_list = [], []
    for py in range(2):
        for px in range(2):
            win = lax.slice(xp, (0, py, px, 0), (B, py + H + 1, px + W + 1, Cin))
            ph_patches, _, _ = _im2col(win, 2, 1)            # (B, H*W, 4*Cin)
            patch_list.append(ph_patches)
            w_sub = wt[:, :, 3 - py::-2, 3 - px::-2]         # (Cin, Cout, 2, 2), (dy,dx) order
            w_list.append(jnp.transpose(w_sub, (2, 3, 0, 1)).reshape(4 * Cin, Cout))

    patches = jnp.stack(patch_list, axis=0)                  # (4, B, H*W, 4*Cin)
    wm = jnp.stack(w_list, axis=0)                           # (4, 4*Cin, Cout)
    y = _fused_matmul_gn_act(patches, wm, gamma, beta, gn=True, act="relu")
    y = y.reshape(2, 2, B, H, W, Cout)
    return jnp.transpose(y, (2, 3, 0, 4, 1, 5)).reshape(B, 2 * H, 2 * W, Cout)


# ----------------------------- model configuration ------------------------------
def _enc_cfg(dim):
    return [(3, dim // 2, 3), (dim // 2, dim, 4), (dim, dim, 3), (dim, dim * 2, 4),
            (dim * 2, dim * 2, 3), (dim * 2, dim * 4, 4), (dim * 4, dim * 4, 3),
            (dim * 4, dim * 8, 4), (dim * 8, dim * 8, 3)]


def _dec_cfg(dim):
    return [("up", dim * 8, dim * 8), ("conv", dim * 8, dim * 4),
            ("up", dim * 4, dim * 4), ("conv", dim * 4, dim * 2),
            ("up", dim * 2, dim * 2), ("conv", dim * 2, dim),
            ("up", dim, dim), ("conv", dim, dim // 2)]


def init_params(key, dim):
    keys = iter(jax.random.split(key, 64))

    def conv_w(k_, cin, cout, ksz):
        std = (2.0 / (cin * ksz * ksz)) ** 0.5               # kaiming-like, deterministic
        return jax.random.normal(k_, (ksz, ksz, cin, cout), jnp.float32) * std

    enc = []
    for cin, cout, k in _enc_cfg(dim):
        enc.append(dict(w=conv_w(next(keys), cin, cout, k),
                        g=jnp.ones((cout,), jnp.float32),
                        b=jnp.zeros((cout,), jnp.float32)))
    dec = []
    for typ, cin, cout in _dec_cfg(dim):
        if typ == "up":
            std = (2.0 / (cin * 16)) ** 0.5
            w = jax.random.normal(next(keys), (cin, cout, 4, 4), jnp.float32) * std
        else:
            w = conv_w(next(keys), cin, cout, 3)
        dec.append(dict(w=w, g=jnp.ones((cout,), jnp.float32),
                        b=jnp.zeros((cout,), jnp.float32)))
    last = dict(w=conv_w(next(keys), dim // 2, 1, 3),
                g=jnp.ones((1,), jnp.float32),               # unused (no GN on last layer)
                b=jnp.zeros((1,), jnp.float32))
    return dict(encoder=enc, decoder=dec, last=last)


# ------------------------------- full forward -----------------------------------
@functools.partial(jax.jit, static_argnums=2)
def autoencoder_forward(x_nchw, params, dim):
    # PyTorch NCHW -> NHWC at the boundary; bf16 activations between layers.
    h = jnp.transpose(x_nchw, (0, 2, 3, 1)).astype(jnp.bfloat16)
    for p, (_, _, k) in zip(params["encoder"], _enc_cfg(dim)):
        h = conv_gn_act(h, p["w"], p["g"], p["b"], stride=1 if k == 3 else 2, pad=1)
    for p, (typ, _, _) in zip(params["decoder"], _dec_cfg(dim)):
        if typ == "up":
            h = convT_gn_act(h, p["w"], p["g"], p["b"])
        else:
            h = conv_gn_act(h, p["w"], p["g"], p["b"], stride=1, pad=1)
    p = params["last"]
    h = conv_gn_act(h, p["w"], p["g"], p["b"], stride=1, pad=1, gn=False, act="tanh")
    return jnp.transpose(h, (0, 3, 1, 2)).astype(jnp.float32)   # NCHW, 1 channel


if __name__ == "__main__":
    key = jax.random.PRNGKey(0)
    pkey, xkey = jax.random.split(key)

    dim = 8                                                   # channels stay /4 for GroupNorm
    params = init_params(pkey, dim)
    x = jax.random.normal(xkey, (2, 3, 16, 16), jnp.float32)  # NCHW, small spatial

    out = autoencoder_forward(x, params, dim)
    out = jax.block_until_ready(out)

    assert out.shape == (2, 1, 16, 16), out.shape
    assert bool(jnp.all(jnp.isfinite(out)))
    assert bool(jnp.all(jnp.abs(out) <= 1.0 + 1e-6))          # tanh range
    print("KERNEL_OK")
</pallas_src>

<mosaic_0001>
module attributes {stable_mosaic.version = 11 : i64} {
  func.func @_mm_kernel(%arg0: i32, %arg1: i32, %arg2: i32, %arg3: memref<1x1x256x32xbf16, #tpu.memory_space<vmem>>, %arg4: memref<1x32x128xbf16, #tpu.memory_space<vmem>>, %arg5: memref<1x1x256x128xbf16, #tpu.memory_space<vmem>>, %arg6: memref<1x1x1x128xf32, #tpu.memory_space<vmem>>, %arg7: memref<1x1x1x128xf32, #tpu.memory_space<vmem>>) attributes {dimension_semantics = [#tpu.dimension_semantics<parallel>, #tpu.dimension_semantics<parallel>, #tpu.dimension_semantics<arbitrary>], iteration_bounds = array<i64: 1, 2, 1>, scalar_prefetch = 0 : i64, scratch_operands = 0 : i64, tpu.core_type = #tpu.core_type<tc>, window_params = [{transform_indices = @transform_0, window_bounds = array<i64: 1, 1, 256, 32>}, {transform_indices = @transform_1, window_bounds = array<i64: 1, 32, 128>}, {transform_indices = @transform_2, window_bounds = array<i64: 1, 1, 256, 128>}, {transform_indices = @transform_3, window_bounds = array<i64: 1, 1, 1, 128>}, {transform_indices = @transform_4, window_bounds = array<i64: 1, 1, 1, 128>}]} {
    %c0 = arith.constant 0 : index
    %c0_0 = arith.constant 0 : index
    %c0_1 = arith.constant 0 : index
    %c0_2 = arith.constant 0 : index
    %0 = vector.load %arg3[%c0, %c0_0, %c0_1, %c0_2] : memref<1x1x256x32xbf16, #tpu.memory_space<vmem>>, vector<1x1x256x32xbf16>
    %1 = vector.shape_cast %0 : vector<1x1x256x32xbf16> to vector<256x32xbf16>
    %c0_3 = arith.constant 0 : index
    %c0_4 = arith.constant 0 : index
    %c0_5 = arith.constant 0 : index
    %2 = vector.load %arg4[%c0_3, %c0_4, %c0_5] : memref<1x32x128xbf16, #tpu.memory_space<vmem>>, vector<1x32x128xbf16>
    %3 = vector.shape_cast %2 : vector<1x32x128xbf16> to vector<32x128xbf16>
    %cst = arith.constant dense<0.000000e+00> : vector<256x128xf32>
    %4 = tpu.matmul %1, %3, %cst {dimension_numbers = #tpu.dot_dimension_numbers<[1], [0], [0], [1], [0, 0, 1, 1], [], []>} : vector<256x32xbf16>, vector<32x128xbf16>, vector<256x128xf32> -> vector<256x128xf32>
    %c0_i32 = arith.constant 0 : i32
    %5 = arith.cmpi eq, %arg2, %c0_i32 : i32
    %6 = arith.extui %5 : i1 to i32
    %c0_i32_6 = arith.constant 0 : i32
    %7 = arith.cmpi ne, %6, %c0_i32_6 : i32
    scf.if %7 {
      %cst_29 = arith.constant 0.000000e+00 : f32
      %29 = vector.broadcast %cst_29 : f32 to vector<1x1x1x128xf32>
      %c0_30 = arith.constant 0 : index
      %c0_31 = arith.constant 0 : index
      %c0_32 = arith.constant 0 : index
      %c0_33 = arith.constant 0 : index
      %30 = vector.load %arg6[%c0_30, %c0_31, %c0_32, %c0_33] : memref<1x1x1x128xf32, #tpu.memory_space<vmem>>, vector<1x1x1x128xf32>
      tpu.vector_store %arg6[%c0_30, %c0_31, %c0_32, %c0_33], %29 {strides = array<i32>} : memref<1x1x1x128xf32, #tpu.memory_space<vmem>>, vector<1x1x1x128xf32>,
      %cst_34 = arith.constant 0.000000e+00 : f32
      %31 = vector.broadcast %cst_34 : f32 to vector<1x1x1x128xf32>
      %c0_35 = arith.constant 0 : index
      %c0_36 = arith.constant 0 : index
      %c0_37 = arith.constant 0 : index
      %c0_38 = arith.constant 0 : index
      %32 = vector.load %arg7[%c0_35, %c0_36, %c0_37, %c0_38] : memref<1x1x1x128xf32, #tpu.memory_space<vmem>>, vector<1x1x1x128xf32>
      tpu.vector_store %arg7[%c0_35, %c0_36, %c0_37, %c0_38], %31 {strides = array<i32>} : memref<1x1x1x128xf32, #tpu.memory_space<vmem>>, vector<1x1x1x128xf32>,
    } else {
    }
    %c0_7 = arith.constant 0 : index
    %c0_8 = arith.constant 0 : index
    %c0_9 = arith.constant 0 : index
    %c0_10 = arith.constant 0 : index
    %8 = vector.load %arg6[%c0_7, %c0_8, %c0_9, %c0_10] : memref<1x1x1x128xf32, #tpu.memory_space<vmem>>, vector<1x1x1x128xf32>
    %9 = vector.shape_cast %8 : vector<1x1x1x128xf32> to vector<1x128xf32>
    %cst_11 = arith.constant dense<0.000000e+00> : vector<128xf32>
    %10 = vector.multi_reduction <add>, %4, %cst_11 [0] : vector<256x128xf32> to vector<128xf32>
    %11 = vector.shape_cast %10 : vector<128xf32> to vector<1x128xf32>
    %12 = arith.addf %9, %11 : vector<1x128xf32>
    %c0_12 = arith.constant 0 : index
    %c0_13 = arith.constant 0 : index
    %c0_14 = arith.constant 0 : index
    %c0_15 = arith.constant 0 : index
    %13 = vector.load %arg6[%c0_12, %c0_13, %c0_14, %c0_15] : memref<1x1x1x128xf32, #tpu.memory_space<vmem>>, vector<1x1x1x128xf32>
    %14 = vector.shape_cast %13 : vector<1x1x1x128xf32> to vector<1x128xf32>
    %15 = vector.shape_cast %12 : vector<1x128xf32> to vector<1x1x1x128xf32>
    tpu.vector_store %arg6[%c0_12, %c0_13, %c0_14, %c0_15], %15 {strides = array<i32>} : memref<1x1x1x128xf32, #tpu.memory_space<vmem>>, vector<1x1x1x128xf32>,
    %c0_16 = arith.constant 0 : index
    %c0_17 = arith.constant 0 : index
    %c0_18 = arith.constant 0 : index
    %c0_19 = arith.constant 0 : index
    %16 = vector.load %arg7[%c0_16, %c0_17, %c0_18, %c0_19] : memref<1x1x1x128xf32, #tpu.memory_space<vmem>>, vector<1x1x1x128xf32>
    %17 = vector.shape_cast %16 : vector<1x1x1x128xf32> to vector<1x128xf32>
    %18 = arith.mulf %4, %4 : vector<256x128xf32>
    %cst_20 = arith.constant dense<0.000000e+00> : vector<128xf32>
    %19 = vector.multi_reduction <add>, %18, %cst_20 [0] : vector<256x128xf32> to vector<128xf32>
    %20 = vector.shape_cast %19 : vector<128xf32> to vector<1x128xf32>
    %21 = arith.addf %17, %20 : vector<1x128xf32>
    %c0_21 = arith.constant 0 : index
    %c0_22 = arith.constant 0 : index
    %c0_23 = arith.constant 0 : index
    %c0_24 = arith.constant 0 : index
    %22 = vector.load %arg7[%c0_21, %c0_22, %c0_23, %c0_24] : memref<1x1x1x128xf32, #tpu.memory_space<vmem>>, vector<1x1x1x128xf32>
    %23 = vector.shape_cast %22 : vector<1x1x1x128xf32> to vector<1x128xf32>
    %24 = vector.shape_cast %21 : vector<1x128xf32> to vector<1x1x1x128xf32>
    tpu.vector_store %arg7[%c0_21, %c0_22, %c0_23, %c0_24], %24 {strides = array<i32>} : memref<1x1x1x128xf32, #tpu.memory_space<vmem>>, vector<1x1x1x128xf32>,
    %25 = arith.truncf %4 : vector<256x128xf32> to vector<256x128xbf16>
    %c0_25 = arith.constant 0 : index
    %c0_26 = arith.constant 0 : index
    %c0_27 = arith.constant 0 : index
    %c0_28 = arith.constant 0 : index
    %26 = vector.load %arg5[%c0_25, %c0_26, %c0_27, %c0_28] : memref<1x1x256x128xbf16, #tpu.memory_space<vmem>>, vector<1x1x256x128xbf16>
    %27 = vector.shape_cast %26 : vector<1x1x256x128xbf16> to vector<256x128xbf16>
    %28 = vector.shape_cast %25 : vector<256x128xbf16> to vector<1x1x256x128xbf16>
    tpu.vector_store %arg5[%c0_25, %c0_26, %c0_27, %c0_28], %28 {strides = array<i32>} : memref<1x1x256x128xbf16, #tpu.memory_space<vmem>>, vector<1x1x256x128xbf16>,
    return
  }
  func.func @transform_0(%arg0: i32, %arg1: i32, %arg2: i32) -> (i32, i32, i32, i32) {
    %c0_i32 = arith.constant 0 : i32
    %c0_i32_0 = arith.constant 0 : i32
    return %arg0, %arg1, %arg2, %c0_i32 : i32, i32, i32, i32
  }
  func.func @transform_1(%arg0: i32, %arg1: i32, %arg2: i32) -> (i32, i32, i32) {
    %c0_i32 = arith.constant 0 : i32
    %c0_i32_0 = arith.constant 0 : i32
    %c0_i32_1 = arith.constant 0 : i32
    return %arg0, %c0_i32, %c0_i32_0 : i32, i32, i32
  }
  func.func @transform_2(%arg0: i32, %arg1: i32, %arg2: i32) -> (i32, i32, i32, i32) {
    %c0_i32 = arith.constant 0 : i32
    %c0_i32_0 = arith.constant 0 : i32
    return %arg0, %arg1, %arg2, %c0_i32 : i32, i32, i32, i32
  }
  func.func @transform_3(%arg0: i32, %arg1: i32, %arg2: i32) -> (i32, i32, i32, i32) {
    %c0_i32 = arith.constant 0 : i32
    %c0_i32_0 = arith.constant 0 : i32
    %c0_i32_1 = arith.constant 0 : i32
    return %arg0, %arg1, %c0_i32, %c0_i32_0 : i32, i32, i32, i32
  }
  func.func @transform_4(%arg0: i32, %arg1: i32, %arg2: i32) -> (i32, i32, i32, i32) {
    %c0_i32 = arith.constant 0 : i32
    %c0_i32_0 = arith.constant 0 : i32
    %c0_i32_1 = arith.constant 0 : i32
    return %arg0, %arg1, %c0_i32, %c0_i32_0 : i32, i32, i32, i32
  }
}

module attributes {stable_mosaic.version = 11 : i64} {
  func.func @_norm_act_kernel(%arg0: i32, %arg1: i32, %arg2: i32, %arg3: memref<1x1x256x128xbf16, #tpu.memory_space<vmem>>, %arg4: memref<1x1x128xf32, #tpu.memory_space<vmem>>, %arg5: memref<1x1x128xf32, #tpu.memory_space<vmem>>, %arg6: memref<1x1x256x128xbf16, #tpu.memory_space<vmem>>) attributes {dimension_semantics = [#tpu.dimension_semantics<parallel>, #tpu.dimension_semantics<parallel>, #tpu.dimension_semantics<parallel>], iteration_bounds = array<i64: 1, 2, 1>, scalar_prefetch = 0 : i64, scratch_operands = 0 : i64, tpu.core_type = #tpu.core_type<tc>, window_params = [{transform_indices = @transform_0, window_bounds = array<i64: 1, 1, 256, 128>}, {transform_indices = @transform_1, window_bounds = array<i64: 1, 1, 128>}, {transform_indices = @transform_2, window_bounds = array<i64: 1, 1, 128>}, {transform_indices = @transform_3, window_bounds = array<i64: 1, 1, 256, 128>}]} {
    %c0 = arith.constant 0 : index
    %c0_0 = arith.constant 0 : index
    %c0_1 = arith.constant 0 : index
    %c0_2 = arith.constant 0 : index
    %0 = vector.load %arg3[%c0, %c0_0, %c0_1, %c0_2] : memref<1x1x256x128xbf16, #tpu.memory_space<vmem>>, vector<1x1x256x128xbf16>
    %1 = vector.shape_cast %0 : vector<1x1x256x128xbf16> to vector<256x128xbf16>
    %2 = arith.extf %1 : vector<256x128xbf16> to vector<256x128xf32>
    %c0_3 = arith.constant 0 : index
    %c0_4 = arith.constant 0 : index
    %c0_5 = arith.constant 0 : index
    %3 = vector.load %arg4[%c0_3, %c0_4, %c0_5] : memref<1x1x128xf32, #tpu.memory_space<vmem>>, vector<1x1x128xf32>
    %4 = vector.shape_cast %3 : vector<1x1x128xf32> to vector<1x128xf32>
    %5 = vector.broadcast %4 : vector<1x128xf32> to vector<256x128xf32>
    %6 = arith.mulf %2, %5 : vector<256x128xf32>
    %c0_6 = arith.constant 0 : index
    %c0_7 = arith.constant 0 : index
    %c0_8 = arith.constant 0 : index
    %7 = vector.load %arg5[%c0_6, %c0_7, %c0_8] : memref<1x1x128xf32, #tpu.memory_space<vmem>>, vector<1x1x128xf32>
    %8 = vector.shape_cast %7 : vector<1x1x128xf32> to vector<1x128xf32>
    %9 = vector.broadcast %8 : vector<1x128xf32> to vector<256x128xf32>
    %10 = arith.addf %6, %9 : vector<256x128xf32>
    %cst = arith.constant 0.000000e+00 : f32
    %11 = vector.broadcast %cst : f32 to vector<256x128xf32>
    %12 = arith.maximumf %10, %11 : vector<256x128xf32>
    %13 = arith.truncf %12 : vector<256x128xf32> to vector<256x128xbf16>
    %c0_9 = arith.constant 0 : index
    %c0_10 = arith.constant 0 : index
    %c0_11 = arith.constant 0 : index
    %c0_12 = arith.constant 0 : index
    %14 = vector.load %arg6[%c0_9, %c0_10, %c0_11, %c0_12] : memref<1x1x256x128xbf16, #tpu.memory_space<vmem>>, vector<1x1x256x128xbf16>
    %15 = vector.shape_cast %14 : vector<1x1x256x128xbf16> to vector<256x128xbf16>
    %16 = vector.shape_cast %13 : vector<256x128xbf16> to vector<1x1x256x128xbf16>
    tpu.vector_store %arg6[%c0_9, %c0_10, %c0_11, %c0_12], %16 {strides = array<i32>} : memref<1x1x256x128xbf16, #tpu.memory_space<vmem>>, vector<1x1x256x128xbf16>,
    return
  }
  func.func @transform_0(%arg0: i32, %arg1: i32, %arg2: i32) -> (i32, i32, i32, i32) {
    %c0_i32 = arith.constant 0 : i32
    %c0_i32_0 = arith.constant 0 : i32
    return %arg0, %arg1, %arg2, %c0_i32 : i32, i32, i32, i32
  }
  func.func @transform_1(%arg0: i32, %arg1: i32, %arg2: i32) -> (i32, i32, i32) {
    %c0_i32 = arith.constant 0 : i32
    %c0_i32_0 = arith.constant 0 : i32
    %c0_i32_1 = arith.constant 0 : i32
    return %arg1, %c0_i32, %c0_i32_0 : i32, i32, i32
  }
  func.func @transform_2(%arg0: i32, %arg1: i32, %arg2: i32) -> (i32, i32, i32) {
    %c0_i32 = arith.constant 0 : i32
    %c0_i32_0 = arith.constant 0 : i32
    %c0_i32_1 = arith.constant 0 : i32
    return %arg1, %c0_i32, %c0_i32_0 : i32, i32, i32
  }
  func.func @transform_3(%arg0: i32, %arg1: i32, %arg2: i32) -> (i32, i32, i32, i32) {
    %c0_i32 = arith.constant 0 : i32
    %c0_i32_0 = arith.constant 0 : i32
    return %arg0, %arg1, %arg2, %c0_i32 : i32, i32, i32, i32
  }
}

module attributes {stable_mosaic.version = 11 : i64} {
  func.func @_mm_kernel(%arg0: i32, %arg1: i32, %arg2: i32, %arg3: memref<1x1x64x64xbf16, #tpu.memory_space<vmem>>, %arg4: memref<1x64x128xbf16, #tpu.memory_space<vmem>>, %arg5: memref<1x1x64x128xbf16, #tpu.memory_space<vmem>>, %arg6: memref<1x1x1x128xf32, #tpu.memory_space<vmem>>, %arg7: memref<1x1x1x128xf32, #tpu.memory_space<vmem>>) attributes {dimension_semantics = [#tpu.dimension_semantics<parallel>, #tpu.dimension_semantics<parallel>, #tpu.dimension_semantics<arbitrary>], iteration_bounds = array<i64: 1, 2, 1>, scalar_prefetch = 0 : i64, scratch_operands = 0 : i64, tpu.core_type = #tpu.core_type<tc>, window_params = [{transform_indices = @transform_0, window_bounds = array<i64: 1, 1, 64, 64>}, {transform_indices = @transform_1, window_bounds = array<i64: 1, 64, 128>}, {transform_indices = @transform_2, window_bounds = array<i64: 1, 1, 64, 128>}, {transform_indices = @transform_3, window_bounds = array<i64: 1, 1, 1, 128>}, {transform_indices = @transform_4, window_bounds = array<i64: 1, 1, 1, 128>}]} {
    %c0 = arith.constant 0 : index
    %c0_0 = arith.constant 0 : index
    %c0_1 = arith.constant 0 : index
    %c0_2 = arith.constant 0 : index
    %0 = vector.load %arg3[%c0, %c0_0, %c0_1, %c0_2] : memref<1x1x64x64xbf16, #tpu.memory_space<vmem>>, vector<1x1x64x64xbf16>
    %1 = vector.shape_cast %0 : vector<1x1x64x64xbf16> to vector<64x64xbf16>
    %c0_3 = arith.constant 0 : index
    %c0_4 = arith.constant 0 : index
    %c0_5 = arith.constant 0 : index
    %2 = vector.load %arg4[%c0_3, %c0_4, %c0_5] : memref<1x64x128xbf16, #tpu.memory_space<vmem>>, vector<1x64x128xbf16>
    %3 = vector.shape_cast %2 : vector<1x64x128xbf16> to vector<64x128xbf16>
    %cst = arith.constant dense<0.000000e+00> : vector<64x128xf32>
    %4 = tpu.matmul %1, %3, %cst {dimension_numbers = #tpu.dot_dimension_numbers<[1], [0], [0], [1], [0, 0, 1, 1], [], []>} : vector<64x64xbf16>, vector<64x128xbf16>, vector<64x128xf32> -> vector<64x128xf32>
    %c0_i32 = arith.constant 0 : i32
    %5 = arith.cmpi eq, %arg2, %c0_i32 : i32
    %6 = arith.extui %5 : i1 to i32
    %c0_i32_6 = arith.constant 0 : i32
    %7 = arith.cmpi ne, %6, %c0_i32_6 : i32
    scf.if %7 {
      %cst_29 = arith.constant 0.000000e+00 : f32
      %29 = vector.broadcast %cst_29 : f32 to vector<1x1x1x128xf32>
      %c0_30 = arith.constant 0 : index
      %c0_31 = arith.constant 0 : index
      %c0_32 = arith.constant 0 : index
      %c0_33 = arith.constant 0 : index
      %30 = vector.load %arg6[%c0_30, %c0_31, %c0_32, %c0_33] : memref<1x1x1x128xf32, #tpu.memory_space<vmem>>, vector<1x1x1x128xf32>
      tpu.vector_store %arg6[%c0_30, %c0_31, %c0_32, %c0_33], %29 {strides = array<i32>} : memref<1x1x1x128xf32, #tpu.memory_space<vmem>>, vector<1x1x1x128xf32>,
      %cst_34 = arith.constant 0.000000e+00 : f32
      %31 = vector.broadcast %cst_34 : f32 to vector<1x1x1x128xf32>
      %c0_35 = arith.constant 0 : index
      %c0_36 = arith.constant 0 : index
      %c0_37 = arith.constant 0 : index
      %c0_38 = arith.constant 0 : index
      %32 = vector.load %arg7[%c0_35, %c0_36, %c0_37, %c0_38] : memref<1x1x1x128xf32, #tpu.memory_space<vmem>>, vector<1x1x1x128xf32>
      tpu.vector_store %arg7[%c0_35, %c0_36, %c0_37, %c0_38], %31 {strides = array<i32>} : memref<1x1x1x128xf32, #tpu.memory_space<vmem>>, vector<1x1x1x128xf32>,
    } else {
    }
    %c0_7 = arith.constant 0 : index
    %c0_8 = arith.constant 0 : index
    %c0_9 = arith.constant 0 : index
    %c0_10 = arith.constant 0 : index
    %8 = vector.load %arg6[%c0_7, %c0_8, %c0_9, %c0_10] : memref<1x1x1x128xf32, #tpu.memory_space<vmem>>, vector<1x1x1x128xf32>
    %9 = vector.shape_cast %8 : vector<1x1x1x128xf32> to vector<1x128xf32>
    %cst_11 = arith.constant dense<0.000000e+00> : vector<128xf32>
    %10 = vector.multi_reduction <add>, %4, %cst_11 [0] : vector<64x128xf32> to vector<128xf32>
    %11 = vector.shape_cast %10 : vector<128xf32> to vector<1x128xf32>
    %12 = arith.addf %9, %11 : vector<1x128xf32>
    %c0_12 = arith.constant 0 : index
    %c0_13 = arith.constant 0 : index
    %c0_14 = arith.constant 0 : index
    %c0_15 = arith.constant 0 : index
    %13 = vector.load %arg6[%c0_12, %c0_13, %c0_14, %c0_15] : memref<1x1x1x128xf32, #tpu.memory_space<vmem>>, vector<1x1x1x128xf32>
    %14 = vector.shape_cast %13 : vector<1x1x1x128xf32> to vector<1x128xf32>
    %15 = vector.shape_cast %12 : vector<1x128xf32> to vector<1x1x1x128xf32>
    tpu.vector_store %arg6[%c0_12, %c0_13, %c0_14, %c0_15], %15 {strides = array<i32>} : memref<1x1x1x128xf32, #tpu.memory_space<vmem>>, vector<1x1x1x128xf32>,
    %c0_16 = arith.constant 0 : index
    %c0_17 = arith.constant 0 : index
    %c0_18 = arith.constant 0 : index
    %c0_19 = arith.constant 0 : index
    %16 = vector.load %arg7[%c0_16, %c0_17, %c0_18, %c0_19] : memref<1x1x1x128xf32, #tpu.memory_space<vmem>>, vector<1x1x1x128xf32>
    %17 = vector.shape_cast %16 : vector<1x1x1x128xf32> to vector<1x128xf32>
    %18 = arith.mulf %4, %4 : vector<64x128xf32>
    %cst_20 = arith.constant dense<0.000000e+00> : vector<128xf32>
    %19 = vector.multi_reduction <add>, %18, %cst_20 [0] : vector<64x128xf32> to vector<128xf32>
    %20 = vector.shape_cast %19 : vector<128xf32> to vector<1x128xf32>
    %21 = arith.addf %17, %20 : vector<1x128xf32>
    %c0_21 = arith.constant 0 : index
    %c0_22 = arith.constant 0 : index
    %c0_23 = arith.constant 0 : index
    %c0_24 = arith.constant 0 : index
    %22 = vector.load %arg7[%c0_21, %c0_22, %c0_23, %c0_24] : memref<1x1x1x128xf32, #tpu.memory_space<vmem>>, vector<1x1x1x128xf32>
    %23 = vector.shape_cast %22 : vector<1x1x1x128xf32> to vector<1x128xf32>
    %24 = vector.shape_cast %21 : vector<1x128xf32> to vector<1x1x1x128xf32>
    tpu.vector_store %arg7[%c0_21, %c0_22, %c0_23, %c0_24], %24 {strides = array<i32>} : memref<1x1x1x128xf32, #tpu.memory_space<vmem>>, vector<1x1x1x128xf32>,
    %25 = arith.truncf %4 : vector<64x128xf32> to vector<64x128xbf16>
    %c0_25 = arith.constant 0 : index
    %c0_26 = arith.constant 0 : index
    %c0_27 = arith.constant 0 : index
    %c0_28 = arith.constant 0 : index
    %26 = vector.load %arg5[%c0_25, %c0_26, %c0_27, %c0_28] : memref<1x1x64x128xbf16, #tpu.memory_space<vmem>>, vector<1x1x64x128xbf16>
    %27 = vector.shape_cast %26 : vector<1x1x64x128xbf16> to vector<64x128xbf16>
    %28 = vector.shape_cast %25 : vector<64x128xbf16> to vector<1x1x64x128xbf16>
    tpu.vector_store %arg5[%c0_25, %c0_26, %c0_27, %c0_28], %28 {strides = array<i32>} : memref<1x1x64x128xbf16, #tpu.memory_space<vmem>>, vector<1x1x64x128xbf16>,
    return
  }
  func.func @transform_0(%arg0: i32, %arg1: i32, %arg2: i32) -> (i32, i32, i32, i32) {
    %c0_i32 = arith.constant 0 : i32
    %c0_i32_0 = arith.constant 0 : i32
    return %arg0, %arg1, %arg2, %c0_i32 : i32, i32, i32, i32
  }
  func.func @transform_1(%arg0: i32, %arg1: i32, %arg2: i32) -> (i32, i32, i32) {
    %c0_i32 = arith.constant 0 : i32
    %c0_i32_0 = arith.constant 0 : i32
    %c0_i32_1 = arith.constant 0 : i32
    return %arg0, %c0_i32, %c0_i32_0 : i32, i32, i32
  }
  func.func @transform_2(%arg0: i32, %arg1: i32, %arg2: i32) -> (i32, i32, i32, i32) {
    %c0_i32 = arith.constant 0 : i32
    %c0_i32_0 = arith.constant 0 : i32
    return %arg0, %arg1, %arg2, %c0_i32 : i32, i32, i32, i32
  }
  func.func @transform_3(%arg0: i32, %arg1: i32, %arg2: i32) -> (i32, i32, i32, i32) {
    %c0_i32 = arith.constant 0 : i32
    %c0_i32_0 = arith.constant 0 : i32
    %c0_i32_1 = arith.constant 0 : i32
    return %arg0, %arg1, %c0_i32, %c0_i32_0 : i32, i32, i32, i32
  }
  func.func @transform_4(%arg0: i32, %arg1: i32, %arg2: i32) -> (i32, i32, i32, i32) {
    %c0_i32 = arith.constant 0 : i32
    %c0_i32_0 = arith.constant 0 : i32
    %c0_i32_1 = arith.constant 0 : i32
    return %arg0, %arg1, %c0_i32, %c0_i32_0 : i32, i32, i32, i32
  }
}

module attributes {stable_mosaic.version = 11 : i64} {
  func.func @_norm_act_kernel(%arg0: i32, %arg1: i32, %arg2: i32, %arg3: memref<1x1x64x128xbf16, #tpu.memory_space<vmem>>, %arg4: memref<1x1x128xf32, #tpu.memory_space<vmem>>, %arg5: memref<1x1x128xf32, #tpu.memory_space<vmem>>, %arg6: memref<1x1x64x128xbf16, #tpu.memory_space<vmem>>) attributes {dimension_semantics = [#tpu.dimension_semantics<parallel>, #tpu.dimension_semantics<parallel>, #tpu.dimension_semantics<parallel>], iteration_bounds = array<i64: 1, 2, 1>, scalar_prefetch = 0 : i64, scratch_operands = 0 : i64, tpu.core_type = #tpu.core_type<tc>, window_params = [{transform_indices = @transform_0, window_bounds = array<i64: 1, 1, 64, 128>}, {transform_indices = @transform_1, window_bounds = array<i64: 1, 1, 128>}, {transform_indices = @transform_2, window_bounds = array<i64: 1, 1, 128>}, {transform_indices = @transform_3, window_bounds = array<i64: 1, 1, 64, 128>}]} {
    %c0 = arith.constant 0 : index
    %c0_0 = arith.constant 0 : index
    %c0_1 = arith.constant 0 : index
    %c0_2 = arith.constant 0 : index
    %0 = vector.load %arg3[%c0, %c0_0, %c0_1, %c0_2] : memref<1x1x64x128xbf16, #tpu.memory_space<vmem>>, vector<1x1x64x128xbf16>
    %1 = vector.shape_cast %0 : vector<1x1x64x128xbf16> to vector<64x128xbf16>
    %2 = arith.extf %1 : vector<64x128xbf16> to vector<64x128xf32>
    %c0_3 = arith.constant 0 : index
    %c0_4 = arith.constant 0 : index
    %c0_5 = arith.constant 0 : index
    %3 = vector.load %arg4[%c0_3, %c0_4, %c0_5] : memref<1x1x128xf32, #tpu.memory_space<vmem>>, vector<1x1x128xf32>
    %4 = vector.shape_cast %3 : vector<1x1x128xf32> to vector<1x128xf32>
    %5 = vector.broadcast %4 : vector<1x128xf32> to vector<64x128xf32>
    %6 = arith.mulf %2, %5 : vector<64x128xf32>
    %c0_6 = arith.constant 0 : index
    %c0_7 = arith.constant 0 : index
    %c0_8 = arith.constant 0 : index
    %7 = vector.load %arg5[%c0_6, %c0_7, %c0_8] : memref<1x1x128xf32, #tpu.memory_space<vmem>>, vector<1x1x128xf32>
    %8 = vector.shape_cast %7 : vector<1x1x128xf32> to vector<1x128xf32>
    %9 = vector.broadcast %8 : vector<1x128xf32> to vector<64x128xf32>
    %10 = arith.addf %6, %9 : vector<64x128xf32>
    %cst = arith.constant 0.000000e+00 : f32
    %11 = vector.broadcast %cst : f32 to vector<64x128xf32>
    %12 = arith.maximumf %10, %11 : vector<64x128xf32>
    %13 = arith.truncf %12 : vector<64x128xf32> to vector<64x128xbf16>
    %c0_9 = arith.constant 0 : index
    %c0_10 = arith.constant 0 : index
    %c0_11 = arith.constant 0 : index
    %c0_12 = arith.constant 0 : index
    %14 = vector.load %arg6[%c0_9, %c0_10, %c0_11, %c0_12] : memref<1x1x64x128xbf16, #tpu.memory_space<vmem>>, vector<1x1x64x128xbf16>
    %15 = vector.shape_cast %14 : vector<1x1x64x128xbf16> to vector<64x128xbf16>
    %16 = vector.shape_cast %13 : vector<64x128xbf16> to vector<1x1x64x128xbf16>
    tpu.vector_store %arg6[%c0_9, %c0_10, %c0_11, %c0_12], %16 {strides = array<i32>} : memref<1x1x64x128xbf16, #tpu.memory_space<vmem>>, vector<1x1x64x128xbf16>,
    return
  }
  func.func @transform_0(%arg0: i32, %arg1: i32, %arg2: i32) -> (i32, i32, i32, i32) {
    %c0_i32 = arith.constant 0 : i32
    %c0_i32_0 = arith.constant 0 : i32
    return %arg0, %arg1, %arg2, %c0_i32 : i32, i32, i32, i32
  }
  func.func @transform_1(%arg0: i32, %arg1: i32, %arg2: i32) -> (i32, i32, i32) {
    %c0_i32 = arith.constant 0 : i32
    %c0_i32_0 = arith.constant 0 : i32
    %c0_i32_1 = arith.constant 0 : i32
    return %arg1, %c0_i32, %c0_i32_0 : i32, i32, i32
  }
  func.func @transform_2(%arg0: i32, %arg1: i32, %arg2: i32) -> (i32, i32, i32) {
    %c0_i32 = arith.constant 0 : i32
    %c0_i32_0 = arith.constant 0 : i32
    %c0_i32_1 = arith.constant 0 : i32
    return %arg1, %c0_i32, %c0_i32_0 : i32, i32, i32
  }
  func.func @transform_3(%arg0: i32, %arg1: i32, %arg2: i32) -> (i32, i32, i32, i32) {
    %c0_i32 = arith.constant 0 : i32
    %c0_i32_0 = arith.constant 0 : i32
    return %arg0, %arg1, %arg2, %c0_i32 : i32, i32, i32, i32
  }
}

module attributes {stable_mosaic.version = 11 : i64} {
  func.func @_mm_kernel(%arg0: i32, %arg1: i32, %arg2: i32, %arg3: memref<1x1x64x80xbf16, #tpu.memory_space<vmem>>, %arg4: memref<1x80x128xbf16, #tpu.memory_space<vmem>>, %arg5: memref<1x1x64x128xbf16, #tpu.memory_space<vmem>>, %arg6: memref<1x1x1x128xf32, #tpu.memory_space<vmem>>, %arg7: memref<1x1x1x128xf32, #tpu.memory_space<vmem>>) attributes {dimension_semantics = [#tpu.dimension_semantics<parallel>, #tpu.dimension_semantics<parallel>, #tpu.dimension_semantics<arbitrary>], iteration_bounds = array<i64: 1, 2, 1>, scalar_prefetch = 0 : i64, scratch_operands = 0 : i64, tpu.core_type = #tpu.core_type<tc>, window_params = [{transform_indices = @transform_0, window_bounds = array<i64: 1, 1, 64, 80>}, {transform_indices = @transform_1, window_bounds = array<i64: 1, 80, 128>}, {transform_indices = @transform_2, window_bounds = array<i64: 1, 1, 64, 128>}, {transform_indices = @transform_3, window_bounds = array<i64: 1, 1, 1, 128>}, {transform_indices = @transform_4, window_bounds = array<i64: 1, 1, 1, 128>}]} {
    %c0 = arith.constant 0 : index
    %c0_0 = arith.constant 0 : index
    %c0_1 = arith.constant 0 : index
    %c0_2 = arith.constant 0 : index
    %0 = vector.load %arg3[%c0, %c0_0, %c0_1, %c0_2] : memref<1x1x64x80xbf16, #tpu.memory_space<vmem>>, vector<1x1x64x80xbf16>
    %1 = vector.shape_cast %0 : vector<1x1x64x80xbf16> to vector<64x80xbf16>
    %c0_3 = arith.constant 0 : index
    %c0_4 = arith.constant 0 : index
    %c0_5 = arith.constant 0 : index
    %2 = vector.load %arg4[%c0_3, %c0_4, %c0_5] : memref<1x80x128xbf16, #tpu.memory_space<vmem>>, vector<1x80x128xbf16>
    %3 = vector.shape_cast %2 : vector<1x80x128xbf16> to vector<80x128xbf16>
    %cst = arith.constant dense<0.000000e+00> : vector<64x128xf32>
    %4 = tpu.matmul %1, %3, %cst {dimension_numbers = #tpu.dot_dimension_numbers<[1], [0], [0], [1], [0, 0, 1, 1], [], []>} : vector<64x80xbf16>, vector<80x128xbf16>, vector<64x128xf32> -> vector<64x128xf32>
    %c0_i32 = arith.constant 0 : i32
    %5 = arith.cmpi eq, %arg2, %c0_i32 : i32
    %6 = arith.extui %5 : i1 to i32
    %c0_i32_6 = arith.constant 0 : i32
    %7 = arith.cmpi ne, %6, %c0_i32_6 : i32
    scf.if %7 {
      %cst_29 = arith.constant 0.000000e+00 : f32
      %29 = vector.broadcast %cst_29 : f32 to vector<1x1x1x128xf32>
      %c0_30 = arith.constant 0 : index
      %c0_31 = arith.constant 0 : index
      %c0_32 = arith.constant 0 : index
      %c0_33 = arith.constant 0 : index
      %30 = vector.load %arg6[%c0_30, %c0_31, %c0_32, %c0_33] : memref<1x1x1x128xf32, #tpu.memory_space<vmem>>, vector<1x1x1x128xf32>
      tpu.vector_store %arg6[%c0_30, %c0_31, %c0_32, %c0_33], %29 {strides = array<i32>} : memref<1x1x1x128xf32, #tpu.memory_space<vmem>>, vector<1x1x1x128xf32>,
      %cst_34 = arith.constant 0.000000e+00 : f32
      %31 = vector.broadcast %cst_34 : f32 to vector<1x1x1x128xf32>
      %c0_35 = arith.constant 0 : index
      %c0_36 = arith.constant 0 : index
      %c0_37 = arith.constant 0 : index
      %c0_38 = arith.constant 0 : index
      %32 = vector.load %arg7[%c0_35, %c0_36, %c0_37, %c0_38] : memref<1x1x1x128xf32, #tpu.memory_space<vmem>>, vector<1x1x1x128xf32>
      tpu.vector_store %arg7[%c0_35, %c0_36, %c0_37, %c0_38], %31 {strides = array<i32>} : memref<1x1x1x128xf32, #tpu.memory_space<vmem>>, vector<1x1x1x128xf32>,
    } else {
    }
    %c0_7 = arith.constant 0 : index
    %c0_8 = arith.constant 0 : index
    %c0_9 = arith.constant 0 : index
    %c0_10 = arith.constant 0 : index
    %8 = vector.load %arg6[%c0_7, %c0_8, %c0_9, %c0_10] : memref<1x1x1x128xf32, #tpu.memory_space<vmem>>, vector<1x1x1x128xf32>
    %9 = vector.shape_cast %8 : vector<1x1x1x128xf32> to vector<1x128xf32>
    %cst_11 = arith.constant dense<0.000000e+00> : vector<128xf32>
    %10 = vector.multi_reduction <add>, %4, %cst_11 [0] : vector<64x128xf32> to vector<128xf32>
    %11 = vector.shape_cast %10 : vector<128xf32> to vector<1x128xf32>
    %12 = arith.addf %9, %11 : vector<1x128xf32>
    %c0_12 = arith.constant 0 : index
    %c0_13 = arith.constant 0 : index
    %c0_14 = arith.constant 0 : index
    %c0_15 = arith.constant 0 : index
    %13 = vector.load %arg6[%c0_12, %c0_13, %c0_14, %c0_15] : memref<1x1x1x128xf32, #tpu.memory_space<vmem>>, vector<1x1x1x128xf32>
    %14 = vector.shape_cast %13 : vector<1x1x1x128xf32> to vector<1x128xf32>
    %15 = vector.shape_cast %12 : vector<1x128xf32> to vector<1x1x1x128xf32>
    tpu.vector_store %arg6[%c0_12, %c0_13, %c0_14, %c0_15], %15 {strides = array<i32>} : memref<1x1x1x128xf32, #tpu.memory_space<vmem>>, vector<1x1x1x128xf32>,
    %c0_16 = arith.constant 0 : index
    %c0_17 = arith.constant 0 : index
    %c0_18 = arith.constant 0 : index
    %c0_19 = arith.constant 0 : index
    %16 = vector.load %arg7[%c0_16, %c0_17, %c0_18, %c0_19] : memref<1x1x1x128xf32, #tpu.memory_space<vmem>>, vector<1x1x1x128xf32>
    %17 = vector.shape_cast %16 : vector<1x1x1x128xf32> to vector<1x128xf32>
    %18 = arith.mulf %4, %4 : vector<64x128xf32>
    %cst_20 = arith.constant dense<0.000000e+00> : vector<128xf32>
    %19 = vector.multi_reduction <add>, %18, %cst_20 [0] : vector<64x128xf32> to vector<128xf32>
    %20 = vector.shape_cast %19 : vector<128xf32> to vector<1x128xf32>
    %21 = arith.addf %17, %20 : vector<1x128xf32>
    %c0_21 = arith.constant 0 : index
    %c0_22 = arith.constant 0 : index
    %c0_23 = arith.constant 0 : index
    %c0_24 = arith.constant 0 : index
    %22 = vector.load %arg7[%c0_21, %c0_22, %c0_23, %c0_24] : memref<1x1x1x128xf32, #tpu.memory_space<vmem>>, vector<1x1x1x128xf32>
    %23 = vector.shape_cast %22 : vector<1x1x1x128xf32> to vector<1x128xf32>
    %24 = vector.shape_cast %21 : vector<1x128xf32> to vector<1x1x1x128xf32>
    tpu.vector_store %arg7[%c0_21, %c0_22, %c0_23, %c0_24], %24 {strides = array<i32>} : memref<1x1x1x128xf32, #tpu.memory_space<vmem>>, vector<1x1x1x128xf32>,
    %25 = arith.truncf %4 : vector<64x128xf32> to vector<64x128xbf16>
    %c0_25 = arith.constant 0 : index
    %c0_26 = arith.constant 0 : index
    %c0_27 = arith.constant 0 : index
    %c0_28 = arith.constant 0 : index
    %26 = vector.load %arg5[%c0_25, %c0_26, %c0_27, %c0_28] : memref<1x1x64x128xbf16, #tpu.memory_space<vmem>>, vector<1x1x64x128xbf16>
    %27 = vector.shape_cast %26 : vector<1x1x64x128xbf16> to vector<64x128xbf16>
    %28 = vector.shape_cast %25 : vector<64x128xbf16> to vector<1x1x64x128xbf16>
    tpu.vector_store %arg5[%c0_25, %c0_26, %c0_27, %c0_28], %28 {strides = array<i32>} : memref<1x1x64x128xbf16, #tpu.memory_space<vmem>>, vector<1x1x64x128xbf16>,
    return
  }
  func.func @transform_0(%arg0: i32, %arg1: i32, %arg2: i32) -> (i32, i32, i32, i32) {
    %c0_i32 = arith.constant 0 : i32
    %c0_i32_0 = arith.constant 0 : i32
    return %arg0, %arg1, %arg2, %c0_i32 : i32, i32, i32, i32
  }
  func.func @transform_1(%arg0: i32, %arg1: i32, %arg2: i32) -> (i32, i32, i32) {
    %c0_i32 = arith.constant 0 : i32
    %c0_i32_0 = arith.constant 0 : i32
    %c0_i32_1 = arith.constant 0 : i32
    return %arg0, %c0_i32, %c0_i32_0 : i32, i32, i32
  }
  func.func @transform_2(%arg0: i32, %arg1: i32, %arg2: i32) -> (i32, i32, i32, i32) {
    %c0_i32 = arith.constant 0 : i32
    %c0_i32_0 = arith.constant 0 : i32
    return %arg0, %arg1, %arg2, %c0_i32 : i32, i32, i32, i32
  }
  func.func @transform_3(%arg0: i32, %arg1: i32, %arg2: i32) -> (i32, i32, i32, i32) {
    %c0_i32 = arith.constant 0 : i32
    %c0_i32_0 = arith.constant 0 : i32
    %c0_i32_1 = arith.constant 0 : i32
    return %arg0, %arg1, %c0_i32, %c0_i32_0 : i32, i32, i32, i32
  }
  func.func @transform_4(%arg0: i32, %arg1: i32, %arg2: i32) -> (i32, i32, i32, i32) {
    %c0_i32 = arith.constant 0 : i32
    %c0_i32_0 = arith.constant 0 : i32
    %c0_i32_1 = arith.constant 0 : i32
    return %arg0, %arg1, %c0_i32, %c0_i32_0 : i32, i32, i32, i32
  }
}

module attributes {stable_mosaic.version = 11 : i64} {
  func.func @_mm_kernel(%arg0: i32, %arg1: i32, %arg2: i32, %arg3: memref<1x1x16x128xbf16, #tpu.memory_space<vmem>>, %arg4: memref<1x128x128xbf16, #tpu.memory_space<vmem>>, %arg5: memref<1x1x16x128xbf16, #tpu.memory_space<vmem>>, %arg6: memref<1x1x1x128xf32, #tpu.memory_space<vmem>>, %arg7: memref<1x1x1x128xf32, #tpu.memory_space<vmem>>) attributes {dimension_semantics = [#tpu.dimension_semantics<parallel>, #tpu.dimension_semantics<parallel>, #tpu.dimension_semantics<arbitrary>], iteration_bounds = array<i64: 1, 2, 1>, scalar_prefetch = 0 : i64, scratch_operands = 0 : i64, tpu.core_type = #tpu.core_type<tc>, window_params = [{transform_indices = @transform_0, window_bounds = array<i64: 1, 1, 16, 128>}, {transform_indices = @transform_1, window_bounds = array<i64: 1, 128, 128>}, {transform_indices = @transform_2, window_bounds = array<i64: 1, 1, 16, 128>}, {transform_indices = @transform_3, window_bounds = array<i64: 1, 1, 1, 128>}, {transform_indices = @transform_4, window_bounds = array<i64: 1, 1, 1, 128>}]} {
    %c0 = arith.constant 0 : index
    %c0_0 = arith.constant 0 : index
    %c0_1 = arith.constant 0 : index
    %c0_2 = arith.constant 0 : index
    %0 = vector.load %arg3[%c0, %c0_0, %c0_1, %c0_2] : memref<1x1x16x128xbf16, #tpu.memory_space<vmem>>, vector<1x1x16x128xbf16>
    %1 = vector.shape_cast %0 : vector<1x1x16x128xbf16> to vector<16x128xbf16>
    %c0_3 = arith.constant 0 : index
    %c0_4 = arith.constant 0 : index
    %c0_5 = arith.constant 0 : index
    %2 = vector.load %arg4[%c0_3, %c0_4, %c0_5] : memref<1x128x128xbf16, #tpu.memory_space<vmem>>, vector<1x128x128xbf16>
    %3 = vector.shape_cast %2 : vector<1x128x128xbf16> to vector<128x128xbf16>
    %cst = arith.constant dense<0.000000e+00> : vector<16x128xf32>
    %4 = tpu.matmul %1, %3, %cst {dimension_numbers = #tpu.dot_dimension_numbers<[1], [0], [0], [1], [0, 0, 1, 1], [], []>} : vector<16x128xbf16>, vector<128x128xbf16>, vector<16x128xf32> -> vector<16x128xf32>
    %c0_i32 = arith.constant 0 : i32
    %5 = arith.cmpi eq, %arg2, %c0_i32 : i32
    %6 = arith.extui %5 : i1 to i32
    %c0_i32_6 = arith.constant 0 : i32
    %7 = arith.cmpi ne, %6, %c0_i32_6 : i32
    scf.if %7 {
      %cst_29 = arith.constant 0.000000e+00 : f32
      %29 = vector.broadcast %cst_29 : f32 to vector<1x1x1x128xf32>
      %c0_30 = arith.constant 0 : index
      %c0_31 = arith.constant 0 : index
      %c0_32 = arith.constant 0 : index
      %c0_33 = arith.constant 0 : index
      %30 = vector.load %arg6[%c0_30, %c0_31, %c0_32, %c0_33] : memref<1x1x1x128xf32, #tpu.memory_space<vmem>>, vector<1x1x1x128xf32>
      tpu.vector_store %arg6[%c0_30, %c0_31, %c0_32, %c0_33], %29 {strides = array<i32>} : memref<1x1x1x128xf32, #tpu.memory_space<vmem>>, vector<1x1x1x128xf32>,
      %cst_34 = arith.constant 0.000000e+00 : f32
      %31 = vector.broadcast %cst_34 : f32 to vector<1x1x1x128xf32>
      %c0_35 = arith.constant 0 : index
      %c0_36 = arith.constant 0 : index
      %c0_37 = arith.constant 0 : index
      %c0_38 = arith.constant 0 : index
      %32 = vector.load %arg7[%c0_35, %c0_36, %c0_37, %c0_38] : memref<1x1x1x128xf32, #tpu.memory_space<vmem>>, vector<1x1x1x128xf32>
      tpu.vector_store %arg7[%c0_35, %c0_36, %c0_37, %c0_38], %31 {strides = array<i32>} : memref<1x1x1x128xf32, #tpu.memory_space<vmem>>, vector<1x1x1x128xf32>,
    } else {
    }
    %c0_7 = arith.constant 0 : index
    %c0_8 = arith.constant 0 : index
    %c0_9 = arith.constant 0 : index
    %c0_10 = arith.constant 0 : index
    %8 = vector.load %arg6[%c0_7, %c0_8, %c0_9, %c0_10] : memref<1x1x1x128xf32, #tpu.memory_space<vmem>>, vector<1x1x1x128xf32>
    %9 = vector.shape_cast %8 : vector<1x1x1x128xf32> to vector<1x128xf32>
    %cst_11 = arith.constant dense<0.000000e+00> : vector<128xf32>
    %10 = vector.multi_reduction <add>, %4, %cst_11 [0] : vector<16x128xf32> to vector<128xf32>
    %11 = vector.shape_cast %10 : vector<128xf32> to vector<1x128xf32>
    %12 = arith.addf %9, %11 : vector<1x128xf32>
    %c0_12 = arith.constant 0 : index
    %c0_13 = arith.constant 0 : index
    %c0_14 = arith.constant 0 : index
    %c0_15 = arith.constant 0 : index
    %13 = vector.load %arg6[%c0_12, %c0_13, %c0_14, %c0_15] : memref<1x1x1x128xf32, #tpu.memory_space<vmem>>, vector<1x1x1x128xf32>
    %14 = vector.shape_cast %13 : vector<1x1x1x128xf32> to vector<1x128xf32>
    %15 = vector.shape_cast %12 : vector<1x128xf32> to vector<1x1x1x128xf32>
    tpu.vector_store %arg6[%c0_12, %c0_13, %c0_14, %c0_15], %15 {strides = array<i32>} : memref<1x1x1x128xf32, #tpu.memory_space<vmem>>, vector<1x1x1x128xf32>,
    %c0_16 = arith.constant 0 : index
    %c0_17 = arith.constant 0 : index
    %c0_18 = arith.constant 0 : index
    %c0_19 = arith.constant 0 : index
    %16 = vector.load %arg7[%c0_16, %c0_17, %c0_18, %c0_19] : memref<1x1x1x128xf32, #tpu.memory_space<vmem>>, vector<1x1x1x128xf32>
    %17 = vector.shape_cast %16 : vector<1x1x1x128xf32> to vector<1x128xf32>
    %18 = arith.mulf %4, %4 : vector<16x128xf32>
    %cst_20 = arith.constant dense<0.000000e+00> : vector<128xf32>
    %19 = vector.multi_reduction <add>, %18, %cst_20 [0] : vector<16x128xf32> to vector<128xf32>
    %20 = vector.shape_cast %19 : vector<128xf32> to vector<1x128xf32>
    %21 = arith.addf %17, %20 : vector<1x128xf32>
    %c0_21 = arith.constant 0 : index
    %c0_22 = arith.constant 0 : index
    %c0_23 = arith.constant 0 : index
    %c0_24 = arith.constant 0 : index
    %22 = vector.load %arg7[%c0_21, %c0_22, %c0_23, %c0_24] : memref<1x1x1x128xf32, #tpu.memory_space<vmem>>, vector<1x1x1x128xf32>
    %23 = vector.shape_cast %22 : vector<1x1x1x128xf32> to vector<1x128xf32>
    %24 = vector.shape_cast %21 : vector<1x128xf32> to vector<1x1x1x128xf32>
    tpu.vector_store %arg7[%c0_21, %c0_22, %c0_23, %c0_24], %24 {strides = array<i32>} : memref<1x1x1x128xf32, #tpu.memory_space<vmem>>, vector<1x1x1x128xf32>,
    %25 = arith.truncf %4 : vector<16x128xf32> to vector<16x128xbf16>
    %c0_25 = arith.constant 0 : index
    %c0_26 = arith.constant 0 : index
    %c0_27 = arith.constant 0 : index
    %c0_28 = arith.constant 0 : index
    %26 = vector.load %arg5[%c0_25, %c0_26, %c0_27, %c0_28] : memref<1x1x16x128xbf16, #tpu.memory_space<vmem>>, vector<1x1x16x128xbf16>
    %27 = vector.shape_cast %26 : vector<1x1x16x128xbf16> to vector<16x128xbf16>
    %28 = vector.shape_cast %25 : vector<16x128xbf16> to vector<1x1x16x128xbf16>
    tpu.vector_store %arg5[%c0_25, %c0_26, %c0_27, %c0_28], %28 {strides = array<i32>} : memref<1x1x16x128xbf16, #tpu.memory_space<vmem>>, vector<1x1x16x128xbf16>,
    return
  }
  func.func @transform_0(%arg0: i32, %arg1: i32, %arg2: i32) -> (i32, i32, i32, i32) {
    %c0_i32 = arith.constant 0 : i32
    %c0_i32_0 = arith.constant 0 : i32
    return %arg0, %arg1, %arg2, %c0_i32 : i32, i32, i32, i32
  }
  func.func @transform_1(%arg0: i32, %arg1: i32, %arg2: i32) -> (i32, i32, i32) {
    %c0_i32 = arith.constant 0 : i32
    %c0_i32_0 = arith.constant 0 : i32
    %c0_i32_1 = arith.constant 0 : i32
    return %arg0, %c0_i32, %c0_i32_0 : i32, i32, i32
  }
  func.func @transform_2(%arg0: i32, %arg1: i32, %arg2: i32) -> (i32, i32, i32, i32) {
    %c0_i32 = arith.constant 0 : i32
    %c0_i32_0 = arith.constant 0 : i32
    return %arg0, %arg1, %arg2, %c0_i32 : i32, i32, i32, i32
  }
  func.func @transform_3(%arg0: i32, %arg1: i32, %arg2: i32) -> (i32, i32, i32, i32) {
    %c0_i32 = arith.constant 0 : i32
    %c0_i32_0 = arith.constant 0 : i32
    %c0_i32_1 = arith.constant 0 : i32
    return %arg0, %arg1, %c0_i32, %c0_i32_0 : i32, i32, i32, i32
  }
  func.func @transform_4(%arg0: i32, %arg1: i32, %arg2: i32) -> (i32, i32, i32, i32) {
    %c0_i32 = arith.constant 0 : i32
    %c0_i32_0 = arith.constant 0 : i32
    %c0_i32_1 = arith.constant 0 : i32
    return %arg0, %arg1, %c0_i32, %c0_i32_0 : i32, i32, i32, i32
  }
}

module attributes {stable_mosaic.version = 11 : i64} {
  func.func @_norm_act_kernel(%arg0: i32, %arg1: i32, %arg2: i32, %arg3: memref<1x1x16x128xbf16, #tpu.memory_space<vmem>>, %arg4: memref<1x1x128xf32, #tpu.memory_space<vmem>>, %arg5: memref<1x1x128xf32, #tpu.memory_space<vmem>>, %arg6: memref<1x1x16x128xbf16, #tpu.memory_space<vmem>>) attributes {dimension_semantics = [#tpu.dimension_semantics<parallel>, #tpu.dimension_semantics<parallel>, #tpu.dimension_semantics<parallel>], iteration_bounds = array<i64: 1, 2, 1>, scalar_prefetch = 0 : i64, scratch_operands = 0 : i64, tpu.core_type = #tpu.core_type<tc>, window_params = [{transform_indices = @transform_0, window_bounds = array<i64: 1, 1, 16, 128>}, {transform_indices = @transform_1, window_bounds = array<i64: 1, 1, 128>}, {transform_indices = @transform_2, window_bounds = array<i64: 1, 1, 128>}, {transform_indices = @transform_3, window_bounds = array<i64: 1, 1, 16, 128>}]} {
    %c0 = arith.constant 0 : index
    %c0_0 = arith.constant 0 : index
    %c0_1 = arith.constant 0 : index
    %c0_2 = arith.constant 0 : index
    %0 = vector.load %arg3[%c0, %c0_0, %c0_1, %c0_2] : memref<1x1x16x128xbf16, #tpu.memory_space<vmem>>, vector<1x1x16x128xbf16>
    %1 = vector.shape_cast %0 : vector<1x1x16x128xbf16> to vector<16x128xbf16>
    %2 = arith.extf %1 : vector<16x128xbf16> to vector<16x128xf32>
    %c0_3 = arith.constant 0 : index
    %c0_4 = arith.constant 0 : index
    %c0_5 = arith.constant 0 : index
    %3 = vector.load %arg4[%c0_3, %c0_4, %c0_5] : memref<1x1x128xf32, #tpu.memory_space<vmem>>, vector<1x1x128xf32>
    %4 = vector.shape_cast %3 : vector<1x1x128xf32> to vector<1x128xf32>
    %5 = vector.broadcast %4 : vector<1x128xf32> to vector<16x128xf32>
    %6 = arith.mulf %2, %5 : vector<16x128xf32>
    %c0_6 = arith.constant 0 : index
    %c0_7 = arith.constant 0 : index
    %c0_8 = arith.constant 0 : index
    %7 = vector.load %arg5[%c0_6, %c0_7, %c0_8] : memref<1x1x128xf32, #tpu.memory_space<vmem>>, vector<1x1x128xf32>
    %8 = vector.shape_cast %7 : vector<1x1x128xf32> to vector<1x128xf32>
    %9 = vector.broadcast %8 : vector<1x128xf32> to vector<16x128xf32>
    %10 = arith.addf %6, %9 : vector<16x128xf32>
    %cst = arith.constant 0.000000e+00 : f32
    %11 = vector.broadcast %cst : f32 to vector<16x128xf32>
    %12 = arith.maximumf %10, %11 : vector<16x128xf32>
    %13 = arith.truncf %12 : vector<16x128xf32> to vector<16x128xbf16>
    %c0_9 = arith.constant 0 : index
    %c0_10 = arith.constant 0 : index
    %c0_11 = arith.constant 0 : index
    %c0_12 = arith.constant 0 : index
    %14 = vector.load %arg6[%c0_9, %c0_10, %c0_11, %c0_12] : memref<1x1x16x128xbf16, #tpu.memory_space<vmem>>, vector<1x1x16x128xbf16>
    %15 = vector.shape_cast %14 : vector<1x1x16x128xbf16> to vector<16x128xbf16>
    %16 = vector.shape_cast %13 : vector<16x128xbf16> to vector<1x1x16x128xbf16>
    tpu.vector_store %arg6[%c0_9, %c0_10, %c0_11, %c0_12], %16 {strides = array<i32>} : memref<1x1x16x128xbf16, #tpu.memory_space<vmem>>, vector<1x1x16x128xbf16>,
    return
  }
  func.func @transform_0(%arg0: i32, %arg1: i32, %arg2: i32) -> (i32, i32, i32, i32) {
    %c0_i32 = arith.constant 0 : i32
    %c0_i32_0 = arith.constant 0 : i32
    return %arg0, %arg1, %arg2, %c0_i32 : i32, i32, i32, i32
  }
  func.func @transform_1(%arg0: i32, %arg1: i32, %arg2: i32) -> (i32, i32, i32) {
    %c0_i32 = arith.constant 0 : i32
    %c0_i32_0 = arith.constant 0 : i32
    %c0_i32_1 = arith.constant 0 : i32
    return %arg1, %c0_i32, %c0_i32_0 : i32, i32, i32
  }
  func.func @transform_2(%arg0: i32, %arg1: i32, %arg2: i32) -> (i32, i32, i32) {
    %c0_i32 = arith.constant 0 : i32
    %c0_i32_0 = arith.constant 0 : i32
    %c0_i32_1 = arith.constant 0 : i32
    return %arg1, %c0_i32, %c0_i32_0 : i32, i32, i32
  }
  func.func @transform_3(%arg0: i32, %arg1: i32, %arg2: i32) -> (i32, i32, i32, i32) {
    %c0_i32 = arith.constant 0 : i32
    %c0_i32_0 = arith.constant 0 : i32
    return %arg0, %arg1, %arg2, %c0_i32 : i32, i32, i32, i32
  }
}

module attributes {stable_mosaic.version = 11 : i64} {
  func.func @_mm_kernel(%arg0: i32, %arg1: i32, %arg2: i32, %arg3: memref<1x1x16x144xbf16, #tpu.memory_space<vmem>>, %arg4: memref<1x144x128xbf16, #tpu.memory_space<vmem>>, %arg5: memref<1x1x16x128xbf16, #tpu.memory_space<vmem>>, %arg6: memref<1x1x1x128xf32, #tpu.memory_space<vmem>>, %arg7: memref<1x1x1x128xf32, #tpu.memory_space<vmem>>) attributes {dimension_semantics = [#tpu.dimension_semantics<parallel>, #tpu.dimension_semantics<parallel>, #tpu.dimension_semantics<arbitrary>], iteration_bounds = array<i64: 1, 2, 1>, scalar_prefetch = 0 : i64, scratch_operands = 0 : i64, tpu.core_type = #tpu.core_type<tc>, window_params = [{transform_indices = @transform_0, window_bounds = array<i64: 1, 1, 16, 144>}, {transform_indices = @transform_1, window_bounds = array<i64: 1, 144, 128>}, {transform_indices = @transform_2, window_bounds = array<i64: 1, 1, 16, 128>}, {transform_indices = @transform_3, window_bounds = array<i64: 1, 1, 1, 128>}, {transform_indices = @transform_4, window_bounds = array<i64: 1, 1, 1, 128>}]} {
    %c0 = arith.constant 0 : index
    %c0_0 = arith.constant 0 : index
    %c0_1 = arith.constant 0 : index
    %c0_2 = arith.constant 0 : index
    %0 = vector.load %arg3[%c0, %c0_0, %c0_1, %c0_2] : memref<1x1x16x144xbf16, #tpu.memory_space<vmem>>, vector<1x1x16x144xbf16>
    %1 = vector.shape_cast %0 : vector<1x1x16x144xbf16> to vector<16x144xbf16>
    %c0_3 = arith.constant 0 : index
    %c0_4 = arith.constant 0 : index
    %c0_5 = arith.constant 0 : index
    %2 = vector.load %arg4[%c0_3, %c0_4, %c0_5] : memref<1x144x128xbf16, #tpu.memory_space<vmem>>, vector<1x144x128xbf16>
    %3 = vector.shape_cast %2 : vector<1x144x128xbf16> to vector<144x128xbf16>
    %cst = arith.constant dense<0.000000e+00> : vector<16x128xf32>
    %4 = tpu.matmul %1, %3, %cst {dimension_numbers = #tpu.dot_dimension_numbers<[1], [0], [0], [1], [0, 0, 1, 1], [], []>} : vector<16x144xbf16>, vector<144x128xbf16>, vector<16x128xf32> -> vector<16x128xf32>
    %c0_i32 = arith.constant 0 : i32
    %5 = arith.cmpi eq, %arg2, %c0_i32 : i32
    %6 = arith.extui %5 : i1 to i32
    %c0_i32_6 = arith.constant 0 : i32
    %7 = arith.cmpi ne, %6, %c0_i32_6 : i32
    scf.if %7 {
      %cst_29 = arith.constant 0.000000e+00 : f32
      %29 = vector.broadcast %cst_29 : f32 to vector<1x1x1x128xf32>
      %c0_30 = arith.constant 0 : index
      %c0_31 = arith.constant 0 : index
      %c0_32 = arith.constant 0 : index
      %c0_33 = arith.constant 0 : index
      %30 = vector.load %arg6[%c0_30, %c0_31, %c0_32, %c0_33] : memref<1x1x1x128xf32, #tpu.memory_space<vmem>>, vector<1x1x1x128xf32>
      tpu.vector_store %arg6[%c0_30, %c0_31, %c0_32, %c0_33], %29 {strides = array<i32>} : memref<1x1x1x128xf32, #tpu.memory_space<vmem>>, vector<1x1x1x128xf32>,
      %cst_34 = arith.constant 0.000000e+00 : f32
      %31 = vector.broadcast %cst_34 : f32 to vector<1x1x1x128xf32>
      %c0_35 = arith.constant 0 : index
      %c0_36 = arith.constant 0 : index
      %c0_37 = arith.constant 0 : index
      %c0_38 = arith.constant 0 : index
      %32 = vector.load %arg7[%c0_35, %c0_36, %c0_37, %c0_38] : memref<1x1x1x128xf32, #tpu.memory_space<vmem>>, vector<1x1x1x128xf32>
      tpu.vector_store %arg7[%c0_35, %c0_36, %c0_37, %c0_38], %31 {strides = array<i32>} : memref<1x1x1x128xf32, #tpu.memory_space<vmem>>, vector<1x1x1x128xf32>,
    } else {
    }
    %c0_7 = arith.constant 0 : index
    %c0_8 = arith.constant 0 : index
    %c0_9 = arith.constant 0 : index
    %c0_10 = arith.constant 0 : index
    %8 = vector.load %arg6[%c0_7, %c0_8, %c0_9, %c0_10] : memref<1x1x1x128xf32, #tpu.memory_space<vmem>>, vector<1x1x1x128xf32>
    %9 = vector.shape_cast %8 : vector<1x1x1x128xf32> to vector<1x128xf32>
    %cst_11 = arith.constant dense<0.000000e+00> : vector<128xf32>
    %10 = vector.multi_reduction <add>, %4, %cst_11 [0] : vector<16x128xf32> to vector<128xf32>
    %11 = vector.shape_cast %10 : vector<128xf32> to vector<1x128xf32>
    %12 = arith.addf %9, %11 : vector<1x128xf32>
    %c0_12 = arith.constant 0 : index
    %c0_13 = arith.constant 0 : index
    %c0_14 = arith.constant 0 : index
    %c0_15 = arith.constant 0 : index
    %13 = vector.load %arg6[%c0_12, %c0_13, %c0_14, %c0_15] : memref<1x1x1x128xf32, #tpu.memory_space<vmem>>, vector<1x1x1x128xf32>
    %14 = vector.shape_cast %13 : vector<1x1x1x128xf32> to vector<1x128xf32>
    %15 = vector.shape_cast %12 : vector<1x128xf32> to vector<1x1x1x128xf32>
    tpu.vector_store %arg6[%c0_12, %c0_13, %c0_14, %c0_15], %15 {strides = array<i32>} : memref<1x1x1x128xf32, #tpu.memory_space<vmem>>, vector<1x1x1x128xf32>,
    %c0_16 = arith.constant 0 : index
    %c0_17 = arith.constant 0 : index
    %c0_18 = arith.constant 0 : index
    %c0_19 = arith.constant 0 : index
    %16 = vector.load %arg7[%c0_16, %c0_17, %c0_18, %c0_19] : memref<1x1x1x128xf32, #tpu.memory_space<vmem>>, vector<1x1x1x128xf32>
    %17 = vector.shape_cast %16 : vector<1x1x1x128xf32> to vector<1x128xf32>
    %18 = arith.mulf %4, %4 : vector<16x128xf32>
    %cst_20 = arith.constant dense<0.000000e+00> : vector<128xf32>
    %19 = vector.multi_reduction <add>, %18, %cst_20 [0] : vector<16x128xf32> to vector<128xf32>
    %20 = vector.shape_cast %19 : vector<128xf32> to vector<1x128xf32>
    %21 = arith.addf %17, %20 : vector<1x128xf32>
    %c0_21 = arith.constant 0 : index
    %c0_22 = arith.constant 0 : index
    %c0_23 = arith.constant 0 : index
    %c0_24 = arith.constant 0 : index
    %22 = vector.load %arg7[%c0_21, %c0_22, %c0_23, %c0_24] : memref<1x1x1x128xf32, #tpu.memory_space<vmem>>, vector<1x1x1x128xf32>
    %23 = vector.shape_cast %22 : vector<1x1x1x128xf32> to vector<1x128xf32>
    %24 = vector.shape_cast %21 : vector<1x128xf32> to vector<1x1x1x128xf32>
    tpu.vector_store %arg7[%c0_21, %c0_22, %c0_23, %c0_24], %24 {strides = array<i32>} : memref<1x1x1x128xf32, #tpu.memory_space<vmem>>, vector<1x1x1x128xf32>,
    %25 = arith.truncf %4 : vector<16x128xf32> to vector<16x128xbf16>
    %c0_25 = arith.constant 0 : index
    %c0_26 = arith.constant 0 : index
    %c0_27 = arith.constant 0 : index
    %c0_28 = arith.constant 0 : index
    %26 = vector.load %arg5[%c0_25, %c0_26, %c0_27, %c0_28] : memref<1x1x16x128xbf16, #tpu.memory_space<vmem>>, vector<1x1x16x128xbf16>
    %27 = vector.shape_cast %26 : vector<1x1x16x128xbf16> to vector<16x128xbf16>
    %28 = vector.shape_cast %25 : vector<16x128xbf16> to vector<1x1x16x128xbf16>
    tpu.vector_store %arg5[%c0_25, %c0_26, %c0_27, %c0_28], %28 {strides = array<i32>} : memref<1x1x16x128xbf16, #tpu.memory_space<vmem>>, vector<1x1x16x128xbf16>,
    return
  }
  func.func @transform_0(%arg0: i32, %arg1: i32, %arg2: i32) -> (i32, i32, i32, i32) {
    %c0_i32 = arith.constant 0 : i32
    %c0_i32_0 = arith.constant 0 : i32
    return %arg0, %arg1, %arg2, %c0_i32 : i32, i32, i32, i32
  }
  func.func @transform_1(%arg0: i32, %arg1: i32, %arg2: i32) -> (i32, i32, i32) {
    %c0_i32 = arith.constant 0 : i32
    %c0_i32_0 = arith.constant 0 : i32
    %c0_i32_1 = arith.constant 0 : i32
    return %arg0, %c0_i32, %c0_i32_0 : i32, i32, i32
  }
  func.func @transform_2(%arg0: i32, %arg1: i32, %arg2: i32) -> (i32, i32, i32, i32) {
    %c0_i32 = arith.constant 0 : i32
    %c0_i32_0 = arith.constant 0 : i32
    return %arg0, %arg1, %arg2, %c0_i32 : i32, i32, i32, i32
  }
  func.func @transform_3(%arg0: i32, %arg1: i32, %arg2: i32) -> (i32, i32, i32, i32) {
    %c0_i32 = arith.constant 0 : i32
    %c0_i32_0 = arith.constant 0 : i32
    %c0_i32_1 = arith.constant 0 : i32
    return %arg0, %arg1, %c0_i32, %c0_i32_0 : i32, i32, i32, i32
  }
  func.func @transform_4(%arg0: i32, %arg1: i32, %arg2: i32) -> (i32, i32, i32, i32) {
    %c0_i32 = arith.constant 0 : i32
    %c0_i32_0 = arith.constant 0 : i32
    %c0_i32_1 = arith.constant 0 : i32
    return %arg0, %arg1, %c0_i32, %c0_i32_0 : i32, i32, i32, i32
  }
}

module attributes {stable_mosaic.version = 11 : i64} {
  func.func @_mm_kernel(%arg0: i32, %arg1: i32, %arg2: i32, %arg3: memref<1x1x16x256xbf16, #tpu.memory_space<vmem>>, %arg4: memref<1x256x128xbf16, #tpu.memory_space<vmem>>, %arg5: memref<1x1x16x128xbf16, #tpu.memory_space<vmem>>, %arg6: memref<1x1x1x128xf32, #tpu.memory_space<vmem>>, %arg7: memref<1x1x1x128xf32, #tpu.memory_space<vmem>>) attributes {dimension_semantics = [#tpu.dimension_semantics<parallel>, #tpu.dimension_semantics<parallel>, #tpu.dimension_semantics<arbitrary>], iteration_bounds = array<i64: 1, 2, 1>, scalar_prefetch = 0 : i64, scratch_operands = 0 : i64, tpu.core_type = #tpu.core_type<tc>, window_params = [{transform_indices = @transform_0, window_bounds = array<i64: 1, 1, 16, 256>}, {transform_indices = @transform_1, window_bounds = array<i64: 1, 256, 128>}, {transform_indices = @transform_2, window_bounds = array<i64: 1, 1, 16, 128>}, {transform_indices = @transform_3, window_bounds = array<i64: 1, 1, 1, 128>}, {transform_indices = @transform_4, window_bounds = array<i64: 1, 1, 1, 128>}]} {
    %c0 = arith.constant 0 : index
    %c0_0 = arith.constant 0 : index
    %c0_1 = arith.constant 0 : index
    %c0_2 = arith.constant 0 : index
    %0 = vector.load %arg3[%c0, %c0_0, %c0_1, %c0_2] : memref<1x1x16x256xbf16, #tpu.memory_space<vmem>>, vector<1x1x16x256xbf16>
    %1 = vector.shape_cast %0 : vector<1x1x16x256xbf16> to vector<16x256xbf16>
    %c0_3 = arith.constant 0 : index
    %c0_4 = arith.constant 0 : index
    %c0_5 = arith.constant 0 : index
    %2 = vector.load %arg4[%c0_3, %c0_4, %c0_5] : memref<1x256x128xbf16, #tpu.memory_space<vmem>>, vector<1x256x128xbf16>
    %3 = vector.shape_cast %2 : vector<1x256x128xbf16> to vector<256x128xbf16>
    %cst = arith.constant dense<0.000000e+00> : vector<16x128xf32>
    %4 = tpu.matmul %1, %3, %cst {dimension_numbers = #tpu.dot_dimension_numbers<[1], [0], [0], [1], [0, 0, 1, 1], [], []>} : vector<16x256xbf16>, vector<256x128xbf16>, vector<16x128xf32> -> vector<16x128xf32>
    %c0_i32 = arith.constant 0 : i32
    %5 = arith.cmpi eq, %arg2, %c0_i32 : i32
    %6 = arith.extui %5 : i1 to i32
    %c0_i32_6 = arith.constant 0 : i32
    %7 = arith.cmpi ne, %6, %c0_i32_6 : i32
    scf.if %7 {
      %cst_29 = arith.constant 0.000000e+00 : f32
      %29 = vector.broadcast %cst_29 : f32 to vector<1x1x1x128xf32>
      %c0_30 = arith.constant 0 : index
      %c0_31 = arith.constant 0 : index
      %c0_32 = arith.constant 0 : index
      %c0_33 = arith.constant 0 : index
      %30 = vector.load %arg6[%c0_30, %c0_31, %c0_32, %c0_33] : memref<1x1x1x128xf32, #tpu.memory_space<vmem>>, vector<1x1x1x128xf32>
      tpu.vector_store %arg6[%c0_30, %c0_31, %c0_32, %c0_33], %29 {strides = array<i32>} : memref<1x1x1x128xf32, #tpu.memory_space<vmem>>, vector<1x1x1x128xf32>,
      %cst_34 = arith.constant 0.000000e+00 : f32
      %31 = vector.broadcast %cst_34 : f32 to vector<1x1x1x128xf32>
      %c0_35 = arith.constant 0 : index
      %c0_36 = arith.constant 0 : index
      %c0_37 = arith.constant 0 : index
      %c0_38 = arith.constant 0 : index
      %32 = vector.load %arg7[%c0_35, %c0_36, %c0_37, %c0_38] : memref<1x1x1x128xf32, #tpu.memory_space<vmem>>, vector<1x1x1x128xf32>
      tpu.vector_store %arg7[%c0_35, %c0_36, %c0_37, %c0_38], %31 {strides = array<i32>} : memref<1x1x1x128xf32, #tpu.memory_space<vmem>>, vector<1x1x1x128xf32>,
    } else {
    }
    %c0_7 = arith.constant 0 : index
    %c0_8 = arith.constant 0 : index
    %c0_9 = arith.constant 0 : index
    %c0_10 = arith.constant 0 : index
    %8 = vector.load %arg6[%c0_7, %c0_8, %c0_9, %c0_10] : memref<1x1x1x128xf32, #tpu.memory_space<vmem>>, vector<1x1x1x128xf32>
    %9 = vector.shape_cast %8 : vector<1x1x1x128xf32> to vector<1x128xf32>
    %cst_11 = arith.constant dense<0.000000e+00> : vector<128xf32>
    %10 = vector.multi_reduction <add>, %4, %cst_11 [0] : vector<16x128xf32> to vector<128xf32>
    %11 = vector.shape_cast %10 : vector<128xf32> to vector<1x128xf32>
    %12 = arith.addf %9, %11 : vector<1x128xf32>
    %c0_12 = arith.constant 0 : index
    %c0_13 = arith.constant 0 : index
    %c0_14 = arith.constant 0 : index
    %c0_15 = arith.constant 0 : index
    %13 = vector.load %arg6[%c0_12, %c0_13, %c0_14, %c0_15] : memref<1x1x1x128xf32, #tpu.memory_space<vmem>>, vector<1x1x1x128xf32>
    %14 = vector.shape_cast %13 : vector<1x1x1x128xf32> to vector<1x128xf32>
    %15 = vector.shape_cast %12 : vector<1x128xf32> to vector<1x1x1x128xf32>
    tpu.vector_store %arg6[%c0_12, %c0_13, %c0_14, %c0_15], %15 {strides = array<i32>} : memref<1x1x1x128xf32, #tpu.memory_space<vmem>>, vector<1x1x1x128xf32>,
    %c0_16 = arith.constant 0 : index
    %c0_17 = arith.constant 0 : index
    %c0_18 = arith.constant 0 : index
    %c0_19 = arith.constant 0 : index
    %16 = vector.load %arg7[%c0_16, %c0_17, %c0_18, %c0_19] : memref<1x1x1x128xf32, #tpu.memory_space<vmem>>, vector<1x1x1x128xf32>
    %17 = vector.shape_cast %16 : vector<1x1x1x128xf32> to vector<1x128xf32>
    %18 = arith.mulf %4, %4 : vector<16x128xf32>
    %cst_20 = arith.constant dense<0.000000e+00> : vector<128xf32>
    %19 = vector.multi_reduction <add>, %18, %cst_20 [0] : vector<16x128xf32> to vector<128xf32>
    %20 = vector.shape_cast %19 : vector<128xf32> to vector<1x128xf32>
    %21 = arith.addf %17, %20 : vector<1x128xf32>
    %c0_21 = arith.constant 0 : index
    %c0_22 = arith.constant 0 : index
    %c0_23 = arith.constant 0 : index
    %c0_24 = arith.constant 0 : index
    %22 = vector.load %arg7[%c0_21, %c0_22, %c0_23, %c0_24] : memref<1x1x1x128xf32, #tpu.memory_space<vmem>>, vector<1x1x1x128xf32>
    %23 = vector.shape_cast %22 : vector<1x1x1x128xf32> to vector<1x128xf32>
    %24 = vector.shape_cast %21 : vector<1x128xf32> to vector<1x1x1x128xf32>
    tpu.vector_store %arg7[%c0_21, %c0_22, %c0_23, %c0_24], %24 {strides = array<i32>} : memref<1x1x1x128xf32, #tpu.memory_space<vmem>>, vector<1x1x1x128xf32>,
    %25 = arith.truncf %4 : vector<16x128xf32> to vector<16x128xbf16>
    %c0_25 = arith.constant 0 : index
    %c0_26 = arith.constant 0 : index
    %c0_27 = arith.constant 0 : index
    %c0_28 = arith.constant 0 : index
    %26 = vector.load %arg5[%c0_25, %c0_26, %c0_27, %c0_28] : memref<1x1x16x128xbf16, #tpu.memory_space<vmem>>, vector<1x1x16x128xbf16>
    %27 = vector.shape_cast %26 : vector<1x1x16x128xbf16> to vector<16x128xbf16>
    %28 = vector.shape_cast %25 : vector<16x128xbf16> to vector<1x1x16x128xbf16>
    tpu.vector_store %arg5[%c0_25, %c0_26, %c0_27, %c0_28], %28 {strides = array<i32>} : memref<1x1x16x128xbf16, #tpu.memory_space<vmem>>, vector<1x1x16x128xbf16>,
    return
  }
  func.func @transform_0(%arg0: i32, %arg1: i32, %arg2: i32) -> (i32, i32, i32, i32) {
    %c0_i32 = arith.constant 0 : i32
    %c0_i32_0 = arith.constant 0 : i32
    return %arg0, %arg1, %arg2, %c0_i32 : i32, i32, i32, i32
  }
  func.func @transform_1(%arg0: i32, %arg1: i32, %arg2: i32) -> (i32, i32, i32) {
    %c0_i32 = arith.constant 0 : i32
    %c0_i32_0 = arith.constant 0 : i32
    %c0_i32_1 = arith.constant 0 : i32
    return %arg0, %c0_i32, %c0_i32_0 : i32, i32, i32
  }
  func.func @transform_2(%arg0: i32, %arg1: i32, %arg2: i32) -> (i32, i32, i32, i32) {
    %c0_i32 = arith.constant 0 : i32
    %c0_i32_0 = arith.constant 0 : i32
    return %arg0, %arg1, %arg2, %c0_i32 : i32, i32, i32, i32
  }
  func.func @transform_3(%arg0: i32, %arg1: i32, %arg2: i32) -> (i32, i32, i32, i32) {
    %c0_i32 = arith.constant 0 : i32
    %c0_i32_0 = arith.constant 0 : i32
    %c0_i32_1 = arith.constant 0 : i32
    return %arg0, %arg1, %c0_i32, %c0_i32_0 : i32, i32, i32, i32
  }
  func.func @transform_4(%arg0: i32, %arg1: i32, %arg2: i32) -> (i32, i32, i32, i32) {
    %c0_i32 = arith.constant 0 : i32
    %c0_i32_0 = arith.constant 0 : i32
    %c0_i32_1 = arith.constant 0 : i32
    return %arg0, %arg1, %c0_i32, %c0_i32_0 : i32, i32, i32, i32
  }
}

module attributes {stable_mosaic.version = 11 : i64} {
  func.func @_mm_kernel(%arg0: i32, %arg1: i32, %arg2: i32, %arg3: memref<1x1x16x288xbf16, #tpu.memory_space<vmem>>, %arg4: memref<1x288x128xbf16, #tpu.memory_space<vmem>>, %arg5: memref<1x1x16x128xbf16, #tpu.memory_space<vmem>>, %arg6: memref<1x1x1x128xf32, #tpu.memory_space<vmem>>, %arg7: memref<1x1x1x128xf32, #tpu.memory_space<vmem>>) attributes {dimension_semantics = [#tpu.dimension_semantics<parallel>, #tpu.dimension_semantics<parallel>, #tpu.dimension_semantics<arbitrary>], iteration_bounds = array<i64: 1, 2, 1>, scalar_prefetch = 0 : i64, scratch_operands = 0 : i64, tpu.core_type = #tpu.core_type<tc>, window_params = [{transform_indices = @transform_0, window_bounds = array<i64: 1, 1, 16, 288>}, {transform_indices = @transform_1, window_bounds = array<i64: 1, 288, 128>}, {transform_indices = @transform_2, window_bounds = array<i64: 1, 1, 16, 128>}, {transform_indices = @transform_3, window_bounds = array<i64: 1, 1, 1, 128>}, {transform_indices = @transform_4, window_bounds = array<i64: 1, 1, 1, 128>}]} {
    %c0 = arith.constant 0 : index
    %c0_0 = arith.constant 0 : index
    %c0_1 = arith.constant 0 : index
    %c0_2 = arith.constant 0 : index
    %0 = vector.load %arg3[%c0, %c0_0, %c0_1, %c0_2] : memref<1x1x16x288xbf16, #tpu.memory_space<vmem>>, vector<1x1x16x288xbf16>
    %1 = vector.shape_cast %0 : vector<1x1x16x288xbf16> to vector<16x288xbf16>
    %c0_3 = arith.constant 0 : index
    %c0_4 = arith.constant 0 : index
    %c0_5 = arith.constant 0 : index
    %2 = vector.load %arg4[%c0_3, %c0_4, %c0_5] : memref<1x288x128xbf16, #tpu.memory_space<vmem>>, vector<1x288x128xbf16>
    %3 = vector.shape_cast %2 : vector<1x288x128xbf16> to vector<288x128xbf16>
    %cst = arith.constant dense<0.000000e+00> : vector<16x128xf32>
    %4 = tpu.matmul %1, %3, %cst {dimension_numbers = #tpu.dot_dimension_numbers<[1], [0], [0], [1], [0, 0, 1, 1], [], []>} : vector<16x288xbf16>, vector<288x128xbf16>, vector<16x128xf32> -> vector<16x128xf32>
    %c0_i32 = arith.constant 0 : i32
    %5 = arith.cmpi eq, %arg2, %c0_i32 : i32
    %6 = arith.extui %5 : i1 to i32
    %c0_i32_6 = arith.constant 0 : i32
    %7 = arith.cmpi ne, %6, %c0_i32_6 : i32
    scf.if %7 {
      %cst_29 = arith.constant 0.000000e+00 : f32
      %29 = vector.broadcast %cst_29 : f32 to vector<1x1x1x128xf32>
      %c0_30 = arith.constant 0 : index
      %c0_31 = arith.constant 0 : index
      %c0_32 = arith.constant 0 : index
      %c0_33 = arith.constant 0 : index
      %30 = vector.load %arg6[%c0_30, %c0_31, %c0_32, %c0_33] : memref<1x1x1x128xf32, #tpu.memory_space<vmem>>, vector<1x1x1x128xf32>
      tpu.vector_store %arg6[%c0_30, %c0_31, %c0_32, %c0_33], %29 {strides = array<i32>} : memref<1x1x1x128xf32, #tpu.memory_space<vmem>>, vector<1x1x1x128xf32>,
      %cst_34 = arith.constant 0.000000e+00 : f32
      %31 = vector.broadcast %cst_34 : f32 to vector<1x1x1x128xf32>
      %c0_35 = arith.constant 0 : index
      %c0_36 = arith.constant 0 : index
      %c0_37 = arith.constant 0 : index
      %c0_38 = arith.constant 0 : index
      %32 = vector.load %arg7[%c0_35, %c0_36, %c0_37, %c0_38] : memref<1x1x1x128xf32, #tpu.memory_space<vmem>>, vector<1x1x1x128xf32>
      tpu.vector_store %arg7[%c0_35, %c0_36, %c0_37, %c0_38], %31 {strides = array<i32>} : memref<1x1x1x128xf32, #tpu.memory_space<vmem>>, vector<1x1x1x128xf32>,
    } else {
    }
    %c0_7 = arith.constant 0 : index
    %c0_8 = arith.constant 0 : index
    %c0_9 = arith.constant 0 : index
    %c0_10 = arith.constant 0 : index
    %8 = vector.load %arg6[%c0_7, %c0_8, %c0_9, %c0_10] : memref<1x1x1x128xf32, #tpu.memory_space<vmem>>, vector<1x1x1x128xf32>
    %9 = vector.shape_cast %8 : vector<1x1x1x128xf32> to vector<1x128xf32>
    %cst_11 = arith.constant dense<0.000000e+00> : vector<128xf32>
    %10 = vector.multi_reduction <add>, %4, %cst_11 [0] : vector<16x128xf32> to vector<128xf32>
    %11 = vector.shape_cast %10 : vector<128xf32> to vector<1x128xf32>
    %12 = arith.addf %9, %11 : vector<1x128xf32>
    %c0_12 = arith.constant 0 : index
    %c0_13 = arith.constant 0 : index
    %c0_14 = arith.constant 0 : index
    %c0_15 = arith.constant 0 : index
    %13 = vector.load %arg6[%c0_12, %c0_13, %c0_14, %c0_15] : memref<1x1x1x128xf32, #tpu.memory_space<vmem>>, vector<1x1x1x128xf32>
    %14 = vector.shape_cast %13 : vector<1x1x1x128xf32> to vector<1x128xf32>
    %15 = vector.shape_cast %12 : vector<1x128xf32> to vector<1x1x1x128xf32>
    tpu.vector_store %arg6[%c0_12, %c0_13, %c0_14, %c0_15], %15 {strides = array<i32>} : memref<1x1x1x128xf32, #tpu.memory_space<vmem>>, vector<1x1x1x128xf32>,
    %c0_16 = arith.constant 0 : index
    %c0_17 = arith.constant 0 : index
    %c0_18 = arith.constant 0 : index
    %c0_19 = arith.constant 0 : index
    %16 = vector.load %arg7[%c0_16, %c0_17, %c0_18, %c0_19] : memref<1x1x1x128xf32, #tpu.memory_space<vmem>>, vector<1x1x1x128xf32>
    %17 = vector.shape_cast %16 : vector<1x1x1x128xf32> to vector<1x128xf32>
    %18 = arith.mulf %4, %4 : vector<16x128xf32>
    %cst_20 = arith.constant dense<0.000000e+00> : vector<128xf32>
    %19 = vector.multi_reduction <add>, %18, %cst_20 [0] : vector<16x128xf32> to vector<128xf32>
    %20 = vector.shape_cast %19 : vector<128xf32> to vector<1x128xf32>
    %21 = arith.addf %17, %20 : vector<1x128xf32>
    %c0_21 = arith.constant 0 : index
    %c0_22 = arith.constant 0 : index
    %c0_23 = arith.constant 0 : index
    %c0_24 = arith.constant 0 : index
    %22 = vector.load %arg7[%c0_21, %c0_22, %c0_23, %c0_24] : memref<1x1x1x128xf32, #tpu.memory_space<vmem>>, vector<1x1x1x128xf32>
    %23 = vector.shape_cast %22 : vector<1x1x1x128xf32> to vector<1x128xf32>
    %24 = vector.shape_cast %21 : vector<1x128xf32> to vector<1x1x1x128xf32>
    tpu.vector_store %arg7[%c0_21, %c0_22, %c0_23, %c0_24], %24 {strides = array<i32>} : memref<1x1x1x128xf32, #tpu.memory_space<vmem>>, vector<1x1x1x128xf32>,
    %25 = arith.truncf %4 : vector<16x128xf32> to vector<16x128xbf16>
    %c0_25 = arith.constant 0 : index
    %c0_26 = arith.constant 0 : index
    %c0_27 = arith.constant 0 : index
    %c0_28 = arith.constant 0 : index
    %26 = vector.load %arg5[%c0_25, %c0_26, %c0_27, %c0_28] : memref<1x1x16x128xbf16, #tpu.memory_space<vmem>>, vector<1x1x16x128xbf16>
    %27 = vector.shape_cast %26 : vector<1x1x16x128xbf16> to vector<16x128xbf16>
    %28 = vector.shape_cast %25 : vector<16x128xbf16> to vector<1x1x16x128xbf16>
    tpu.vector_store %arg5[%c0_25, %c0_26, %c0_27, %c0_28], %28 {strides = array<i32>} : memref<1x1x16x128xbf16, #tpu.memory_space<vmem>>, vector<1x1x16x128xbf16>,
    return
  }
  func.func @transform_0(%arg0: i32, %arg1: i32, %arg2: i32) -> (i32, i32, i32, i32) {
    %c0_i32 = arith.constant 0 : i32
    %c0_i32_0 = arith.constant 0 : i32
    return %arg0, %arg1, %arg2, %c0_i32 : i32, i32, i32, i32
  }
  func.func @transform_1(%arg0: i32, %arg1: i32, %arg2: i32) -> (i32, i32, i32) {
    %c0_i32 = arith.constant 0 : i32
    %c0_i32_0 = arith.constant 0 : i32
    %c0_i32_1 = arith.constant 0 : i32
    return %arg0, %c0_i32, %c0_i32_0 : i32, i32, i32
  }
  func.func @transform_2(%arg0: i32, %arg1: i32, %arg2: i32) -> (i32, i32, i32, i32) {
    %c0_i32 = arith.constant 0 : i32
    %c0_i32_0 = arith.constant 0 : i32
    return %arg0, %arg1, %arg2, %c0_i32 : i32, i32, i32, i32
  }
  func.func @transform_3(%arg0: i32, %arg1: i32, %arg2: i32) -> (i32, i32, i32, i32) {
    %c0_i32 = arith.constant 0 : i32
    %c0_i32_0 = arith.constant 0 : i32
    %c0_i32_1 = arith.constant 0 : i32
    return %arg0, %arg1, %c0_i32, %c0_i32_0 : i32, i32, i32, i32
  }
  func.func @transform_4(%arg0: i32, %arg1: i32, %arg2: i32) -> (i32, i32, i32, i32) {
    %c0_i32 = arith.constant 0 : i32
    %c0_i32_0 = arith.constant 0 : i32
    %c0_i32_1 = arith.constant 0 : i32
    return %arg0, %arg1, %c0_i32, %c0_i32_0 : i32, i32, i32, i32
  }
}

module attributes {stable_mosaic.version = 11 : i64} {
  func.func @_mm_kernel(%arg0: i32, %arg1: i32, %arg2: i32, %arg3: memref<1x1x16x512xbf16, #tpu.memory_space<vmem>>, %arg4: memref<1x512x128xbf16, #tpu.memory_space<vmem>>, %arg5: memref<1x1x16x128xbf16, #tpu.memory_space<vmem>>, %arg6: memref<1x1x1x128xf32, #tpu.memory_space<vmem>>, %arg7: memref<1x1x1x128xf32, #tpu.memory_space<vmem>>) attributes {dimension_semantics = [#tpu.dimension_semantics<parallel>, #tpu.dimension_semantics<parallel>, #tpu.dimension_semantics<arbitrary>], iteration_bounds = array<i64: 1, 2, 1>, scalar_prefetch = 0 : i64, scratch_operands = 0 : i64, tpu.core_type = #tpu.core_type<tc>, window_params = [{transform_indices = @transform_0, window_bounds = array<i64: 1, 1, 16, 512>}, {transform_indices = @transform_1, window_bounds = array<i64: 1, 512, 128>}, {transform_indices = @transform_2, window_bounds = array<i64: 1, 1, 16, 128>}, {transform_indices = @transform_3, window_bounds = array<i64: 1, 1, 1, 128>}, {transform_indices = @transform_4, window_bounds = array<i64: 1, 1, 1, 128>}]} {
    %c0 = arith.constant 0 : index
    %c0_0 = arith.constant 0 : index
    %c0_1 = arith.constant 0 : index
    %c0_2 = arith.constant 0 : index
    %0 = vector.load %arg3[%c0, %c0_0, %c0_1, %c0_2] : memref<1x1x16x512xbf16, #tpu.memory_space<vmem>>, vector<1x1x16x512xbf16>
    %1 = vector.shape_cast %0 : vector<1x1x16x512xbf16> to vector<16x512xbf16>
    %c0_3 = arith.constant 0 : index
    %c0_4 = arith.constant 0 : index
    %c0_5 = arith.constant 0 : index
    %2 = vector.load %arg4[%c0_3, %c0_4, %c0_5] : memref<1x512x128xbf16, #tpu.memory_space<vmem>>, vector<1x512x128xbf16>
    %3 = vector.shape_cast %2 : vector<1x512x128xbf16> to vector<512x128xbf16>
    %cst = arith.constant dense<0.000000e+00> : vector<16x128xf32>
    %4 = tpu.matmul %1, %3, %cst {dimension_numbers = #tpu.dot_dimension_numbers<[1], [0], [0], [1], [0, 0, 1, 1], [], []>} : vector<16x512xbf16>, vector<512x128xbf16>, vector<16x128xf32> -> vector<16x128xf32>
    %c0_i32 = arith.constant 0 : i32
    %5 = arith.cmpi eq, %arg2, %c0_i32 : i32
    %6 = arith.extui %5 : i1 to i32
    %c0_i32_6 = arith.constant 0 : i32
    %7 = arith.cmpi ne, %6, %c0_i32_6 : i32
    scf.if %7 {
      %cst_29 = arith.constant 0.000000e+00 : f32
      %29 = vector.broadcast %cst_29 : f32 to vector<1x1x1x128xf32>
      %c0_30 = arith.constant 0 : index
      %c0_31 = arith.constant 0 : index
      %c0_32 = arith.constant 0 : index
      %c0_33 = arith.constant 0 : index
      %30 = vector.load %arg6[%c0_30, %c0_31, %c0_32, %c0_33] : memref<1x1x1x128xf32, #tpu.memory_space<vmem>>, vector<1x1x1x128xf32>
      tpu.vector_store %arg6[%c0_30, %c0_31, %c0_32, %c0_33], %29 {strides = array<i32>} : memref<1x1x1x128xf32, #tpu.memory_space<vmem>>, vector<1x1x1x128xf32>,
      %cst_34 = arith.constant 0.000000e+00 : f32
      %31 = vector.broadcast %cst_34 : f32 to vector<1x1x1x128xf32>
      %c0_35 = arith.constant 0 : index
      %c0_36 = arith.constant 0 : index
      %c0_37 = arith.constant 0 : index
      %c0_38 = arith.constant 0 : index
      %32 = vector.load %arg7[%c0_35, %c0_36, %c0_37, %c0_38] : memref<1x1x1x128xf32, #tpu.memory_space<vmem>>, vector<1x1x1x128xf32>
      tpu.vector_store %arg7[%c0_35, %c0_36, %c0_37, %c0_38], %31 {strides = array<i32>} : memref<1x1x1x128xf32, #tpu.memory_space<vmem>>, vector<1x1x1x128xf32>,
    } else {
    }
    %c0_7 = arith.constant 0 : index
    %c0_8 = arith.constant 0 : index
    %c0_9 = arith.constant 0 : index
    %c0_10 = arith.constant 0 : index
    %8 = vector.load %arg6[%c0_7, %c0_8, %c0_9, %c0_10] : memref<1x1x1x128xf32, #tpu.memory_space<vmem>>, vector<1x1x1x128xf32>
    %9 = vector.shape_cast %8 : vector<1x1x1x128xf32> to vector<1x128xf32>
    %cst_11 = arith.constant dense<0.000000e+00> : vector<128xf32>
    %10 = vector.multi_reduction <add>, %4, %cst_11 [0] : vector<16x128xf32> to vector<128xf32>
    %11 = vector.shape_cast %10 : vector<128xf32> to vector<1x128xf32>
    %12 = arith.addf %9, %11 : vector<1x128xf32>
    %c0_12 = arith.constant 0 : index
    %c0_13 = arith.constant 0 : index
    %c0_14 = arith.constant 0 : index
    %c0_15 = arith.constant 0 : index
    %13 = vector.load %arg6[%c0_12, %c0_13, %c0_14, %c0_15] : memref<1x1x1x128xf32, #tpu.memory_space<vmem>>, vector<1x1x1x128xf32>
    %14 = vector.shape_cast %13 : vector<1x1x1x128xf32> to vector<1x128xf32>
    %15 = vector.shape_cast %12 : vector<1x128xf32> to vector<1x1x1x128xf32>
    tpu.vector_store %arg6[%c0_12, %c0_13, %c0_14, %c0_15], %15 {strides = array<i32>} : memref<1x1x1x128xf32, #tpu.memory_space<vmem>>, vector<1x1x1x128xf32>,
    %c0_16 = arith.constant 0 : index
    %c0_17 = arith.constant 0 : index
    %c0_18 = arith.constant 0 : index
    %c0_19 = arith.constant 0 : index
    %16 = vector.load %arg7[%c0_16, %c0_17, %c0_18, %c0_19] : memref<1x1x1x128xf32, #tpu.memory_space<vmem>>, vector<1x1x1x128xf32>
    %17 = vector.shape_cast %16 : vector<1x1x1x128xf32> to vector<1x128xf32>
    %18 = arith.mulf %4, %4 : vector<16x128xf32>
    %cst_20 = arith.constant dense<0.000000e+00> : vector<128xf32>
    %19 = vector.multi_reduction <add>, %18, %cst_20 [0] : vector<16x128xf32> to vector<128xf32>
    %20 = vector.shape_cast %19 : vector<128xf32> to vector<1x128xf32>
    %21 = arith.addf %17, %20 : vector<1x128xf32>
    %c0_21 = arith.constant 0 : index
    %c0_22 = arith.constant 0 : index
    %c0_23 = arith.constant 0 : index
    %c0_24 = arith.constant 0 : index
    %22 = vector.load %arg7[%c0_21, %c0_22, %c0_23, %c0_24] : memref<1x1x1x128xf32, #tpu.memory_space<vmem>>, vector<1x1x1x128xf32>
    %23 = vector.shape_cast %22 : vector<1x1x1x128xf32> to vector<1x128xf32>
    %24 = vector.shape_cast %21 : vector<1x128xf32> to vector<1x1x1x128xf32>
    tpu.vector_store %arg7[%c0_21, %c0_22, %c0_23, %c0_24], %24 {strides = array<i32>} : memref<1x1x1x128xf32, #tpu.memory_space<vmem>>, vector<1x1x1x128xf32>,
    %25 = arith.truncf %4 : vector<16x128xf32> to vector<16x128xbf16>
    %c0_25 = arith.constant 0 : index
    %c0_26 = arith.constant 0 : index
    %c0_27 = arith.constant 0 : index
    %c0_28 = arith.constant 0 : index
    %26 = vector.load %arg5[%c0_25, %c0_26, %c0_27, %c0_28] : memref<1x1x16x128xbf16, #tpu.memory_space<vmem>>, vector<1x1x16x128xbf16>
    %27 = vector.shape_cast %26 : vector<1x1x16x128xbf16> to vector<16x128xbf16>
    %28 = vector.shape_cast %25 : vector<16x128xbf16> to vector<1x1x16x128xbf16>
    tpu.vector_store %arg5[%c0_25, %c0_26, %c0_27, %c0_28], %28 {strides = array<i32>} : memref<1x1x16x128xbf16, #tpu.memory_space<vmem>>, vector<1x1x16x128xbf16>,
    return
  }
  func.func @transform_0(%arg0: i32, %arg1: i32, %arg2: i32) -> (i32, i32, i32, i32) {
    %c0_i32 = arith.constant 0 : i32
    %c0_i32_0 = arith.constant 0 : i32
    return %arg0, %arg1, %arg2, %c0_i32 : i32, i32, i32, i32
  }
  func.func @transform_1(%arg0: i32, %arg1: i32, %arg2: i32) -> (i32, i32, i32) {
    %c0_i32 = arith.constant 0 : i32
    %c0_i32_0 = arith.constant 0 : i32
    %c0_i32_1 = arith.constant 0 : i32
    return %arg0, %c0_i32, %c0_i32_0 : i32, i32, i32
  }
  func.func @transform_2(%arg0: i32, %arg1: i32, %arg2: i32) -> (i32, i32, i32, i32) {
    %c0_i32 = arith.constant 0 : i32
    %c0_i32_0 = arith.constant 0 : i32
    return %arg0, %arg1, %arg2, %c0_i32 : i32, i32, i32, i32
  }
  func.func @transform_3(%arg0: i32, %arg1: i32, %arg2: i32) -> (i32, i32, i32, i32) {
    %c0_i32 = arith.constant 0 : i32
    %c0_i32_0 = arith.constant 0 : i32
    %c0_i32_1 = arith.constant 0 : i32
    return %arg0, %arg1, %c0_i32, %c0_i32_0 : i32, i32, i32, i32
  }
  func.func @transform_4(%arg0: i32, %arg1: i32, %arg2: i32) -> (i32, i32, i32, i32) {
    %c0_i32 = arith.constant 0 : i32
    %c0_i32_0 = arith.constant 0 : i32
    %c0_i32_1 = arith.constant 0 : i32
    return %arg0, %arg1, %c0_i32, %c0_i32_0 : i32, i32, i32, i32
  }
}

module attributes {stable_mosaic.version = 11 : i64} {
  func.func @_mm_kernel(%arg0: i32, %arg1: i32, %arg2: i32, %arg3: memref<1x1x16x576xbf16, #tpu.memory_space<vmem>>, %arg4: memref<1x576x128xbf16, #tpu.memory_space<vmem>>, %arg5: memref<1x1x16x128xbf16, #tpu.memory_space<vmem>>, %arg6: memref<1x1x1x128xf32, #tpu.memory_space<vmem>>, %arg7: memref<1x1x1x128xf32, #tpu.memory_space<vmem>>) attributes {dimension_semantics = [#tpu.dimension_semantics<parallel>, #tpu.dimension_semantics<parallel>, #tpu.dimension_semantics<arbitrary>], iteration_bounds = array<i64: 1, 2, 1>, scalar_prefetch = 0 : i64, scratch_operands = 0 : i64, tpu.core_type = #tpu.core_type<tc>, window_params = [{transform_indices = @transform_0, window_bounds = array<i64: 1, 1, 16, 576>}, {transform_indices = @transform_1, window_bounds = array<i64: 1, 576, 128>}, {transform_indices = @transform_2, window_bounds = array<i64: 1, 1, 16, 128>}, {transform_indices = @transform_3, window_bounds = array<i64: 1, 1, 1, 128>}, {transform_indices = @transform_4, window_bounds = array<i64: 1, 1, 1, 128>}]} {
    %c0 = arith.constant 0 : index
    %c0_0 = arith.constant 0 : index
    %c0_1 = arith.constant 0 : index
    %c0_2 = arith.constant 0 : index
    %0 = vector.load %arg3[%c0, %c0_0, %c0_1, %c0_2] : memref<1x1x16x576xbf16, #tpu.memory_space<vmem>>, vector<1x1x16x576xbf16>
    %1 = vector.shape_cast %0 : vector<1x1x16x576xbf16> to vector<16x576xbf16>
    %c0_3 = arith.constant 0 : index
    %c0_4 = arith.constant 0 : index
    %c0_5 = arith.constant 0 : index
    %2 = vector.load %arg4[%c0_3, %c0_4, %c0_5] : memref<1x576x128xbf16, #tpu.memory_space<vmem>>, vector<1x576x128xbf16>
    %3 = vector.shape_cast %2 : vector<1x576x128xbf16> to vector<576x128xbf16>
    %cst = arith.constant dense<0.000000e+00> : vector<16x128xf32>
    %4 = tpu.matmul %1, %3, %cst {dimension_numbers = #tpu.dot_dimension_numbers<[1], [0], [0], [1], [0, 0, 1, 1], [], []>} : vector<16x576xbf16>, vector<576x128xbf16>, vector<16x128xf32> -> vector<16x128xf32>
    %c0_i32 = arith.constant 0 : i32
    %5 = arith.cmpi eq, %arg2, %c0_i32 : i32
    %6 = arith.extui %5 : i1 to i32
    %c0_i32_6 = arith.constant 0 : i32
    %7 = arith.cmpi ne, %6, %c0_i32_6 : i32
    scf.if %7 {
      %cst_29 = arith.constant 0.000000e+00 : f32
      %29 = vector.broadcast %cst_29 : f32 to vector<1x1x1x128xf32>
      %c0_30 = arith.constant 0 : index
      %c0_31 = arith.constant 0 : index
      %c0_32 = arith.constant 0 : index
      %c0_33 = arith.constant 0 : index
      %30 = vector.load %arg6[%c0_30, %c0_31, %c0_32, %c0_33] : memref<1x1x1x128xf32, #tpu.memory_space<vmem>>, vector<1x1x1x128xf32>
      tpu.vector_store %arg6[%c0_30, %c0_31, %c0_32, %c0_33], %29 {strides = array<i32>} : memref<1x1x1x128xf32, #tpu.memory_space<vmem>>, vector<1x1x1x128xf32>,
      %cst_34 = arith.constant 0.000000e+00 : f32
      %31 = vector.broadcast %cst_34 : f32 to vector<1x1x1x128xf32>
      %c0_35 = arith.constant 0 : index
      %c0_36 = arith.constant 0 : index
      %c0_37 = arith.constant 0 : index
      %c0_38 = arith.constant 0 : index
      %32 = vector.load %arg7[%c0_35, %c0_36, %c0_37, %c0_38] : memref<1x1x1x128xf32, #tpu.memory_space<vmem>>, vector<1x1x1x128xf32>
      tpu.vector_store %arg7[%c0_35, %c0_36, %c0_37, %c0_38], %31 {strides = array<i32>} : memref<1x1x1x128xf32, #tpu.memory_space<vmem>>, vector<1x1x1x128xf32>,
    } else {
    }
    %c0_7 = arith.constant 0 : index
    %c0_8 = arith.constant 0 : index
    %c0_9 = arith.constant 0 : index
    %c0_10 = arith.constant 0 : index
    %8 = vector.load %arg6[%c0_7, %c0_8, %c0_9, %c0_10] : memref<1x1x1x128xf32, #tpu.memory_space<vmem>>, vector<1x1x1x128xf32>
    %9 = vector.shape_cast %8 : vector<1x1x1x128xf32> to vector<1x128xf32>
    %cst_11 = arith.constant dense<0.000000e+00> : vector<128xf32>
    %10 = vector.multi_reduction <add>, %4, %cst_11 [0] : vector<16x128xf32> to vector<128xf32>
    %11 = vector.shape_cast %10 : vector<128xf32> to vector<1x128xf32>
    %12 = arith.addf %9, %11 : vector<1x128xf32>
    %c0_12 = arith.constant 0 : index
    %c0_13 = arith.constant 0 : index
    %c0_14 = arith.constant 0 : index
    %c0_15 = arith.constant 0 : index
    %13 = vector.load %arg6[%c0_12, %c0_13, %c0_14, %c0_15] : memref<1x1x1x128xf32, #tpu.memory_space<vmem>>, vector<1x1x1x128xf32>
    %14 = vector.shape_cast %13 : vector<1x1x1x128xf32> to vector<1x128xf32>
    %15 = vector.shape_cast %12 : vector<1x128xf32> to vector<1x1x1x128xf32>
    tpu.vector_store %arg6[%c0_12, %c0_13, %c0_14, %c0_15], %15 {strides = array<i32>} : memref<1x1x1x128xf32, #tpu.memory_space<vmem>>, vector<1x1x1x128xf32>,
    %c0_16 = arith.constant 0 : index
    %c0_17 = arith.constant 0 : index
    %c0_18 = arith.constant 0 : index
    %c0_19 = arith.constant 0 : index
    %16 = vector.load %arg7[%c0_16, %c0_17, %c0_18, %c0_19] : memref<1x1x1x128xf32, #tpu.memory_space<vmem>>, vector<1x1x1x128xf32>
    %17 = vector.shape_cast %16 : vector<1x1x1x128xf32> to vector<1x128xf32>
    %18 = arith.mulf %4, %4 : vector<16x128xf32>
    %cst_20 = arith.constant dense<0.000000e+00> : vector<128xf32>
    %19 = vector.multi_reduction <add>, %18, %cst_20 [0] : vector<16x128xf32> to vector<128xf32>
    %20 = vector.shape_cast %19 : vector<128xf32> to vector<1x128xf32>
    %21 = arith.addf %17, %20 : vector<1x128xf32>
    %c0_21 = arith.constant 0 : index
    %c0_22 = arith.constant 0 : index
    %c0_23 = arith.constant 0 : index
    %c0_24 = arith.constant 0 : index
    %22 = vector.load %arg7[%c0_21, %c0_22, %c0_23, %c0_24] : memref<1x1x1x128xf32, #tpu.memory_space<vmem>>, vector<1x1x1x128xf32>
    %23 = vector.shape_cast %22 : vector<1x1x1x128xf32> to vector<1x128xf32>
    %24 = vector.shape_cast %21 : vector<1x128xf32> to vector<1x1x1x128xf32>
    tpu.vector_store %arg7[%c0_21, %c0_22, %c0_23, %c0_24], %24 {strides = array<i32>} : memref<1x1x1x128xf32, #tpu.memory_space<vmem>>, vector<1x1x1x128xf32>,
    %25 = arith.truncf %4 : vector<16x128xf32> to vector<16x128xbf16>
    %c0_25 = arith.constant 0 : index
    %c0_26 = arith.constant 0 : index
    %c0_27 = arith.constant 0 : index
    %c0_28 = arith.constant 0 : index
    %26 = vector.load %arg5[%c0_25, %c0_26, %c0_27, %c0_28] : memref<1x1x16x128xbf16, #tpu.memory_space<vmem>>, vector<1x1x16x128xbf16>
    %27 = vector.shape_cast %26 : vector<1x1x16x128xbf16> to vector<16x128xbf16>
    %28 = vector.shape_cast %25 : vector<16x128xbf16> to vector<1x1x16x128xbf16>
    tpu.vector_store %arg5[%c0_25, %c0_26, %c0_27, %c0_28], %28 {strides = array<i32>} : memref<1x1x16x128xbf16, #tpu.memory_space<vmem>>, vector<1x1x16x128xbf16>,
    return
  }
  func.func @transform_0(%arg0: i32, %arg1: i32, %arg2: i32) -> (i32, i32, i32, i32) {
    %c0_i32 = arith.constant 0 : i32
    %c0_i32_0 = arith.constant 0 : i32
    return %arg0, %arg1, %arg2, %c0_i32 : i32, i32, i32, i32
  }
  func.func @transform_1(%arg0: i32, %arg1: i32, %arg2: i32) -> (i32, i32, i32) {
    %c0_i32 = arith.constant 0 : i32
    %c0_i32_0 = arith.constant 0 : i32
    %c0_i32_1 = arith.constant 0 : i32
    return %arg0, %c0_i32, %c0_i32_0 : i32, i32, i32
  }
  func.func @transform_2(%arg0: i32, %arg1: i32, %arg2: i32) -> (i32, i32, i32, i32) {
    %c0_i32 = arith.constant 0 : i32
    %c0_i32_0 = arith.constant 0 : i32
    return %arg0, %arg1, %arg2, %c0_i32 : i32, i32, i32, i32
  }
  func.func @transform_3(%arg0: i32, %arg1: i32, %arg2: i32) -> (i32, i32, i32, i32) {
    %c0_i32 = arith.constant 0 : i32
    %c0_i32_0 = arith.constant 0 : i32
    %c0_i32_1 = arith.constant 0 : i32
    return %arg0, %arg1, %c0_i32, %c0_i32_0 : i32, i32, i32, i32
  }
  func.func @transform_4(%arg0: i32, %arg1: i32, %arg2: i32) -> (i32, i32, i32, i32) {
    %c0_i32 = arith.constant 0 : i32
    %c0_i32_0 = arith.constant 0 : i32
    %c0_i32_1 = arith.constant 0 : i32
    return %arg0, %arg1, %c0_i32, %c0_i32_0 : i32, i32, i32, i32
  }
}

module attributes {stable_mosaic.version = 11 : i64} {
  func.func @_mm_kernel(%arg0: i32, %arg1: i32, %arg2: i32, %arg3: memref<1x1x16x256xbf16, #tpu.memory_space<vmem>>, %arg4: memref<1x256x128xbf16, #tpu.memory_space<vmem>>, %arg5: memref<1x1x16x128xbf16, #tpu.memory_space<vmem>>, %arg6: memref<1x1x1x128xf32, #tpu.memory_space<vmem>>, %arg7: memref<1x1x1x128xf32, #tpu.memory_space<vmem>>) attributes {dimension_semantics = [#tpu.dimension_semantics<parallel>, #tpu.dimension_semantics<parallel>, #tpu.dimension_semantics<arbitrary>], iteration_bounds = array<i64: 4, 2, 1>, scalar_prefetch = 0 : i64, scratch_operands = 0 : i64, tpu.core_type = #tpu.core_type<tc>, window_params = [{transform_indices = @transform_0, window_bounds = array<i64: 1, 1, 16, 256>}, {transform_indices = @transform_1, window_bounds = array<i64: 1, 256, 128>}, {transform_indices = @transform_2, window_bounds = array<i64: 1, 1, 16, 128>}, {transform_indices = @transform_3, window_bounds = array<i64: 1, 1, 1, 128>}, {transform_indices = @transform_4, window_bounds = array<i64: 1, 1, 1, 128>}]} {
    %c0 = arith.constant 0 : index
    %c0_0 = arith.constant 0 : index
    %c0_1 = arith.constant 0 : index
    %c0_2 = arith.constant 0 : index
    %0 = vector.load %arg3[%c0, %c0_0, %c0_1, %c0_2] : memref<1x1x16x256xbf16, #tpu.memory_space<vmem>>, vector<1x1x16x256xbf16>
    %1 = vector.shape_cast %0 : vector<1x1x16x256xbf16> to vector<16x256xbf16>
    %c0_3 = arith.constant 0 : index
    %c0_4 = arith.constant 0 : index
    %c0_5 = arith.constant 0 : index
    %2 = vector.load %arg4[%c0_3, %c0_4, %c0_5] : memref<1x256x128xbf16, #tpu.memory_space<vmem>>, vector<1x256x128xbf16>
    %3 = vector.shape_cast %2 : vector<1x256x128xbf16> to vector<256x128xbf16>
    %cst = arith.constant dense<0.000000e+00> : vector<16x128xf32>
    %4 = tpu.matmul %1, %3, %cst {dimension_numbers = #tpu.dot_dimension_numbers<[1], [0], [0], [1], [0, 0, 1, 1], [], []>} : vector<16x256xbf16>, vector<256x128xbf16>, vector<16x128xf32> -> vector<16x128xf32>
    %c0_i32 = arith.constant 0 : i32
    %5 = arith.cmpi eq, %arg2, %c0_i32 : i32
    %6 = arith.extui %5 : i1 to i32
    %c0_i32_6 = arith.constant 0 : i32
    %7 = arith.cmpi ne, %6, %c0_i32_6 : i32
    scf.if %7 {
      %cst_29 = arith.constant 0.000000e+00 : f32
      %29 = vector.broadcast %cst_29 : f32 to vector<1x1x1x128xf32>
      %c0_30 = arith.constant 0 : index
      %c0_31 = arith.constant 0 : index
      %c0_32 = arith.constant 0 : index
      %c0_33 = arith.constant 0 : index
      %30 = vector.load %arg6[%c0_30, %c0_31, %c0_32, %c0_33] : memref<1x1x1x128xf32, #tpu.memory_space<vmem>>, vector<1x1x1x128xf32>
      tpu.vector_store %arg6[%c0_30, %c0_31, %c0_32, %c0_33], %29 {strides = array<i32>} : memref<1x1x1x128xf32, #tpu.memory_space<vmem>>, vector<1x1x1x128xf32>,
      %cst_34 = arith.constant 0.000000e+00 : f32
      %31 = vector.broadcast %cst_34 : f32 to vector<1x1x1x128xf32>
      %c0_35 = arith.constant 0 : index
      %c0_36 = arith.constant 0 : index
      %c0_37 = arith.constant 0 : index
      %c0_38 = arith.constant 0 : index
      %32 = vector.load %arg7[%c0_35, %c0_36, %c0_37, %c0_38] : memref<1x1x1x128xf32, #tpu.memory_space<vmem>>, vector<1x1x1x128xf32>
      tpu.vector_store %arg7[%c0_35, %c0_36, %c0_37, %c0_38], %31 {strides = array<i32>} : memref<1x1x1x128xf32, #tpu.memory_space<vmem>>, vector<1x1x1x128xf32>,
    } else {
    }
    %c0_7 = arith.constant 0 : index
    %c0_8 = arith.constant 0 : index
    %c0_9 = arith.constant 0 : index
    %c0_10 = arith.constant 0 : index
    %8 = vector.load %arg6[%c0_7, %c0_8, %c0_9, %c0_10] : memref<1x1x1x128xf32, #tpu.memory_space<vmem>>, vector<1x1x1x128xf32>
    %9 = vector.shape_cast %8 : vector<1x1x1x128xf32> to vector<1x128xf32>
    %cst_11 = arith.constant dense<0.000000e+00> : vector<128xf32>
    %10 = vector.multi_reduction <add>, %4, %cst_11 [0] : vector<16x128xf32> to vector<128xf32>
    %11 = vector.shape_cast %10 : vector<128xf32> to vector<1x128xf32>
    %12 = arith.addf %9, %11 : vector<1x128xf32>
    %c0_12 = arith.constant 0 : index
    %c0_13 = arith.constant 0 : index
    %c0_14 = arith.constant 0 : index
    %c0_15 = arith.constant 0 : index
    %13 = vector.load %arg6[%c0_12, %c0_13, %c0_14, %c0_15] : memref<1x1x1x128xf32, #tpu.memory_space<vmem>>, vector<1x1x1x128xf32>
    %14 = vector.shape_cast %13 : vector<1x1x1x128xf32> to vector<1x128xf32>
    %15 = vector.shape_cast %12 : vector<1x128xf32> to vector<1x1x1x128xf32>
    tpu.vector_store %arg6[%c0_12, %c0_13, %c0_14, %c0_15], %15 {strides = array<i32>} : memref<1x1x1x128xf32, #tpu.memory_space<vmem>>, vector<1x1x1x128xf32>,
    %c0_16 = arith.constant 0 : index
    %c0_17 = arith.constant 0 : index
    %c0_18 = arith.constant 0 : index
    %c0_19 = arith.constant 0 : index
    %16 = vector.load %arg7[%c0_16, %c0_17, %c0_18, %c0_19] : memref<1x1x1x128xf32, #tpu.memory_space<vmem>>, vector<1x1x1x128xf32>
    %17 = vector.shape_cast %16 : vector<1x1x1x128xf32> to vector<1x128xf32>
    %18 = arith.mulf %4, %4 : vector<16x128xf32>
    %cst_20 = arith.constant dense<0.000000e+00> : vector<128xf32>
    %19 = vector.multi_reduction <add>, %18, %cst_20 [0] : vector<16x128xf32> to vector<128xf32>
    %20 = vector.shape_cast %19 : vector<128xf32> to vector<1x128xf32>
    %21 = arith.addf %17, %20 : vector<1x128xf32>
    %c0_21 = arith.constant 0 : index
    %c0_22 = arith.constant 0 : index
    %c0_23 = arith.constant 0 : index
    %c0_24 = arith.constant 0 : index
    %22 = vector.load %arg7[%c0_21, %c0_22, %c0_23, %c0_24] : memref<1x1x1x128xf32, #tpu.memory_space<vmem>>, vector<1x1x1x128xf32>
    %23 = vector.shape_cast %22 : vector<1x1x1x128xf32> to vector<1x128xf32>
    %24 = vector.shape_cast %21 : vector<1x128xf32> to vector<1x1x1x128xf32>
    tpu.vector_store %arg7[%c0_21, %c0_22, %c0_23, %c0_24], %24 {strides = array<i32>} : memref<1x1x1x128xf32, #tpu.memory_space<vmem>>, vector<1x1x1x128xf32>,
    %25 = arith.truncf %4 : vector<16x128xf32> to vector<16x128xbf16>
    %c0_25 = arith.constant 0 : index
    %c0_26 = arith.constant 0 : index
    %c0_27 = arith.constant 0 : index
    %c0_28 = arith.constant 0 : index
    %26 = vector.load %arg5[%c0_25, %c0_26, %c0_27, %c0_28] : memref<1x1x16x128xbf16, #tpu.memory_space<vmem>>, vector<1x1x16x128xbf16>
    %27 = vector.shape_cast %26 : vector<1x1x16x128xbf16> to vector<16x128xbf16>
    %28 = vector.shape_cast %25 : vector<16x128xbf16> to vector<1x1x16x128xbf16>
    tpu.vector_store %arg5[%c0_25, %c0_26, %c0_27, %c0_28], %28 {strides = array<i32>} : memref<1x1x16x128xbf16, #tpu.memory_space<vmem>>, vector<1x1x16x128xbf16>,
    return
  }
  func.func @transform_0(%arg0: i32, %arg1: i32, %arg2: i32) -> (i32, i32, i32, i32) {
    %c0_i32 = arith.constant 0 : i32
    %c0_i32_0 = arith.constant 0 : i32
    return %arg0, %arg1, %arg2, %c0_i32 : i32, i32, i32, i32
  }
  func.func @transform_1(%arg0: i32, %arg1: i32, %arg2: i32) -> (i32, i32, i32) {
    %c0_i32 = arith.constant 0 : i32
    %c0_i32_0 = arith.constant 0 : i32
    %c0_i32_1 = arith.constant 0 : i32
    return %arg0, %c0_i32, %c0_i32_0 : i32, i32, i32
  }
  func.func @transform_2(%arg0: i32, %arg1: i32, %arg2: i32) -> (i32, i32, i32, i32) {
    %c0_i32 = arith.constant 0 : i32
    %c0_i32_0 = arith.constant 0 : i32
    return %arg0, %arg1, %arg2, %c0_i32 : i32, i32, i32, i32
  }
  func.func @transform_3(%arg0: i32, %arg1: i32, %arg2: i32) -> (i32, i32, i32, i32) {
    %c0_i32 = arith.constant 0 : i32
    %c0_i32_0 = arith.constant 0 : i32
    %c0_i32_1 = arith.constant 0 : i32
    return %arg0, %arg1, %c0_i32, %c0_i32_0 : i32, i32, i32, i32
  }
  func.func @transform_4(%arg0: i32, %arg1: i32, %arg2: i32) -> (i32, i32, i32, i32) {
    %c0_i32 = arith.constant 0 : i32
    %c0_i32_0 = arith.constant 0 : i32
    %c0_i32_1 = arith.constant 0 : i32
    return %arg0, %arg1, %c0_i32, %c0_i32_0 : i32, i32, i32, i32
  }
}

module attributes {stable_mosaic.version = 11 : i64} {
  func.func @_norm_act_kernel(%arg0: i32, %arg1: i32, %arg2: i32, %arg3: memref<1x1x16x128xbf16, #tpu.memory_space<vmem>>, %arg4: memref<1x1x128xf32, #tpu.memory_space<vmem>>, %arg5: memref<1x1x128xf32, #tpu.memory_space<vmem>>, %arg6: memref<1x1x16x128xbf16, #tpu.memory_space<vmem>>) attributes {dimension_semantics = [#tpu.dimension_semantics<parallel>, #tpu.dimension_semantics<parallel>, #tpu.dimension_semantics<parallel>], iteration_bounds = array<i64: 4, 2, 1>, scalar_prefetch = 0 : i64, scratch_operands = 0 : i64, tpu.core_type = #tpu.core_type<tc>, window_params = [{transform_indices = @transform_0, window_bounds = array<i64: 1, 1, 16, 128>}, {transform_indices = @transform_1, window_bounds = array<i64: 1, 1, 128>}, {transform_indices = @transform_2, window_bounds = array<i64: 1, 1, 128>}, {transform_indices = @transform_3, window_bounds = array<i64: 1, 1, 16, 128>}]} {
    %c0 = arith.constant 0 : index
    %c0_0 = arith.constant 0 : index
    %c0_1 = arith.constant 0 : index
    %c0_2 = arith.constant 0 : index
    %0 = vector.load %arg3[%c0, %c0_0, %c0_1, %c0_2] : memref<1x1x16x128xbf16, #tpu.memory_space<vmem>>, vector<1x1x16x128xbf16>
    %1 = vector.shape_cast %0 : vector<1x1x16x128xbf16> to vector<16x128xbf16>
    %2 = arith.extf %1 : vector<16x128xbf16> to vector<16x128xf32>
    %c0_3 = arith.constant 0 : index
    %c0_4 = arith.constant 0 : index
    %c0_5 = arith.constant 0 : index
    %3 = vector.load %arg4[%c0_3, %c0_4, %c0_5] : memref<1x1x128xf32, #tpu.memory_space<vmem>>, vector<1x1x128xf32>
    %4 = vector.shape_cast %3 : vector<1x1x128xf32> to vector<1x128xf32>
    %5 = vector.broadcast %4 : vector<1x128xf32> to vector<16x128xf32>
    %6 = arith.mulf %2, %5 : vector<16x128xf32>
    %c0_6 = arith.constant 0 : index
    %c0_7 = arith.constant 0 : index
    %c0_8 = arith.constant 0 : index
    %7 = vector.load %arg5[%c0_6, %c0_7, %c0_8] : memref<1x1x128xf32, #tpu.memory_space<vmem>>, vector<1x1x128xf32>
    %8 = vector.shape_cast %7 : vector<1x1x128xf32> to vector<1x128xf32>
    %9 = vector.broadcast %8 : vector<1x128xf32> to vector<16x128xf32>
    %10 = arith.addf %6, %9 : vector<16x128xf32>
    %cst = arith.constant 0.000000e+00 : f32
    %11 = vector.broadcast %cst : f32 to vector<16x128xf32>
    %12 = arith.maximumf %10, %11 : vector<16x128xf32>
    %13 = arith.truncf %12 : vector<16x128xf32> to vector<16x128xbf16>
    %c0_9 = arith.constant 0 : index
    %c0_10 = arith.constant 0 : index
    %c0_11 = arith.constant 0 : index
    %c0_12 = arith.constant 0 : index
    %14 = vector.load %arg6[%c0_9, %c0_10, %c0_11, %c0_12] : memref<1x1x16x128xbf16, #tpu.memory_space<vmem>>, vector<1x1x16x128xbf16>
    %15 = vector.shape_cast %14 : vector<1x1x16x128xbf16> to vector<16x128xbf16>
    %16 = vector.shape_cast %13 : vector<16x128xbf16> to vector<1x1x16x128xbf16>
    tpu.vector_store %arg6[%c0_9, %c0_10, %c0_11, %c0_12], %16 {strides = array<i32>} : memref<1x1x16x128xbf16, #tpu.memory_space<vmem>>, vector<1x1x16x128xbf16>,
    return
  }
  func.func @transform_0(%arg0: i32, %arg1: i32, %arg2: i32) -> (i32, i32, i32, i32) {
    %c0_i32 = arith.constant 0 : i32
    %c0_i32_0 = arith.constant 0 : i32
    return %arg0, %arg1, %arg2, %c0_i32 : i32, i32, i32, i32
  }
  func.func @transform_1(%arg0: i32, %arg1: i32, %arg2: i32) -> (i32, i32, i32) {
    %c0_i32 = arith.constant 0 : i32
    %c0_i32_0 = arith.constant 0 : i32
    %c0_i32_1 = arith.constant 0 : i32
    return %arg1, %c0_i32, %c0_i32_0 : i32, i32, i32
  }
  func.func @transform_2(%arg0: i32, %arg1: i32, %arg2: i32) -> (i32, i32, i32) {
    %c0_i32 = arith.constant 0 : i32
    %c0_i32_0 = arith.constant 0 : i32
    %c0_i32_1 = arith.constant 0 : i32
    return %arg1, %c0_i32, %c0_i32_0 : i32, i32, i32
  }
  func.func @transform_3(%arg0: i32, %arg1: i32, %arg2: i32) -> (i32, i32, i32, i32) {
    %c0_i32 = arith.constant 0 : i32
    %c0_i32_0 = arith.constant 0 : i32
    return %arg0, %arg1, %arg2, %c0_i32 : i32, i32, i32, i32
  }
}

module attributes {stable_mosaic.version = 11 : i64} {
  func.func @_mm_kernel(%arg0: i32, %arg1: i32, %arg2: i32, %arg3: memref<1x1x16x128xbf16, #tpu.memory_space<vmem>>, %arg4: memref<1x128x128xbf16, #tpu.memory_space<vmem>>, %arg5: memref<1x1x16x128xbf16, #tpu.memory_space<vmem>>, %arg6: memref<1x1x1x128xf32, #tpu.memory_space<vmem>>, %arg7: memref<1x1x1x128xf32, #tpu.memory_space<vmem>>) attributes {dimension_semantics = [#tpu.dimension_semantics<parallel>, #tpu.dimension_semantics<parallel>, #tpu.dimension_semantics<arbitrary>], iteration_bounds = array<i64: 4, 2, 1>, scalar_prefetch = 0 : i64, scratch_operands = 0 : i64, tpu.core_type = #tpu.core_type<tc>, window_params = [{transform_indices = @transform_0, window_bounds = array<i64: 1, 1, 16, 128>}, {transform_indices = @transform_1, window_bounds = array<i64: 1, 128, 128>}, {transform_indices = @transform_2, window_bounds = array<i64: 1, 1, 16, 128>}, {transform_indices = @transform_3, window_bounds = array<i64: 1, 1, 1, 128>}, {transform_indices = @transform_4, window_bounds = array<i64: 1, 1, 1, 128>}]} {
    %c0 = arith.constant 0 : index
    %c0_0 = arith.constant 0 : index
    %c0_1 = arith.constant 0 : index
    %c0_2 = arith.constant 0 : index
    %0 = vector.load %arg3[%c0, %c0_0, %c0_1, %c0_2] : memref<1x1x16x128xbf16, #tpu.memory_space<vmem>>, vector<1x1x16x128xbf16>
    %1 = vector.shape_cast %0 : vector<1x1x16x128xbf16> to vector<16x128xbf16>
    %c0_3 = arith.constant 0 : index
    %c0_4 = arith.constant 0 : index
    %c0_5 = arith.constant 0 : index
    %2 = vector.load %arg4[%c0_3, %c0_4, %c0_5] : memref<1x128x128xbf16, #tpu.memory_space<vmem>>, vector<1x128x128xbf16>
    %3 = vector.shape_cast %2 : vector<1x128x128xbf16> to vector<128x128xbf16>
    %cst = arith.constant dense<0.000000e+00> : vector<16x128xf32>
    %4 = tpu.matmul %1, %3, %cst {dimension_numbers = #tpu.dot_dimension_numbers<[1], [0], [0], [1], [0, 0, 1, 1], [], []>} : vector<16x128xbf16>, vector<128x128xbf16>, vector<16x128xf32> -> vector<16x128xf32>
    %c0_i32 = arith.constant 0 : i32
    %5 = arith.cmpi eq, %arg2, %c0_i32 : i32
    %6 = arith.extui %5 : i1 to i32
    %c0_i32_6 = arith.constant 0 : i32
    %7 = arith.cmpi ne, %6, %c0_i32_6 : i32
    scf.if %7 {
      %cst_29 = arith.constant 0.000000e+00 : f32
      %29 = vector.broadcast %cst_29 : f32 to vector<1x1x1x128xf32>
      %c0_30 = arith.constant 0 : index
      %c0_31 = arith.constant 0 : index
      %c0_32 = arith.constant 0 : index
      %c0_33 = arith.constant 0 : index
      %30 = vector.load %arg6[%c0_30, %c0_31, %c0_32, %c0_33] : memref<1x1x1x128xf32, #tpu.memory_space<vmem>>, vector<1x1x1x128xf32>
      tpu.vector_store %arg6[%c0_30, %c0_31, %c0_32, %c0_33], %29 {strides = array<i32>} : memref<1x1x1x128xf32, #tpu.memory_space<vmem>>, vector<1x1x1x128xf32>,
      %cst_34 = arith.constant 0.000000e+00 : f32
      %31 = vector.broadcast %cst_34 : f32 to vector<1x1x1x128xf32>
      %c0_35 = arith.constant 0 : index
      %c0_36 = arith.constant 0 : index
      %c0_37 = arith.constant 0 : index
      %c0_38 = arith.constant 0 : index
      %32 = vector.load %arg7[%c0_35, %c0_36, %c0_37, %c0_38] : memref<1x1x1x128xf32, #tpu.memory_space<vmem>>, vector<1x1x1x128xf32>
      tpu.vector_store %arg7[%c0_35, %c0_36, %c0_37, %c0_38], %31 {strides = array<i32>} : memref<1x1x1x128xf32, #tpu.memory_space<vmem>>, vector<1x1x1x128xf32>,
    } else {
    }
    %c0_7 = arith.constant 0 : index
    %c0_8 = arith.constant 0 : index
    %c0_9 = arith.constant 0 : index
    %c0_10 = arith.constant 0 : index
    %8 = vector.load %arg6[%c0_7, %c0_8, %c0_9, %c0_10] : memref<1x1x1x128xf32, #tpu.memory_space<vmem>>, vector<1x1x1x128xf32>
    %9 = vector.shape_cast %8 : vector<1x1x1x128xf32> to vector<1x128xf32>
    %cst_11 = arith.constant dense<0.000000e+00> : vector<128xf32>
    %10 = vector.multi_reduction <add>, %4, %cst_11 [0] : vector<16x128xf32> to vector<128xf32>
    %11 = vector.shape_cast %10 : vector<128xf32> to vector<1x128xf32>
    %12 = arith.addf %9, %11 : vector<1x128xf32>
    %c0_12 = arith.constant 0 : index
    %c0_13 = arith.constant 0 : index
    %c0_14 = arith.constant 0 : index
    %c0_15 = arith.constant 0 : index
    %13 = vector.load %arg6[%c0_12, %c0_13, %c0_14, %c0_15] : memref<1x1x1x128xf32, #tpu.memory_space<vmem>>, vector<1x1x1x128xf32>
    %14 = vector.shape_cast %13 : vector<1x1x1x128xf32> to vector<1x128xf32>
    %15 = vector.shape_cast %12 : vector<1x128xf32> to vector<1x1x1x128xf32>
    tpu.vector_store %arg6[%c0_12, %c0_13, %c0_14, %c0_15], %15 {strides = array<i32>} : memref<1x1x1x128xf32, #tpu.memory_space<vmem>>, vector<1x1x1x128xf32>,
    %c0_16 = arith.constant 0 : index
    %c0_17 = arith.constant 0 : index
    %c0_18 = arith.constant 0 : index
    %c0_19 = arith.constant 0 : index
    %16 = vector.load %arg7[%c0_16, %c0_17, %c0_18, %c0_19] : memref<1x1x1x128xf32, #tpu.memory_space<vmem>>, vector<1x1x1x128xf32>
    %17 = vector.shape_cast %16 : vector<1x1x1x128xf32> to vector<1x128xf32>
    %18 = arith.mulf %4, %4 : vector<16x128xf32>
    %cst_20 = arith.constant dense<0.000000e+00> : vector<128xf32>
    %19 = vector.multi_reduction <add>, %18, %cst_20 [0] : vector<16x128xf32> to vector<128xf32>
    %20 = vector.shape_cast %19 : vector<128xf32> to vector<1x128xf32>
    %21 = arith.addf %17, %20 : vector<1x128xf32>
    %c0_21 = arith.constant 0 : index
    %c0_22 = arith.constant 0 : index
    %c0_23 = arith.constant 0 : index
    %c0_24 = arith.constant 0 : index
    %22 = vector.load %arg7[%c0_21, %c0_22, %c0_23, %c0_24] : memref<1x1x1x128xf32, #tpu.memory_space<vmem>>, vector<1x1x1x128xf32>
    %23 = vector.shape_cast %22 : vector<1x1x1x128xf32> to vector<1x128xf32>
    %24 = vector.shape_cast %21 : vector<1x128xf32> to vector<1x1x1x128xf32>
    tpu.vector_store %arg7[%c0_21, %c0_22, %c0_23, %c0_24], %24 {strides = array<i32>} : memref<1x1x1x128xf32, #tpu.memory_space<vmem>>, vector<1x1x1x128xf32>,
    %25 = arith.truncf %4 : vector<16x128xf32> to vector<16x128xbf16>
    %c0_25 = arith.constant 0 : index
    %c0_26 = arith.constant 0 : index
    %c0_27 = arith.constant 0 : index
    %c0_28 = arith.constant 0 : index
    %26 = vector.load %arg5[%c0_25, %c0_26, %c0_27, %c0_28] : memref<1x1x16x128xbf16, #tpu.memory_space<vmem>>, vector<1x1x16x128xbf16>
    %27 = vector.shape_cast %26 : vector<1x1x16x128xbf16> to vector<16x128xbf16>
    %28 = vector.shape_cast %25 : vector<16x128xbf16> to vector<1x1x16x128xbf16>
    tpu.vector_store %arg5[%c0_25, %c0_26, %c0_27, %c0_28], %28 {strides = array<i32>} : memref<1x1x16x128xbf16, #tpu.memory_space<vmem>>, vector<1x1x16x128xbf16>,
    return
  }
  func.func @transform_0(%arg0: i32, %arg1: i32, %arg2: i32) -> (i32, i32, i32, i32) {
    %c0_i32 = arith.constant 0 : i32
    %c0_i32_0 = arith.constant 0 : i32
    return %arg0, %arg1, %arg2, %c0_i32 : i32, i32, i32, i32
  }
  func.func @transform_1(%arg0: i32, %arg1: i32, %arg2: i32) -> (i32, i32, i32) {
    %c0_i32 = arith.constant 0 : i32
    %c0_i32_0 = arith.constant 0 : i32
    %c0_i32_1 = arith.constant 0 : i32
    return %arg0, %c0_i32, %c0_i32_0 : i32, i32, i32
  }
  func.func @transform_2(%arg0: i32, %arg1: i32, %arg2: i32) -> (i32, i32, i32, i32) {
    %c0_i32 = arith.constant 0 : i32
    %c0_i32_0 = arith.constant 0 : i32
    return %arg0, %arg1, %arg2, %c0_i32 : i32, i32, i32, i32
  }
  func.func @transform_3(%arg0: i32, %arg1: i32, %arg2: i32) -> (i32, i32, i32, i32) {
    %c0_i32 = arith.constant 0 : i32
    %c0_i32_0 = arith.constant 0 : i32
    %c0_i32_1 = arith.constant 0 : i32
    return %arg0, %arg1, %c0_i32, %c0_i32_0 : i32, i32, i32, i32
  }
  func.func @transform_4(%arg0: i32, %arg1: i32, %arg2: i32) -> (i32, i32, i32, i32) {
    %c0_i32 = arith.constant 0 : i32
    %c0_i32_0 = arith.constant 0 : i32
    %c0_i32_1 = arith.constant 0 : i32
    return %arg0, %arg1, %c0_i32, %c0_i32_0 : i32, i32, i32, i32
  }
}

module attributes {stable_mosaic.version = 11 : i64} {
  func.func @_mm_kernel(%arg0: i32, %arg1: i32, %arg2: i32, %arg3: memref<1x1x16x64xbf16, #tpu.memory_space<vmem>>, %arg4: memref<1x64x128xbf16, #tpu.memory_space<vmem>>, %arg5: memref<1x1x16x128xbf16, #tpu.memory_space<vmem>>, %arg6: memref<1x1x1x128xf32, #tpu.memory_space<vmem>>, %arg7: memref<1x1x1x128xf32, #tpu.memory_space<vmem>>) attributes {dimension_semantics = [#tpu.dimension_semantics<parallel>, #tpu.dimension_semantics<parallel>, #tpu.dimension_semantics<arbitrary>], iteration_bounds = array<i64: 4, 2, 1>, scalar_prefetch = 0 : i64, scratch_operands = 0 : i64, tpu.core_type = #tpu.core_type<tc>, window_params = [{transform_indices = @transform_0, window_bounds = array<i64: 1, 1, 16, 64>}, {transform_indices = @transform_1, window_bounds = array<i64: 1, 64, 128>}, {transform_indices = @transform_2, window_bounds = array<i64: 1, 1, 16, 128>}, {transform_indices = @transform_3, window_bounds = array<i64: 1, 1, 1, 128>}, {transform_indices = @transform_4, window_bounds = array<i64: 1, 1, 1, 128>}]} {
    %c0 = arith.constant 0 : index
    %c0_0 = arith.constant 0 : index
    %c0_1 = arith.constant 0 : index
    %c0_2 = arith.constant 0 : index
    %0 = vector.load %arg3[%c0, %c0_0, %c0_1, %c0_2] : memref<1x1x16x64xbf16, #tpu.memory_space<vmem>>, vector<1x1x16x64xbf16>
    %1 = vector.shape_cast %0 : vector<1x1x16x64xbf16> to vector<16x64xbf16>
    %c0_3 = arith.constant 0 : index
    %c0_4 = arith.constant 0 : index
    %c0_5 = arith.constant 0 : index
    %2 = vector.load %arg4[%c0_3, %c0_4, %c0_5] : memref<1x64x128xbf16, #tpu.memory_space<vmem>>, vector<1x64x128xbf16>
    %3 = vector.shape_cast %2 : vector<1x64x128xbf16> to vector<64x128xbf16>
    %cst = arith.constant dense<0.000000e+00> : vector<16x128xf32>
    %4 = tpu.matmul %1, %3, %cst {dimension_numbers = #tpu.dot_dimension_numbers<[1], [0], [0], [1], [0, 0, 1, 1], [], []>} : vector<16x64xbf16>, vector<64x128xbf16>, vector<16x128xf32> -> vector<16x128xf32>
    %c0_i32 = arith.constant 0 : i32
    %5 = arith.cmpi eq, %arg2, %c0_i32 : i32
    %6 = arith.extui %5 : i1 to i32
    %c0_i32_6 = arith.constant 0 : i32
    %7 = arith.cmpi ne, %6, %c0_i32_6 : i32
    scf.if %7 {
      %cst_29 = arith.constant 0.000000e+00 : f32
      %29 = vector.broadcast %cst_29 : f32 to vector<1x1x1x128xf32>
      %c0_30 = arith.constant 0 : index
      %c0_31 = arith.constant 0 : index
      %c0_32 = arith.constant 0 : index
      %c0_33 = arith.constant 0 : index
      %30 = vector.load %arg6[%c0_30, %c0_31, %c0_32, %c0_33] : memref<1x1x1x128xf32, #tpu.memory_space<vmem>>, vector<1x1x1x128xf32>
      tpu.vector_store %arg6[%c0_30, %c0_31, %c0_32, %c0_33], %29 {strides = array<i32>} : memref<1x1x1x128xf32, #tpu.memory_space<vmem>>, vector<1x1x1x128xf32>,
      %cst_34 = arith.constant 0.000000e+00 : f32
      %31 = vector.broadcast %cst_34 : f32 to vector<1x1x1x128xf32>
      %c0_35 = arith.constant 0 : index
      %c0_36 = arith.constant 0 : index
      %c0_37 = arith.constant 0 : index
      %c0_38 = arith.constant 0 : index
      %32 = vector.load %arg7[%c0_35, %c0_36, %c0_37, %c0_38] : memref<1x1x1x128xf32, #tpu.memory_space<vmem>>, vector<1x1x1x128xf32>
      tpu.vector_store %arg7[%c0_35, %c0_36, %c0_37, %c0_38], %31 {strides = array<i32>} : memref<1x1x1x128xf32, #tpu.memory_space<vmem>>, vector<1x1x1x128xf32>,
    } else {
    }
    %c0_7 = arith.constant 0 : index
    %c0_8 = arith.constant 0 : index
    %c0_9 = arith.constant 0 : index
    %c0_10 = arith.constant 0 : index
    %8 = vector.load %arg6[%c0_7, %c0_8, %c0_9, %c0_10] : memref<1x1x1x128xf32, #tpu.memory_space<vmem>>, vector<1x1x1x128xf32>
    %9 = vector.shape_cast %8 : vector<1x1x1x128xf32> to vector<1x128xf32>
    %cst_11 = arith.constant dense<0.000000e+00> : vector<128xf32>
    %10 = vector.multi_reduction <add>, %4, %cst_11 [0] : vector<16x128xf32> to vector<128xf32>
    %11 = vector.shape_cast %10 : vector<128xf32> to vector<1x128xf32>
    %12 = arith.addf %9, %11 : vector<1x128xf32>
    %c0_12 = arith.constant 0 : index
    %c0_13 = arith.constant 0 : index
    %c0_14 = arith.constant 0 : index
    %c0_15 = arith.constant 0 : index
    %13 = vector.load %arg6[%c0_12, %c0_13, %c0_14, %c0_15] : memref<1x1x1x128xf32, #tpu.memory_space<vmem>>, vector<1x1x1x128xf32>
    %14 = vector.shape_cast %13 : vector<1x1x1x128xf32> to vector<1x128xf32>
    %15 = vector.shape_cast %12 : vector<1x128xf32> to vector<1x1x1x128xf32>
    tpu.vector_store %arg6[%c0_12, %c0_13, %c0_14, %c0_15], %15 {strides = array<i32>} : memref<1x1x1x128xf32, #tpu.memory_space<vmem>>, vector<1x1x1x128xf32>,
    %c0_16 = arith.constant 0 : index
    %c0_17 = arith.constant 0 : index
    %c0_18 = arith.constant 0 : index
    %c0_19 = arith.constant 0 : index
    %16 = vector.load %arg7[%c0_16, %c0_17, %c0_18, %c0_19] : memref<1x1x1x128xf32, #tpu.memory_space<vmem>>, vector<1x1x1x128xf32>
    %17 = vector.shape_cast %16 : vector<1x1x1x128xf32> to vector<1x128xf32>
    %18 = arith.mulf %4, %4 : vector<16x128xf32>
    %cst_20 = arith.constant dense<0.000000e+00> : vector<128xf32>
    %19 = vector.multi_reduction <add>, %18, %cst_20 [0] : vector<16x128xf32> to vector<128xf32>
    %20 = vector.shape_cast %19 : vector<128xf32> to vector<1x128xf32>
    %21 = arith.addf %17, %20 : vector<1x128xf32>
    %c0_21 = arith.constant 0 : index
    %c0_22 = arith.constant 0 : index
    %c0_23 = arith.constant 0 : index
    %c0_24 = arith.constant 0 : index
    %22 = vector.load %arg7[%c0_21, %c0_22, %c0_23, %c0_24] : memref<1x1x1x128xf32, #tpu.memory_space<vmem>>, vector<1x1x1x128xf32>
    %23 = vector.shape_cast %22 : vector<1x1x1x128xf32> to vector<1x128xf32>
    %24 = vector.shape_cast %21 : vector<1x128xf32> to vector<1x1x1x128xf32>
    tpu.vector_store %arg7[%c0_21, %c0_22, %c0_23, %c0_24], %24 {strides = array<i32>} : memref<1x1x1x128xf32, #tpu.memory_space<vmem>>, vector<1x1x1x128xf32>,
    %25 = arith.truncf %4 : vector<16x128xf32> to vector<16x128xbf16>
    %c0_25 = arith.constant 0 : index
    %c0_26 = arith.constant 0 : index
    %c0_27 = arith.constant 0 : index
    %c0_28 = arith.constant 0 : index
    %26 = vector.load %arg5[%c0_25, %c0_26, %c0_27, %c0_28] : memref<1x1x16x128xbf16, #tpu.memory_space<vmem>>, vector<1x1x16x128xbf16>
    %27 = vector.shape_cast %26 : vector<1x1x16x128xbf16> to vector<16x128xbf16>
    %28 = vector.shape_cast %25 : vector<16x128xbf16> to vector<1x1x16x128xbf16>
    tpu.vector_store %arg5[%c0_25, %c0_26, %c0_27, %c0_28], %28 {strides = array<i32>} : memref<1x1x16x128xbf16, #tpu.memory_space<vmem>>, vector<1x1x16x128xbf16>,
    return
  }
  func.func @transform_0(%arg0: i32, %arg1: i32, %arg2: i32) -> (i32, i32, i32, i32) {
    %c0_i32 = arith.constant 0 : i32
    %c0_i32_0 = arith.constant 0 : i32
    return %arg0, %arg1, %arg2, %c0_i32 : i32, i32, i32, i32
  }
  func.func @transform_1(%arg0: i32, %arg1: i32, %arg2: i32) -> (i32, i32, i32) {
    %c0_i32 = arith.constant 0 : i32
    %c0_i32_0 = arith.constant 0 : i32
    %c0_i32_1 = arith.constant 0 : i32
    return %arg0, %c0_i32, %c0_i32_0 : i32, i32, i32
  }
  func.func @transform_2(%arg0: i32, %arg1: i32, %arg2: i32) -> (i32, i32, i32, i32) {
    %c0_i32 = arith.constant 0 : i32
    %c0_i32_0 = arith.constant 0 : i32
    return %arg0, %arg1, %arg2, %c0_i32 : i32, i32, i32, i32
  }
  func.func @transform_3(%arg0: i32, %arg1: i32, %arg2: i32) -> (i32, i32, i32, i32) {
    %c0_i32 = arith.constant 0 : i32
    %c0_i32_0 = arith.constant 0 : i32
    %c0_i32_1 = arith.constant 0 : i32
    return %arg0, %arg1, %c0_i32, %c0_i32_0 : i32, i32, i32, i32
  }
  func.func @transform_4(%arg0: i32, %arg1: i32, %arg2: i32) -> (i32, i32, i32, i32) {
    %c0_i32 = arith.constant 0 : i32
    %c0_i32_0 = arith.constant 0 : i32
    %c0_i32_1 = arith.constant 0 : i32
    return %arg0, %arg1, %c0_i32, %c0_i32_0 : i32, i32, i32, i32
  }
}

module attributes {stable_mosaic.version = 11 : i64} {
  func.func @_mm_kernel(%arg0: i32, %arg1: i32, %arg2: i32, %arg3: memref<1x1x64x144xbf16, #tpu.memory_space<vmem>>, %arg4: memref<1x144x128xbf16, #tpu.memory_space<vmem>>, %arg5: memref<1x1x64x128xbf16, #tpu.memory_space<vmem>>, %arg6: memref<1x1x1x128xf32, #tpu.memory_space<vmem>>, %arg7: memref<1x1x1x128xf32, #tpu.memory_space<vmem>>) attributes {dimension_semantics = [#tpu.dimension_semantics<parallel>, #tpu.dimension_semantics<parallel>, #tpu.dimension_semantics<arbitrary>], iteration_bounds = array<i64: 1, 2, 1>, scalar_prefetch = 0 : i64, scratch_operands = 0 : i64, tpu.core_type = #tpu.core_type<tc>, window_params = [{transform_indices = @transform_0, window_bounds = array<i64: 1, 1, 64, 144>}, {transform_indices = @transform_1, window_bounds = array<i64: 1, 144, 128>}, {transform_indices = @transform_2, window_bounds = array<i64: 1, 1, 64, 128>}, {transform_indices = @transform_3, window_bounds = array<i64: 1, 1, 1, 128>}, {transform_indices = @transform_4, window_bounds = array<i64: 1, 1, 1, 128>}]} {
    %c0 = arith.constant 0 : index
    %c0_0 = arith.constant 0 : index
    %c0_1 = arith.constant 0 : index
    %c0_2 = arith.constant 0 : index
    %0 = vector.load %arg3[%c0, %c0_0, %c0_1, %c0_2] : memref<1x1x64x144xbf16, #tpu.memory_space<vmem>>, vector<1x1x64x144xbf16>
    %1 = vector.shape_cast %0 : vector<1x1x64x144xbf16> to vector<64x144xbf16>
    %c0_3 = arith.constant 0 : index
    %c0_4 = arith.constant 0 : index
    %c0_5 = arith.constant 0 : index
    %2 = vector.load %arg4[%c0_3, %c0_4, %c0_5] : memref<1x144x128xbf16, #tpu.memory_space<vmem>>, vector<1x144x128xbf16>
    %3 = vector.shape_cast %2 : vector<1x144x128xbf16> to vector<144x128xbf16>
    %cst = arith.constant dense<0.000000e+00> : vector<64x128xf32>
    %4 = tpu.matmul %1, %3, %cst {dimension_numbers = #tpu.dot_dimension_numbers<[1], [0], [0], [1], [0, 0, 1, 1], [], []>} : vector<64x144xbf16>, vector<144x128xbf16>, vector<64x128xf32> -> vector<64x128xf32>
    %c0_i32 = arith.constant 0 : i32
    %5 = arith.cmpi eq, %arg2, %c0_i32 : i32
    %6 = arith.extui %5 : i1 to i32
    %c0_i32_6 = arith.constant 0 : i32
    %7 = arith.cmpi ne, %6, %c0_i32_6 : i32
    scf.if %7 {
      %cst_29 = arith.constant 0.000000e+00 : f32
      %29 = vector.broadcast %cst_29 : f32 to vector<1x1x1x128xf32>
      %c0_30 = arith.constant 0 : index
      %c0_31 = arith.constant 0 : index
      %c0_32 = arith.constant 0 : index
      %c0_33 = arith.constant 0 : index
      %30 = vector.load %arg6[%c0_30, %c0_31, %c0_32, %c0_33] : memref<1x1x1x128xf32, #tpu.memory_space<vmem>>, vector<1x1x1x128xf32>
      tpu.vector_store %arg6[%c0_30, %c0_31, %c0_32, %c0_33], %29 {strides = array<i32>} : memref<1x1x1x128xf32, #tpu.memory_space<vmem>>, vector<1x1x1x128xf32>,
      %cst_34 = arith.constant 0.000000e+00 : f32
      %31 = vector.broadcast %cst_34 : f32 to vector<1x1x1x128xf32>
      %c0_35 = arith.constant 0 : index
      %c0_36 = arith.constant 0 : index
      %c0_37 = arith.constant 0 : index
      %c0_38 = arith.constant 0 : index
      %32 = vector.load %arg7[%c0_35, %c0_36, %c0_37, %c0_38] : memref<1x1x1x128xf32, #tpu.memory_space<vmem>>, vector<1x1x1x128xf32>
      tpu.vector_store %arg7[%c0_35, %c0_36, %c0_37, %c0_38], %31 {strides = array<i32>} : memref<1x1x1x128xf32, #tpu.memory_space<vmem>>, vector<1x1x1x128xf32>,
    } else {
    }
    %c0_7 = arith.constant 0 : index
    %c0_8 = arith.constant 0 : index
    %c0_9 = arith.constant 0 : index
    %c0_10 = arith.constant 0 : index
    %8 = vector.load %arg6[%c0_7, %c0_8, %c0_9, %c0_10] : memref<1x1x1x128xf32, #tpu.memory_space<vmem>>, vector<1x1x1x128xf32>
    %9 = vector.shape_cast %8 : vector<1x1x1x128xf32> to vector<1x128xf32>
    %cst_11 = arith.constant dense<0.000000e+00> : vector<128xf32>
    %10 = vector.multi_reduction <add>, %4, %cst_11 [0] : vector<64x128xf32> to vector<128xf32>
    %11 = vector.shape_cast %10 : vector<128xf32> to vector<1x128xf32>
    %12 = arith.addf %9, %11 : vector<1x128xf32>
    %c0_12 = arith.constant 0 : index
    %c0_13 = arith.constant 0 : index
    %c0_14 = arith.constant 0 : index
    %c0_15 = arith.constant 0 : index
    %13 = vector.load %arg6[%c0_12, %c0_13, %c0_14, %c0_15] : memref<1x1x1x128xf32, #tpu.memory_space<vmem>>, vector<1x1x1x128xf32>
    %14 = vector.shape_cast %13 : vector<1x1x1x128xf32> to vector<1x128xf32>
    %15 = vector.shape_cast %12 : vector<1x128xf32> to vector<1x1x1x128xf32>
    tpu.vector_store %arg6[%c0_12, %c0_13, %c0_14, %c0_15], %15 {strides = array<i32>} : memref<1x1x1x128xf32, #tpu.memory_space<vmem>>, vector<1x1x1x128xf32>,
    %c0_16 = arith.constant 0 : index
    %c0_17 = arith.constant 0 : index
    %c0_18 = arith.constant 0 : index
    %c0_19 = arith.constant 0 : index
    %16 = vector.load %arg7[%c0_16, %c0_17, %c0_18, %c0_19] : memref<1x1x1x128xf32, #tpu.memory_space<vmem>>, vector<1x1x1x128xf32>
    %17 = vector.shape_cast %16 : vector<1x1x1x128xf32> to vector<1x128xf32>
    %18 = arith.mulf %4, %4 : vector<64x128xf32>
    %cst_20 = arith.constant dense<0.000000e+00> : vector<128xf32>
    %19 = vector.multi_reduction <add>, %18, %cst_20 [0] : vector<64x128xf32> to vector<128xf32>
    %20 = vector.shape_cast %19 : vector<128xf32> to vector<1x128xf32>
    %21 = arith.addf %17, %20 : vector<1x128xf32>
    %c0_21 = arith.constant 0 : index
    %c0_22 = arith.constant 0 : index
    %c0_23 = arith.constant 0 : index
    %c0_24 = arith.constant 0 : index
    %22 = vector.load %arg7[%c0_21, %c0_22, %c0_23, %c0_24] : memref<1x1x1x128xf32, #tpu.memory_space<vmem>>, vector<1x1x1x128xf32>
    %23 = vector.shape_cast %22 : vector<1x1x1x128xf32> to vector<1x128xf32>
    %24 = vector.shape_cast %21 : vector<1x128xf32> to vector<1x1x1x128xf32>
    tpu.vector_store %arg7[%c0_21, %c0_22, %c0_23, %c0_24], %24 {strides = array<i32>} : memref<1x1x1x128xf32, #tpu.memory_space<vmem>>, vector<1x1x1x128xf32>,
    %25 = arith.truncf %4 : vector<64x128xf32> to vector<64x128xbf16>
    %c0_25 = arith.constant 0 : index
    %c0_26 = arith.constant 0 : index
    %c0_27 = arith.constant 0 : index
    %c0_28 = arith.constant 0 : index
    %26 = vector.load %arg5[%c0_25, %c0_26, %c0_27, %c0_28] : memref<1x1x64x128xbf16, #tpu.memory_space<vmem>>, vector<1x1x64x128xbf16>
    %27 = vector.shape_cast %26 : vector<1x1x64x128xbf16> to vector<64x128xbf16>
    %28 = vector.shape_cast %25 : vector<64x128xbf16> to vector<1x1x64x128xbf16>
    tpu.vector_store %arg5[%c0_25, %c0_26, %c0_27, %c0_28], %28 {strides = array<i32>} : memref<1x1x64x128xbf16, #tpu.memory_space<vmem>>, vector<1x1x64x128xbf16>,
    return
  }
  func.func @transform_0(%arg0: i32, %arg1: i32, %arg2: i32) -> (i32, i32, i32, i32) {
    %c0_i32 = arith.constant 0 : i32
    %c0_i32_0 = arith.constant 0 : i32
    return %arg0, %arg1, %arg2, %c0_i32 : i32, i32, i32, i32
  }
  func.func @transform_1(%arg0: i32, %arg1: i32, %arg2: i32) -> (i32, i32, i32) {
    %c0_i32 = arith.constant 0 : i32
    %c0_i32_0 = arith.constant 0 : i32
    %c0_i32_1 = arith.constant 0 : i32
    return %arg0, %c0_i32, %c0_i32_0 : i32, i32, i32
  }
  func.func @transform_2(%arg0: i32, %arg1: i32, %arg2: i32) -> (i32, i32, i32, i32) {
    %c0_i32 = arith.constant 0 : i32
    %c0_i32_0 = arith.constant 0 : i32
    return %arg0, %arg1, %arg2, %c0_i32 : i32, i32, i32, i32
  }
  func.func @transform_3(%arg0: i32, %arg1: i32, %arg2: i32) -> (i32, i32, i32, i32) {
    %c0_i32 = arith.constant 0 : i32
    %c0_i32_0 = arith.constant 0 : i32
    %c0_i32_1 = arith.constant 0 : i32
    return %arg0, %arg1, %c0_i32, %c0_i32_0 : i32, i32, i32, i32
  }
  func.func @transform_4(%arg0: i32, %arg1: i32, %arg2: i32) -> (i32, i32, i32, i32) {
    %c0_i32 = arith.constant 0 : i32
    %c0_i32_0 = arith.constant 0 : i32
    %c0_i32_1 = arith.constant 0 : i32
    return %arg0, %arg1, %c0_i32, %c0_i32_0 : i32, i32, i32, i32
  }
}

module attributes {stable_mosaic.version = 11 : i64} {
  func.func @_mm_kernel(%arg0: i32, %arg1: i32, %arg2: i32, %arg3: memref<1x1x64x32xbf16, #tpu.memory_space<vmem>>, %arg4: memref<1x32x128xbf16, #tpu.memory_space<vmem>>, %arg5: memref<1x1x64x128xbf16, #tpu.memory_space<vmem>>, %arg6: memref<1x1x1x128xf32, #tpu.memory_space<vmem>>, %arg7: memref<1x1x1x128xf32, #tpu.memory_space<vmem>>) attributes {dimension_semantics = [#tpu.dimension_semantics<parallel>, #tpu.dimension_semantics<parallel>, #tpu.dimension_semantics<arbitrary>], iteration_bounds = array<i64: 4, 2, 1>, scalar_prefetch = 0 : i64, scratch_operands = 0 : i64, tpu.core_type = #tpu.core_type<tc>, window_params = [{transform_indices = @transform_0, window_bounds = array<i64: 1, 1, 64, 32>}, {transform_indices = @transform_1, window_bounds = array<i64: 1, 32, 128>}, {transform_indices = @transform_2, window_bounds = array<i64: 1, 1, 64, 128>}, {transform_indices = @transform_3, window_bounds = array<i64: 1, 1, 1, 128>}, {transform_indices = @transform_4, window_bounds = array<i64: 1, 1, 1, 128>}]} {
    %c0 = arith.constant 0 : index
    %c0_0 = arith.constant 0 : index
    %c0_1 = arith.constant 0 : index
    %c0_2 = arith.constant 0 : index
    %0 = vector.load %arg3[%c0, %c0_0, %c0_1, %c0_2] : memref<1x1x64x32xbf16, #tpu.memory_space<vmem>>, vector<1x1x64x32xbf16>
    %1 = vector.shape_cast %0 : vector<1x1x64x32xbf16> to vector<64x32xbf16>
    %c0_3 = arith.constant 0 : index
    %c0_4 = arith.constant 0 : index
    %c0_5 = arith.constant 0 : index
    %2 = vector.load %arg4[%c0_3, %c0_4, %c0_5] : memref<1x32x128xbf16, #tpu.memory_space<vmem>>, vector<1x32x128xbf16>
    %3 = vector.shape_cast %2 : vector<1x32x128xbf16> to vector<32x128xbf16>
    %cst = arith.constant dense<0.000000e+00> : vector<64x128xf32>
    %4 = tpu.matmul %1, %3, %cst {dimension_numbers = #tpu.dot_dimension_numbers<[1], [0], [0], [1], [0, 0, 1, 1], [], []>} : vector<64x32xbf16>, vector<32x128xbf16>, vector<64x128xf32> -> vector<64x128xf32>
    %c0_i32 = arith.constant 0 : i32
    %5 = arith.cmpi eq, %arg2, %c0_i32 : i32
    %6 = arith.extui %5 : i1 to i32
    %c0_i32_6 = arith.constant 0 : i32
    %7 = arith.cmpi ne, %6, %c0_i32_6 : i32
    scf.if %7 {
      %cst_29 = arith.constant 0.000000e+00 : f32
      %29 = vector.broadcast %cst_29 : f32 to vector<1x1x1x128xf32>
      %c0_30 = arith.constant 0 : index
      %c0_31 = arith.constant 0 : index
      %c0_32 = arith.constant 0 : index
      %c0_33 = arith.constant 0 : index
      %30 = vector.load %arg6[%c0_30, %c0_31, %c0_32, %c0_33] : memref<1x1x1x128xf32, #tpu.memory_space<vmem>>, vector<1x1x1x128xf32>
      tpu.vector_store %arg6[%c0_30, %c0_31, %c0_32, %c0_33], %29 {strides = array<i32>} : memref<1x1x1x128xf32, #tpu.memory_space<vmem>>, vector<1x1x1x128xf32>,
      %cst_34 = arith.constant 0.000000e+00 : f32
      %31 = vector.broadcast %cst_34 : f32 to vector<1x1x1x128xf32>
      %c0_35 = arith.constant 0 : index
      %c0_36 = arith.constant 0 : index
      %c0_37 = arith.constant 0 : index
      %c0_38 = arith.constant 0 : index
      %32 = vector.load %arg7[%c0_35, %c0_36, %c0_37, %c0_38] : memref<1x1x1x128xf32, #tpu.memory_space<vmem>>, vector<1x1x1x128xf32>
      tpu.vector_store %arg7[%c0_35, %c0_36, %c0_37, %c0_38], %31 {strides = array<i32>} : memref<1x1x1x128xf32, #tpu.memory_space<vmem>>, vector<1x1x1x128xf32>,
    } else {
    }
    %c0_7 = arith.constant 0 : index
    %c0_8 = arith.constant 0 : index
    %c0_9 = arith.constant 0 : index
    %c0_10 = arith.constant 0 : index
    %8 = vector.load %arg6[%c0_7, %c0_8, %c0_9, %c0_10] : memref<1x1x1x128xf32, #tpu.memory_space<vmem>>, vector<1x1x1x128xf32>
    %9 = vector.shape_cast %8 : vector<1x1x1x128xf32> to vector<1x128xf32>
    %cst_11 = arith.constant dense<0.000000e+00> : vector<128xf32>
    %10 = vector.multi_reduction <add>, %4, %cst_11 [0] : vector<64x128xf32> to vector<128xf32>
    %11 = vector.shape_cast %10 : vector<128xf32> to vector<1x128xf32>
    %12 = arith.addf %9, %11 : vector<1x128xf32>
    %c0_12 = arith.constant 0 : index
    %c0_13 = arith.constant 0 : index
    %c0_14 = arith.constant 0 : index
    %c0_15 = arith.constant 0 : index
    %13 = vector.load %arg6[%c0_12, %c0_13, %c0_14, %c0_15] : memref<1x1x1x128xf32, #tpu.memory_space<vmem>>, vector<1x1x1x128xf32>
    %14 = vector.shape_cast %13 : vector<1x1x1x128xf32> to vector<1x128xf32>
    %15 = vector.shape_cast %12 : vector<1x128xf32> to vector<1x1x1x128xf32>
    tpu.vector_store %arg6[%c0_12, %c0_13, %c0_14, %c0_15], %15 {strides = array<i32>} : memref<1x1x1x128xf32, #tpu.memory_space<vmem>>, vector<1x1x1x128xf32>,
    %c0_16 = arith.constant 0 : index
    %c0_17 = arith.constant 0 : index
    %c0_18 = arith.constant 0 : index
    %c0_19 = arith.constant 0 : index
    %16 = vector.load %arg7[%c0_16, %c0_17, %c0_18, %c0_19] : memref<1x1x1x128xf32, #tpu.memory_space<vmem>>, vector<1x1x1x128xf32>
    %17 = vector.shape_cast %16 : vector<1x1x1x128xf32> to vector<1x128xf32>
    %18 = arith.mulf %4, %4 : vector<64x128xf32>
    %cst_20 = arith.constant dense<0.000000e+00> : vector<128xf32>
    %19 = vector.multi_reduction <add>, %18, %cst_20 [0] : vector<64x128xf32> to vector<128xf32>
    %20 = vector.shape_cast %19 : vector<128xf32> to vector<1x128xf32>
    %21 = arith.addf %17, %20 : vector<1x128xf32>
    %c0_21 = arith.constant 0 : index
    %c0_22 = arith.constant 0 : index
    %c0_23 = arith.constant 0 : index
    %c0_24 = arith.constant 0 : index
    %22 = vector.load %arg7[%c0_21, %c0_22, %c0_23, %c0_24] : memref<1x1x1x128xf32, #tpu.memory_space<vmem>>, vector<1x1x1x128xf32>
    %23 = vector.shape_cast %22 : vector<1x1x1x128xf32> to vector<1x128xf32>
    %24 = vector.shape_cast %21 : vector<1x128xf32> to vector<1x1x1x128xf32>
    tpu.vector_store %arg7[%c0_21, %c0_22, %c0_23, %c0_24], %24 {strides = array<i32>} : memref<1x1x1x128xf32, #tpu.memory_space<vmem>>, vector<1x1x1x128xf32>,
    %25 = arith.truncf %4 : vector<64x128xf32> to vector<64x128xbf16>
    %c0_25 = arith.constant 0 : index
    %c0_26 = arith.constant 0 : index
    %c0_27 = arith.constant 0 : index
    %c0_28 = arith.constant 0 : index
    %26 = vector.load %arg5[%c0_25, %c0_26, %c0_27, %c0_28] : memref<1x1x64x128xbf16, #tpu.memory_space<vmem>>, vector<1x1x64x128xbf16>
    %27 = vector.shape_cast %26 : vector<1x1x64x128xbf16> to vector<64x128xbf16>
    %28 = vector.shape_cast %25 : vector<64x128xbf16> to vector<1x1x64x128xbf16>
    tpu.vector_store %arg5[%c0_25, %c0_26, %c0_27, %c0_28], %28 {strides = array<i32>} : memref<1x1x64x128xbf16, #tpu.memory_space<vmem>>, vector<1x1x64x128xbf16>,
    return
  }
  func.func @transform_0(%arg0: i32, %arg1: i32, %arg2: i32) -> (i32, i32, i32, i32) {
    %c0_i32 = arith.constant 0 : i32
    %c0_i32_0 = arith.constant 0 : i32
    return %arg0, %arg1, %arg2, %c0_i32 : i32, i32, i32, i32
  }
  func.func @transform_1(%arg0: i32, %arg1: i32, %arg2: i32) -> (i32, i32, i32) {
    %c0_i32 = arith.constant 0 : i32
    %c0_i32_0 = arith.constant 0 : i32
    %c0_i32_1 = arith.constant 0 : i32
    return %arg0, %c0_i32, %c0_i32_0 : i32, i32, i32
  }
  func.func @transform_2(%arg0: i32, %arg1: i32, %arg2: i32) -> (i32, i32, i32, i32) {
    %c0_i32 = arith.constant 0 : i32
    %c0_i32_0 = arith.constant 0 : i32
    return %arg0, %arg1, %arg2, %c0_i32 : i32, i32, i32, i32
  }
  func.func @transform_3(%arg0: i32, %arg1: i32, %arg2: i32) -> (i32, i32, i32, i32) {
    %c0_i32 = arith.constant 0 : i32
    %c0_i32_0 = arith.constant 0 : i32
    %c0_i32_1 = arith.constant 0 : i32
    return %arg0, %arg1, %c0_i32, %c0_i32_0 : i32, i32, i32, i32
  }
  func.func @transform_4(%arg0: i32, %arg1: i32, %arg2: i32) -> (i32, i32, i32, i32) {
    %c0_i32 = arith.constant 0 : i32
    %c0_i32_0 = arith.constant 0 : i32
    %c0_i32_1 = arith.constant 0 : i32
    return %arg0, %arg1, %c0_i32, %c0_i32_0 : i32, i32, i32, i32
  }
}

module attributes {stable_mosaic.version = 11 : i64} {
  func.func @_norm_act_kernel(%arg0: i32, %arg1: i32, %arg2: i32, %arg3: memref<1x1x64x128xbf16, #tpu.memory_space<vmem>>, %arg4: memref<1x1x128xf32, #tpu.memory_space<vmem>>, %arg5: memref<1x1x128xf32, #tpu.memory_space<vmem>>, %arg6: memref<1x1x64x128xbf16, #tpu.memory_space<vmem>>) attributes {dimension_semantics = [#tpu.dimension_semantics<parallel>, #tpu.dimension_semantics<parallel>, #tpu.dimension_semantics<parallel>], iteration_bounds = array<i64: 4, 2, 1>, scalar_prefetch = 0 : i64, scratch_operands = 0 : i64, tpu.core_type = #tpu.core_type<tc>, window_params = [{transform_indices = @transform_0, window_bounds = array<i64: 1, 1, 64, 128>}, {transform_indices = @transform_1, window_bounds = array<i64: 1, 1, 128>}, {transform_indices = @transform_2, window_bounds = array<i64: 1, 1, 128>}, {transform_indices = @transform_3, window_bounds = array<i64: 1, 1, 64, 128>}]} {
    %c0 = arith.constant 0 : index
    %c0_0 = arith.constant 0 : index
    %c0_1 = arith.constant 0 : index
    %c0_2 = arith.constant 0 : index
    %0 = vector.load %arg3[%c0, %c0_0, %c0_1, %c0_2] : memref<1x1x64x128xbf16, #tpu.memory_space<vmem>>, vector<1x1x64x128xbf16>
    %1 = vector.shape_cast %0 : vector<1x1x64x128xbf16> to vector<64x128xbf16>
    %2 = arith.extf %1 : vector<64x128xbf16> to vector<64x128xf32>
    %c0_3 = arith.constant 0 : index
    %c0_4 = arith.constant 0 : index
    %c0_5 = arith.constant 0 : index
    %3 = vector.load %arg4[%c0_3, %c0_4, %c0_5] : memref<1x1x128xf32, #tpu.memory_space<vmem>>, vector<1x1x128xf32>
    %4 = vector.shape_cast %3 : vector<1x1x128xf32> to vector<1x128xf32>
    %5 = vector.broadcast %4 : vector<1x128xf32> to vector<64x128xf32>
    %6 = arith.mulf %2, %5 : vector<64x128xf32>
    %c0_6 = arith.constant 0 : index
    %c0_7 = arith.constant 0 : index
    %c0_8 = arith.constant 0 : index
    %7 = vector.load %arg5[%c0_6, %c0_7, %c0_8] : memref<1x1x128xf32, #tpu.memory_space<vmem>>, vector<1x1x128xf32>
    %8 = vector.shape_cast %7 : vector<1x1x128xf32> to vector<1x128xf32>
    %9 = vector.broadcast %8 : vector<1x128xf32> to vector<64x128xf32>
    %10 = arith.addf %6, %9 : vector<64x128xf32>
    %cst = arith.constant 0.000000e+00 : f32
    %11 = vector.broadcast %cst : f32 to vector<64x128xf32>
    %12 = arith.maximumf %10, %11 : vector<64x128xf32>
    %13 = arith.truncf %12 : vector<64x128xf32> to vector<64x128xbf16>
    %c0_9 = arith.constant 0 : index
    %c0_10 = arith.constant 0 : index
    %c0_11 = arith.constant 0 : index
    %c0_12 = arith.constant 0 : index
    %14 = vector.load %arg6[%c0_9, %c0_10, %c0_11, %c0_12] : memref<1x1x64x128xbf16, #tpu.memory_space<vmem>>, vector<1x1x64x128xbf16>
    %15 = vector.shape_cast %14 : vector<1x1x64x128xbf16> to vector<64x128xbf16>
    %16 = vector.shape_cast %13 : vector<64x128xbf16> to vector<1x1x64x128xbf16>
    tpu.vector_store %arg6[%c0_9, %c0_10, %c0_11, %c0_12], %16 {strides = array<i32>} : memref<1x1x64x128xbf16, #tpu.memory_space<vmem>>, vector<1x1x64x128xbf16>,
    return
  }
  func.func @transform_0(%arg0: i32, %arg1: i32, %arg2: i32) -> (i32, i32, i32, i32) {
    %c0_i32 = arith.constant 0 : i32
    %c0_i32_0 = arith.constant 0 : i32
    return %arg0, %arg1, %arg2, %c0_i32 : i32, i32, i32, i32
  }
  func.func @transform_1(%arg0: i32, %arg1: i32, %arg2: i32) -> (i32, i32, i32) {
    %c0_i32 = arith.constant 0 : i32
    %c0_i32_0 = arith.constant 0 : i32
    %c0_i32_1 = arith.constant 0 : i32
    return %arg1, %c0_i32, %c0_i32_0 : i32, i32, i32
  }
  func.func @transform_2(%arg0: i32, %arg1: i32, %arg2: i32) -> (i32, i32, i32) {
    %c0_i32 = arith.constant 0 : i32
    %c0_i32_0 = arith.constant 0 : i32
    %c0_i32_1 = arith.constant 0 : i32
    return %arg1, %c0_i32, %c0_i32_0 : i32, i32, i32
  }
  func.func @transform_3(%arg0: i32, %arg1: i32, %arg2: i32) -> (i32, i32, i32, i32) {
    %c0_i32 = arith.constant 0 : i32
    %c0_i32_0 = arith.constant 0 : i32
    return %arg0, %arg1, %arg2, %c0_i32 : i32, i32, i32, i32
  }
}

module attributes {stable_mosaic.version = 11 : i64} {
  func.func @_mm_kernel(%arg0: i32, %arg1: i32, %arg2: i32, %arg3: memref<1x1x256x80xbf16, #tpu.memory_space<vmem>>, %arg4: memref<1x80x128xbf16, #tpu.memory_space<vmem>>, %arg5: memref<1x1x256x128xbf16, #tpu.memory_space<vmem>>, %arg6: memref<1x1x1x128xf32, #tpu.memory_space<vmem>>, %arg7: memref<1x1x1x128xf32, #tpu.memory_space<vmem>>) attributes {dimension_semantics = [#tpu.dimension_semantics<parallel>, #tpu.dimension_semantics<parallel>, #tpu.dimension_semantics<arbitrary>], iteration_bounds = array<i64: 1, 2, 1>, scalar_prefetch = 0 : i64, scratch_operands = 0 : i64, tpu.core_type = #tpu.core_type<tc>, window_params = [{transform_indices = @transform_0, window_bounds = array<i64: 1, 1, 256, 80>}, {transform_indices = @transform_1, window_bounds = array<i64: 1, 80, 128>}, {transform_indices = @transform_2, window_bounds = array<i64: 1, 1, 256, 128>}, {transform_indices = @transform_3, window_bounds = array<i64: 1, 1, 1, 128>}, {transform_indices = @transform_4, window_bounds = array<i64: 1, 1, 1, 128>}]} {
    %c0 = arith.constant 0 : index
    %c0_0 = arith.constant 0 : index
    %c0_1 = arith.constant 0 : index
    %c0_2 = arith.constant 0 : index
    %0 = vector.load %arg3[%c0, %c0_0, %c0_1, %c0_2] : memref<1x1x256x80xbf16, #tpu.memory_space<vmem>>, vector<1x1x256x80xbf16>
    %1 = vector.shape_cast %0 : vector<1x1x256x80xbf16> to vector<256x80xbf16>
    %c0_3 = arith.constant 0 : index
    %c0_4 = arith.constant 0 : index
    %c0_5 = arith.constant 0 : index
    %2 = vector.load %arg4[%c0_3, %c0_4, %c0_5] : memref<1x80x128xbf16, #tpu.memory_space<vmem>>, vector<1x80x128xbf16>
    %3 = vector.shape_cast %2 : vector<1x80x128xbf16> to vector<80x128xbf16>
    %cst = arith.constant dense<0.000000e+00> : vector<256x128xf32>
    %4 = tpu.matmul %1, %3, %cst {dimension_numbers = #tpu.dot_dimension_numbers<[1], [0], [0], [1], [0, 0, 1, 1], [], []>} : vector<256x80xbf16>, vector<80x128xbf16>, vector<256x128xf32> -> vector<256x128xf32>
    %c0_i32 = arith.constant 0 : i32
    %5 = arith.cmpi eq, %arg2, %c0_i32 : i32
    %6 = arith.extui %5 : i1 to i32
    %c0_i32_6 = arith.constant 0 : i32
    %7 = arith.cmpi ne, %6, %c0_i32_6 : i32
    scf.if %7 {
      %cst_29 = arith.constant 0.000000e+00 : f32
      %29 = vector.broadcast %cst_29 : f32 to vector<1x1x1x128xf32>
      %c0_30 = arith.constant 0 : index
      %c0_31 = arith.constant 0 : index
      %c0_32 = arith.constant 0 : index
      %c0_33 = arith.constant 0 : index
      %30 = vector.load %arg6[%c0_30, %c0_31, %c0_32, %c0_33] : memref<1x1x1x128xf32, #tpu.memory_space<vmem>>, vector<1x1x1x128xf32>
      tpu.vector_store %arg6[%c0_30, %c0_31, %c0_32, %c0_33], %29 {strides = array<i32>} : memref<1x1x1x128xf32, #tpu.memory_space<vmem>>, vector<1x1x1x128xf32>,
      %cst_34 = arith.constant 0.000000e+00 : f32
      %31 = vector.broadcast %cst_34 : f32 to vector<1x1x1x128xf32>
      %c0_35 = arith.constant 0 : index
      %c0_36 = arith.constant 0 : index
      %c0_37 = arith.constant 0 : index
      %c0_38 = arith.constant 0 : index
      %32 = vector.load %arg7[%c0_35, %c0_36, %c0_37, %c0_38] : memref<1x1x1x128xf32, #tpu.memory_space<vmem>>, vector<1x1x1x128xf32>
      tpu.vector_store %arg7[%c0_35, %c0_36, %c0_37, %c0_38], %31 {strides = array<i32>} : memref<1x1x1x128xf32, #tpu.memory_space<vmem>>, vector<1x1x1x128xf32>,
    } else {
    }
    %c0_7 = arith.constant 0 : index
    %c0_8 = arith.constant 0 : index
    %c0_9 = arith.constant 0 : index
    %c0_10 = arith.constant 0 : index
    %8 = vector.load %arg6[%c0_7, %c0_8, %c0_9, %c0_10] : memref<1x1x1x128xf32, #tpu.memory_space<vmem>>, vector<1x1x1x128xf32>
    %9 = vector.shape_cast %8 : vector<1x1x1x128xf32> to vector<1x128xf32>
    %cst_11 = arith.constant dense<0.000000e+00> : vector<128xf32>
    %10 = vector.multi_reduction <add>, %4, %cst_11 [0] : vector<256x128xf32> to vector<128xf32>
    %11 = vector.shape_cast %10 : vector<128xf32> to vector<1x128xf32>
    %12 = arith.addf %9, %11 : vector<1x128xf32>
    %c0_12 = arith.constant 0 : index
    %c0_13 = arith.constant 0 : index
    %c0_14 = arith.constant 0 : index
    %c0_15 = arith.constant 0 : index
    %13 = vector.load %arg6[%c0_12, %c0_13, %c0_14, %c0_15] : memref<1x1x1x128xf32, #tpu.memory_space<vmem>>, vector<1x1x1x128xf32>
    %14 = vector.shape_cast %13 : vector<1x1x1x128xf32> to vector<1x128xf32>
    %15 = vector.shape_cast %12 : vector<1x128xf32> to vector<1x1x1x128xf32>
    tpu.vector_store %arg6[%c0_12, %c0_13, %c0_14, %c0_15], %15 {strides = array<i32>} : memref<1x1x1x128xf32, #tpu.memory_space<vmem>>, vector<1x1x1x128xf32>,
    %c0_16 = arith.constant 0 : index
    %c0_17 = arith.constant 0 : index
    %c0_18 = arith.constant 0 : index
    %c0_19 = arith.constant 0 : index
    %16 = vector.load %arg7[%c0_16, %c0_17, %c0_18, %c0_19] : memref<1x1x1x128xf32, #tpu.memory_space<vmem>>, vector<1x1x1x128xf32>
    %17 = vector.shape_cast %16 : vector<1x1x1x128xf32> to vector<1x128xf32>
    %18 = arith.mulf %4, %4 : vector<256x128xf32>
    %cst_20 = arith.constant dense<0.000000e+00> : vector<128xf32>
    %19 = vector.multi_reduction <add>, %18, %cst_20 [0] : vector<256x128xf32> to vector<128xf32>
    %20 = vector.shape_cast %19 : vector<128xf32> to vector<1x128xf32>
    %21 = arith.addf %17, %20 : vector<1x128xf32>
    %c0_21 = arith.constant 0 : index
    %c0_22 = arith.constant 0 : index
    %c0_23 = arith.constant 0 : index
    %c0_24 = arith.constant 0 : index
    %22 = vector.load %arg7[%c0_21, %c0_22, %c0_23, %c0_24] : memref<1x1x1x128xf32, #tpu.memory_space<vmem>>, vector<1x1x1x128xf32>
    %23 = vector.shape_cast %22 : vector<1x1x1x128xf32> to vector<1x128xf32>
    %24 = vector.shape_cast %21 : vector<1x128xf32> to vector<1x1x1x128xf32>
    tpu.vector_store %arg7[%c0_21, %c0_22, %c0_23, %c0_24], %24 {strides = array<i32>} : memref<1x1x1x128xf32, #tpu.memory_space<vmem>>, vector<1x1x1x128xf32>,
    %25 = arith.truncf %4 : vector<256x128xf32> to vector<256x128xbf16>
    %c0_25 = arith.constant 0 : index
    %c0_26 = arith.constant 0 : index
    %c0_27 = arith.constant 0 : index
    %c0_28 = arith.constant 0 : index
    %26 = vector.load %arg5[%c0_25, %c0_26, %c0_27, %c0_28] : memref<1x1x256x128xbf16, #tpu.memory_space<vmem>>, vector<1x1x256x128xbf16>
    %27 = vector.shape_cast %26 : vector<1x1x256x128xbf16> to vector<256x128xbf16>
    %28 = vector.shape_cast %25 : vector<256x128xbf16> to vector<1x1x256x128xbf16>
    tpu.vector_store %arg5[%c0_25, %c0_26, %c0_27, %c0_28], %28 {strides = array<i32>} : memref<1x1x256x128xbf16, #tpu.memory_space<vmem>>, vector<1x1x256x128xbf16>,
    return
  }
  func.func @transform_0(%arg0: i32, %arg1: i32, %arg2: i32) -> (i32, i32, i32, i32) {
    %c0_i32 = arith.constant 0 : i32
    %c0_i32_0 = arith.constant 0 : i32
    return %arg0, %arg1, %arg2, %c0_i32 : i32, i32, i32, i32
  }
  func.func @transform_1(%arg0: i32, %arg1: i32, %arg2: i32) -> (i32, i32, i32) {
    %c0_i32 = arith.constant 0 : i32
    %c0_i32_0 = arith.constant 0 : i32
    %c0_i32_1 = arith.constant 0 : i32
    return %arg0, %c0_i32, %c0_i32_0 : i32, i32, i32
  }
  func.func @transform_2(%arg0: i32, %arg1: i32, %arg2: i32) -> (i32, i32, i32, i32) {
    %c0_i32 = arith.constant 0 : i32
    %c0_i32_0 = arith.constant 0 : i32
    return %arg0, %arg1, %arg2, %c0_i32 : i32, i32, i32, i32
  }
  func.func @transform_3(%arg0: i32, %arg1: i32, %arg2: i32) -> (i32, i32, i32, i32) {
    %c0_i32 = arith.constant 0 : i32
    %c0_i32_0 = arith.constant 0 : i32
    %c0_i32_1 = arith.constant 0 : i32
    return %arg0, %arg1, %c0_i32, %c0_i32_0 : i32, i32, i32, i32
  }
  func.func @transform_4(%arg0: i32, %arg1: i32, %arg2: i32) -> (i32, i32, i32, i32) {
    %c0_i32 = arith.constant 0 : i32
    %c0_i32_0 = arith.constant 0 : i32
    %c0_i32_1 = arith.constant 0 : i32
    return %arg0, %arg1, %c0_i32, %c0_i32_0 : i32, i32, i32, i32
  }
}

module attributes {stable_mosaic.version = 11 : i64} {
  func.func @_mm_kernel(%arg0: i32, %arg1: i32, %arg2: i32, %arg3: memref<1x1x256x48xbf16, #tpu.memory_space<vmem>>, %arg4: memref<1x48x128xbf16, #tpu.memory_space<vmem>>, %arg5: memref<1x1x256x128xbf16, #tpu.memory_space<vmem>>) attributes {dimension_semantics = [#tpu.dimension_semantics<parallel>, #tpu.dimension_semantics<parallel>, #tpu.dimension_semantics<parallel>], iteration_bounds = array<i64: 1, 2, 1>, scalar_prefetch = 0 : i64, scratch_operands = 0 : i64, tpu.core_type = #tpu.core_type<tc>, window_params = [{transform_indices = @transform_0, window_bounds = array<i64: 1, 1, 256, 48>}, {transform_indices = @transform_1, window_bounds = array<i64: 1, 48, 128>}, {transform_indices = @transform_2, window_bounds = array<i64: 1, 1, 256, 128>}]} {
    %c0 = arith.constant 0 : index
    %c0_0 = arith.constant 0 : index
    %c0_1 = arith.constant 0 : index
    %c0_2 = arith.constant 0 : index
    %0 = vector.load %arg3[%c0, %c0_0, %c0_1, %c0_2] : memref<1x1x256x48xbf16, #tpu.memory_space<vmem>>, vector<1x1x256x48xbf16>
    %1 = vector.shape_cast %0 : vector<1x1x256x48xbf16> to vector<256x48xbf16>
    %c0_3 = arith.constant 0 : index
    %c0_4 = arith.constant 0 : index
    %c0_5 = arith.constant 0 : index
    %2 = vector.load %arg4[%c0_3, %c0_4, %c0_5] : memref<1x48x128xbf16, #tpu.memory_space<vmem>>, vector<1x48x128xbf16>
    %3 = vector.shape_cast %2 : vector<1x48x128xbf16> to vector<48x128xbf16>
    %cst = arith.constant dense<0.000000e+00> : vector<256x128xf32>
    %4 = tpu.matmul %1, %3, %cst {dimension_numbers = #tpu.dot_dimension_numbers<[1], [0], [0], [1], [0, 0, 1, 1], [], []>} : vector<256x48xbf16>, vector<48x128xbf16>, vector<256x128xf32> -> vector<256x128xf32>
    %5 = math.tanh %4 : vector<256x128xf32>
    %6 = arith.truncf %5 : vector<256x128xf32> to vector<256x128xbf16>
    %c0_6 = arith.constant 0 : index
    %c0_7 = arith.constant 0 : index
    %c0_8 = arith.constant 0 : index
    %c0_9 = arith.constant 0 : index
    %7 = vector.load %arg5[%c0_6, %c0_7, %c0_8, %c0_9] : memref<1x1x256x128xbf16, #tpu.memory_space<vmem>>, vector<1x1x256x128xbf16>
    %8 = vector.shape_cast %7 : vector<1x1x256x128xbf16> to vector<256x128xbf16>
    %9 = vector.shape_cast %6 : vector<256x128xbf16> to vector<1x1x256x128xbf16>
    tpu.vector_store %arg5[%c0_6, %c0_7, %c0_8, %c0_9], %9 {strides = array<i32>} : memref<1x1x256x128xbf16, #tpu.memory_space<vmem>>, vector<1x1x256x128xbf16>,
    return
  }
  func.func @transform_0(%arg0: i32, %arg1: i32, %arg2: i32) -> (i32, i32, i32, i32) {
    %c0_i32 = arith.constant 0 : i32
    %c0_i32_0 = arith.constant 0 : i32
    return %arg0, %arg1, %arg2, %c0_i32 : i32, i32, i32, i32
  }
  func.func @transform_1(%arg0: i32, %arg1: i32, %arg2: i32) -> (i32, i32, i32) {
    %c0_i32 = arith.constant 0 : i32
    %c0_i32_0 = arith.constant 0 : i32
    %c0_i32_1 = arith.constant 0 : i32
    return %arg0, %c0_i32, %c0_i32_0 : i32, i32, i32
  }
  func.func @transform_2(%arg0: i32, %arg1: i32, %arg2: i32) -> (i32, i32, i32, i32) {
    %c0_i32 = arith.constant 0 : i32
    %c0_i32_0 = arith.constant 0 : i32
    return %arg0, %arg1, %arg2, %c0_i32 : i32, i32, i32, i32
  }
}

</mosaic_0001>

<bundles_post_ra>
// kernel: autoencoder_forward.36
= control target key start
LH: loop header
LB: loop body
LE: loop exit
PB: predicated region body
PF: predicated region fallthrough
CT: control target
= control target key end

     0   :  { %s888_s12 = smov 0   ;;  %s890_s13 = smov 0   ;;  %s1040_s0 = inlined_call_operand.vmem [shape: bf16[1,2,256,128], index: 0, kind: input, shape index: {}]   ;;  %s1041_s1 = inlined_call_operand.vmem [shape: f32[2,1,128], index: 1, kind: input, shape index: {}]   ;;  %s1042_s2 = inlined_call_operand.vmem [shape: f32[2,1,128], index: 2, kind: input, shape index: {}]   ;;  %s1043_s3 = inlined_call_operand.vmem [shape: bf16[1,2,256,128], index: 3, kind: output, shape index: {}]  }
   0x1   :  { %s892_s14 = smov 0  }
   0x2 LB: > { %s28_s15 = sadd.s32 1, %s862_s13  ;;  %p635_p0 = scmp.ge.s32.totalorder %s866_s14, 1  ;;  %s866_s14 = sphi %s892_s14, %s13_s14   ;;  %s862_s13 = sphi %s890_s13, %s1045_s13   ;;  %s858_s12 = sphi %s888_s12, %s1044_s12  }
   0x3   : > { %p30_p1 = scmp.ge.s32.totalorder %s28_s15, 2  ;;  %p189_p2 = scmp.lt.s32.totalorder %s866_s14, 3 }
   0x5   : > { %s1047_s15 = smov (%p30_p1, %s28_s15), 0  ;;  %p190_p3 = pnand %p635_p0, %p189_p2 }
   0x6   : > { %p238_p4 = scmp.lt.s32.totalorder (!%p190_p3), %s858_s12, 1 }
   0x7   : > { %193 = sbr.rel (%p190_p3) target bundleno = 58 (0x3a), region = 32 }
   0xc   : > { %s1049_s12 = smov (!%p238_p4, %s858_s12), 1 }
   0xd   : > { %s642_s16 = sshll.u32 %s1049_s12, 7  ;;  %s251_s19 = scalar_lea.vmem %s1041_s1, %s1049_s12 }
   0xe   : > { %s918_s22 = scalar_lea.vmem %s1040_s0, %s642_s16  ;;  %s254_s25 = scalar_lea.vmem %s1042_s2, %s1049_s12  ;;  %v924_v0 = vld [vmem:[%s251_s19] ss:$0 sm:$0xff] }
   0xf   : > { %v645_v1 = vld [vmem:[%s918_s22] sm:$0xff]   ;;  %v788_v5 = vld [vmem:[%s918_s22 + $0x8] sm:$0xff]   ;;  %v789_v6 = vld [vmem:[%s918_s22 + $0x10] sm:$0xff]   ;;  %s955_s28 = scalar_lea.vmem %s1043_s3, %s642_s16 }
  0x10   : > { %v927_v2 = vld [vmem:[%s254_s25] ss:$0 sm:$0xff]  ;;  %v646_v3 = vunpack.c.l.bf16 %v645_v1  ;;  %v647_v4 = vunpack.c.h.bf16 %v645_v1  ;;  %v790_v7 = vld [vmem:[%s918_s22 + $0x18] sm:$0xff]   ;;  %v650_v8 = vunpack.c.l.bf16 %v788_v5  ;;  %v651_v9 = vunpack.c.h.bf16 %v788_v5  ;;  %v792_v33 = vld [vmem:[%s918_s22 + $0x28] sm:$0xff]  }
  0x11   : > { %v654_v10 = vunpack.c.l.bf16 %v789_v6  ;;  %v655_v11 = vunpack.c.h.bf16 %v789_v6  ;;  %v658_v14 = vunpack.c.l.bf16 %v790_v7  ;;  %v659_v15 = vunpack.c.h.bf16 %v790_v7  ;;  %v791_v28 = vld [vmem:[%s918_s22 + $0x20] sm:$0xff]   ;;  %v793_v38 = vld [vmem:[%s918_s22 + $0x30] sm:$0xff]   ;;  %v794_v43 = vld [vmem:[%s918_s22 + $0x38] sm:$0xff]  }
  0x12   : > { %v337_v12 = vmul.f32 %v924_v0, %v646_v3  ;;  %v338_v13 = vmul.f32 %v924_v0, %v647_v4  ;;  %v339_v16 = vmul.f32 %v924_v0, %v650_v8  ;;  %v340_v17 = vmul.f32 %v924_v0, %v651_v9  ;;  %v795_v1 = vld [vmem:[%s918_s22 + $0x40] sm:$0xff]  }
  0x13   : > { %v341_v18 = vmul.f32 %v924_v0, %v654_v10  ;;  %v342_v19 = vmul.f32 %v924_v0, %v655_v11  ;;  %v343_v22 = vmul.f32 %v924_v0, %v658_v14  ;;  %v344_v23 = vmul.f32 %v924_v0, %v659_v15  ;;  %v796_v11 = vld [vmem:[%s918_s22 + $0x48] sm:$0xff]  }
  0x14   : > { %v373_v20 = vadd.f32 %v927_v2, %v337_v12  ;;  %v374_v21 = vadd.f32 %v927_v2, %v338_v13  ;;  %v375_v24 = vadd.f32 %v927_v2, %v339_v16  ;;  %v376_v25 = vadd.f32 %v927_v2, %v340_v17  ;;  %v797_v16 = vld [vmem:[%s918_s22 + $0x50] sm:$0xff]  }
  0x15   : > { %v377_v26 = vadd.f32 %v927_v2, %v341_v18  ;;  %v378_v27 = vadd.f32 %v927_v2, %v342_v19  ;;  %v379_v31 = vadd.f32 %v927_v2, %v343_v22  ;;  %v380_v32 = vadd.f32 %v927_v2, %v344_v23 }
  0x16   : > { %v405_v29 = vmax.f32 %v373_v20, 0.0  ;;  %v406_v30 = vmax.f32 %v374_v21, 0.0  ;;  %v407_v34 = vmax.f32 %v375_v24, 0.0  ;;  %v408_v35 = vmax.f32 %v376_v25, 0.0  ;;  %v798_v25 = vld [vmem:[%s918_s22 + $0x58] sm:$0xff]  }
  0x17   : > { %v409_v36 = vmax.f32 %v377_v26, 0.0  ;;  %v410_v37 = vmax.f32 %v378_v27, 0.0  ;;  %v411_v40 = vmax.f32 %v379_v31, 0.0  ;;  %v412_v41 = vmax.f32 %v380_v32, 0.0 }
  0x18   : > { %v711_v39 = vpack.c.bf16 %v406_v30, %v405_v29  ;;  %v662_v42 = vunpack.c.l.bf16 %v791_v28  ;;  %v716_v44 = vpack.c.bf16 %v408_v35, %v407_v34  ;;  %v663_v46 = vunpack.c.h.bf16 %v791_v28 }
  0x19   : > { %v721_v45 = vpack.c.bf16 %v410_v37, %v409_v36  ;;  %v666_v47 = vunpack.c.l.bf16 %v792_v33  ;;  %v726_v48 = vpack.c.bf16 %v412_v41, %v411_v40  ;;  %v667_v50 = vunpack.c.h.bf16 %v792_v33 }
  0x1a   : > { %712 = vst [vmem:[%s955_s28] sm:$0xff] %v711_v39   ;;  %v345_v49 = vmul.f32 %v924_v0, %v662_v42  ;;  %v670_v51 = vunpack.c.l.bf16 %v793_v38  ;;  %v346_v52 = vmul.f32 %v924_v0, %v663_v46  ;;  %v671_v54 = vunpack.c.h.bf16 %v793_v38  ;;  %v799_v38 = vld [vmem:[%s918_s22 + $0x60] sm:$0xff]  }
  0x1b   : > { %803 = vst [vmem:[%s955_s28 + $0x8] sm:$0xff] %v716_v44   ;;  %v347_v53 = vmul.f32 %v924_v0, %v666_v47  ;;  %v674_v55 = vunpack.c.l.bf16 %v794_v43  ;;  %v348_v57 = vmul.f32 %v924_v0, %v667_v50  ;;  %v675_v59 = vunpack.c.h.bf16 %v794_v43 }
  0x1c   : > { %804 = vst [vmem:[%s955_s28 + $0x10] sm:$0xff] %v721_v45   ;;  %v381_v56 = vadd.f32 %v927_v2, %v345_v49  ;;  %v349_v58 = vmul.f32 %v924_v0, %v670_v51  ;;  %v382_v60 = vadd.f32 %v927_v2, %v346_v52  ;;  %v350_v62 = vmul.f32 %v924_v0, %v671_v54  ;;  %v800_v51 = vld [vmem:[%s918_s22 + $0x68] sm:$0xff]  }
  0x1d   : > { %805 = vst [vmem:[%s955_s28 + $0x18] sm:$0xff] %v726_v48   ;;  %v383_v61 = vadd.f32 %v927_v2, %v347_v53  ;;  %v351_v63 = vmul.f32 %v924_v0, %v674_v55  ;;  %v384_v4 = vadd.f32 %v927_v2, %v348_v57  ;;  %v352_v6 = vmul.f32 %v924_v0, %v675_v59 }
  0x1e   : > { %v413_v3 = vmax.f32 %v381_v56, 0.0  ;;  %v385_v5 = vadd.f32 %v927_v2, %v349_v58  ;;  %v414_v7 = vmax.f32 %v382_v60, 0.0  ;;  %v386_v9 = vadd.f32 %v927_v2, %v350_v62  ;;  %v801_v60 = vld [vmem:[%s918_s22 + $0x70] sm:$0xff]  }
  0x1f   : > { %v415_v8 = vmax.f32 %v383_v61, 0.0  ;;  %v387_v10 = vadd.f32 %v927_v2, %v351_v63  ;;  %v416_v12 = vmax.f32 %v384_v4, 0.0  ;;  %v388_v14 = vadd.f32 %v927_v2, %v352_v6 }
  0x20   : > { %v417_v13 = vmax.f32 %v385_v5, 0.0  ;;  %v678_v15 = vunpack.c.l.bf16 %v795_v1  ;;  %v731_v17 = vpack.c.bf16 %v414_v7, %v413_v3  ;;  %v418_v18 = vmax.f32 %v386_v9, 0.0  ;;  %v802_v3 = vld [vmem:[%s918_s22 + $0x78] sm:$0xff]  }
  0x21   : > { %v419_v19 = vmax.f32 %v387_v10, 0.0  ;;  %v679_v20 = vunpack.c.h.bf16 %v795_v1  ;;  %v736_v21 = vpack.c.bf16 %v416_v12, %v415_v8  ;;  %v420_v22 = vmax.f32 %v388_v14, 0.0 }
  0x22   : > { %v353_v23 = vmul.f32 %v924_v0, %v678_v15  ;;  %v682_v24 = vunpack.c.l.bf16 %v796_v11  ;;  %806 = vst [vmem:[%s955_s28 + $0x20] sm:$0xff] %v731_v17   ;;  %v741_v26 = vpack.c.bf16 %v418_v18, %v417_v13  ;;  %v683_v28 = vunpack.c.h.bf16 %v796_v11 }
  0x23   : > { %v354_v27 = vmul.f32 %v924_v0, %v679_v20  ;;  %v686_v29 = vunpack.c.l.bf16 %v797_v16  ;;  %807 = vst [vmem:[%s955_s28 + $0x28] sm:$0xff] %v736_v21   ;;  %v746_v30 = vpack.c.bf16 %v420_v22, %v419_v19  ;;  %v687_v33 = vunpack.c.h.bf16 %v797_v16 }
  0x24   : > { %v389_v31 = vadd.f32 %v927_v2, %v353_v23  ;;  %v355_v32 = vmul.f32 %v924_v0, %v682_v24  ;;  %808 = vst [vmem:[%s955_s28 + $0x30] sm:$0xff] %v741_v26   ;;  %v356_v35 = vmul.f32 %v924_v0, %v683_v28  ;;  %v690_v37 = vunpack.c.l.bf16 %v798_v25 }
  0x25   : > { %v390_v34 = vadd.f32 %v927_v2, %v354_v27  ;;  %v357_v36 = vmul.f32 %v924_v0, %v686_v29  ;;  %809 = vst [vmem:[%s955_s28 + $0x38] sm:$0xff] %v746_v30   ;;  %v358_v41 = vmul.f32 %v924_v0, %v687_v33  ;;  %v691_v42 = vunpack.c.h.bf16 %v798_v25 }
  0x26   : > { %v421_v39 = vmax.f32 %v389_v31, 0.0  ;;  %v391_v40 = vadd.f32 %v927_v2, %v355_v32  ;;  %v392_v44 = vadd.f32 %v927_v2, %v356_v35  ;;  %v359_v46 = vmul.f32 %v924_v0, %v690_v37 }
  0x27   : > { %v422_v43 = vmax.f32 %v390_v34, 0.0  ;;  %v393_v45 = vadd.f32 %v927_v2, %v357_v36  ;;  %v394_v48 = vadd.f32 %v927_v2, %v358_v41  ;;  %v360_v49 = vmul.f32 %v924_v0, %v691_v42 }
  0x28   : > { %v423_v47 = vmax.f32 %v391_v40, 0.0  ;;  %v694_v50 = vunpack.c.l.bf16 %v799_v38  ;;  %v424_v53 = vmax.f32 %v392_v44, 0.0  ;;  %v395_v55 = vadd.f32 %v927_v2, %v359_v46 }
  0x29   : > { %v751_v52 = vpack.c.bf16 %v422_v43, %v421_v39  ;;  %v425_v54 = vmax.f32 %v393_v45, 0.0  ;;  %v426_v56 = vmax.f32 %v394_v48, 0.0  ;;  %v396_v57 = vadd.f32 %v927_v2, %v360_v49 }
  0x2a   : > { %v695_v58 = vunpack.c.h.bf16 %v799_v38  ;;  %v361_v59 = vmul.f32 %v924_v0, %v694_v50  ;;  %v756_v61 = vpack.c.bf16 %v424_v53, %v423_v47  ;;  %v427_v62 = vmax.f32 %v395_v55, 0.0 }
  0x2b   : > { %810 = vst [vmem:[%s955_s28 + $0x40] sm:$0xff] %v751_v52   ;;  %v698_v63 = vunpack.c.l.bf16 %v800_v51  ;;  %v699_v1 = vunpack.c.h.bf16 %v800_v51  ;;  %v761_v4 = vpack.c.bf16 %v426_v56, %v425_v54  ;;  %v428_v5 = vmax.f32 %v396_v57, 0.0 }
  0x2c   : > { %v362_v6 = vmul.f32 %v924_v0, %v695_v58  ;;  %v397_v7 = vadd.f32 %v927_v2, %v361_v59  ;;  %811 = vst [vmem:[%s955_s28 + $0x48] sm:$0xff] %v756_v61   ;;  %v702_v10 = vunpack.c.l.bf16 %v801_v60  ;;  %v703_v11 = vunpack.c.h.bf16 %v801_v60 }
  0x2d   : > { %v363_v8 = vmul.f32 %v924_v0, %v698_v63  ;;  %v364_v9 = vmul.f32 %v924_v0, %v699_v1  ;;  %812 = vst [vmem:[%s955_s28 + $0x50] sm:$0xff] %v761_v4   ;;  %v766_v12 = vpack.c.bf16 %v428_v5, %v427_v62  ;;  %v706_v15 = vunpack.c.l.bf16 %v802_v3 }
  0x2e   : > { %v398_v13 = vadd.f32 %v927_v2, %v362_v6  ;;  %v429_v14 = vmax.f32 %v397_v7, 0.0  ;;  %v365_v18 = vmul.f32 %v924_v0, %v702_v10  ;;  %v366_v19 = vmul.f32 %v924_v0, %v703_v11 }
  0x2f   : > { %v399_v16 = vadd.f32 %v927_v2, %v363_v8  ;;  %v400_v17 = vadd.f32 %v927_v2, %v364_v9  ;;  %813 = vst [vmem:[%s955_s28 + $0x58] sm:$0xff] %v766_v12   ;;  %v707_v21 = vunpack.c.h.bf16 %v802_v3  ;;  %v367_v22 = vmul.f32 %v924_v0, %v706_v15 }
  0x30   : > { %v430_v20 = vmax.f32 %v398_v13, 0.0  ;;  %v401_v25 = vadd.f32 %v927_v2, %v365_v18  ;;  %v402_v26 = vadd.f32 %v927_v2, %v366_v19 }
  0x31   : > { %v431_v23 = vmax.f32 %v399_v16, 0.0  ;;  %v432_v24 = vmax.f32 %v400_v17, 0.0  ;;  %v368_v28 = vmul.f32 %v924_v0, %v707_v21  ;;  %v403_v29 = vadd.f32 %v927_v2, %v367_v22 }
  0x32   : > { %v771_v27 = vpack.c.bf16 %v430_v20, %v429_v14  ;;  %v433_v31 = vmax.f32 %v401_v25, 0.0  ;;  %v434_v32 = vmax.f32 %v402_v26, 0.0 }
  0x33   : > { %v776_v30 = vpack.c.bf16 %v432_v24, %v431_v23  ;;  %v404_v33 = vadd.f32 %v927_v2, %v368_v28  ;;  %v435_v34 = vmax.f32 %v403_v29, 0.0 }
  0x34   : > { %814 = vst [vmem:[%s955_s28 + $0x60] sm:$0xff] %v771_v27   ;;  %v781_v35 = vpack.c.bf16 %v434_v32, %v433_v31 }
  0x35   : > { %815 = vst [vmem:[%s955_s28 + $0x68] sm:$0xff] %v776_v30   ;;  %v436_v36 = vmax.f32 %v404_v33, 0.0 }
  0x36   : > { %816 = vst [vmem:[%s955_s28 + $0x70] sm:$0xff] %v781_v35  }
  0x37   : > { %v786_v37 = vpack.c.bf16 %v436_v36, %v435_v34 }
  0x39   : > { %817 = vst [vmem:[%s955_s28 + $0x78] sm:$0xff] %v786_v37  }
  0x3a PF: > { %s13_s14 = sadd.s32 1, %s866_s14   ;;  %s1044_s12 = smov %s862_s13 }
  0x3b   : > { %p10_p5 = scmp.ge.s32.totalorder %s13_s14, 4   ;;  %s1045_s13 = smov %s1047_s15 }
  0x3d   :  { %12 = sbr.rel (!%p10_p5) target bundleno = 2 (0x2), region = 68 }

// kernel: autoencoder_forward.35
= control target key start
LH: loop header
LB: loop body
LE: loop exit
PB: predicated region body
PF: predicated region fallthrough
CT: control target
= control target key end

     0   :  { %s1279_s15 = smov 0   ;;  %s1281_s16 = smov 0   ;;  %s1521_s0 = inlined_call_operand.vmem [shape: bf16[1,2,256,32], index: 0, kind: input, shape index: {}]   ;;  %s1522_s1 = inlined_call_operand.vmem [shape: bf16[1,32,128], index: 1, kind: input, shape index: {}]   ;;  %s1523_s2 = inlined_call_operand.vmem [shape: bf16[1,2,256,128], index: 2, kind: output, shape index: {0}]   ;;  %s1524_s3 = inlined_call_operand.vmem [shape: f32[1,2,1,128], index: 3, kind: output, shape index: {1}]   ;;  %s1525_s4 = inlined_call_operand.vmem [shape: f32[1,2,1,128], index: 4, kind: output, shape index: {2}]  }
   0x1   :  { %s1283_s17 = smov 0  }
   0x2 LB: > { %s30_s18 = sadd.s32 1, %s1247_s16  ;;  %p988_p0 = scmp.ge.s32.totalorder %s1251_s17, 1  ;;  %s1251_s17 = sphi %s1283_s17, %s15_s17   ;;  %s1247_s16 = sphi %s1281_s16, %s1527_s16   ;;  %s1243_s15 = sphi %s1279_s15, %s1526_s15  }
   0x3   : > { %p32_p1 = scmp.ge.s32.totalorder %s30_s18, 2  ;;  %p217_p2 = scmp.lt.s32.totalorder %s1251_s17, 3 }
   0x5   : > { %s1529_s18 = smov (%p32_p1, %s30_s18), 0  ;;  %p218_p3 = pnand %p988_p0, %p217_p2 }
   0x6   : > { %p281_p4 = scmp.lt.s32.totalorder (!%p218_p3), %s1243_s15, 1 }
   0x7   : > { %221 = sbr.rel (%p218_p3) target bundleno = 269 (0x10d), region = 28 }
   0xc   : > { %v1102_v0 = vld [vmem:[%s1522_s1 + $0x8] sm:$0xff]  ;;  %v1101_v1 = vld [vmem:[%s1522_s1] sm:$0xff]  ;;  %s1531_s15 = smov (!%p281_p4, %s1243_s15), 1  ;;  %vm454_vm0 = vcmask 261120  }
   0xd   : > { %509 = vmatpush.bf16.msra.mxu0 %v1102_v0  ;;  %1198 = vmatpush.bf16.msra.mxu1 %v1102_v0  ;;  %s1083_s23 = sshll.u32 %s1531_s15, 7  ;;  %s1453_s6 = scalar_lea.vmem %s1524_s3, %s1531_s15 }
   0xe   : > { %1199 = vmatpush.bf16.msra.mxu2 %v1102_v0  ;;  %1200 = vmatpush.bf16.msra.mxu3 %v1102_v0  ;;  %s1311_s26 = scalar_lea.vmem %s1521_s0, %s1083_s23  ;;  %s1354_s29 = scalar_lea.vmem %s1523_s2, %s1083_s23 }
   0xf   : > { %v1085_v2 = vld [vmem:[%s1311_s26] sm:$0xff]  ;;  %v1086_v6 = vld [vmem:[%s1311_s26 + $0x8] sm:$0xff]  ;;  %v1087_v10 = vld [vmem:[%s1311_s26 + $0x10] sm:$0xff]  ;;  %s1459_s9 = scalar_lea.vmem %s1525_s4, %s1531_s15 }
  0x10   : > { %v1089_v3 = vld [vmem:[%s1311_s26 + $0x20] sm:$0xff]  ;;  %v1090_v7 = vld [vmem:[%s1311_s26 + $0x28] sm:$0xff]  ;;  %v1091_v11 = vld [vmem:[%s1311_s26 + $0x30] sm:$0xff] }
  0x11   : > { %510 = vmatpush.bf16.msra.mxu0 %v1101_v1  ;;  %1201 = vmatpush.bf16.msra.mxu1 %v1101_v1  ;;  %v1093_v4 = vld [vmem:[%s1311_s26 + $0x40] sm:$0xff]  ;;  %v1094_v8 = vld [vmem:[%s1311_s26 + $0x48] sm:$0xff]  ;;  %v1095_v12 = vld [vmem:[%s1311_s26 + $0x50] sm:$0xff] }
  0x12   : > { %1202 = vmatpush.bf16.msra.mxu2 %v1101_v1  ;;  %1203 = vmatpush.bf16.msra.mxu3 %v1101_v1  ;;  %v1097_v5 = vld [vmem:[%s1311_s26 + $0x60] sm:$0xff]  ;;  %v1098_v9 = vld [vmem:[%s1311_s26 + $0x68] sm:$0xff]  ;;  %v1099_v13 = vld [vmem:[%s1311_s26 + $0x70] sm:$0xff] }
  0x13   : > { %v1088_v14 = vld [vmem:[%s1311_s26 + $0x18] sm:$0xff] }
  0x14   : > { %1065 = vmatmul.msk.bf16.vlgmr.msra.gmra.mxu0 %vm454_vm0, %v1085_v2  ;;  %1069 = vmatmul.msk.bf16.vlgmr.msra.gmra.mxu1 %vm454_vm0, %v1089_v3  ;;  %v1092_v15 = vld [vmem:[%s1311_s26 + $0x38] sm:$0xff] }
  0x15   : > { %1073 = vmatmul.msk.bf16.vlgmr.msra.gmra.mxu2 %vm454_vm0, %v1093_v4  ;;  %1077 = vmatmul.msk.bf16.vlgmr.msra.gmra.mxu3 %vm454_vm0, %v1097_v5  ;;  %v1096_v16 = vld [vmem:[%s1311_s26 + $0x58] sm:$0xff] }
  0x16   : > { %v1100_v17 = vld [vmem:[%s1311_s26 + $0x78] sm:$0xff] }
  0x24   : > { %1066 = vmatmul.msk.bf16.gmra.mxu0 %vm454_vm0, %v1086_v6  ;;  %1070 = vmatmul.msk.bf16.gmra.mxu1 %vm454_vm0, %v1090_v7 }
  0x25   : > { %1074 = vmatmul.msk.bf16.gmra.mxu2 %vm454_vm0, %v1094_v8  ;;  %1078 = vmatmul.msk.bf16.gmra.mxu3 %vm454_vm0, %v1098_v9 }
  0x34   : > { %1067 = vmatmul.msk.bf16.gmra.mxu0 %vm454_vm0, %v1087_v10  ;;  %1071 = vmatmul.msk.bf16.gmra.mxu1 %vm454_vm0, %v1091_v11 }
  0x35   : > { %1075 = vmatmul.msk.bf16.gmra.mxu2 %vm454_vm0, %v1095_v12  ;;  %1079 = vmatmul.msk.bf16.gmra.mxu3 %vm454_vm0, %v1099_v13 }
  0x44   : > { %1068 = vmatmul.msk.bf16.gmra.mxu0 %vm454_vm0, %v1088_v14  ;;  %1072 = vmatmul.msk.bf16.gmra.mxu1 %vm454_vm0, %v1092_v15 }
  0x45   : > { %1076 = vmatmul.msk.bf16.gmra.mxu2 %vm454_vm0, %v1096_v16  ;;  %1080 = vmatmul.msk.bf16.gmra.mxu3 %vm454_vm0, %v1100_v17 }
  0x91   : > { %v512_v18 = vpop.f32.mrf.mxu0  ;;  %v1345_v19 = vpop.f32.mrf.mxu1 }
  0x92   : > { %v639_v51 = vmul.f32 %v512_v18, %v512_v18 }
  0x98   : > { %v1347_v20 = vpop.f32.mrf.mxu2  ;;  %v1358_v24 = vpop.f32.mrf.mxu3 }
  0x99   : > { %v514_v21 = vpop.f32.mrf.mxu0  ;;  %v1356_v22 = vpop.f32.mrf.mxu1 }
  0x9a   : > { %v1106_v23 = vpack.c.bf16 %v514_v21, %v512_v18  ;;  %v1126_v25 = vpack.c.bf16 %v1356_v22, %v1345_v19  ;;  %v640_v50 = vmul.f32 %v514_v21, %v514_v21  ;;  %v599_v52 = vadd.f32 %v514_v21, %v512_v18 }
  0x9b   : > { %v647_v21 = vmul.f32 %v1345_v19, %v1345_v19 }
  0x9c   : > { %1107 = vst [vmem:[%s1354_s29] sm:$0xff] %v1106_v23   ;;  %v671_v54 = vadd.f32 %v640_v50, %v639_v51 }
  0x9d   : > { %1186 = vst [vmem:[%s1354_s29 + $0x20] sm:$0xff] %v1126_v25  }
  0xa0   : > { %v1364_v26 = vpop.f32.mrf.mxu2  ;;  %v1370_v30 = vpop.f32.mrf.mxu3 }
  0xa1   : > { %v517_v27 = vpop.f32.mrf.mxu0  ;;  %v1366_v28 = vpop.f32.mrf.mxu1  ;;  %v1146_v29 = vpack.c.bf16 %v1364_v26, %v1347_v20  ;;  %v1166_v31 = vpack.c.bf16 %v1370_v30, %v1358_v24 }
  0xa2   : > { %v641_v53 = vmul.f32 %v517_v27, %v517_v27  ;;  %v600_v55 = vadd.f32 %v599_v52, %v517_v27 }
  0xa3   : > { %1190 = vst [vmem:[%s1354_s29 + $0x40] sm:$0xff] %v1146_v29  }
  0xa4   : > { %1194 = vst [vmem:[%s1354_s29 + $0x60] sm:$0xff] %v1166_v31   ;;  %v672_v61 = vadd.f32 %v671_v54, %v641_v53 }
  0xa8   : > { %v1376_v32 = vpop.f32.mrf.mxu2  ;;  %v1380_v36 = vpop.f32.mrf.mxu3 }
  0xa9   : > { %v519_v33 = vpop.f32.mrf.mxu0  ;;  %v1378_v34 = vpop.f32.mrf.mxu1 }
  0xaa   : > { %v1111_v35 = vpack.c.bf16 %v519_v33, %v517_v27  ;;  %v1131_v37 = vpack.c.bf16 %v1378_v34, %v1366_v28  ;;  %v642_v56 = vmul.f32 %v519_v33, %v519_v33  ;;  %v601_v62 = vadd.f32 %v600_v55, %v519_v33 }
  0xab   : > { %v648_v27 = vmul.f32 %v1356_v22, %v1356_v22  ;;  %v649_v33 = vmul.f32 %v1366_v28, %v1366_v28 }
  0xac   : > { %1183 = vst [vmem:[%s1354_s29 + $0x8] sm:$0xff] %v1111_v35   ;;  %v673_v2 = vadd.f32 %v672_v61, %v642_v56 }
  0xad   : > { %1187 = vst [vmem:[%s1354_s29 + $0x28] sm:$0xff] %v1131_v37  }
  0xb0   : > { %v1386_v38 = vpop.f32.mrf.mxu2  ;;  %v1392_v42 = vpop.f32.mrf.mxu3 }
  0xb1   : > { %v522_v39 = vpop.f32.mrf.mxu0  ;;  %v1388_v40 = vpop.f32.mrf.mxu1  ;;  %v1151_v41 = vpack.c.bf16 %v1386_v38, %v1376_v32  ;;  %v1171_v43 = vpack.c.bf16 %v1392_v42, %v1380_v36 }
  0xb2   : > { %v643_v63 = vmul.f32 %v522_v39, %v522_v39  ;;  %v602_v3 = vadd.f32 %v601_v62, %v522_v39  ;;  %v656_v62 = vmul.f32 %v1364_v26, %v1364_v26 }
  0xb3   : > { %1191 = vst [vmem:[%s1354_s29 + $0x48] sm:$0xff] %v1151_v41   ;;  %v650_v41 = vmul.f32 %v1378_v34, %v1378_v34 }
  0xb4   : > { %1195 = vst [vmem:[%s1354_s29 + $0x68] sm:$0xff] %v1171_v43   ;;  %v674_v5 = vadd.f32 %v673_v2, %v643_v63  ;;  %v657_v2 = vmul.f32 %v1376_v32, %v1376_v32 }
  0xb8   : > { %v1398_v44 = vpop.f32.mrf.mxu2  ;;  %v1402_v48 = vpop.f32.mrf.mxu3 }
  0xb9   : > { %v524_v45 = vpop.f32.mrf.mxu0  ;;  %v1400_v46 = vpop.f32.mrf.mxu1 }
  0xba   : > { %v1116_v47 = vpack.c.bf16 %v524_v45, %v522_v39  ;;  %v1136_v49 = vpack.c.bf16 %v1400_v46, %v1388_v40  ;;  %v644_v4 = vmul.f32 %v524_v45, %v524_v45  ;;  %v603_v6 = vadd.f32 %v602_v3, %v524_v45 }
  0xbb   : > { %v652_v51 = vmul.f32 %v1400_v46, %v1400_v46 }
  0xbc   : > { %1184 = vst [vmem:[%s1354_s29 + $0x10] sm:$0xff] %v1116_v47   ;;  %v675_v8 = vadd.f32 %v674_v5, %v644_v4  ;;  %v658_v5 = vmul.f32 %v1386_v38, %v1386_v38 }
  0xbd   : > { %1188 = vst [vmem:[%s1354_s29 + $0x30] sm:$0xff] %v1136_v49  }
  0xc0   : > { %v1408_v57 = vpop.f32.mrf.mxu2  ;;  %v1412_v0 = vpop.f32.mrf.mxu3 }
  0xc1   : > { %v527_v58 = vpop.f32.mrf.mxu0  ;;  %v547_v59 = vpop.f32.mrf.mxu1  ;;  %v1156_v60 = vpack.c.bf16 %v1408_v57, %v1398_v44  ;;  %v1176_v1 = vpack.c.bf16 %v1412_v0, %v1402_v48 }
  0xc2   : > { %v645_v7 = vmul.f32 %v527_v58, %v527_v58  ;;  %v604_v9 = vadd.f32 %v603_v6, %v527_v58  ;;  %v653_v54 = vmul.f32 %v547_v59, %v547_v59 }
  0xc3   : > { %1192 = vst [vmem:[%s1354_s29 + $0x50] sm:$0xff] %v1156_v60  }
  0xc4   : > { %1196 = vst [vmem:[%s1354_s29 + $0x70] sm:$0xff] %v1176_v1   ;;  %v676_v13 = vadd.f32 %v675_v8, %v645_v7  ;;  %v659_v7 = vmul.f32 %v1398_v44, %v1398_v44 }
  0xc8   : > { %v1418_v10 = vpop.f32.mrf.mxu2  ;;  %v1420_v17 = vpop.f32.mrf.mxu3 }
  0xc9   : > { %v529_v11 = vpop.f32.mrf.mxu0  ;;  %v549_v12 = vpop.f32.mrf.mxu1 }
  0xca   : > { %v605_v14 = vadd.f32 %v604_v9, %v529_v11  ;;  %v646_v15 = vmul.f32 %v529_v11, %v529_v11  ;;  %v1121_v16 = vpack.c.bf16 %v529_v11, %v527_v58  ;;  %v1141_v18 = vpack.c.bf16 %v549_v12, %v547_v59 }
  0xcb   : > { %v654_v58 = vmul.f32 %v549_v12, %v549_v12  ;;  %v660_v11 = vmul.f32 %v1408_v57, %v1408_v57 }
  0xcc   : > { %v606_v23 = vadd.f32 %v605_v14, %v1345_v19  ;;  %v677_v25 = vadd.f32 %v676_v13, %v646_v15  ;;  %1185 = vst [vmem:[%s1354_s29 + $0x18] sm:$0xff] %v1121_v16   ;;  %v661_v14 = vmul.f32 %v1418_v10, %v1418_v10 }
  0xcd   : > { %1189 = vst [vmem:[%s1354_s29 + $0x38] sm:$0xff] %v1141_v18   ;;  %v663_v18 = vmul.f32 %v1358_v24, %v1358_v24 }
  0xce   : > { %v607_v29 = vadd.f32 %v606_v23, %v1356_v22  ;;  %v678_v31 = vadd.f32 %v677_v25, %v647_v21  ;;  %v664_v23 = vmul.f32 %v1370_v30, %v1370_v30 }
  0xd0   : > { %v608_v35 = vadd.f32 %v607_v29, %v1366_v28  ;;  %v679_v37 = vadd.f32 %v678_v31, %v648_v27  ;;  %v569_v39 = vpop.f32.mrf.mxu2  ;;  %v1437_v22 = vpop.f32.mrf.mxu3  ;;  %v651_v28 = vmul.f32 %v1388_v40, %v1388_v40  ;;  %v665_v27 = vmul.f32 %v1380_v36, %v1380_v36 }
  0xd1   : > { %v1161_v19 = vpack.c.bf16 %v569_v39, %v1418_v10  ;;  %v1181_v47 = vpack.c.bf16 %v1437_v22, %v1420_v17  ;;  %v662_v16 = vmul.f32 %v569_v39, %v569_v39  ;;  %v666_v31 = vmul.f32 %v1392_v42, %v1392_v42 }
  0xd2   : > { %v680_v43 = vadd.f32 %v679_v37, %v649_v33  ;;  %v609_v45 = vadd.f32 %v608_v35, %v1378_v34 }
  0xd3   : > { %1193 = vst [vmem:[%s1354_s29 + $0x58] sm:$0xff] %v1161_v19   ;;  %v668_v19 = vmul.f32 %v1412_v0, %v1412_v0 }
  0xd4   : > { %v610_v49 = vadd.f32 %v609_v45, %v1388_v40  ;;  %v681_v50 = vadd.f32 %v680_v43, %v650_v41  ;;  %1197 = vst [vmem:[%s1354_s29 + $0x78] sm:$0xff] %v1181_v47   ;;  %v669_v45 = vmul.f32 %v1420_v17, %v1420_v17 }
  0xd6   : > { %v611_v52 = vadd.f32 %v610_v49, %v1400_v46  ;;  %v682_v53 = vadd.f32 %v681_v50, %v651_v28  ;;  %v1253_v46 = vmov 0.0  }
  0xd7   : > { %596 = vst [vmem:[%s1453_s6] sm:$0x1] %v1253_v46 }
  0xd8   : > { %v612_v34 = vadd.f32 %v611_v52, %v547_v59  ;;  %v683_v55 = vadd.f32 %v682_v53, %v652_v51  ;;  %v655_v59 = vmul.f32 %v1347_v20, %v1347_v20  ;;  %597 = vst [vmem:[%s1459_s9] sm:$0x1] %v1253_v46 }
  0xda   : > { %v684_v40 = vadd.f32 %v683_v55, %v653_v54  ;;  %v613_v56 = vadd.f32 %v612_v34, %v549_v12 }
  0xdc   : > { %v614_v60 = vadd.f32 %v613_v56, %v1347_v20  ;;  %v685_v61 = vadd.f32 %v684_v40, %v654_v58 }
  0xde   : > { %v615_v63 = vadd.f32 %v614_v60, %v1364_v26  ;;  %v686_v1 = vadd.f32 %v685_v61, %v655_v59 }
  0xdf   : > { %v638_v58 = vld [vmem:[%s1459_s9] sm:$0x1] }
  0xe0   : > { %v616_v3 = vadd.f32 %v615_v63, %v1376_v32  ;;  %v687_v4 = vadd.f32 %v686_v1, %v656_v62 }
  0xe2   : > { %v688_v6 = vadd.f32 %v687_v4, %v657_v2  ;;  %v617_v20 = vadd.f32 %v616_v3, %v1386_v38 }
  0xe4   : > { %v618_v8 = vadd.f32 %v617_v20, %v1398_v44  ;;  %v689_v9 = vadd.f32 %v688_v6, %v658_v5 }
  0xe6   : > { %v619_v26 = vadd.f32 %v618_v8, %v1408_v57  ;;  %v690_v12 = vadd.f32 %v689_v9, %v659_v7 }
  0xe8   : > { %v691_v32 = vadd.f32 %v690_v12, %v660_v11  ;;  %v620_v13 = vadd.f32 %v619_v26, %v1418_v10 }
  0xea   : > { %v692_v15 = vadd.f32 %v691_v32, %v661_v14  ;;  %v621_v38 = vadd.f32 %v620_v13, %v569_v39 }
  0xec   : > { %v622_v44 = vadd.f32 %v621_v38, %v1358_v24  ;;  %v693_v21 = vadd.f32 %v692_v15, %v662_v16  ;;  %v667_v24 = vmul.f32 %v1402_v48, %v1402_v48 }
  0xee   : > { %v623_v57 = vadd.f32 %v622_v44, %v1370_v30  ;;  %v694_v25 = vadd.f32 %v693_v21, %v663_v18 }
  0xf0   : > { %v624_v10 = vadd.f32 %v623_v57, %v1380_v36  ;;  %v695_v29 = vadd.f32 %v694_v25, %v664_v23 }
  0xf2   : > { %v696_v33 = vadd.f32 %v695_v29, %v665_v27  ;;  %v625_v35 = vadd.f32 %v624_v10, %v1392_v42 }
  0xf4   : > { %v626_v37 = vadd.f32 %v625_v35, %v1402_v48  ;;  %v697_v39 = vadd.f32 %v696_v33, %v666_v31  ;;  %v670_v48 = vmul.f32 %v1437_v22, %v1437_v22 }
  0xf6   : > { %v627_v30 = vadd.f32 %v626_v37, %v1412_v0  ;;  %v698_v41 = vadd.f32 %v697_v39, %v667_v24 }
  0xf8   : > { %v699_v36 = vadd.f32 %v698_v41, %v668_v19  ;;  %v628_v43 = vadd.f32 %v627_v30, %v1420_v17  ;;  %v598_v17 = vld [vmem:[%s1453_s6] sm:$0x1] }
  0xfa   : > { %v700_v42 = vadd.f32 %v699_v36, %v669_v45  ;;  %v629_v47 = vadd.f32 %v628_v43, %v1437_v22 }
  0xfc   : > { %v630_v28 = vrot.slane %v629_v47, 4  ;;  %v701_v49 = vadd.f32 %v700_v42, %v670_v48 }
  0xfe   : > { %v631_v50 = vadd.f32 %v630_v28, %v629_v47  ;;  %v702_v0 = vrot.slane %v701_v49, 4 }
 0x100   : > { %v632_v51 = vrot.slane %v631_v50, 2  ;;  %v703_v52 = vadd.f32 %v702_v0, %v701_v49 }
 0x102   : > { %v633_v53 = vadd.f32 %v632_v51, %v631_v50  ;;  %v704_v34 = vrot.slane %v703_v52, 2 }
 0x104   : > { %v634_v54 = vrot.slane %v633_v53, 1  ;;  %v705_v55 = vadd.f32 %v704_v34, %v703_v52 }
 0x106   : > { %v635_v40 = vadd.f32 %v634_v54, %v633_v53  ;;  %v706_v56 = vrot.slane %v705_v55, 1 }
 0x108   : > { %v636_v46 = vadd.f32 %v635_v40, %v598_v17  ;;  %v707_v59 = vadd.f32 %v706_v56, %v705_v55 }
 0x10a   : > { %637 = vst [vmem:[%s1453_s6] sm:$0x1] %v636_v46  ;;  %v708_v22 = vadd.f32 %v707_v59, %v638_v58 }
 0x10c   : > { %709 = vst [vmem:[%s1459_s9] sm:$0x1] %v708_v22 }
 0x10d PF: > { %s15_s17 = sadd.s32 1, %s1251_s17   ;;  %s1526_s15 = smov %s1247_s16 }
 0x10e   : > { %p12_p5 = scmp.ge.s32.totalorder %s15_s17, 4   ;;  %s1527_s16 = smov %s1529_s18 }
 0x110   :  { %14 = sbr.rel (!%p12_p5) target bundleno = 2 (0x2), region = 89 }

// kernel: autoencoder_forward.37
= control target key start
LH: loop header
LB: loop body
LE: loop exit
PB: predicated region body
PF: predicated region fallthrough
CT: control target
= control target key end

     0   :  { %s867_s15 = smov 0   ;;  %s869_s16 = smov 0   ;;  %s937_s0 = inlined_call_operand.vmem [shape: bf16[1,2,64,64], index: 0, kind: input, shape index: {}]   ;;  %s938_s1 = inlined_call_operand.vmem [shape: bf16[1,64,128], index: 1, kind: input, shape index: {}]   ;;  %s939_s2 = inlined_call_operand.vmem [shape: bf16[1,2,64,128], index: 2, kind: output, shape index: {0}]   ;;  %s940_s3 = inlined_call_operand.vmem [shape: f32[1,2,1,128], index: 3, kind: output, shape index: {1}]   ;;  %s941_s4 = inlined_call_operand.vmem [shape: f32[1,2,1,128], index: 4, kind: output, shape index: {2}]  }
   0x1   :  { %s871_s17 = smov 0  }
   0x2 LB: > { %s30_s18 = sadd.s32 1, %s835_s16  ;;  %p704_p0 = scmp.ge.s32.totalorder %s839_s17, 1  ;;  %s839_s17 = sphi %s871_s17, %s15_s17   ;;  %s835_s16 = sphi %s869_s16, %s943_s16   ;;  %s831_s15 = sphi %s867_s15, %s942_s15  }
   0x3   : > { %p32_p1 = scmp.ge.s32.totalorder %s30_s18, 2  ;;  %p217_p2 = scmp.lt.s32.totalorder %s839_s17, 3 }
   0x5   : > { %s945_s18 = smov (%p32_p1, %s30_s18), 0  ;;  %p218_p3 = pnand %p704_p0, %p217_p2 }
   0x6   : > { %p281_p4 = scmp.lt.s32.totalorder (!%p218_p3), %s831_s15, 1 }
   0x7   : > { %221 = sbr.rel (%p218_p3) target bundleno = 193 (0xc1), region = 28 }
   0xc   : > { %v756_v0 = vld [vmem:[%s938_s1 + $0x18] sm:$0xff]  ;;  %v755_v1 = vld [vmem:[%s938_s1 + $0x10] sm:$0xff]  ;;  %s947_s15 = smov (!%p281_p4, %s831_s15), 1  ;;  %v754_v2 = vld [vmem:[%s938_s1 + $0x8] sm:$0xff]  ;;  %vm386_vm0 = vcmask 523264   ;;  %v841_v8 = vmov 0.0  }
   0xd   : > { %403 = vmatpush.bf16.msra.mxu0 %v756_v0  ;;  %780 = vmatpush.bf16.msra.mxu1 %v756_v0  ;;  %s747_s25 = sshll.u32 %s947_s15, 5  ;;  %v753_v3 = vld [vmem:[%s938_s1] sm:$0xff]  ;;  %s909_s7 = scalar_lea.vmem %s940_s3, %s947_s15 }
   0xe   : > { %781 = vmatpush.bf16.msra.mxu2 %v756_v0  ;;  %782 = vmatpush.bf16.msra.mxu3 %v756_v0  ;;  %s290_s30 = scalar_lea.vmem %s937_s0, %s747_s25  ;;  %s915_s10 = scalar_lea.vmem %s941_s4, %s947_s15  ;;  %432 = vst [vmem:[%s909_s7] sm:$0x1] %v841_v8 }
   0xf   : > { %v749_v4 = vld [vmem:[%s290_s30] sm:$0xff]  ;;  %v750_v5 = vld [vmem:[%s290_s30 + $0x8] sm:$0xff]  ;;  %v751_v6 = vld [vmem:[%s290_s30 + $0x10] sm:$0xff]  ;;  %433 = vst [vmem:[%s915_s10] sm:$0x1] %v841_v8  ;;  %s309_s13 = scalar_lea.vmem %s939_s2, %s747_s25 }
  0x10   : > { %v752_v7 = vld [vmem:[%s290_s30 + $0x18] sm:$0xff] }
  0x11   : > { %404 = vmatpush.bf16.msra.mxu0 %v755_v1  ;;  %783 = vmatpush.bf16.msra.mxu1 %v755_v1 }
  0x12   : > { %784 = vmatpush.bf16.msra.mxu2 %v755_v1  ;;  %785 = vmatpush.bf16.msra.mxu3 %v755_v1 }
  0x15   : > { %405 = vmatpush.bf16.msra.mxu0 %v754_v2  ;;  %786 = vmatpush.bf16.msra.mxu1 %v754_v2  ;;  %v434_v52 = vld [vmem:[%s909_s7] sm:$0x1] }
  0x16   : > { %787 = vmatpush.bf16.msra.mxu2 %v754_v2  ;;  %788 = vmatpush.bf16.msra.mxu3 %v754_v2  ;;  %v450_v55 = vld [vmem:[%s915_s10] sm:$0x1] }
  0x19   : > { %406 = vmatpush.bf16.msra.mxu0 %v753_v3  ;;  %789 = vmatpush.bf16.msra.mxu1 %v753_v3 }
  0x1a   : > { %790 = vmatpush.bf16.msra.mxu2 %v753_v3  ;;  %791 = vmatpush.bf16.msra.mxu3 %v753_v3 }
  0x1c   : > { %741 = vmatmul.msk.bf16.vlgmr.msra.gmra.mxu0 %vm386_vm0, %v749_v4  ;;  %742 = vmatmul.msk.bf16.vlgmr.msra.gmra.mxu1 %vm386_vm0, %v750_v5 }
  0x1d   : > { %743 = vmatmul.msk.bf16.vlgmr.msra.gmra.mxu2 %vm386_vm0, %v751_v6  ;;  %744 = vmatmul.msk.bf16.vlgmr.msra.gmra.mxu3 %vm386_vm0, %v752_v7 }
  0x99   : > { %v408_v9 = vpop.f32.mrf.mxu0  ;;  %v413_v10 = vpop.f32.mrf.mxu1 }
  0x9a   : > { %v451_v15 = vmul.f32 %v408_v9, %v408_v9  ;;  %v453_v20 = vmul.f32 %v413_v10, %v413_v10 }
  0xa0   : > { %v418_v11 = vpop.f32.mrf.mxu2  ;;  %v423_v12 = vpop.f32.mrf.mxu3 }
  0xa1   : > { %v410_v13 = vpop.f32.mrf.mxu0  ;;  %v415_v14 = vpop.f32.mrf.mxu1  ;;  %v455_v26 = vmul.f32 %v418_v11, %v418_v11  ;;  %v457_v36 = vmul.f32 %v423_v12, %v423_v12 }
  0xa2   : > { %v435_v16 = vadd.f32 %v410_v13, %v408_v9  ;;  %v452_v17 = vmul.f32 %v410_v13, %v410_v13  ;;  %v760_v18 = vpack.c.bf16 %v410_v13, %v408_v9  ;;  %v765_v19 = vpack.c.bf16 %v415_v14, %v413_v10 }
  0xa3   : > { %v454_v24 = vmul.f32 %v415_v14, %v415_v14 }
  0xa4   : > { %v459_v21 = vadd.f32 %v452_v17, %v451_v15  ;;  %761 = vst [vmem:[%s309_s13] sm:$0xff] %v760_v18   ;;  %v436_v22 = vadd.f32 %v435_v16, %v413_v10 }
  0xa5   : > { %777 = vst [vmem:[%s309_s13 + $0x8] sm:$0xff] %v765_v19  }
  0xa6   : > { %v437_v23 = vadd.f32 %v436_v22, %v415_v14  ;;  %v460_v25 = vadd.f32 %v459_v21, %v453_v20 }
  0xa8   : > { %v461_v27 = vadd.f32 %v460_v25, %v454_v24  ;;  %v420_v28 = vpop.f32.mrf.mxu2  ;;  %v438_v29 = vadd.f32 %v437_v23, %v418_v11  ;;  %v425_v30 = vpop.f32.mrf.mxu3 }
  0xa9   : > { %v770_v31 = vpack.c.bf16 %v420_v28, %v418_v11  ;;  %v775_v32 = vpack.c.bf16 %v425_v30, %v423_v12  ;;  %v456_v34 = vmul.f32 %v420_v28, %v420_v28  ;;  %v458_v40 = vmul.f32 %v425_v30, %v425_v30 }
  0xaa   : > { %v439_v33 = vadd.f32 %v438_v29, %v420_v28  ;;  %v462_v35 = vadd.f32 %v461_v27, %v455_v26 }
  0xab   : > { %778 = vst [vmem:[%s309_s13 + $0x10] sm:$0xff] %v770_v31  }
  0xac   : > { %v463_v37 = vadd.f32 %v462_v35, %v456_v34  ;;  %v440_v38 = vadd.f32 %v439_v33, %v423_v12  ;;  %779 = vst [vmem:[%s309_s13 + $0x18] sm:$0xff] %v775_v32  }
  0xae   : > { %v441_v39 = vadd.f32 %v440_v38, %v425_v30  ;;  %v464_v41 = vadd.f32 %v463_v37, %v457_v36 }
  0xb0   : > { %v442_v42 = vrot.slane %v441_v39, 4  ;;  %v465_v43 = vadd.f32 %v464_v41, %v458_v40 }
  0xb2   : > { %v443_v44 = vadd.f32 %v442_v42, %v441_v39  ;;  %v466_v45 = vrot.slane %v465_v43, 4 }
  0xb4   : > { %v444_v46 = vrot.slane %v443_v44, 2  ;;  %v467_v47 = vadd.f32 %v466_v45, %v465_v43 }
  0xb6   : > { %v445_v48 = vadd.f32 %v444_v46, %v443_v44  ;;  %v468_v49 = vrot.slane %v467_v47, 2 }
  0xb8   : > { %v446_v50 = vrot.slane %v445_v48, 1  ;;  %v469_v51 = vadd.f32 %v468_v49, %v467_v47 }
  0xba   : > { %v447_v53 = vadd.f32 %v446_v50, %v445_v48  ;;  %v470_v54 = vrot.slane %v469_v51, 1 }
  0xbc   : > { %v448_v56 = vadd.f32 %v447_v53, %v434_v52  ;;  %v471_v57 = vadd.f32 %v470_v54, %v469_v51 }
  0xbe   : > { %449 = vst [vmem:[%s909_s7] sm:$0x1] %v448_v56  ;;  %v472_v58 = vadd.f32 %v471_v57, %v450_v55 }
  0xc0   : > { %473 = vst [vmem:[%s915_s10] sm:$0x1] %v472_v58 }
  0xc1 PF: > { %s15_s17 = sadd.s32 1, %s839_s17   ;;  %s942_s15 = smov %s835_s16 }
  0xc2   : > { %p12_p5 = scmp.ge.s32.totalorder %s15_s17, 4   ;;  %s943_s16 = smov %s945_s18 }
  0xc4   :  { %14 = sbr.rel (!%p12_p5) target bundleno = 2 (0x2), region = 89 }

// kernel: autoencoder_forward.38
= control target key start
LH: loop header
LB: loop body
LE: loop exit
PB: predicated region body
PF: predicated region fallthrough
CT: control target
= control target key end

     0   :  { %s588_s12 = smov 0   ;;  %s590_s13 = smov 0   ;;  %s636_s0 = inlined_call_operand.vmem [shape: bf16[1,2,64,128], index: 0, kind: input, shape index: {}]   ;;  %s637_s1 = inlined_call_operand.vmem [shape: f32[2,1,128], index: 1, kind: input, shape index: {}]   ;;  %s638_s2 = inlined_call_operand.vmem [shape: f32[2,1,128], index: 2, kind: input, shape index: {}]   ;;  %s639_s3 = inlined_call_operand.vmem [shape: bf16[1,2,64,128], index: 3, kind: output, shape index: {}]  }
   0x1   :  { %s592_s14 = smov 0  }
   0x2 LB: > { %s28_s15 = sadd.s32 1, %s562_s13  ;;  %p467_p0 = scmp.ge.s32.totalorder %s566_s14, 1  ;;  %s566_s14 = sphi %s592_s14, %s13_s14   ;;  %s562_s13 = sphi %s590_s13, %s641_s13   ;;  %s558_s12 = sphi %s588_s12, %s640_s12  }
   0x3   : > { %p30_p1 = scmp.ge.s32.totalorder %s28_s15, 2  ;;  %p189_p2 = scmp.lt.s32.totalorder %s566_s14, 3 }
   0x5   : > { %s643_s15 = smov (%p30_p1, %s28_s15), 0  ;;  %p190_p3 = pnand %p467_p0, %p189_p2 }
   0x6   : > { %p238_p4 = scmp.lt.s32.totalorder (!%p190_p3), %s558_s12, 1 }
   0x7   : > { %193 = sbr.rel (%p190_p3) target bundleno = 30 (0x1e), region = 32 }
   0xc   : > { %s645_s12 = smov (!%p238_p4, %s558_s12), 1 }
   0xd   : > { %s474_s16 = sshll.u32 %s645_s12, 5  ;;  %s251_s19 = scalar_lea.vmem %s637_s1, %s645_s12 }
   0xe   : > { %s247_s22 = scalar_lea.vmem %s636_s0, %s474_s16  ;;  %s254_s25 = scalar_lea.vmem %s638_s2, %s645_s12  ;;  %v542_v0 = vld [vmem:[%s251_s19] ss:$0 sm:$0xff] }
   0xf   : > { %v477_v1 = vld [vmem:[%s247_s22] sm:$0xff]   ;;  %v512_v5 = vld [vmem:[%s247_s22 + $0x8] sm:$0xff]   ;;  %v513_v6 = vld [vmem:[%s247_s22 + $0x10] sm:$0xff]   ;;  %s267_s28 = scalar_lea.vmem %s639_s3, %s474_s16 }
  0x10   : > { %v543_v2 = vld [vmem:[%s254_s25] ss:$0 sm:$0xff]  ;;  %v478_v3 = vunpack.c.l.bf16 %v477_v1  ;;  %v479_v4 = vunpack.c.h.bf16 %v477_v1  ;;  %v514_v7 = vld [vmem:[%s247_s22 + $0x18] sm:$0xff]   ;;  %v482_v8 = vunpack.c.l.bf16 %v512_v5  ;;  %v483_v9 = vunpack.c.h.bf16 %v512_v5 }
  0x11   : > { %v486_v10 = vunpack.c.l.bf16 %v513_v6  ;;  %v487_v11 = vunpack.c.h.bf16 %v513_v6  ;;  %v490_v14 = vunpack.c.l.bf16 %v514_v7  ;;  %v491_v15 = vunpack.c.h.bf16 %v514_v7 }
  0x12   : > { %v289_v12 = vmul.f32 %v542_v0, %v478_v3  ;;  %v290_v13 = vmul.f32 %v542_v0, %v479_v4  ;;  %v291_v16 = vmul.f32 %v542_v0, %v482_v8  ;;  %v292_v17 = vmul.f32 %v542_v0, %v483_v9 }
  0x13   : > { %v293_v18 = vmul.f32 %v542_v0, %v486_v10  ;;  %v294_v19 = vmul.f32 %v542_v0, %v487_v11  ;;  %v295_v22 = vmul.f32 %v542_v0, %v490_v14  ;;  %v296_v23 = vmul.f32 %v542_v0, %v491_v15 }
  0x14   : > { %v301_v20 = vadd.f32 %v543_v2, %v289_v12  ;;  %v302_v21 = vadd.f32 %v543_v2, %v290_v13  ;;  %v303_v24 = vadd.f32 %v543_v2, %v291_v16  ;;  %v304_v25 = vadd.f32 %v543_v2, %v292_v17 }
  0x15   : > { %v305_v26 = vadd.f32 %v543_v2, %v293_v18  ;;  %v306_v27 = vadd.f32 %v543_v2, %v294_v19  ;;  %v307_v30 = vadd.f32 %v543_v2, %v295_v22  ;;  %v308_v31 = vadd.f32 %v543_v2, %v296_v23 }
  0x16   : > { %v309_v28 = vmax.f32 %v301_v20, 0.0  ;;  %v310_v29 = vmax.f32 %v302_v21, 0.0  ;;  %v311_v32 = vmax.f32 %v303_v24, 0.0  ;;  %v312_v33 = vmax.f32 %v304_v25, 0.0 }
  0x17   : > { %v313_v34 = vmax.f32 %v305_v26, 0.0  ;;  %v314_v35 = vmax.f32 %v306_v27, 0.0  ;;  %v315_v37 = vmax.f32 %v307_v30, 0.0  ;;  %v316_v38 = vmax.f32 %v308_v31, 0.0 }
  0x18   : > { %v495_v36 = vpack.c.bf16 %v310_v29, %v309_v28  ;;  %v500_v39 = vpack.c.bf16 %v312_v33, %v311_v32 }
  0x19   : > { %v505_v40 = vpack.c.bf16 %v314_v35, %v313_v34  ;;  %v510_v41 = vpack.c.bf16 %v316_v38, %v315_v37 }
  0x1a   : > { %496 = vst [vmem:[%s267_s28] sm:$0xff] %v495_v36  }
  0x1b   : > { %515 = vst [vmem:[%s267_s28 + $0x8] sm:$0xff] %v500_v39  }
  0x1c   : > { %516 = vst [vmem:[%s267_s28 + $0x10] sm:$0xff] %v505_v40  }
  0x1d   : > { %517 = vst [vmem:[%s267_s28 + $0x18] sm:$0xff] %v510_v41  }
  0x1e PF: > { %s13_s14 = sadd.s32 1, %s566_s14   ;;  %s640_s12 = smov %s562_s13 }
  0x1f   : > { %p10_p5 = scmp.ge.s32.totalorder %s13_s14, 4   ;;  %s641_s13 = smov %s643_s15 }
  0x21   :  { %12 = sbr.rel (!%p10_p5) target bundleno = 2 (0x2), region = 68 }

// kernel: autoencoder_forward.39
= control target key start
LH: loop header
LB: loop body
LE: loop exit
PB: predicated region body
PF: predicated region fallthrough
CT: control target
= control target key end

     0   :  { %s883_s15 = smov 0   ;;  %s885_s16 = smov 0   ;;  %s956_s0 = inlined_call_operand.vmem [shape: bf16[1,2,64,80], index: 0, kind: input, shape index: {}]   ;;  %s957_s1 = inlined_call_operand.vmem [shape: bf16[1,80,128], index: 1, kind: input, shape index: {}]   ;;  %s958_s2 = inlined_call_operand.vmem [shape: bf16[1,2,64,128], index: 2, kind: output, shape index: {0}]   ;;  %s959_s3 = inlined_call_operand.vmem [shape: f32[1,2,1,128], index: 3, kind: output, shape index: {1}]   ;;  %s960_s4 = inlined_call_operand.vmem [shape: f32[1,2,1,128], index: 4, kind: output, shape index: {2}]  }
   0x1   :  { %s887_s17 = smov 0  }
   0x2 LB: > { %s30_s18 = sadd.s32 1, %s851_s16  ;;  %p712_p0 = scmp.ge.s32.totalorder %s855_s17, 1  ;;  %s855_s17 = sphi %s887_s17, %s15_s17   ;;  %s851_s16 = sphi %s885_s16, %s962_s16   ;;  %s847_s15 = sphi %s883_s15, %s961_s15  }
   0x3   : > { %p32_p1 = scmp.ge.s32.totalorder %s30_s18, 2  ;;  %p217_p2 = scmp.lt.s32.totalorder %s855_s17, 3 }
   0x5   : > { %s964_s18 = smov (%p32_p1, %s30_s18), 0  ;;  %p218_p3 = pnand %p712_p0, %p217_p2 }
   0x6   : > { %p281_p4 = scmp.lt.s32.totalorder (!%p218_p3), %s847_s15, 1 }
   0x7   : > { %221 = sbr.rel (%p218_p3) target bundleno = 197 (0xc5), region = 28 }
   0xc   : > { %v769_v0 = vld [vmem:[%s957_s1 + $0x20] sm:$0xff]  ;;  %v768_v1 = vld [vmem:[%s957_s1 + $0x18] sm:$0xff]  ;;  %v767_v2 = vld [vmem:[%s957_s1 + $0x10] sm:$0xff]  ;;  %s966_s15 = smov (!%p281_p4, %s847_s15), 1  ;;  %vm394_vm0 = vcmask 654336   ;;  %v857_v9 = vmov 0.0  }
   0xd   : > { %410 = vmatpush.bf16.msra.mxu0 %v769_v0  ;;  %793 = vmatpush.bf16.msra.mxu1 %v769_v0  ;;  %v766_v3 = vld [vmem:[%s957_s1 + $0x8] sm:$0xff]  ;;  %s759_s27 = sshll.u32 %s966_s15, 5  ;;  %v765_v4 = vld [vmem:[%s957_s1] sm:$0xff]  ;;  %s928_s9 = scalar_lea.vmem %s959_s3, %s966_s15 }
   0xe   : > { %794 = vmatpush.bf16.msra.mxu2 %v769_v0  ;;  %795 = vmatpush.bf16.msra.mxu3 %v769_v0  ;;  %s290_s6 = scalar_lea.vmem %s956_s0, %s759_s27  ;;  %s934_s12 = scalar_lea.vmem %s960_s4, %s966_s15  ;;  %440 = vst [vmem:[%s928_s9] sm:$0x1] %v857_v9 }
   0xf   : > { %v761_v5 = vld [vmem:[%s290_s6] sm:$0xff]  ;;  %v762_v6 = vld [vmem:[%s290_s6 + $0x8] sm:$0xff]  ;;  %v763_v7 = vld [vmem:[%s290_s6 + $0x10] sm:$0xff]  ;;  %441 = vst [vmem:[%s934_s12] sm:$0x1] %v857_v9  ;;  %s309_s19 = scalar_lea.vmem %s958_s2, %s759_s27 }
  0x10   : > { %v764_v8 = vld [vmem:[%s290_s6 + $0x18] sm:$0xff] }
  0x11   : > { %411 = vmatpush.bf16.msra.mxu0 %v768_v1  ;;  %796 = vmatpush.bf16.msra.mxu1 %v768_v1 }
  0x12   : > { %797 = vmatpush.bf16.msra.mxu2 %v768_v1  ;;  %798 = vmatpush.bf16.msra.mxu3 %v768_v1 }
  0x15   : > { %412 = vmatpush.bf16.msra.mxu0 %v767_v2  ;;  %799 = vmatpush.bf16.msra.mxu1 %v767_v2  ;;  %v442_v53 = vld [vmem:[%s928_s9] sm:$0x1] }
  0x16   : > { %800 = vmatpush.bf16.msra.mxu2 %v767_v2  ;;  %801 = vmatpush.bf16.msra.mxu3 %v767_v2  ;;  %v458_v56 = vld [vmem:[%s934_s12] sm:$0x1] }
  0x19   : > { %413 = vmatpush.bf16.msra.mxu0 %v766_v3  ;;  %802 = vmatpush.bf16.msra.mxu1 %v766_v3 }
  0x1a   : > { %803 = vmatpush.bf16.msra.mxu2 %v766_v3  ;;  %804 = vmatpush.bf16.msra.mxu3 %v766_v3 }
  0x1d   : > { %414 = vmatpush.bf16.msra.mxu0 %v765_v4  ;;  %805 = vmatpush.bf16.msra.mxu1 %v765_v4 }
  0x1e   : > { %806 = vmatpush.bf16.msra.mxu2 %v765_v4  ;;  %807 = vmatpush.bf16.msra.mxu3 %v765_v4 }
  0x20   : > { %753 = vmatmul.msk.bf16.vlgmr.msra.gmra.mxu0 %vm394_vm0, %v761_v5  ;;  %754 = vmatmul.msk.bf16.vlgmr.msra.gmra.mxu1 %vm394_vm0, %v762_v6 }
  0x21   : > { %755 = vmatmul.msk.bf16.vlgmr.msra.gmra.mxu2 %vm394_vm0, %v763_v7  ;;  %756 = vmatmul.msk.bf16.vlgmr.msra.gmra.mxu3 %vm394_vm0, %v764_v8 }
  0x9d   : > { %v416_v10 = vpop.f32.mrf.mxu0  ;;  %v421_v11 = vpop.f32.mrf.mxu1 }
  0x9e   : > { %v459_v16 = vmul.f32 %v416_v10, %v416_v10  ;;  %v461_v21 = vmul.f32 %v421_v11, %v421_v11 }
  0xa4   : > { %v426_v12 = vpop.f32.mrf.mxu2  ;;  %v431_v13 = vpop.f32.mrf.mxu3 }
  0xa5   : > { %v418_v14 = vpop.f32.mrf.mxu0  ;;  %v423_v15 = vpop.f32.mrf.mxu1  ;;  %v463_v27 = vmul.f32 %v426_v12, %v426_v12  ;;  %v465_v37 = vmul.f32 %v431_v13, %v431_v13 }
  0xa6   : > { %v443_v17 = vadd.f32 %v418_v14, %v416_v10  ;;  %v460_v18 = vmul.f32 %v418_v14, %v418_v14  ;;  %v773_v19 = vpack.c.bf16 %v418_v14, %v416_v10  ;;  %v778_v20 = vpack.c.bf16 %v423_v15, %v421_v11 }
  0xa7   : > { %v462_v25 = vmul.f32 %v423_v15, %v423_v15 }
  0xa8   : > { %v467_v22 = vadd.f32 %v460_v18, %v459_v16  ;;  %774 = vst [vmem:[%s309_s19] sm:$0xff] %v773_v19   ;;  %v444_v23 = vadd.f32 %v443_v17, %v421_v11 }
  0xa9   : > { %790 = vst [vmem:[%s309_s19 + $0x8] sm:$0xff] %v778_v20  }
  0xaa   : > { %v445_v24 = vadd.f32 %v444_v23, %v423_v15  ;;  %v468_v26 = vadd.f32 %v467_v22, %v461_v21 }
  0xac   : > { %v469_v28 = vadd.f32 %v468_v26, %v462_v25  ;;  %v428_v29 = vpop.f32.mrf.mxu2  ;;  %v446_v30 = vadd.f32 %v445_v24, %v426_v12  ;;  %v433_v31 = vpop.f32.mrf.mxu3 }
  0xad   : > { %v783_v32 = vpack.c.bf16 %v428_v29, %v426_v12  ;;  %v788_v33 = vpack.c.bf16 %v433_v31, %v431_v13  ;;  %v464_v35 = vmul.f32 %v428_v29, %v428_v29  ;;  %v466_v41 = vmul.f32 %v433_v31, %v433_v31 }
  0xae   : > { %v447_v34 = vadd.f32 %v446_v30, %v428_v29  ;;  %v470_v36 = vadd.f32 %v469_v28, %v463_v27 }
  0xaf   : > { %791 = vst [vmem:[%s309_s19 + $0x10] sm:$0xff] %v783_v32  }
  0xb0   : > { %v471_v38 = vadd.f32 %v470_v36, %v464_v35  ;;  %v448_v39 = vadd.f32 %v447_v34, %v431_v13  ;;  %792 = vst [vmem:[%s309_s19 + $0x18] sm:$0xff] %v788_v33  }
  0xb2   : > { %v449_v40 = vadd.f32 %v448_v39, %v433_v31  ;;  %v472_v42 = vadd.f32 %v471_v38, %v465_v37 }
  0xb4   : > { %v450_v43 = vrot.slane %v449_v40, 4  ;;  %v473_v44 = vadd.f32 %v472_v42, %v466_v41 }
  0xb6   : > { %v451_v45 = vadd.f32 %v450_v43, %v449_v40  ;;  %v474_v46 = vrot.slane %v473_v44, 4 }
  0xb8   : > { %v452_v47 = vrot.slane %v451_v45, 2  ;;  %v475_v48 = vadd.f32 %v474_v46, %v473_v44 }
  0xba   : > { %v453_v49 = vadd.f32 %v452_v47, %v451_v45  ;;  %v476_v50 = vrot.slane %v475_v48, 2 }
  0xbc   : > { %v454_v51 = vrot.slane %v453_v49, 1  ;;  %v477_v52 = vadd.f32 %v476_v50, %v475_v48 }
  0xbe   : > { %v455_v54 = vadd.f32 %v454_v51, %v453_v49  ;;  %v478_v55 = vrot.slane %v477_v52, 1 }
  0xc0   : > { %v456_v57 = vadd.f32 %v455_v54, %v442_v53  ;;  %v479_v58 = vadd.f32 %v478_v55, %v477_v52 }
  0xc2   : > { %457 = vst [vmem:[%s928_s9] sm:$0x1] %v456_v57  ;;  %v480_v59 = vadd.f32 %v479_v58, %v458_v56 }
  0xc4   : > { %481 = vst [vmem:[%s934_s12] sm:$0x1] %v480_v59 }
  0xc5 PF: > { %s15_s17 = sadd.s32 1, %s855_s17   ;;  %s961_s15 = smov %s851_s16 }
  0xc6   : > { %p12_p5 = scmp.ge.s32.totalorder %s15_s17, 4   ;;  %s962_s16 = smov %s964_s18 }
  0xc8   :  { %14 = sbr.rel (!%p12_p5) target bundleno = 2 (0x2), region = 89 }

// kernel: autoencoder_forward.41
= control target key start
LH: loop header
LB: loop body
LE: loop exit
PB: predicated region body
PF: predicated region fallthrough
CT: control target
= control target key end

     0   :  { %s791_s15 = smov 0   ;;  %s793_s16 = smov 0   ;;  %s859_s0 = inlined_call_operand.vmem [shape: bf16[1,2,16,128], index: 0, kind: input, shape index: {}]   ;;  %s860_s1 = inlined_call_operand.vmem [shape: bf16[1,128,128], index: 1, kind: input, shape index: {}]   ;;  %s861_s2 = inlined_call_operand.vmem [shape: bf16[1,2,16,128], index: 2, kind: output, shape index: {0}]   ;;  %s862_s3 = inlined_call_operand.vmem [shape: f32[1,2,1,128], index: 3, kind: output, shape index: {1}]   ;;  %s863_s4 = inlined_call_operand.vmem [shape: f32[1,2,1,128], index: 4, kind: output, shape index: {2}]  }
   0x1   :  { %s795_s17 = smov 0  }
   0x2 LB: > { %s30_s18 = sadd.s32 1, %s759_s16  ;;  %p657_p0 = scmp.ge.s32.totalorder %s763_s17, 1  ;;  %s763_s17 = sphi %s795_s17, %s15_s17   ;;  %s759_s16 = sphi %s793_s16, %s865_s16   ;;  %s755_s15 = sphi %s791_s15, %s864_s15  }
   0x3   : > { %p32_p1 = scmp.ge.s32.totalorder %s30_s18, 2  ;;  %p217_p2 = scmp.lt.s32.totalorder %s763_s17, 3 }
   0x5   : > { %s867_s18 = smov (%p32_p1, %s30_s18), 0  ;;  %p218_p3 = pnand %p657_p0, %p217_p2 }
   0x6   : > { %p281_p4 = scmp.lt.s32.totalorder (!%p218_p3), %s755_s15, 1 }
   0x7   : > { %221 = sbr.rel (%p218_p3) target bundleno = 197 (0xc5), region = 28 }
   0xc   : > { %v710_v0 = vld [vmem:[%s860_s1 + $0x38] sm:$0xff]  ;;  %v709_v1 = vld [vmem:[%s860_s1 + $0x30] sm:$0xff]  ;;  %s869_s15 = smov (!%p281_p4, %s755_s15), 1  ;;  %v765_v2 = vmov 0.0   ;;  %v708_v3 = vld [vmem:[%s860_s1 + $0x28] sm:$0xff] }
   0xd   : > { %397 = vmatpush.bf16.msra.mxu0 %v710_v0  ;;  %s818_s25 = scalar_lea.vmem %s863_s4, %s869_s15  ;;  %v707_v4 = vld [vmem:[%s860_s1 + $0x20] sm:$0xff]  ;;  %v706_v5 = vld [vmem:[%s860_s1 + $0x18] sm:$0xff]  ;;  %v705_v6 = vld [vmem:[%s860_s1 + $0x10] sm:$0xff]  ;;  %s700_s10 = sshll.u32 %s869_s15, 3 }
   0xe   : > { %416 = vst [vmem:[%s818_s25] sm:$0x1] %v765_v2  ;;  %v704_v7 = vld [vmem:[%s860_s1 + $0x8] sm:$0xff]  ;;  %v703_v8 = vld [vmem:[%s860_s1] sm:$0xff]  ;;  %s290_s19 = scalar_lea.vmem %s859_s0, %s700_s10  ;;  %s317_s22 = scalar_lea.vmem %s862_s3, %s869_s15 }
   0xf   : > { %v702_v9 = vld [vmem:[%s290_s19] sm:$0xff]  ;;  %415 = vst [vmem:[%s317_s22] sm:$0x1] %v765_v2  ;;  %s309_s26 = scalar_lea.vmem %s861_s2, %s700_s10 }
  0x11   : > { %398 = vmatpush.bf16.msra.mxu0 %v709_v1 }
  0x15   : > { %399 = vmatpush.bf16.msra.mxu0 %v708_v3  ;;  %v427_v29 = vld [vmem:[%s818_s25] sm:$0x1] }
  0x16   : > { %v417_v26 = vld [vmem:[%s317_s22] sm:$0x1] }
  0x19   : > { %400 = vmatpush.bf16.msra.mxu0 %v707_v4 }
  0x1d   : > { %401 = vmatpush.bf16.msra.mxu0 %v706_v5 }
  0x21   : > { %402 = vmatpush.bf16.msra.mxu0 %v705_v6 }
  0x25   : > { %403 = vmatpush.bf16.msra.mxu0 %v704_v7 }
  0x29   : > { %404 = vmatpush.bf16.msra.mxu0 %v703_v8 }
  0x2c   : > { %405 = vmatmul.bf16.vlgmr.msra.gmra.mxu0 %v702_v9 }
  0xa9   : > { %v406_v10 = vpop.f32.mrf.mxu0 }
  0xaa   : > { %v428_v12 = vmul.f32 %v406_v10, %v406_v10 }
  0xb1   : > { %v408_v11 = vpop.f32.mrf.mxu0 }
  0xb2   : > { %v418_v13 = vadd.f32 %v408_v11, %v406_v10  ;;  %v429_v14 = vmul.f32 %v408_v11, %v408_v11  ;;  %v714_v15 = vpack.c.bf16 %v408_v11, %v406_v10 }
  0xb4   : > { %v419_v16 = vrot.slane %v418_v13, 4  ;;  %v430_v17 = vadd.f32 %v429_v14, %v428_v12  ;;  %715 = vst [vmem:[%s309_s26] sm:$0xff] %v714_v15  }
  0xb6   : > { %v420_v18 = vadd.f32 %v419_v16, %v418_v13  ;;  %v431_v19 = vrot.slane %v430_v17, 4 }
  0xb8   : > { %v421_v20 = vrot.slane %v420_v18, 2  ;;  %v432_v21 = vadd.f32 %v431_v19, %v430_v17 }
  0xba   : > { %v422_v22 = vadd.f32 %v421_v20, %v420_v18  ;;  %v433_v23 = vrot.slane %v432_v21, 2 }
  0xbc   : > { %v423_v24 = vrot.slane %v422_v22, 1  ;;  %v434_v25 = vadd.f32 %v433_v23, %v432_v21 }
  0xbe   : > { %v424_v27 = vadd.f32 %v423_v24, %v422_v22  ;;  %v435_v28 = vrot.slane %v434_v25, 1 }
  0xc0   : > { %v425_v30 = vadd.f32 %v424_v27, %v417_v26  ;;  %v436_v31 = vadd.f32 %v435_v28, %v434_v25 }
  0xc2   : > { %426 = vst [vmem:[%s317_s22] sm:$0x1] %v425_v30  ;;  %v437_v32 = vadd.f32 %v436_v31, %v427_v29 }
  0xc4   : > { %438 = vst [vmem:[%s818_s25] sm:$0x1] %v437_v32 }
  0xc5 PF: > { %s15_s17 = sadd.s32 1, %s763_s17   ;;  %s864_s15 = smov %s759_s16 }
  0xc6   : > { %p12_p5 = scmp.ge.s32.totalorder %s15_s17, 4   ;;  %s865_s16 = smov %s867_s18 }
  0xc8   :  { %14 = sbr.rel (!%p12_p5) target bundleno = 2 (0x2), region = 89 }

// kernel: autoencoder_forward.42
= control target key start
LH: loop header
LB: loop body
LE: loop exit
PB: predicated region body
PF: predicated region fallthrough
CT: control target
= control target key end

     0   :  { %s513_s12 = smov 0   ;;  %s515_s13 = smov 0   ;;  %s549_s0 = inlined_call_operand.vmem [shape: bf16[1,2,16,128], index: 0, kind: input, shape index: {}]   ;;  %s550_s1 = inlined_call_operand.vmem [shape: f32[2,1,128], index: 1, kind: input, shape index: {}]   ;;  %s551_s2 = inlined_call_operand.vmem [shape: f32[2,1,128], index: 2, kind: input, shape index: {}]   ;;  %s552_s3 = inlined_call_operand.vmem [shape: bf16[1,2,16,128], index: 3, kind: output, shape index: {}]  }
   0x1   :  { %s517_s14 = smov 0  }
   0x2 LB: > { %s28_s15 = sadd.s32 1, %s487_s13  ;;  %p425_p0 = scmp.ge.s32.totalorder %s491_s14, 1  ;;  %s491_s14 = sphi %s517_s14, %s13_s14   ;;  %s487_s13 = sphi %s515_s13, %s554_s13   ;;  %s483_s12 = sphi %s513_s12, %s553_s12  }
   0x3   : > { %p30_p1 = scmp.ge.s32.totalorder %s28_s15, 2  ;;  %p189_p2 = scmp.lt.s32.totalorder %s491_s14, 3 }
   0x5   : > { %s556_s15 = smov (%p30_p1, %s28_s15), 0  ;;  %p190_p3 = pnand %p425_p0, %p189_p2 }
   0x6   : > { %p238_p4 = scmp.lt.s32.totalorder (!%p190_p3), %s483_s12, 1 }
   0x7   : > { %193 = sbr.rel (%p190_p3) target bundleno = 27 (0x1b), region = 32 }
   0xc   : > { %s558_s12 = smov (!%p238_p4, %s483_s12), 1 }
   0xd   : > { %s432_s16 = sshll.u32 %s558_s12, 3  ;;  %s251_s19 = scalar_lea.vmem %s550_s1, %s558_s12 }
   0xe   : > { %s247_s22 = scalar_lea.vmem %s549_s0, %s432_s16  ;;  %s254_s25 = scalar_lea.vmem %s551_s2, %s558_s12  ;;  %v467_v0 = vld [vmem:[%s251_s19] ss:$0 sm:$0xff] }
   0xf   : > { %v435_v1 = vld [vmem:[%s247_s22] sm:$0xff]   ;;  %s267_s28 = scalar_lea.vmem %s552_s3, %s432_s16 }
  0x10   : > { %v436_v2 = vunpack.c.l.bf16 %v435_v1  ;;  %v437_v3 = vunpack.c.h.bf16 %v435_v1  ;;  %v468_v4 = vld [vmem:[%s254_s25] ss:$0 sm:$0xff] }
  0x12   : > { %v277_v5 = vmul.f32 %v467_v0, %v436_v2  ;;  %v278_v6 = vmul.f32 %v467_v0, %v437_v3 }
  0x14   : > { %v283_v7 = vadd.f32 %v468_v4, %v277_v5  ;;  %v284_v8 = vadd.f32 %v468_v4, %v278_v6 }
  0x16   : > { %v285_v9 = vmax.f32 %v283_v7, 0.0  ;;  %v286_v10 = vmax.f32 %v284_v8, 0.0 }
  0x18   : > { %v441_v11 = vpack.c.bf16 %v286_v10, %v285_v9 }
  0x1a   : > { %442 = vst [vmem:[%s267_s28] sm:$0xff] %v441_v11  }
  0x1b PF: > { %s13_s14 = sadd.s32 1, %s491_s14   ;;  %s553_s12 = smov %s487_s13 }
  0x1c   : > { %p10_p5 = scmp.ge.s32.totalorder %s13_s14, 4   ;;  %s554_s13 = smov %s556_s15 }
  0x1e   :  { %12 = sbr.rel (!%p10_p5) target bundleno = 2 (0x2), region = 68 }

// kernel: autoencoder_forward.43
= control target key start
LH: loop header
LB: loop body
LE: loop exit
PB: predicated region body
PF: predicated region fallthrough
CT: control target
= control target key end

     0   :  { %s838_s15 = smov 0   ;;  %s840_s16 = smov 0   ;;  %s920_s0 = inlined_call_operand.vmem [shape: bf16[1,2,16,144], index: 0, kind: input, shape index: {}]   ;;  %s921_s1 = inlined_call_operand.vmem [shape: bf16[1,144,128], index: 1, kind: input, shape index: {}]   ;;  %s922_s2 = inlined_call_operand.vmem [shape: bf16[1,2,16,128], index: 2, kind: output, shape index: {0}]   ;;  %s923_s3 = inlined_call_operand.vmem [shape: f32[1,2,1,128], index: 3, kind: output, shape index: {1}]   ;;  %s924_s4 = inlined_call_operand.vmem [shape: f32[1,2,1,128], index: 4, kind: output, shape index: {2}]  }
   0x1   :  { %s842_s17 = smov 0  }
   0x2 LB: > { %s30_s18 = sadd.s32 1, %s806_s16  ;;  %p693_p0 = scmp.ge.s32.totalorder %s810_s17, 1  ;;  %s810_s17 = sphi %s842_s17, %s15_s17   ;;  %s806_s16 = sphi %s840_s16, %s926_s16   ;;  %s802_s15 = sphi %s838_s15, %s925_s15  }
   0x3   : > { %p32_p1 = scmp.ge.s32.totalorder %s30_s18, 2  ;;  %p218_p2 = scmp.lt.s32.totalorder %s810_s17, 3 }
   0x5   : > { %s928_s18 = smov (%p32_p1, %s30_s18), 0  ;;  %p219_p3 = pnand %p693_p0, %p218_p2 }
   0x6   : > { %p283_p4 = scmp.lt.s32.totalorder (!%p219_p3), %s802_s15, 1 }
   0x7   : > { %222 = sbr.rel (%p219_p3) target bundleno = 199 (0xc7), region = 28 }
   0xc   : > { %v756_v0 = vld [vmem:[%s921_s1 + $0x38] sm:$0xff]  ;;  %v755_v1 = vld [vmem:[%s921_s1 + $0x30] sm:$0xff]  ;;  %v757_v2 = vld [vmem:[%s921_s1 + $0x40] sm:$0xff]  ;;  %s930_s15 = smov (!%p283_p4, %s802_s15), 1  ;;  %vm412_vm0 = vcmask 130048   ;;  %v812_v15 = vmov 0.0  }
   0xd   : > { %416 = vmatpush.bf16.msra.mxu0 %v756_v0  ;;  %437 = vmatpush.bf16.msra.mxu1 %v757_v2  ;;  %s745_s25 = sshll.u32 %s930_s15, 4  ;;  %v754_v3 = vld [vmem:[%s921_s1 + $0x28] sm:$0xff]  ;;  %v753_v7 = vld [vmem:[%s921_s1 + $0x20] sm:$0xff]  ;;  %v752_v8 = vld [vmem:[%s921_s1 + $0x18] sm:$0xff]  ;;  %s893_s21 = scalar_lea.vmem %s923_s3, %s930_s15 }
   0xe   : > { %s293_s28 = scalar_lea.vmem %s920_s0, %s745_s25  ;;  %v751_v9 = vld [vmem:[%s921_s1 + $0x10] sm:$0xff]  ;;  %v750_v10 = vld [vmem:[%s921_s1 + $0x8] sm:$0xff]  ;;  %v749_v11 = vld [vmem:[%s921_s1] sm:$0xff]  ;;  %s899_s24 = scalar_lea.vmem %s924_s4, %s930_s15  ;;  %448 = vst [vmem:[%s893_s21] sm:$0x1] %v812_v15 }
   0xf   : > { %v747_v4 = vld [vmem:[%s293_s28 + $0x4] sm:$0xf]  ;;  %v702_v5 = vld [vmem:[%s293_s28 + $0x8] sm:$0xf0]  ;;  %v700_v12 = vld [vmem:[%s293_s28] sm:$0xf] }
  0x10   : > { %v705_v6 = vor.u32 %v747_v4, %v702_v5  ;;  %v748_v13 = vld [vmem:[%s293_s28 + $0x4] sm:$0xf0]  ;;  %449 = vst [vmem:[%s899_s24] sm:$0x1] %v812_v15  ;;  %s746_s25 = sshll.u32 %s930_s15, 3 }
  0x11   : > { %417 = vmatpush.bf16.msra.mxu0 %v755_v1  ;;  %v701_v14 = vor.u32 %v748_v13, %v700_v12  ;;  %s312_s28 = scalar_lea.vmem %s922_s2, %s746_s25 }
  0x12   : > { %742 = vmatmul.msk.bf16.vlgmr.msra.gmra.mxu1 %vm412_vm0, %v705_v6 }
  0x15   : > { %418 = vmatpush.bf16.msra.mxu0 %v754_v3  ;;  %v450_v36 = vld [vmem:[%s893_s21] sm:$0x1] }
  0x17   : > { %v460_v39 = vld [vmem:[%s899_s24] sm:$0x1] }
  0x19   : > { %419 = vmatpush.bf16.msra.mxu0 %v753_v7 }
  0x1d   : > { %420 = vmatpush.bf16.msra.mxu0 %v752_v8 }
  0x21   : > { %421 = vmatpush.bf16.msra.mxu0 %v751_v9 }
  0x25   : > { %422 = vmatpush.bf16.msra.mxu0 %v750_v10 }
  0x29   : > { %423 = vmatpush.bf16.msra.mxu0 %v749_v11 }
  0x2c   : > { %424 = vmatmul.bf16.vlgmr.msra.gmra.mxu0 %v701_v14 }
  0x8f   : > { %v439_v16 = vpop.f32.mrf.mxu1 }
  0x97   : > { %v441_v19 = vpop.f32.mrf.mxu1 }
  0xa9   : > { %v425_v17 = vpop.f32.mrf.mxu0 }
  0xaa   : > { %v440_v18 = vadd.f32 %v439_v16, %v425_v17 }
  0xac   : > { %v461_v22 = vmul.f32 %v440_v18, %v440_v18 }
  0xb1   : > { %v427_v20 = vpop.f32.mrf.mxu0 }
  0xb2   : > { %v442_v21 = vadd.f32 %v441_v19, %v427_v20 }
  0xb4   : > { %v451_v23 = vadd.f32 %v442_v21, %v440_v18  ;;  %v462_v24 = vmul.f32 %v442_v21, %v442_v21  ;;  %v761_v25 = vpack.c.bf16 %v442_v21, %v440_v18 }
  0xb6   : > { %v452_v26 = vrot.slane %v451_v23, 4  ;;  %v463_v27 = vadd.f32 %v462_v24, %v461_v22  ;;  %762 = vst [vmem:[%s312_s28] sm:$0xff] %v761_v25  }
  0xb8   : > { %v453_v28 = vadd.f32 %v452_v26, %v451_v23  ;;  %v464_v29 = vrot.slane %v463_v27, 4 }
  0xba   : > { %v454_v30 = vrot.slane %v453_v28, 2  ;;  %v465_v31 = vadd.f32 %v464_v29, %v463_v27 }
  0xbc   : > { %v455_v32 = vadd.f32 %v454_v30, %v453_v28  ;;  %v466_v33 = vrot.slane %v465_v31, 2 }
  0xbe   : > { %v456_v34 = vrot.slane %v455_v32, 1  ;;  %v467_v35 = vadd.f32 %v466_v33, %v465_v31 }
  0xc0   : > { %v457_v37 = vadd.f32 %v456_v34, %v455_v32  ;;  %v468_v38 = vrot.slane %v467_v35, 1 }
  0xc2   : > { %v458_v40 = vadd.f32 %v457_v37, %v450_v36  ;;  %v469_v41 = vadd.f32 %v468_v38, %v467_v35 }
  0xc4   : > { %459 = vst [vmem:[%s893_s21] sm:$0x1] %v458_v40  ;;  %v470_v42 = vadd.f32 %v469_v41, %v460_v39 }
  0xc6   : > { %471 = vst [vmem:[%s899_s24] sm:$0x1] %v470_v42 }
  0xc7 PF: > { %s15_s17 = sadd.s32 1, %s810_s17   ;;  %s925_s15 = smov %s806_s16 }
  0xc8   : > { %p12_p5 = scmp.ge.s32.totalorder %s15_s17, 4   ;;  %s926_s16 = smov %s928_s18 }
  0xca   :  { %14 = sbr.rel (!%p12_p5) target bundleno = 2 (0x2), region = 89 }

// kernel: autoencoder_forward.45
= control target key start
LH: loop header
LB: loop body
LE: loop exit
PB: predicated region body
PF: predicated region fallthrough
CT: control target
= control target key end

     0   :  { %s924_s15 = smov 0   ;;  %s926_s16 = smov 0   ;;  %s1027_s0 = inlined_call_operand.vmem [shape: bf16[1,2,16,256], index: 0, kind: input, shape index: {}]   ;;  %s1028_s1 = inlined_call_operand.vmem [shape: bf16[1,256,128], index: 1, kind: input, shape index: {}]   ;;  %s1029_s2 = inlined_call_operand.vmem [shape: bf16[1,2,16,128], index: 2, kind: output, shape index: {0}]   ;;  %s1030_s3 = inlined_call_operand.vmem [shape: f32[1,2,1,128], index: 3, kind: output, shape index: {1}]   ;;  %s1031_s4 = inlined_call_operand.vmem [shape: f32[1,2,1,128], index: 4, kind: output, shape index: {2}]  }
   0x1   :  { %s928_s17 = smov 0  }
   0x2 LB: > { %s30_s18 = sadd.s32 1, %s892_s16  ;;  %p745_p0 = scmp.ge.s32.totalorder %s896_s17, 1  ;;  %s896_s17 = sphi %s928_s17, %s15_s17   ;;  %s892_s16 = sphi %s926_s16, %s1033_s16   ;;  %s888_s15 = sphi %s924_s15, %s1032_s15  }
   0x3   : > { %p32_p1 = scmp.ge.s32.totalorder %s30_s18, 2  ;;  %p218_p2 = scmp.lt.s32.totalorder %s896_s17, 3 }
   0x5   : > { %s1035_s18 = smov (%p32_p1, %s30_s18), 0  ;;  %p219_p3 = pnand %p745_p0, %p218_p2 }
   0x6   : > { %p283_p4 = scmp.lt.s32.totalorder (!%p219_p3), %s888_s15, 1 }
   0x7   : > { %222 = sbr.rel (%p219_p3) target bundleno = 200 (0xc8), region = 28 }
   0xc   : > { %v835_v0 = vld [vmem:[%s1028_s1 + $0x38] sm:$0xff]  ;;  %v834_v2 = vld [vmem:[%s1028_s1 + $0x30] sm:$0xff]  ;;  %v833_v4 = vld [vmem:[%s1028_s1 + $0x28] sm:$0xff]  ;;  %s1037_s15 = smov (!%p283_p4, %s888_s15), 1  ;;  %v898_v22 = vmov 0.0  }
   0xd   : > { %v843_v1 = vld [vmem:[%s1028_s1 + $0x78] sm:$0xff]  ;;  %468 = vmatpush.bf16.msra.mxu0 %v835_v0  ;;  %v842_v3 = vld [vmem:[%s1028_s1 + $0x70] sm:$0xff]  ;;  %v841_v5 = vld [vmem:[%s1028_s1 + $0x68] sm:$0xff]  ;;  %s824_s21 = sshll.u32 %s1037_s15, 4  ;;  %s1000_s9 = scalar_lea.vmem %s1030_s3, %s1037_s15 }
   0xe   : > { %482 = vmatpush.bf16.msra.mxu1 %v843_v1  ;;  %v832_v6 = vld [vmem:[%s1028_s1 + $0x20] sm:$0xff]  ;;  %v831_v8 = vld [vmem:[%s1028_s1 + $0x18] sm:$0xff]  ;;  %v830_v10 = vld [vmem:[%s1028_s1 + $0x10] sm:$0xff]  ;;  %s293_s28 = scalar_lea.vmem %s1027_s0, %s824_s21  ;;  %s1006_s12 = scalar_lea.vmem %s1031_s4, %s1037_s15  ;;  %500 = vst [vmem:[%s1000_s9] sm:$0x1] %v898_v22 }
   0xf   : > { %v840_v7 = vld [vmem:[%s1028_s1 + $0x60] sm:$0xff]  ;;  %v839_v9 = vld [vmem:[%s1028_s1 + $0x58] sm:$0xff]  ;;  %v838_v11 = vld [vmem:[%s1028_s1 + $0x50] sm:$0xff]  ;;  %501 = vst [vmem:[%s1006_s12] sm:$0x1] %v898_v22  ;;  %s825_s13 = sshll.u32 %s1037_s15, 3 }
  0x10   : > { %v829_v12 = vld [vmem:[%s1028_s1 + $0x8] sm:$0xff]  ;;  %v828_v14 = vld [vmem:[%s1028_s1] sm:$0xff]  ;;  %s312_s20 = scalar_lea.vmem %s1029_s2, %s825_s13 }
  0x11   : > { %469 = vmatpush.bf16.msra.mxu0 %v834_v2  ;;  %v837_v13 = vld [vmem:[%s1028_s1 + $0x48] sm:$0xff]  ;;  %v836_v15 = vld [vmem:[%s1028_s1 + $0x40] sm:$0xff] }
  0x12   : > { %483 = vmatpush.bf16.msra.mxu1 %v842_v3  ;;  %v752_v16 = vld [vmem:[%s293_s28] sm:$0xf]  ;;  %v827_v17 = vld [vmem:[%s293_s28 + $0x4] sm:$0xf0]  ;;  %v826_v18 = vld [vmem:[%s293_s28 + $0x4] sm:$0xf] }
  0x13   : > { %v754_v19 = vld [vmem:[%s293_s28 + $0x8] sm:$0xf0]  ;;  %v753_v20 = vor.u32 %v827_v17, %v752_v16 }
  0x14   : > { %v757_v21 = vor.u32 %v826_v18, %v754_v19 }
  0x15   : > { %470 = vmatpush.bf16.msra.mxu0 %v833_v4  ;;  %v502_v43 = vld [vmem:[%s1000_s9] sm:$0x1] }
  0x16   : > { %484 = vmatpush.bf16.msra.mxu1 %v841_v5  ;;  %v512_v46 = vld [vmem:[%s1006_s12] sm:$0x1] }
  0x19   : > { %471 = vmatpush.bf16.msra.mxu0 %v832_v6 }
  0x1a   : > { %485 = vmatpush.bf16.msra.mxu1 %v840_v7 }
  0x1d   : > { %472 = vmatpush.bf16.msra.mxu0 %v831_v8 }
  0x1e   : > { %486 = vmatpush.bf16.msra.mxu1 %v839_v9 }
  0x21   : > { %473 = vmatpush.bf16.msra.mxu0 %v830_v10 }
  0x22   : > { %487 = vmatpush.bf16.msra.mxu1 %v838_v11 }
  0x25   : > { %474 = vmatpush.bf16.msra.mxu0 %v829_v12 }
  0x26   : > { %488 = vmatpush.bf16.msra.mxu1 %v837_v13 }
  0x29   : > { %475 = vmatpush.bf16.msra.mxu0 %v828_v14 }
  0x2a   : > { %489 = vmatpush.bf16.msra.mxu1 %v836_v15 }
  0x2c   : > { %476 = vmatmul.bf16.vlgmr.msra.gmra.mxu0 %v753_v20 }
  0x2d   : > { %490 = vmatmul.bf16.vlgmr.msra.gmra.mxu1 %v757_v21 }
  0xa9   : > { %v477_v23 = vpop.f32.mrf.mxu0 }
  0xaa   : > { %v491_v24 = vpop.f32.mrf.mxu1 }
  0xab   : > { %v492_v25 = vadd.f32 %v491_v24, %v477_v23 }
  0xad   : > { %v513_v29 = vmul.f32 %v492_v25, %v492_v25 }
  0xb1   : > { %v479_v26 = vpop.f32.mrf.mxu0 }
  0xb2   : > { %v493_v27 = vpop.f32.mrf.mxu1 }
  0xb3   : > { %v494_v28 = vadd.f32 %v493_v27, %v479_v26 }
  0xb5   : > { %v503_v30 = vadd.f32 %v494_v28, %v492_v25  ;;  %v514_v31 = vmul.f32 %v494_v28, %v494_v28  ;;  %v847_v32 = vpack.c.bf16 %v494_v28, %v492_v25 }
  0xb7   : > { %v504_v33 = vrot.slane %v503_v30, 4  ;;  %v515_v34 = vadd.f32 %v514_v31, %v513_v29  ;;  %848 = vst [vmem:[%s312_s20] sm:$0xff] %v847_v32  }
  0xb9   : > { %v505_v35 = vadd.f32 %v504_v33, %v503_v30  ;;  %v516_v36 = vrot.slane %v515_v34, 4 }
  0xbb   : > { %v506_v37 = vrot.slane %v505_v35, 2  ;;  %v517_v38 = vadd.f32 %v516_v36, %v515_v34 }
  0xbd   : > { %v507_v39 = vadd.f32 %v506_v37, %v505_v35  ;;  %v518_v40 = vrot.slane %v517_v38, 2 }
  0xbf   : > { %v508_v41 = vrot.slane %v507_v39, 1  ;;  %v519_v42 = vadd.f32 %v518_v40, %v517_v38 }
  0xc1   : > { %v509_v44 = vadd.f32 %v508_v41, %v507_v39  ;;  %v520_v45 = vrot.slane %v519_v42, 1 }
  0xc3   : > { %v510_v47 = vadd.f32 %v509_v44, %v502_v43  ;;  %v521_v48 = vadd.f32 %v520_v45, %v519_v42 }
  0xc5   : > { %511 = vst [vmem:[%s1000_s9] sm:$0x1] %v510_v47  ;;  %v522_v49 = vadd.f32 %v521_v48, %v512_v46 }
  0xc7   : > { %523 = vst [vmem:[%s1006_s12] sm:$0x1] %v522_v49 }
  0xc8 PF: > { %s15_s17 = sadd.s32 1, %s896_s17   ;;  %s1032_s15 = smov %s892_s16 }
  0xc9   : > { %p12_p5 = scmp.ge.s32.totalorder %s15_s17, 4   ;;  %s1033_s16 = smov %s1035_s18 }
  0xcb   :  { %14 = sbr.rel (!%p12_p5) target bundleno = 2 (0x2), region = 89 }

// kernel: autoencoder_forward.47
= control target key start
LH: loop header
LB: loop body
LE: loop exit
PB: predicated region body
PF: predicated region fallthrough
CT: control target
= control target key end

     0   :  { %s981_s15 = smov 0   ;;  %s983_s16 = smov 0   ;;  %s1090_s0 = inlined_call_operand.vmem [shape: bf16[1,2,16,288], index: 0, kind: input, shape index: {}]   ;;  %s1091_s1 = inlined_call_operand.vmem [shape: bf16[1,288,128], index: 1, kind: input, shape index: {}]   ;;  %s1092_s2 = inlined_call_operand.vmem [shape: bf16[1,2,16,128], index: 2, kind: output, shape index: {0}]   ;;  %s1093_s3 = inlined_call_operand.vmem [shape: f32[1,2,1,128], index: 3, kind: output, shape index: {1}]   ;;  %s1094_s4 = inlined_call_operand.vmem [shape: f32[1,2,1,128], index: 4, kind: output, shape index: {2}]  }
   0x1   :  { %s985_s17 = smov 0  }
   0x2 LB: > { %s30_s18 = sadd.s32 1, %s949_s16  ;;  %p787_p0 = scmp.ge.s32.totalorder %s953_s17, 1  ;;  %s953_s17 = sphi %s985_s17, %s15_s17   ;;  %s949_s16 = sphi %s983_s16, %s1096_s16   ;;  %s945_s15 = sphi %s981_s15, %s1095_s15  }
   0x3   : > { %p32_p1 = scmp.ge.s32.totalorder %s30_s18, 2  ;;  %p218_p2 = scmp.lt.s32.totalorder %s953_s17, 3 }
   0x5   : > { %s1098_s18 = smov (%p32_p1, %s30_s18), 0  ;;  %p219_p3 = pnand %p787_p0, %p218_p2 }
   0x6   : > { %p283_p4 = scmp.lt.s32.totalorder (!%p219_p3), %s945_s15, 1 }
   0x7   : > { %222 = sbr.rel (%p219_p3) target bundleno = 202 (0xca), region = 28 }
   0xc   : > { %v889_v0 = vld [vmem:[%s1091_s1 + $0x38] sm:$0xff]  ;;  %v888_v2 = vld [vmem:[%s1091_s1 + $0x30] sm:$0xff]  ;;  %v899_v4 = vld [vmem:[%s1091_s1 + $0x88] sm:$0xff]  ;;  %s1100_s15 = smov (!%p283_p4, %s945_s15), 1  ;;  %vm492_vm0 = vcmask 261120   ;;  %v955_v27 = vmov 0.0  }
   0xd   : > { %v897_v1 = vld [vmem:[%s1091_s1 + $0x78] sm:$0xff]  ;;  %496 = vmatpush.bf16.msra.mxu0 %v889_v0  ;;  %v896_v3 = vld [vmem:[%s1091_s1 + $0x70] sm:$0xff]  ;;  %530 = vmatpush.bf16.msra.mxu2 %v899_v4  ;;  %v898_v5 = vld [vmem:[%s1091_s1 + $0x80] sm:$0xff]  ;;  %s905_s5 = smul.u32 24, %s1100_s15  ;;  %s1063_s14 = scalar_lea.vmem %s1093_s3, %s1100_s15 }
   0xe   : > { %510 = vmatpush.bf16.msra.mxu1 %v897_v1  ;;  %v887_v6 = vld [vmem:[%s1091_s1 + $0x28] sm:$0xff]  ;;  %v886_v11 = vld [vmem:[%s1091_s1 + $0x20] sm:$0xff]  ;;  %v885_v13 = vld [vmem:[%s1091_s1 + $0x18] sm:$0xff]  ;;  %s1069_s21 = scalar_lea.vmem %s1094_s4, %s1100_s15  ;;  %542 = vst [vmem:[%s1063_s14] sm:$0x1] %v955_v27 }
   0xf   : > { %v895_v7 = vld [vmem:[%s1091_s1 + $0x68] sm:$0xff]  ;;  %s293_s12 = scalar_lea.vmem %s1090_s0, %s905_s5  ;;  %v894_v12 = vld [vmem:[%s1091_s1 + $0x60] sm:$0xff]  ;;  %v893_v14 = vld [vmem:[%s1091_s1 + $0x58] sm:$0xff]  ;;  %543 = vst [vmem:[%s1069_s21] sm:$0x1] %v955_v27 }
  0x10   : > { %v801_v8 = vld [vmem:[%s293_s12 + $0x8] sm:$0xf]  ;;  %v881_v9 = vld [vmem:[%s293_s12 + $0x10] sm:$0xf0]  ;;  %v882_v19 = vld [vmem:[%s1091_s1] sm:$0xff] }
  0x11   : > { %497 = vmatpush.bf16.msra.mxu0 %v888_v2  ;;  %531 = vmatpush.bf16.msra.mxu2 %v898_v5  ;;  %v802_v10 = vor.u32 %v881_v9, %v801_v8  ;;  %v884_v15 = vld [vmem:[%s1091_s1 + $0x10] sm:$0xff]  ;;  %v883_v17 = vld [vmem:[%s1091_s1 + $0x8] sm:$0xff]  ;;  %v890_v20 = vld [vmem:[%s1091_s1 + $0x40] sm:$0xff] }
  0x12   : > { %511 = vmatpush.bf16.msra.mxu1 %v896_v3  ;;  %v892_v16 = vld [vmem:[%s1091_s1 + $0x50] sm:$0xff]  ;;  %v891_v18 = vld [vmem:[%s1091_s1 + $0x48] sm:$0xff]  ;;  %v793_v21 = vld [vmem:[%s293_s12] sm:$0xf] }
  0x13   : > { %v880_v22 = vld [vmem:[%s293_s12 + $0x8] sm:$0xf0]  ;;  %v879_v23 = vld [vmem:[%s293_s12 + $0x4] sm:$0xf]  ;;  %v795_v24 = vld [vmem:[%s293_s12 + $0xc] sm:$0xf0] }
  0x14   : > { %875 = vmatmul.msk.bf16.vlgmr.msra.gmra.mxu2 %vm492_vm0, %v802_v10  ;;  %v794_v25 = vor.u32 %v880_v22, %v793_v21  ;;  %v798_v26 = vor.u32 %v879_v23, %v795_v24  ;;  %s878_s12 = sshll.u32 %s1100_s15, 3 }
  0x15   : > { %498 = vmatpush.bf16.msra.mxu0 %v887_v6  ;;  %s312_s24 = scalar_lea.vmem %s1092_s2, %s878_s12  ;;  %v544_v52 = vld [vmem:[%s1063_s14] sm:$0x1] }
  0x16   : > { %512 = vmatpush.bf16.msra.mxu1 %v895_v7  ;;  %v554_v55 = vld [vmem:[%s1069_s21] sm:$0x1] }
  0x19   : > { %499 = vmatpush.bf16.msra.mxu0 %v886_v11 }
  0x1a   : > { %513 = vmatpush.bf16.msra.mxu1 %v894_v12 }
  0x1d   : > { %500 = vmatpush.bf16.msra.mxu0 %v885_v13 }
  0x1e   : > { %514 = vmatpush.bf16.msra.mxu1 %v893_v14 }
  0x21   : > { %501 = vmatpush.bf16.msra.mxu0 %v884_v15 }
  0x22   : > { %515 = vmatpush.bf16.msra.mxu1 %v892_v16 }
  0x25   : > { %502 = vmatpush.bf16.msra.mxu0 %v883_v17 }
  0x26   : > { %516 = vmatpush.bf16.msra.mxu1 %v891_v18 }
  0x29   : > { %503 = vmatpush.bf16.msra.mxu0 %v882_v19 }
  0x2a   : > { %517 = vmatpush.bf16.msra.mxu1 %v890_v20 }
  0x2c   : > { %504 = vmatmul.bf16.vlgmr.msra.gmra.mxu0 %v794_v25 }
  0x2d   : > { %518 = vmatmul.bf16.vlgmr.msra.gmra.mxu1 %v798_v26 }
  0x97   : > { %v533_v28 = vpop.f32.mrf.mxu2 }
  0x9f   : > { %v535_v36 = vpop.f32.mrf.mxu2 }
  0xa9   : > { %v505_v29 = vpop.f32.mrf.mxu0 }
  0xaa   : > { %v519_v30 = vpop.f32.mrf.mxu1 }
  0xab   : > { %v520_v31 = vadd.f32 %v519_v30, %v505_v29 }
  0xad   : > { %v534_v34 = vadd.f32 %v533_v28, %v520_v31 }
  0xaf   : > { %v555_v38 = vmul.f32 %v534_v34, %v534_v34 }
  0xb1   : > { %v507_v32 = vpop.f32.mrf.mxu0 }
  0xb2   : > { %v521_v33 = vpop.f32.mrf.mxu1 }
  0xb3   : > { %v522_v35 = vadd.f32 %v521_v33, %v507_v32 }
  0xb5   : > { %v536_v37 = vadd.f32 %v535_v36, %v522_v35 }
  0xb7   : > { %v545_v39 = vadd.f32 %v536_v37, %v534_v34  ;;  %v556_v40 = vmul.f32 %v536_v37, %v536_v37  ;;  %v903_v41 = vpack.c.bf16 %v536_v37, %v534_v34 }
  0xb9   : > { %v546_v42 = vrot.slane %v545_v39, 4  ;;  %v557_v43 = vadd.f32 %v556_v40, %v555_v38  ;;  %904 = vst [vmem:[%s312_s24] sm:$0xff] %v903_v41  }
  0xbb   : > { %v547_v44 = vadd.f32 %v546_v42, %v545_v39  ;;  %v558_v45 = vrot.slane %v557_v43, 4 }
  0xbd   : > { %v548_v46 = vrot.slane %v547_v44, 2  ;;  %v559_v47 = vadd.f32 %v558_v45, %v557_v43 }
  0xbf   : > { %v549_v48 = vadd.f32 %v548_v46, %v547_v44  ;;  %v560_v49 = vrot.slane %v559_v47, 2 }
  0xc1   : > { %v550_v50 = vrot.slane %v549_v48, 1  ;;  %v561_v51 = vadd.f32 %v560_v49, %v559_v47 }
  0xc3   : > { %v551_v53 = vadd.f32 %v550_v50, %v549_v48  ;;  %v562_v54 = vrot.slane %v561_v51, 1 }
  0xc5   : > { %v552_v56 = vadd.f32 %v551_v53, %v544_v52  ;;  %v563_v57 = vadd.f32 %v562_v54, %v561_v51 }
  0xc7   : > { %553 = vst [vmem:[%s1063_s14] sm:$0x1] %v552_v56  ;;  %v564_v58 = vadd.f32 %v563_v57, %v554_v55 }
  0xc9   : > { %565 = vst [vmem:[%s1069_s21] sm:$0x1] %v564_v58 }
  0xca PF: > { %s15_s17 = sadd.s32 1, %s953_s17   ;;  %s1095_s15 = smov %s949_s16 }
  0xcb   : > { %p12_p5 = scmp.ge.s32.totalorder %s15_s17, 4   ;;  %s1096_s16 = smov %s1098_s18 }
  0xcd   :  { %14 = sbr.rel (!%p12_p5) target bundleno = 2 (0x2), region = 89 }

// kernel: autoencoder_forward.49
= control target key start
LH: loop header
LB: loop body
LE: loop exit
PB: predicated region body
PF: predicated region fallthrough
CT: control target
= control target key end

     0   :  { %s1182_s15 = smov 0   ;;  %s1184_s16 = smov 0   ;;  %s1337_s0 = inlined_call_operand.vmem [shape: bf16[1,2,16,512], index: 0, kind: input, shape index: {}]   ;;  %s1338_s1 = inlined_call_operand.vmem [shape: bf16[1,512,128], index: 1, kind: input, shape index: {}]   ;;  %s1339_s2 = inlined_call_operand.vmem [shape: bf16[1,2,16,128], index: 2, kind: output, shape index: {0}]   ;;  %s1340_s3 = inlined_call_operand.vmem [shape: f32[1,2,1,128], index: 3, kind: output, shape index: {1}]   ;;  %s1341_s4 = inlined_call_operand.vmem [shape: f32[1,2,1,128], index: 4, kind: output, shape index: {2}]  }
   0x1   :  { %s1186_s17 = smov 0  }
   0x2 LB: > { %s30_s18 = sadd.s32 1, %s1150_s16  ;;  %p913_p0 = scmp.ge.s32.totalorder %s1154_s17, 1  ;;  %s1154_s17 = sphi %s1186_s17, %s15_s17   ;;  %s1150_s16 = sphi %s1184_s16, %s1343_s16   ;;  %s1146_s15 = sphi %s1182_s15, %s1342_s15  }
   0x3   : > { %p32_p1 = scmp.ge.s32.totalorder %s30_s18, 2  ;;  %p218_p2 = scmp.lt.s32.totalorder %s1154_s17, 3 }
   0x5   : > { %s1345_s18 = smov (%p32_p1, %s30_s18), 0  ;;  %p219_p3 = pnand %p913_p0, %p218_p2 }
   0x6   : > { %p283_p4 = scmp.lt.s32.totalorder (!%p219_p3), %s1146_s15, 1 }
   0x7   : > { %222 = sbr.rel (%p219_p3) target bundleno = 209 (0xd1), region = 28 }
   0xc   : > { %v1077_v0 = vld [vmem:[%s1338_s1 + $0x38] sm:$0xff]  ;;  %v1076_v4 = vld [vmem:[%s1338_s1 + $0x30] sm:$0xff]  ;;  %v1075_v8 = vld [vmem:[%s1338_s1 + $0x28] sm:$0xff]  ;;  %s1347_s15 = smov (!%p283_p4, %s1146_s15), 1  ;;  %v1156_v44 = vmov 0.0  }
   0xd   : > { %v1085_v1 = vld [vmem:[%s1338_s1 + $0x78] sm:$0xff]  ;;  %608 = vmatpush.bf16.msra.mxu0 %v1077_v0  ;;  %v1084_v5 = vld [vmem:[%s1338_s1 + $0x70] sm:$0xff]  ;;  %v1083_v9 = vld [vmem:[%s1338_s1 + $0x68] sm:$0xff]  ;;  %s1064_s23 = sshll.u32 %s1347_s15, 5  ;;  %s1316_s26 = scalar_lea.vmem %s1341_s4, %s1347_s15 }
   0xe   : > { %v1093_v2 = vld [vmem:[%s1338_s1 + $0xb8] sm:$0xff]  ;;  %622 = vmatpush.bf16.msra.mxu1 %v1085_v1  ;;  %v1092_v6 = vld [vmem:[%s1338_s1 + $0xb0] sm:$0xff]  ;;  %v1091_v10 = vld [vmem:[%s1338_s1 + $0xa8] sm:$0xff]  ;;  %s293_s30 = scalar_lea.vmem %s1337_s0, %s1064_s23  ;;  %s1310_s23 = scalar_lea.vmem %s1340_s3, %s1347_s15  ;;  %669 = vst [vmem:[%s1316_s26] sm:$0x1] %v1156_v44 }
   0xf   : > { %v1101_v3 = vld [vmem:[%s1338_s1 + $0xf8] sm:$0xff]  ;;  %636 = vmatpush.bf16.msra.mxu2 %v1093_v2  ;;  %v1100_v7 = vld [vmem:[%s1338_s1 + $0xf0] sm:$0xff]  ;;  %v1099_v11 = vld [vmem:[%s1338_s1 + $0xe8] sm:$0xff]  ;;  %668 = vst [vmem:[%s1310_s23] sm:$0x1] %v1156_v44  ;;  %s1065_s27 = sshll.u32 %s1347_s15, 3 }
  0x10   : > { %650 = vmatpush.bf16.msra.mxu3 %v1101_v3  ;;  %v1074_v12 = vld [vmem:[%s1338_s1 + $0x20] sm:$0xff]  ;;  %v1073_v16 = vld [vmem:[%s1338_s1 + $0x18] sm:$0xff]  ;;  %v1072_v20 = vld [vmem:[%s1338_s1 + $0x10] sm:$0xff] }
  0x11   : > { %609 = vmatpush.bf16.msra.mxu0 %v1076_v4  ;;  %v1082_v13 = vld [vmem:[%s1338_s1 + $0x60] sm:$0xff]  ;;  %v1081_v17 = vld [vmem:[%s1338_s1 + $0x58] sm:$0xff]  ;;  %v1080_v21 = vld [vmem:[%s1338_s1 + $0x50] sm:$0xff] }
  0x12   : > { %623 = vmatpush.bf16.msra.mxu1 %v1084_v5  ;;  %v1090_v14 = vld [vmem:[%s1338_s1 + $0xa0] sm:$0xff]  ;;  %v1089_v18 = vld [vmem:[%s1338_s1 + $0x98] sm:$0xff]  ;;  %v1088_v22 = vld [vmem:[%s1338_s1 + $0x90] sm:$0xff] }
  0x13   : > { %637 = vmatpush.bf16.msra.mxu2 %v1092_v6  ;;  %v1098_v15 = vld [vmem:[%s1338_s1 + $0xe0] sm:$0xff]  ;;  %v1097_v19 = vld [vmem:[%s1338_s1 + $0xd8] sm:$0xff]  ;;  %v1096_v23 = vld [vmem:[%s1338_s1 + $0xd0] sm:$0xff] }
  0x14   : > { %651 = vmatpush.bf16.msra.mxu3 %v1100_v7  ;;  %v1071_v24 = vld [vmem:[%s1338_s1 + $0x8] sm:$0xff]  ;;  %v1070_v28 = vld [vmem:[%s1338_s1] sm:$0xff]  ;;  %v1068_v33 = vld [vmem:[%s293_s30 + $0xc] sm:$0xf0] }
  0x15   : > { %610 = vmatpush.bf16.msra.mxu0 %v1075_v8  ;;  %v1079_v25 = vld [vmem:[%s1338_s1 + $0x48] sm:$0xff]  ;;  %v1078_v29 = vld [vmem:[%s1338_s1 + $0x40] sm:$0xff]  ;;  %v922_v35 = vld [vmem:[%s293_s30 + $0x10] sm:$0xf0] }
  0x16   : > { %624 = vmatpush.bf16.msra.mxu1 %v1083_v9  ;;  %v1087_v26 = vld [vmem:[%s1338_s1 + $0x88] sm:$0xff]  ;;  %v1086_v30 = vld [vmem:[%s1338_s1 + $0x80] sm:$0xff]  ;;  %v1069_v37 = vld [vmem:[%s293_s30 + $0x14] sm:$0xf0] }
  0x17   : > { %638 = vmatpush.bf16.msra.mxu2 %v1091_v10  ;;  %v1095_v27 = vld [vmem:[%s1338_s1 + $0xc8] sm:$0xff]  ;;  %v1094_v31 = vld [vmem:[%s1338_s1 + $0xc0] sm:$0xff]  ;;  %v930_v39 = vld [vmem:[%s293_s30 + $0x18] sm:$0xf0] }
  0x18   : > { %652 = vmatpush.bf16.msra.mxu3 %v1099_v11  ;;  %v920_v32 = vld [vmem:[%s293_s30] sm:$0xf]  ;;  %v1066_v34 = vld [vmem:[%s293_s30 + $0x4] sm:$0xf]  ;;  %v928_v36 = vld [vmem:[%s293_s30 + $0x8] sm:$0xf] }
  0x19   : > { %611 = vmatpush.bf16.msra.mxu0 %v1074_v12  ;;  %v1067_v38 = vld [vmem:[%s293_s30 + $0xc] sm:$0xf]  ;;  %v921_v40 = vor.u32 %v1068_v33, %v920_v32  ;;  %v925_v41 = vor.u32 %v1066_v34, %v922_v35  ;;  %v929_v42 = vor.u32 %v1069_v37, %v928_v36  ;;  %s312_s30 = scalar_lea.vmem %s1339_s2, %s1065_s27  ;;  %v670_v9 = vld [vmem:[%s1310_s23] sm:$0x1] }
  0x1a   : > { %625 = vmatpush.bf16.msra.mxu1 %v1082_v13  ;;  %v933_v43 = vor.u32 %v1067_v38, %v930_v39  ;;  %v680_v12 = vld [vmem:[%s1316_s26] sm:$0x1] }
  0x1b   : > { %639 = vmatpush.bf16.msra.mxu2 %v1090_v14 }
  0x1c   : > { %653 = vmatpush.bf16.msra.mxu3 %v1098_v15 }
  0x1d   : > { %612 = vmatpush.bf16.msra.mxu0 %v1073_v16 }
  0x1e   : > { %626 = vmatpush.bf16.msra.mxu1 %v1081_v17 }
  0x1f   : > { %640 = vmatpush.bf16.msra.mxu2 %v1089_v18 }
  0x20   : > { %654 = vmatpush.bf16.msra.mxu3 %v1097_v19 }
  0x21   : > { %613 = vmatpush.bf16.msra.mxu0 %v1072_v20 }
  0x22   : > { %627 = vmatpush.bf16.msra.mxu1 %v1080_v21 }
  0x23   : > { %641 = vmatpush.bf16.msra.mxu2 %v1088_v22 }
  0x24   : > { %655 = vmatpush.bf16.msra.mxu3 %v1096_v23 }
  0x25   : > { %614 = vmatpush.bf16.msra.mxu0 %v1071_v24 }
  0x26   : > { %628 = vmatpush.bf16.msra.mxu1 %v1079_v25 }
  0x27   : > { %642 = vmatpush.bf16.msra.mxu2 %v1087_v26 }
  0x28   : > { %656 = vmatpush.bf16.msra.mxu3 %v1095_v27 }
  0x29   : > { %615 = vmatpush.bf16.msra.mxu0 %v1070_v28 }
  0x2a   : > { %629 = vmatpush.bf16.msra.mxu1 %v1078_v29 }
  0x2b   : > { %643 = vmatpush.bf16.msra.mxu2 %v1086_v30 }
  0x2c   : > { %657 = vmatpush.bf16.msra.mxu3 %v1094_v31  ;;  %616 = vmatmul.bf16.vlgmr.msra.gmra.mxu0 %v921_v40 }
  0x2d   : > { %630 = vmatmul.bf16.vlgmr.msra.gmra.mxu1 %v925_v41 }
  0x2e   : > { %644 = vmatmul.bf16.vlgmr.msra.gmra.mxu2 %v929_v42 }
  0x2f   : > { %658 = vmatmul.bf16.vlgmr.msra.gmra.mxu3 %v933_v43 }
  0xa9   : > { %v617_v45 = vpop.f32.mrf.mxu0 }
  0xaa   : > { %v631_v46 = vpop.f32.mrf.mxu1 }
  0xab   : > { %v632_v49 = vadd.f32 %v631_v46, %v617_v45 }
  0xb1   : > { %v645_v47 = vpop.f32.mrf.mxu2  ;;  %v619_v50 = vpop.f32.mrf.mxu0 }
  0xb2   : > { %v659_v48 = vpop.f32.mrf.mxu3  ;;  %v633_v51 = vpop.f32.mrf.mxu1  ;;  %v646_v52 = vadd.f32 %v645_v47, %v632_v49 }
  0xb3   : > { %v634_v53 = vadd.f32 %v633_v51, %v619_v50 }
  0xb4   : > { %v660_v55 = vadd.f32 %v659_v48, %v646_v52 }
  0xb6   : > { %v681_v59 = vmul.f32 %v660_v55, %v660_v55 }
  0xb9   : > { %v647_v54 = vpop.f32.mrf.mxu2 }
  0xba   : > { %v648_v56 = vadd.f32 %v647_v54, %v634_v53  ;;  %v661_v57 = vpop.f32.mrf.mxu3 }
  0xbc   : > { %v662_v58 = vadd.f32 %v661_v57, %v648_v56 }
  0xbe   : > { %v671_v60 = vadd.f32 %v662_v58, %v660_v55  ;;  %v682_v61 = vmul.f32 %v662_v58, %v662_v58  ;;  %v1105_v62 = vpack.c.bf16 %v662_v58, %v660_v55 }
  0xc0   : > { %v672_v63 = vrot.slane %v671_v60, 4  ;;  %v683_v0 = vadd.f32 %v682_v61, %v681_v59  ;;  %1106 = vst [vmem:[%s312_s30] sm:$0xff] %v1105_v62  }
  0xc2   : > { %v673_v1 = vadd.f32 %v672_v63, %v671_v60  ;;  %v684_v2 = vrot.slane %v683_v0, 4 }
  0xc4   : > { %v674_v3 = vrot.slane %v673_v1, 2  ;;  %v685_v4 = vadd.f32 %v684_v2, %v683_v0 }
  0xc6   : > { %v675_v5 = vadd.f32 %v674_v3, %v673_v1  ;;  %v686_v6 = vrot.slane %v685_v4, 2 }
  0xc8   : > { %v676_v7 = vrot.slane %v675_v5, 1  ;;  %v687_v8 = vadd.f32 %v686_v6, %v685_v4 }
  0xca   : > { %v677_v10 = vadd.f32 %v676_v7, %v675_v5  ;;  %v688_v11 = vrot.slane %v687_v8, 1 }
  0xcc   : > { %v678_v13 = vadd.f32 %v677_v10, %v670_v9  ;;  %v689_v14 = vadd.f32 %v688_v11, %v687_v8 }
  0xce   : > { %679 = vst [vmem:[%s1310_s23] sm:$0x1] %v678_v13  ;;  %v690_v15 = vadd.f32 %v689_v14, %v680_v12 }
  0xd0   : > { %691 = vst [vmem:[%s1316_s26] sm:$0x1] %v690_v15 }
  0xd1 PF: > { %s15_s17 = sadd.s32 1, %s1154_s17   ;;  %s1342_s15 = smov %s1150_s16 }
  0xd2   : > { %p12_p5 = scmp.ge.s32.totalorder %s15_s17, 4   ;;  %s1343_s16 = smov %s1345_s18 }
  0xd4   :  { %14 = sbr.rel (!%p12_p5) target bundleno = 2 (0x2), region = 89 }

// kernel: autoencoder_forward.51
= control target key start
LH: loop header
LB: loop body
LE: loop exit
PB: predicated region body
PF: predicated region fallthrough
CT: control target
= control target key end

     0   :  { %s1265_s15 = smov 0   ;;  %s1267_s16 = smov 0   ;;  %s1444_s0 = inlined_call_operand.vmem [shape: bf16[1,2,16,576], index: 0, kind: input, shape index: {}]   ;;  %s1445_s1 = inlined_call_operand.vmem [shape: bf16[1,576,128], index: 1, kind: input, shape index: {}]   ;;  %s1446_s2 = inlined_call_operand.vmem [shape: bf16[1,2,16,128], index: 2, kind: output, shape index: {0}]   ;;  %s1447_s3 = inlined_call_operand.vmem [shape: f32[1,2,1,128], index: 3, kind: output, shape index: {1}]   ;;  %s1448_s4 = inlined_call_operand.vmem [shape: f32[1,2,1,128], index: 4, kind: output, shape index: {2}]  }
   0x1   :  { %s1269_s17 = smov 0  }
   0x2 LB: > { %s30_s18 = sadd.s32 1, %s1233_s16  ;;  %p971_p0 = scmp.ge.s32.totalorder %s1237_s17, 1  ;;  %s1237_s17 = sphi %s1269_s17, %s15_s17   ;;  %s1233_s16 = sphi %s1267_s16, %s1450_s16   ;;  %s1229_s15 = sphi %s1265_s15, %s1449_s15  }
   0x3   : > { %p32_p1 = scmp.ge.s32.totalorder %s30_s18, 2  ;;  %p218_p2 = scmp.lt.s32.totalorder %s1237_s17, 3 }
   0x5   : > { %s1452_s18 = smov (%p32_p1, %s30_s18), 0  ;;  %p219_p3 = pnand %p971_p0, %p218_p2 }
   0x6   : > { %p283_p4 = scmp.lt.s32.totalorder (!%p219_p3), %s1229_s15, 1 }
   0x7   : > { %222 = sbr.rel (%p219_p3) target bundleno = 215 (0xd7), region = 28 }
   0xc   : > { %v1155_v0 = vld [vmem:[%s1445_s1 + $0x38] sm:$0xff]  ;;  %v1154_v4 = vld [vmem:[%s1445_s1 + $0x30] sm:$0xff]  ;;  %v1153_v8 = vld [vmem:[%s1445_s1 + $0x28] sm:$0xff]  ;;  %s1454_s15 = smov (!%p283_p4, %s1229_s15), 1  ;;  %vm648_vm0 = vcmask 523264   ;;  %v1239_v51 = vmov 0.0  }
   0xd   : > { %v1163_v1 = vld [vmem:[%s1445_s1 + $0x78] sm:$0xff]  ;;  %652 = vmatpush.bf16.msra.mxu0 %v1155_v0  ;;  %v1162_v5 = vld [vmem:[%s1445_s1 + $0x70] sm:$0xff]  ;;  %v1161_v9 = vld [vmem:[%s1445_s1 + $0x68] sm:$0xff]  ;;  %s1189_s19 = smul.u32 40, %s1454_s15  ;;  %s1417_s6 = scalar_lea.vmem %s1447_s3, %s1454_s15 }
   0xe   : > { %v1171_v2 = vld [vmem:[%s1445_s1 + $0xb8] sm:$0xff]  ;;  %666 = vmatpush.bf16.msra.mxu1 %v1163_v1  ;;  %v1170_v6 = vld [vmem:[%s1445_s1 + $0xb0] sm:$0xff]  ;;  %v1169_v10 = vld [vmem:[%s1445_s1 + $0xa8] sm:$0xff]  ;;  %s1423_s9 = scalar_lea.vmem %s1448_s4, %s1454_s15  ;;  %726 = vst [vmem:[%s1417_s6] sm:$0x1] %v1239_v51 }
   0xf   : > { %v1179_v3 = vld [vmem:[%s1445_s1 + $0xf8] sm:$0xff]  ;;  %680 = vmatpush.bf16.msra.mxu2 %v1171_v2  ;;  %v1178_v7 = vld [vmem:[%s1445_s1 + $0xf0] sm:$0xff]  ;;  %v1177_v11 = vld [vmem:[%s1445_s1 + $0xe8] sm:$0xff]  ;;  %s1371_s30 = scalar_lea.vmem %s1444_s0, %s1189_s19  ;;  %727 = vst [vmem:[%s1423_s9] sm:$0x1] %v1239_v51 }
  0x10   : > { %694 = vmatpush.bf16.msra.mxu3 %v1179_v3  ;;  %v1152_v12 = vld [vmem:[%s1445_s1 + $0x20] sm:$0xff]  ;;  %v1151_v16 = vld [vmem:[%s1445_s1 + $0x18] sm:$0xff]  ;;  %v1150_v20 = vld [vmem:[%s1445_s1 + $0x10] sm:$0xff] }
  0x11   : > { %653 = vmatpush.bf16.msra.mxu0 %v1154_v4  ;;  %v1160_v13 = vld [vmem:[%s1445_s1 + $0x60] sm:$0xff]  ;;  %v1159_v17 = vld [vmem:[%s1445_s1 + $0x58] sm:$0xff]  ;;  %v1158_v21 = vld [vmem:[%s1445_s1 + $0x50] sm:$0xff] }
  0x12   : > { %667 = vmatpush.bf16.msra.mxu1 %v1162_v5  ;;  %v1168_v14 = vld [vmem:[%s1445_s1 + $0xa0] sm:$0xff]  ;;  %v1167_v18 = vld [vmem:[%s1445_s1 + $0x98] sm:$0xff]  ;;  %v1166_v22 = vld [vmem:[%s1445_s1 + $0x90] sm:$0xff] }
  0x13   : > { %681 = vmatpush.bf16.msra.mxu2 %v1170_v6  ;;  %v1176_v15 = vld [vmem:[%s1445_s1 + $0xe0] sm:$0xff]  ;;  %v1175_v19 = vld [vmem:[%s1445_s1 + $0xd8] sm:$0xff]  ;;  %v1174_v23 = vld [vmem:[%s1445_s1 + $0xd0] sm:$0xff] }
  0x14   : > { %695 = vmatpush.bf16.msra.mxu3 %v1178_v7  ;;  %v1149_v24 = vld [vmem:[%s1445_s1 + $0x8] sm:$0xff]  ;;  %v1148_v28 = vld [vmem:[%s1445_s1] sm:$0xff]  ;;  %v1145_v33 = vld [vmem:[%s1371_s30 + $0x10] sm:$0xf0] }
  0x15   : > { %654 = vmatpush.bf16.msra.mxu0 %v1153_v8  ;;  %v1157_v25 = vld [vmem:[%s1445_s1 + $0x48] sm:$0xff]  ;;  %v1156_v29 = vld [vmem:[%s1445_s1 + $0x40] sm:$0xff]  ;;  %v979_v35 = vld [vmem:[%s1371_s30 + $0x14] sm:$0xf0] }
  0x16   : > { %668 = vmatpush.bf16.msra.mxu1 %v1161_v9  ;;  %v1165_v26 = vld [vmem:[%s1445_s1 + $0x88] sm:$0xff]  ;;  %v1164_v30 = vld [vmem:[%s1445_s1 + $0x80] sm:$0xff]  ;;  %v1146_v37 = vld [vmem:[%s1371_s30 + $0x18] sm:$0xf0] }
  0x17   : > { %682 = vmatpush.bf16.msra.mxu2 %v1169_v10  ;;  %v1173_v27 = vld [vmem:[%s1445_s1 + $0xc8] sm:$0xff]  ;;  %v1172_v31 = vld [vmem:[%s1445_s1 + $0xc0] sm:$0xff]  ;;  %v1183_v40 = vld [vmem:[%s1445_s1 + $0x118] sm:$0xff] }
  0x18   : > { %696 = vmatpush.bf16.msra.mxu3 %v1177_v11  ;;  %v977_v32 = vld [vmem:[%s1371_s30] sm:$0xf]  ;;  %v1143_v34 = vld [vmem:[%s1371_s30 + $0x4] sm:$0xf]  ;;  %v985_v36 = vld [vmem:[%s1371_s30 + $0x8] sm:$0xf] }
  0x19   : > { %655 = vmatpush.bf16.msra.mxu0 %v1152_v12  ;;  %v1144_v38 = vld [vmem:[%s1371_s30 + $0xc] sm:$0xf]  ;;  %v987_v39 = vld [vmem:[%s1371_s30 + $0x1c] sm:$0xf0]  ;;  %v978_v41 = vor.u32 %v1145_v33, %v977_v32  ;;  %v982_v42 = vor.u32 %v1143_v34, %v979_v35  ;;  %v986_v43 = vor.u32 %v1146_v37, %v985_v36  ;;  %v1182_v45 = vld [vmem:[%s1445_s1 + $0x110] sm:$0xff] }
  0x1a   : > { %669 = vmatpush.bf16.msra.mxu1 %v1160_v13  ;;  %v990_v44 = vor.u32 %v1144_v38, %v987_v39  ;;  %v1181_v46 = vld [vmem:[%s1445_s1 + $0x108] sm:$0xff]  ;;  %v1180_v47 = vld [vmem:[%s1445_s1 + $0x100] sm:$0xff]  ;;  %v993_v48 = vld [vmem:[%s1371_s30 + $0x10] sm:$0xf] }
  0x1b   : > { %683 = vmatpush.bf16.msra.mxu2 %v1168_v14  ;;  %v1147_v49 = vld [vmem:[%s1371_s30 + $0x20] sm:$0xf0]  ;;  %s1142_s30 = sshll.u32 %s1454_s15, 3 }
  0x1c   : > { %697 = vmatpush.bf16.msra.mxu3 %v1176_v15  ;;  %v994_v50 = vor.u32 %v1147_v49, %v993_v48  ;;  %s312_s12 = scalar_lea.vmem %s1446_s2, %s1142_s30 }
  0x1d   : > { %656 = vmatpush.bf16.msra.mxu0 %v1151_v16 }
  0x1e   : > { %670 = vmatpush.bf16.msra.mxu1 %v1159_v17 }
  0x1f   : > { %684 = vmatpush.bf16.msra.mxu2 %v1167_v18 }
  0x20   : > { %698 = vmatpush.bf16.msra.mxu3 %v1175_v19 }
  0x21   : > { %657 = vmatpush.bf16.msra.mxu0 %v1150_v20  ;;  %v728_v20 = vld [vmem:[%s1417_s6] sm:$0x1] }
  0x22   : > { %671 = vmatpush.bf16.msra.mxu1 %v1158_v21 }
  0x23   : > { %685 = vmatpush.bf16.msra.mxu2 %v1166_v22 }
  0x24   : > { %699 = vmatpush.bf16.msra.mxu3 %v1174_v23  ;;  %v738_v23 = vld [vmem:[%s1423_s9] sm:$0x1] }
  0x25   : > { %658 = vmatpush.bf16.msra.mxu0 %v1149_v24 }
  0x26   : > { %672 = vmatpush.bf16.msra.mxu1 %v1157_v25 }
  0x27   : > { %686 = vmatpush.bf16.msra.mxu2 %v1165_v26 }
  0x28   : > { %700 = vmatpush.bf16.msra.mxu3 %v1173_v27 }
  0x29   : > { %659 = vmatpush.bf16.msra.mxu0 %v1148_v28 }
  0x2a   : > { %673 = vmatpush.bf16.msra.mxu1 %v1156_v29 }
  0x2b   : > { %687 = vmatpush.bf16.msra.mxu2 %v1164_v30 }
  0x2c   : > { %701 = vmatpush.bf16.msra.mxu3 %v1172_v31  ;;  %660 = vmatmul.bf16.vlgmr.msra.gmra.mxu0 %v978_v41 }
  0x2d   : > { %712 = vmatpush.bf16.msrb.mxu0 %v1183_v40  ;;  %674 = vmatmul.bf16.vlgmr.msra.gmra.mxu1 %v982_v42 }
  0x2e   : > { %688 = vmatmul.bf16.vlgmr.msra.gmra.mxu2 %v986_v43 }
  0x2f   : > { %702 = vmatmul.bf16.vlgmr.msra.gmra.mxu3 %v990_v44 }
  0x31   : > { %713 = vmatpush.bf16.msrb.mxu0 %v1182_v45 }
  0x35   : > { %714 = vmatpush.bf16.msrb.mxu0 %v1181_v46 }
  0x39   : > { %715 = vmatpush.bf16.msrb.mxu0 %v1180_v47 }
  0x3c   : > { %1139 = vmatmul.msk.bf16.vlgmr.msrb.gmra.mxu0 %vm648_vm0, %v994_v50 }
  0xa9   : > { %v661_v52 = vpop.f32.mrf.mxu0 }
  0xaa   : > { %v675_v53 = vpop.f32.mrf.mxu1 }
  0xab   : > { %v676_v58 = vadd.f32 %v675_v53, %v661_v52 }
  0xb1   : > { %v689_v54 = vpop.f32.mrf.mxu2  ;;  %v663_v55 = vpop.f32.mrf.mxu0 }
  0xb2   : > { %v703_v56 = vpop.f32.mrf.mxu3  ;;  %v677_v57 = vpop.f32.mrf.mxu1  ;;  %v690_v61 = vadd.f32 %v689_v54, %v676_v58 }
  0xb3   : > { %v678_v62 = vadd.f32 %v677_v57, %v663_v55 }
  0xb4   : > { %v704_v0 = vadd.f32 %v703_v56, %v690_v61 }
  0xb9   : > { %v691_v59 = vpop.f32.mrf.mxu2  ;;  %v717_v60 = vpop.f32.mrf.mxu0 }
  0xba   : > { %v692_v63 = vadd.f32 %v691_v59, %v678_v62  ;;  %v705_v1 = vpop.f32.mrf.mxu3  ;;  %v718_v3 = vadd.f32 %v717_v60, %v704_v0 }
  0xbc   : > { %v706_v2 = vadd.f32 %v705_v1, %v692_v63  ;;  %v739_v6 = vmul.f32 %v718_v3, %v718_v3 }
  0xc1   : > { %v719_v4 = vpop.f32.mrf.mxu0 }
  0xc2   : > { %v720_v5 = vadd.f32 %v719_v4, %v706_v2 }
  0xc4   : > { %v729_v7 = vadd.f32 %v720_v5, %v718_v3  ;;  %v740_v8 = vmul.f32 %v720_v5, %v720_v5  ;;  %v1187_v9 = vpack.c.bf16 %v720_v5, %v718_v3 }
  0xc6   : > { %v730_v10 = vrot.slane %v729_v7, 4  ;;  %v741_v11 = vadd.f32 %v740_v8, %v739_v6  ;;  %1188 = vst [vmem:[%s312_s12] sm:$0xff] %v1187_v9  }
  0xc8   : > { %v731_v12 = vadd.f32 %v730_v10, %v729_v7  ;;  %v742_v13 = vrot.slane %v741_v11, 4 }
  0xca   : > { %v732_v14 = vrot.slane %v731_v12, 2  ;;  %v743_v15 = vadd.f32 %v742_v13, %v741_v11 }
  0xcc   : > { %v733_v16 = vadd.f32 %v732_v14, %v731_v12  ;;  %v744_v17 = vrot.slane %v743_v15, 2 }
  0xce   : > { %v734_v18 = vrot.slane %v733_v16, 1  ;;  %v745_v19 = vadd.f32 %v744_v17, %v743_v15 }
  0xd0   : > { %v735_v21 = vadd.f32 %v734_v18, %v733_v16  ;;  %v746_v22 = vrot.slane %v745_v19, 1 }
  0xd2   : > { %v736_v24 = vadd.f32 %v735_v21, %v728_v20  ;;  %v747_v25 = vadd.f32 %v746_v22, %v745_v19 }
  0xd4   : > { %737 = vst [vmem:[%s1417_s6] sm:$0x1] %v736_v24  ;;  %v748_v26 = vadd.f32 %v747_v25, %v738_v23 }
  0xd6   : > { %749 = vst [vmem:[%s1423_s9] sm:$0x1] %v748_v26 }
  0xd7 PF: > { %s15_s17 = sadd.s32 1, %s1237_s17   ;;  %s1449_s15 = smov %s1233_s16 }
  0xd8   : > { %p12_p5 = scmp.ge.s32.totalorder %s15_s17, 4   ;;  %s1450_s16 = smov %s1452_s18 }
  0xda   :  { %14 = sbr.rel (!%p12_p5) target bundleno = 2 (0x2), region = 89 }

// kernel: autoencoder_forward.53
= control target key start
LH: loop header
LB: loop body
LE: loop exit
PB: predicated region body
PF: predicated region fallthrough
CT: control target
= control target key end

     0   :  { %s960_s15 = smov 0   ;;  %s962_s16 = smov 0   ;;  %s1063_s0 = inlined_call_operand.vmem [shape: bf16[4,2,16,256], index: 0, kind: input, shape index: {}]   ;;  %s1064_s1 = inlined_call_operand.vmem [shape: bf16[4,256,128], index: 1, kind: input, shape index: {}]   ;;  %s1065_s2 = inlined_call_operand.vmem [shape: bf16[4,2,16,128], index: 2, kind: output, shape index: {0}]   ;;  %s1066_s3 = inlined_call_operand.vmem [shape: f32[4,2,1,128], index: 3, kind: output, shape index: {1}]   ;;  %s1067_s4 = inlined_call_operand.vmem [shape: f32[4,2,1,128], index: 4, kind: output, shape index: {2}]  }
   0x1   :  { %s964_s17 = smov 0   ;;  %s966_s18 = smov 0  }
   0x2   :  { %s968_s19 = smov 0  }
   0x3 LB: > { %s30_s20 = sadd.s32 1, %s924_s17  ;;  %s34_s21 = sadd.s32 1, %s928_s18  ;;  %s932_s19 = sphi %s968_s19, %s15_s19   ;;  %s928_s18 = sphi %s966_s18, %s1071_s18   ;;  %s924_s17 = sphi %s964_s17, %s1070_s17   ;;  %s920_s16 = sphi %s962_s16, %s1069_s16   ;;  %s916_s15 = sphi %s960_s15, %s1068_s15  }
   0x4   : > { %p32_p0 = scmp.ge.s32.totalorder %s30_s20, 2  ;;  %p744_p1 = scmp.ge.s32.totalorder %s932_s19, 1 }
   0x5   : > { %p218_p2 = scmp.lt.s32.totalorder %s932_s19, 9 }
   0x6   : > { %s1073_s20 = smov (%p32_p0, %s30_s20), 0  ;;  %s1075_s21 = smov (!%p32_p0, %s34_s21), %s928_s18 }
   0x7   : > { %p219_p3 = pnand %p744_p1, %p218_p2  ;;  %p36_p4 = scmp.ge.s32.totalorder %s1075_s21, 4 }
   0x8   : > { %p281_p5 = scmp.lt.s32.totalorder (!%p219_p3), %s920_s16, 3  ;;  %p283_p6 = scmp.lt.s32.totalorder (!%p219_p3), %s916_s15, 1 }
   0x9   : > { %s1077_s21 = smov (%p36_p4, %s1075_s21), 0  ;;  %222 = sbr.rel (%p219_p3) target bundleno = 205 (0xcd), region = 28 }
   0xe   : > { %s1079_s16 = smov (!%p281_p5, %s920_s16), 3  ;;  %s1081_s15 = smov (!%p283_p6, %s916_s15), 1  ;;  %v934_v22 = vmov 0.0  }
   0xf   : > { %s829_s22 = sshll.u32 %s1079_s16, 7  ;;  %s753_s26 = sshll.u32 %s1079_s16, 1 }
  0x10   : > { %s998_s25 = scalar_lea.vmem %s1064_s1, %s829_s22  ;;  %s1004_s27 = sadd.s32 %s753_s26, %s1081_s15 }
  0x11   : > { %v839_v0 = vld [vmem:[%s998_s25 + $0x38] sm:$0xff]  ;;  %v838_v2 = vld [vmem:[%s998_s25 + $0x30] sm:$0xff]  ;;  %v837_v4 = vld [vmem:[%s998_s25 + $0x28] sm:$0xff]  ;;  %s745_s28 = sshll.u32 %s1081_s15, 2  ;;  %s746_s29 = sshll.u32 %s1079_s16, 3 }
  0x12   : > { %v847_v1 = vld [vmem:[%s998_s25 + $0x78] sm:$0xff]  ;;  %468 = vmatpush.bf16.msra.mxu0 %v839_v0  ;;  %v846_v3 = vld [vmem:[%s998_s25 + $0x70] sm:$0xff]  ;;  %v845_v5 = vld [vmem:[%s998_s25 + $0x68] sm:$0xff]  ;;  %s291_s30 = sadd.s32 %s746_s29, %s745_s28  ;;  %s750_s9 = sshll.u32 %s1081_s15, 1 }
  0x13   : > { %482 = vmatpush.bf16.msra.mxu1 %v847_v1  ;;  %v836_v6 = vld [vmem:[%s998_s25 + $0x20] sm:$0xff]  ;;  %v835_v8 = vld [vmem:[%s998_s25 + $0x18] sm:$0xff]  ;;  %v834_v10 = vld [vmem:[%s998_s25 + $0x10] sm:$0xff]  ;;  %s747_s5 = sshll.u32 %s291_s30, 2  ;;  %s751_s10 = sshll.u32 %s1079_s16, 2 }
  0x14   : > { %v844_v7 = vld [vmem:[%s998_s25 + $0x60] sm:$0xff]  ;;  %v843_v9 = vld [vmem:[%s998_s25 + $0x58] sm:$0xff]  ;;  %v842_v11 = vld [vmem:[%s998_s25 + $0x50] sm:$0xff]  ;;  %s293_s8 = scalar_lea.vmem %s1063_s0, %s747_s5  ;;  %s310_s11 = sadd.s32 %s751_s10, %s750_s9 }
  0x15   : > { %v833_v12 = vld [vmem:[%s998_s25 + $0x8] sm:$0xff]  ;;  %v832_v14 = vld [vmem:[%s998_s25] sm:$0xff]  ;;  %s1031_s14 = scalar_lea.vmem %s1066_s3, %s1004_s27  ;;  %s1037_s24 = scalar_lea.vmem %s1067_s4, %s1004_s27 }
  0x16   : > { %469 = vmatpush.bf16.msra.mxu0 %v838_v2  ;;  %v841_v13 = vld [vmem:[%s998_s25 + $0x48] sm:$0xff]  ;;  %v840_v15 = vld [vmem:[%s998_s25 + $0x40] sm:$0xff]  ;;  %500 = vst [vmem:[%s1031_s14] sm:$0x1] %v934_v22  ;;  %s752_s15 = sshll.u32 %s310_s11, 2 }
  0x17   : > { %483 = vmatpush.bf16.msra.mxu1 %v846_v3  ;;  %v757_v16 = vld [vmem:[%s293_s8] sm:$0xf]  ;;  %v831_v17 = vld [vmem:[%s293_s8 + $0x4] sm:$0xf0]  ;;  %v830_v18 = vld [vmem:[%s293_s8 + $0x4] sm:$0xf]  ;;  %s312_s26 = scalar_lea.vmem %s1065_s2, %s752_s15 }
  0x18   : > { %v759_v19 = vld [vmem:[%s293_s8 + $0x8] sm:$0xf0]  ;;  %v758_v20 = vor.u32 %v831_v17, %v757_v16  ;;  %501 = vst [vmem:[%s1037_s24] sm:$0x1] %v934_v22 }
  0x19   : > { %v762_v21 = vor.u32 %v830_v18, %v759_v19 }
  0x1a   : > { %470 = vmatpush.bf16.msra.mxu0 %v837_v4 }
  0x1b   : > { %484 = vmatpush.bf16.msra.mxu1 %v845_v5 }
  0x1d   : > { %v502_v43 = vld [vmem:[%s1031_s14] sm:$0x1] }
  0x1e   : > { %471 = vmatpush.bf16.msra.mxu0 %v836_v6 }
  0x1f   : > { %485 = vmatpush.bf16.msra.mxu1 %v844_v7  ;;  %v512_v46 = vld [vmem:[%s1037_s24] sm:$0x1] }
  0x22   : > { %472 = vmatpush.bf16.msra.mxu0 %v835_v8 }
  0x23   : > { %486 = vmatpush.bf16.msra.mxu1 %v843_v9 }
  0x26   : > { %473 = vmatpush.bf16.msra.mxu0 %v834_v10 }
  0x27   : > { %487 = vmatpush.bf16.msra.mxu1 %v842_v11 }
  0x2a   : > { %474 = vmatpush.bf16.msra.mxu0 %v833_v12 }
  0x2b   : > { %488 = vmatpush.bf16.msra.mxu1 %v841_v13 }
  0x2e   : > { %475 = vmatpush.bf16.msra.mxu0 %v832_v14 }
  0x2f   : > { %489 = vmatpush.bf16.msra.mxu1 %v840_v15 }
  0x31   : > { %476 = vmatmul.bf16.vlgmr.msra.gmra.mxu0 %v758_v20 }
  0x32   : > { %490 = vmatmul.bf16.vlgmr.msra.gmra.mxu1 %v762_v21 }
  0xae   : > { %v477_v23 = vpop.f32.mrf.mxu0 }
  0xaf   : > { %v491_v24 = vpop.f32.mrf.mxu1 }
  0xb0   : > { %v492_v25 = vadd.f32 %v491_v24, %v477_v23 }
  0xb2   : > { %v513_v29 = vmul.f32 %v492_v25, %v492_v25 }
  0xb6   : > { %v479_v26 = vpop.f32.mrf.mxu0 }
  0xb7   : > { %v493_v27 = vpop.f32.mrf.mxu1 }
  0xb8   : > { %v494_v28 = vadd.f32 %v493_v27, %v479_v26 }
  0xba   : > { %v503_v30 = vadd.f32 %v494_v28, %v492_v25  ;;  %v514_v31 = vmul.f32 %v494_v28, %v494_v28  ;;  %v851_v32 = vpack.c.bf16 %v494_v28, %v492_v25 }
  0xbc   : > { %v504_v33 = vrot.slane %v503_v30, 4  ;;  %v515_v34 = vadd.f32 %v514_v31, %v513_v29  ;;  %852 = vst [vmem:[%s312_s26] sm:$0xff] %v851_v32  }
  0xbe   : > { %v505_v35 = vadd.f32 %v504_v33, %v503_v30  ;;  %v516_v36 = vrot.slane %v515_v34, 4 }
  0xc0   : > { %v506_v37 = vrot.slane %v505_v35, 2  ;;  %v517_v38 = vadd.f32 %v516_v36, %v515_v34 }
  0xc2   : > { %v507_v39 = vadd.f32 %v506_v37, %v505_v35  ;;  %v518_v40 = vrot.slane %v517_v38, 2 }
  0xc4   : > { %v508_v41 = vrot.slane %v507_v39, 1  ;;  %v519_v42 = vadd.f32 %v518_v40, %v517_v38 }
  0xc6   : > { %v509_v44 = vadd.f32 %v508_v41, %v507_v39  ;;  %v520_v45 = vrot.slane %v519_v42, 1 }
  0xc8   : > { %v510_v47 = vadd.f32 %v509_v44, %v502_v43  ;;  %v521_v48 = vadd.f32 %v520_v45, %v519_v42 }
  0xca   : > { %511 = vst [vmem:[%s1031_s14] sm:$0x1] %v510_v47  ;;  %v522_v49 = vadd.f32 %v521_v48, %v512_v46 }
  0xcc   : > { %523 = vst [vmem:[%s1037_s24] sm:$0x1] %v522_v49 }
  0xcd PF: > { %s15_s19 = sadd.s32 1, %s932_s19   ;;  %s1068_s15 = smov %s924_s17 }
  0xce   : > { %p12_p7 = scmp.ge.s32.totalorder %s15_s19, 10   ;;  %s1069_s16 = smov %s928_s18 }
  0xcf   : > { %s1070_s17 = smov %s1073_s20  ;;  %s1071_s18 = smov %s1077_s21 }
  0xd0   :  { %14 = sbr.rel (!%p12_p7) target bundleno = 3 (0x3), region = 89 }

// kernel: autoencoder_forward.54
= control target key start
LH: loop header
LB: loop body
LE: loop exit
PB: predicated region body
PF: predicated region fallthrough
CT: control target
= control target key end

     0   :  { %s548_s12 = smov 0   ;;  %s550_s13 = smov 0   ;;  %s605_s0 = inlined_call_operand.vmem [shape: bf16[4,2,16,128], index: 0, kind: input, shape index: {}]   ;;  %s606_s1 = inlined_call_operand.vmem [shape: f32[2,1,128], index: 1, kind: input, shape index: {}]   ;;  %s607_s2 = inlined_call_operand.vmem [shape: f32[2,1,128], index: 2, kind: input, shape index: {}]   ;;  %s608_s3 = inlined_call_operand.vmem [shape: bf16[4,2,16,128], index: 3, kind: output, shape index: {}]  }
   0x1   :  { %s552_s14 = smov 0   ;;  %s554_s15 = smov 0  }
   0x2   :  { %s556_s16 = smov 0  }
   0x3 LB: > { %s28_s17 = sadd.s32 1, %s518_s14  ;;  %s32_s18 = sadd.s32 1, %s522_s15  ;;  %s526_s16 = sphi %s556_s16, %s13_s16   ;;  %s522_s15 = sphi %s554_s15, %s612_s15   ;;  %s518_s14 = sphi %s552_s14, %s611_s14   ;;  %s514_s13 = sphi %s550_s13, %s610_s13   ;;  %s510_s12 = sphi %s548_s12, %s609_s12  }
   0x4   : > { %p30_p0 = scmp.ge.s32.totalorder %s28_s17, 2  ;;  %p428_p1 = scmp.ge.s32.totalorder %s526_s16, 1 }
   0x5   : > { %p189_p2 = scmp.lt.s32.totalorder %s526_s16, 9 }
   0x6   : > { %s614_s17 = smov (%p30_p0, %s28_s17), 0  ;;  %s616_s18 = smov (!%p30_p0, %s32_s18), %s522_s15 }
   0x7   : > { %p190_p3 = pnand %p428_p1, %p189_p2  ;;  %p34_p4 = scmp.ge.s32.totalorder %s616_s18, 4 }
   0x8   : > { %p236_p5 = scmp.lt.s32.totalorder (!%p190_p3), %s514_s13, 3  ;;  %p238_p6 = scmp.lt.s32.totalorder (!%p190_p3), %s510_s12, 1 }
   0x9   : > { %s618_s18 = smov (%p34_p4, %s616_s18), 0  ;;  %193 = sbr.rel (%p190_p3) target bundleno = 31 (0x1f), region = 32 }
   0xe   : > { %s620_s13 = smov (!%p236_p5, %s514_s13), 3  ;;  %s622_s12 = smov (!%p238_p6, %s510_s12), 1 }
   0xf   : > { %s430_s19 = sshll.u32 %s620_s13, 2  ;;  %s429_s20 = sshll.u32 %s622_s12, 1 }
  0x10   : > { %s251_s23 = scalar_lea.vmem %s606_s1, %s622_s12  ;;  %s245_s24 = sadd.s32 %s430_s19, %s429_s20 }
  0x11   : > { %s254_s27 = scalar_lea.vmem %s607_s2, %s622_s12  ;;  %s431_s28 = sshll.u32 %s245_s24, 2  ;;  %v486_v0 = vld [vmem:[%s251_s23] ss:$0 sm:$0xff] }
  0x12   : > { %s247_s4 = scalar_lea.vmem %s605_s0, %s431_s28  ;;  %v487_v4 = vld [vmem:[%s254_s27] ss:$0 sm:$0xff]  ;;  %s267_s7 = scalar_lea.vmem %s608_s3, %s431_s28 }
  0x13   : > { %v438_v1 = vld [vmem:[%s247_s4] sm:$0xff]  }
  0x14   : > { %v439_v2 = vunpack.c.l.bf16 %v438_v1  ;;  %v440_v3 = vunpack.c.h.bf16 %v438_v1 }
  0x16   : > { %v277_v5 = vmul.f32 %v486_v0, %v439_v2  ;;  %v278_v6 = vmul.f32 %v486_v0, %v440_v3 }
  0x18   : > { %v283_v7 = vadd.f32 %v487_v4, %v277_v5  ;;  %v284_v8 = vadd.f32 %v487_v4, %v278_v6 }
  0x1a   : > { %v285_v9 = vmax.f32 %v283_v7, 0.0  ;;  %v286_v10 = vmax.f32 %v284_v8, 0.0 }
  0x1c   : > { %v444_v11 = vpack.c.bf16 %v286_v10, %v285_v9 }
  0x1e   : > { %445 = vst [vmem:[%s267_s7] sm:$0xff] %v444_v11  }
  0x1f PF: > { %s13_s16 = sadd.s32 1, %s526_s16   ;;  %s609_s12 = smov %s518_s14 }
  0x20   : > { %p10_p7 = scmp.ge.s32.totalorder %s13_s16, 10   ;;  %s610_s13 = smov %s522_s15 }
  0x21   : > { %s611_s14 = smov %s614_s17  ;;  %s612_s15 = smov %s618_s18 }
  0x22   :  { %12 = sbr.rel (!%p10_p7) target bundleno = 3 (0x3), region = 68 }

// kernel: autoencoder_forward.57
= control target key start
LH: loop header
LB: loop body
LE: loop exit
PB: predicated region body
PF: predicated region fallthrough
CT: control target
= control target key end

     0   :  { %s827_s15 = smov 0   ;;  %s829_s16 = smov 0   ;;  %s897_s0 = inlined_call_operand.vmem [shape: bf16[4,2,16,128], index: 0, kind: input, shape index: {}]   ;;  %s898_s1 = inlined_call_operand.vmem [shape: bf16[4,128,128], index: 1, kind: input, shape index: {}]   ;;  %s899_s2 = inlined_call_operand.vmem [shape: bf16[4,2,16,128], index: 2, kind: output, shape index: {0}]   ;;  %s900_s3 = inlined_call_operand.vmem [shape: f32[4,2,1,128], index: 3, kind: output, shape index: {1}]   ;;  %s901_s4 = inlined_call_operand.vmem [shape: f32[4,2,1,128], index: 4, kind: output, shape index: {2}]  }
   0x1   :  { %s831_s17 = smov 0   ;;  %s833_s18 = smov 0  }
   0x2   :  { %s835_s19 = smov 0  }
   0x3 LB: > { %s30_s20 = sadd.s32 1, %s791_s17  ;;  %s34_s21 = sadd.s32 1, %s795_s18  ;;  %s799_s19 = sphi %s835_s19, %s15_s19   ;;  %s795_s18 = sphi %s833_s18, %s905_s18   ;;  %s791_s17 = sphi %s831_s17, %s904_s17   ;;  %s787_s16 = sphi %s829_s16, %s903_s16   ;;  %s783_s15 = sphi %s827_s15, %s902_s15  }
   0x4   : > { %p32_p0 = scmp.ge.s32.totalorder %s30_s20, 2  ;;  %p656_p1 = scmp.ge.s32.totalorder %s799_s19, 1 }
   0x5   : > { %p217_p2 = scmp.lt.s32.totalorder %s799_s19, 9 }
   0x6   : > { %s907_s20 = smov (%p32_p0, %s30_s20), 0  ;;  %s909_s21 = smov (!%p32_p0, %s34_s21), %s795_s18 }
   0x7   : > { %p218_p3 = pnand %p656_p1, %p217_p2  ;;  %p36_p4 = scmp.ge.s32.totalorder %s909_s21, 4 }
   0x8   : > { %p279_p5 = scmp.lt.s32.totalorder (!%p218_p3), %s787_s16, 3  ;;  %p281_p6 = scmp.lt.s32.totalorder (!%p218_p3), %s783_s15, 1 }
   0x9   : > { %s911_s21 = smov (%p36_p4, %s909_s21), 0  ;;  %221 = sbr.rel (%p218_p3) target bundleno = 202 (0xca), region = 28 }
   0xe   : > { %s913_s16 = smov (!%p279_p5, %s787_s16), 3  ;;  %s915_s15 = smov (!%p281_p6, %s783_s15), 1  ;;  %v801_v2 = vmov 0.0  }
   0xf   : > { %s705_s22 = sshll.u32 %s913_s16, 6  ;;  %s665_s26 = sshll.u32 %s913_s16, 1 }
  0x10   : > { %s296_s25 = scalar_lea.vmem %s898_s1, %s705_s22  ;;  %s316_s27 = sadd.s32 %s665_s26, %s915_s15 }
  0x11   : > { %v714_v0 = vld [vmem:[%s296_s25 + $0x38] sm:$0xff]  ;;  %v713_v1 = vld [vmem:[%s296_s25 + $0x30] sm:$0xff]  ;;  %s863_s30 = scalar_lea.vmem %s900_s3, %s316_s27  ;;  %s868_s7 = scalar_lea.vmem %s901_s4, %s316_s27  ;;  %v712_v3 = vld [vmem:[%s296_s25 + $0x28] sm:$0xff] }
  0x12   : > { %397 = vmatpush.bf16.msra.mxu0 %v714_v0  ;;  %415 = vst [vmem:[%s863_s30] sm:$0x1] %v801_v2  ;;  %v711_v4 = vld [vmem:[%s296_s25 + $0x20] sm:$0xff]  ;;  %v710_v5 = vld [vmem:[%s296_s25 + $0x18] sm:$0xff]  ;;  %s657_s8 = sshll.u32 %s915_s15, 1  ;;  %s658_s9 = sshll.u32 %s913_s16, 2  ;;  %v709_v6 = vld [vmem:[%s296_s25 + $0x10] sm:$0xff] }
  0x13   : > { %416 = vst [vmem:[%s868_s7] sm:$0x1] %v801_v2  ;;  %s288_s10 = sadd.s32 %s658_s9, %s657_s8  ;;  %v708_v7 = vld [vmem:[%s296_s25 + $0x8] sm:$0xff]  ;;  %v707_v8 = vld [vmem:[%s296_s25] sm:$0xff] }
  0x14   : > { %s659_s11 = sshll.u32 %s288_s10, 2 }
  0x15   : > { %s290_s14 = scalar_lea.vmem %s897_s0, %s659_s11  ;;  %s309_s15 = scalar_lea.vmem %s899_s2, %s659_s11 }
  0x16   : > { %398 = vmatpush.bf16.msra.mxu0 %v713_v1  ;;  %v706_v9 = vld [vmem:[%s290_s14] sm:$0xff] }
  0x19   : > { %v417_v26 = vld [vmem:[%s863_s30] sm:$0x1] }
  0x1a   : > { %399 = vmatpush.bf16.msra.mxu0 %v712_v3  ;;  %v427_v29 = vld [vmem:[%s868_s7] sm:$0x1] }
  0x1e   : > { %400 = vmatpush.bf16.msra.mxu0 %v711_v4 }
  0x22   : > { %401 = vmatpush.bf16.msra.mxu0 %v710_v5 }
  0x26   : > { %402 = vmatpush.bf16.msra.mxu0 %v709_v6 }
  0x2a   : > { %403 = vmatpush.bf16.msra.mxu0 %v708_v7 }
  0x2e   : > { %404 = vmatpush.bf16.msra.mxu0 %v707_v8 }
  0x31   : > { %405 = vmatmul.bf16.vlgmr.msra.gmra.mxu0 %v706_v9 }
  0xae   : > { %v406_v10 = vpop.f32.mrf.mxu0 }
  0xaf   : > { %v428_v12 = vmul.f32 %v406_v10, %v406_v10 }
  0xb6   : > { %v408_v11 = vpop.f32.mrf.mxu0 }
  0xb7   : > { %v418_v13 = vadd.f32 %v408_v11, %v406_v10  ;;  %v429_v14 = vmul.f32 %v408_v11, %v408_v11  ;;  %v718_v15 = vpack.c.bf16 %v408_v11, %v406_v10 }
  0xb9   : > { %v419_v16 = vrot.slane %v418_v13, 4  ;;  %v430_v17 = vadd.f32 %v429_v14, %v428_v12  ;;  %719 = vst [vmem:[%s309_s15] sm:$0xff] %v718_v15  }
  0xbb   : > { %v420_v18 = vadd.f32 %v419_v16, %v418_v13  ;;  %v431_v19 = vrot.slane %v430_v17, 4 }
  0xbd   : > { %v421_v20 = vrot.slane %v420_v18, 2  ;;  %v432_v21 = vadd.f32 %v431_v19, %v430_v17 }
  0xbf   : > { %v422_v22 = vadd.f32 %v421_v20, %v420_v18  ;;  %v433_v23 = vrot.slane %v432_v21, 2 }
  0xc1   : > { %v423_v24 = vrot.slane %v422_v22, 1  ;;  %v434_v25 = vadd.f32 %v433_v23, %v432_v21 }
  0xc3   : > { %v424_v27 = vadd.f32 %v423_v24, %v422_v22  ;;  %v435_v28 = vrot.slane %v434_v25, 1 }
  0xc5   : > { %v425_v30 = vadd.f32 %v424_v27, %v417_v26  ;;  %v436_v31 = vadd.f32 %v435_v28, %v434_v25 }
  0xc7   : > { %426 = vst [vmem:[%s863_s30] sm:$0x1] %v425_v30  ;;  %v437_v32 = vadd.f32 %v436_v31, %v427_v29 }
  0xc9   : > { %438 = vst [vmem:[%s868_s7] sm:$0x1] %v437_v32 }
  0xca PF: > { %s15_s19 = sadd.s32 1, %s799_s19   ;;  %s902_s15 = smov %s791_s17 }
  0xcb   : > { %p12_p7 = scmp.ge.s32.totalorder %s15_s19, 10   ;;  %s903_s16 = smov %s795_s18 }
  0xcc   : > { %s904_s17 = smov %s907_s20  ;;  %s905_s18 = smov %s911_s21 }
  0xcd   :  { %14 = sbr.rel (!%p12_p7) target bundleno = 3 (0x3), region = 89 }

// kernel: autoencoder_forward.61
= control target key start
LH: loop header
LB: loop body
LE: loop exit
PB: predicated region body
PF: predicated region fallthrough
CT: control target
= control target key end

     0   :  { %s780_s15 = smov 0   ;;  %s782_s16 = smov 0   ;;  %s845_s0 = inlined_call_operand.vmem [shape: bf16[4,2,16,64], index: 0, kind: input, shape index: {}]   ;;  %s846_s1 = inlined_call_operand.vmem [shape: bf16[4,64,128], index: 1, kind: input, shape index: {}]   ;;  %s847_s2 = inlined_call_operand.vmem [shape: bf16[4,2,16,128], index: 2, kind: output, shape index: {0}]   ;;  %s848_s3 = inlined_call_operand.vmem [shape: f32[4,2,1,128], index: 3, kind: output, shape index: {1}]   ;;  %s849_s4 = inlined_call_operand.vmem [shape: f32[4,2,1,128], index: 4, kind: output, shape index: {2}]  }
   0x1   :  { %s784_s17 = smov 0   ;;  %s786_s18 = smov 0  }
   0x2   :  { %s788_s19 = smov 0  }
   0x3 LB: > { %s30_s20 = sadd.s32 1, %s744_s17  ;;  %s34_s21 = sadd.s32 1, %s748_s18  ;;  %s752_s19 = sphi %s788_s19, %s15_s19   ;;  %s748_s18 = sphi %s786_s18, %s853_s18   ;;  %s744_s17 = sphi %s784_s17, %s852_s17   ;;  %s740_s16 = sphi %s782_s16, %s851_s16   ;;  %s736_s15 = sphi %s780_s15, %s850_s15  }
   0x4   : > { %p32_p0 = scmp.ge.s32.totalorder %s30_s20, 2  ;;  %p628_p1 = scmp.ge.s32.totalorder %s752_s19, 1 }
   0x5   : > { %p217_p2 = scmp.lt.s32.totalorder %s752_s19, 9 }
   0x6   : > { %s855_s20 = smov (%p32_p0, %s30_s20), 0  ;;  %s857_s21 = smov (!%p32_p0, %s34_s21), %s748_s18 }
   0x7   : > { %p218_p3 = pnand %p628_p1, %p217_p2  ;;  %p36_p4 = scmp.ge.s32.totalorder %s857_s21, 4 }
   0x8   : > { %p279_p5 = scmp.lt.s32.totalorder (!%p218_p3), %s740_s16, 3  ;;  %p281_p6 = scmp.lt.s32.totalorder (!%p218_p3), %s736_s15, 1 }
   0x9   : > { %s859_s21 = smov (%p36_p4, %s857_s21), 0  ;;  %221 = sbr.rel (%p218_p3) target bundleno = 186 (0xba), region = 28 }
   0xe   : > { %s861_s16 = smov (!%p279_p5, %s740_s16), 3  ;;  %s863_s15 = smov (!%p281_p6, %s736_s15), 1  ;;  %v754_v2 = vmov 0.0   ;;  %vm365_vm0 = vcmask 523264  }
   0xf   : > { %s662_s22 = sshll.u32 %s861_s16, 5  ;;  %s630_s26 = sshll.u32 %s861_s16, 2 }
  0x10   : > { %s296_s25 = scalar_lea.vmem %s846_s1, %s662_s22  ;;  %s637_s27 = sshll.u32 %s861_s16, 1 }
  0x11   : > { %v667_v0 = vld [vmem:[%s296_s25 + $0x18] sm:$0xff]  ;;  %s629_s28 = sshll.u32 %s863_s15, 1  ;;  %s316_s29 = sadd.s32 %s637_s27, %s863_s15  ;;  %v666_v1 = vld [vmem:[%s296_s25 + $0x10] sm:$0xff]  ;;  %v665_v3 = vld [vmem:[%s296_s25 + $0x8] sm:$0xff] }
  0x12   : > { %373 = vmatpush.bf16.msra.mxu0 %v667_v0  ;;  %s816_s6 = scalar_lea.vmem %s849_s4, %s316_s29  ;;  %s288_s7 = sadd.s32 %s630_s26, %s629_s28  ;;  %v664_v4 = vld [vmem:[%s296_s25] sm:$0xff] }
  0x13   : > { %388 = vst [vmem:[%s816_s6] sm:$0x1] %v754_v2  ;;  %s631_s8 = sshll.u32 %s288_s7, 2  ;;  %s317_s14 = scalar_lea.vmem %s848_s3, %s316_s29 }
  0x14   : > { %s290_s11 = scalar_lea.vmem %s845_s0, %s631_s8  ;;  %387 = vst [vmem:[%s317_s14] sm:$0x1] %v754_v2  ;;  %s309_s22 = scalar_lea.vmem %s847_s2, %s631_s8 }
  0x15   : > { %v663_v5 = vld [vmem:[%s290_s11] sm:$0xff] }
  0x16   : > { %374 = vmatpush.bf16.msra.mxu0 %v666_v1 }
  0x1a   : > { %375 = vmatpush.bf16.msra.mxu0 %v665_v3  ;;  %v399_v25 = vld [vmem:[%s816_s6] sm:$0x1] }
  0x1b   : > { %v389_v22 = vld [vmem:[%s317_s14] sm:$0x1] }
  0x1e   : > { %376 = vmatpush.bf16.msra.mxu0 %v664_v4 }
  0x21   : > { %659 = vmatmul.msk.bf16.vlgmr.msra.gmra.mxu0 %vm365_vm0, %v663_v5 }
  0x9e   : > { %v378_v6 = vpop.f32.mrf.mxu0 }
  0x9f   : > { %v400_v8 = vmul.f32 %v378_v6, %v378_v6 }
  0xa6   : > { %v380_v7 = vpop.f32.mrf.mxu0 }
  0xa7   : > { %v390_v9 = vadd.f32 %v380_v7, %v378_v6  ;;  %v401_v10 = vmul.f32 %v380_v7, %v380_v7  ;;  %v671_v11 = vpack.c.bf16 %v380_v7, %v378_v6 }
  0xa9   : > { %v391_v12 = vrot.slane %v390_v9, 4  ;;  %v402_v13 = vadd.f32 %v401_v10, %v400_v8  ;;  %672 = vst [vmem:[%s309_s22] sm:$0xff] %v671_v11  }
  0xab   : > { %v392_v14 = vadd.f32 %v391_v12, %v390_v9  ;;  %v403_v15 = vrot.slane %v402_v13, 4 }
  0xad   : > { %v393_v16 = vrot.slane %v392_v14, 2  ;;  %v404_v17 = vadd.f32 %v403_v15, %v402_v13 }
  0xaf   : > { %v394_v18 = vadd.f32 %v393_v16, %v392_v14  ;;  %v405_v19 = vrot.slane %v404_v17, 2 }
  0xb1   : > { %v395_v20 = vrot.slane %v394_v18, 1  ;;  %v406_v21 = vadd.f32 %v405_v19, %v404_v17 }
  0xb3   : > { %v396_v23 = vadd.f32 %v395_v20, %v394_v18  ;;  %v407_v24 = vrot.slane %v406_v21, 1 }
  0xb5   : > { %v397_v26 = vadd.f32 %v396_v23, %v389_v22  ;;  %v408_v27 = vadd.f32 %v407_v24, %v406_v21 }
  0xb7   : > { %398 = vst [vmem:[%s317_s14] sm:$0x1] %v397_v26  ;;  %v409_v28 = vadd.f32 %v408_v27, %v399_v25 }
  0xb9   : > { %410 = vst [vmem:[%s816_s6] sm:$0x1] %v409_v28 }
  0xba PF: > { %s15_s19 = sadd.s32 1, %s752_s19   ;;  %s850_s15 = smov %s744_s17 }
  0xbb   : > { %p12_p7 = scmp.ge.s32.totalorder %s15_s19, 10   ;;  %s851_s16 = smov %s748_s18 }
  0xbc   : > { %s852_s17 = smov %s855_s20  ;;  %s853_s18 = smov %s859_s21 }
  0xbd   :  { %14 = sbr.rel (!%p12_p7) target bundleno = 3 (0x3), region = 89 }

// kernel: autoencoder_forward.63
= control target key start
LH: loop header
LB: loop body
LE: loop exit
PB: predicated region body
PF: predicated region fallthrough
CT: control target
= control target key end

     0   :  { %s1000_s15 = smov 0   ;;  %s1002_s16 = smov 0   ;;  %s1110_s0 = inlined_call_operand.vmem [shape: bf16[1,2,64,144], index: 0, kind: input, shape index: {}]   ;;  %s1111_s1 = inlined_call_operand.vmem [shape: bf16[1,144,128], index: 1, kind: input, shape index: {}]   ;;  %s1112_s2 = inlined_call_operand.vmem [shape: bf16[1,2,64,128], index: 2, kind: output, shape index: {0}]   ;;  %s1113_s3 = inlined_call_operand.vmem [shape: f32[1,2,1,128], index: 3, kind: output, shape index: {1}]   ;;  %s1114_s4 = inlined_call_operand.vmem [shape: f32[1,2,1,128], index: 4, kind: output, shape index: {2}]  }
   0x1   :  { %s1004_s17 = smov 0  }
   0x2 LB: > { %s30_s18 = sadd.s32 1, %s968_s16  ;;  %p795_p0 = scmp.ge.s32.totalorder %s972_s17, 1  ;;  %s972_s17 = sphi %s1004_s17, %s15_s17   ;;  %s968_s16 = sphi %s1002_s16, %s1116_s16   ;;  %s964_s15 = sphi %s1000_s15, %s1115_s15  }
   0x3   : > { %p32_p1 = scmp.ge.s32.totalorder %s30_s18, 2  ;;  %p218_p2 = scmp.lt.s32.totalorder %s972_s17, 3 }
   0x5   : > { %s1118_s18 = smov (%p32_p1, %s30_s18), 0  ;;  %p219_p3 = pnand %p795_p0, %p218_p2 }
   0x6   : > { %p283_p4 = scmp.lt.s32.totalorder (!%p219_p3), %s964_s15, 1 }
   0x7   : > { %222 = sbr.rel (%p219_p3) target bundleno = 223 (0xdf), region = 28 }
   0xc   : > { %v891_v0 = vld [vmem:[%s1111_s1 + $0x38] sm:$0xff]  ;;  %v892_v1 = vld [vmem:[%s1111_s1 + $0x40] sm:$0xff]  ;;  %v890_v2 = vld [vmem:[%s1111_s1 + $0x30] sm:$0xff]  ;;  %s1120_s15 = smov (!%p283_p4, %s964_s15), 1  ;;  %vm445_vm0 = vcmask 130048   ;;  %v974_v38 = vmov 0.0  }
   0xd   : > { %458 = vmatpush.bf16.msra.mxu0 %v891_v0  ;;  %916 = vmatpush.bf16.msra.mxu2 %v891_v0  ;;  %s874_s25 = sshll.u32 %s1120_s15, 6  ;;  %v889_v3 = vld [vmem:[%s1111_s1 + $0x28] sm:$0xff]  ;;  %v888_v9 = vld [vmem:[%s1111_s1 + $0x20] sm:$0xff]  ;;  %v887_v11 = vld [vmem:[%s1111_s1 + $0x18] sm:$0xff]  ;;  %s1077_s21 = scalar_lea.vmem %s1113_s3, %s1120_s15 }
   0xe   : > { %924 = vmatpush.bf16.msra.mxu3 %v892_v1  ;;  %494 = vmatpush.bf16.msra.mxu1 %v892_v1  ;;  %s1033_s28 = scalar_lea.vmem %s1110_s0, %s874_s25  ;;  %v886_v12 = vld [vmem:[%s1111_s1 + $0x10] sm:$0xff]  ;;  %v885_v16 = vld [vmem:[%s1111_s1 + $0x8] sm:$0xff]  ;;  %v884_v17 = vld [vmem:[%s1111_s1] sm:$0xff]  ;;  %s1083_s24 = scalar_lea.vmem %s1114_s4, %s1120_s15  ;;  %520 = vst [vmem:[%s1077_s21] sm:$0x1] %v974_v38 }
   0xf   : > { %v878_v4 = vld [vmem:[%s1033_s28 + $0x14] sm:$0xf]  ;;  %v812_v5 = vld [vmem:[%s1033_s28 + $0x18] sm:$0xf0]  ;;  %v876_v7 = vld [vmem:[%s1033_s28 + $0x4] sm:$0xf] }
  0x10   : > { %v815_v6 = vor.u32 %v878_v4, %v812_v5  ;;  %v804_v8 = vld [vmem:[%s1033_s28 + $0x8] sm:$0xf0]  ;;  %v880_v13 = vld [vmem:[%s1033_s28 + $0x24] sm:$0xf]  ;;  %v802_v18 = vld [vmem:[%s1033_s28] sm:$0xf] }
  0x11   : > { %459 = vmatpush.bf16.msra.mxu0 %v890_v2  ;;  %917 = vmatpush.bf16.msra.mxu2 %v890_v2  ;;  %v807_v10 = vor.u32 %v876_v7, %v804_v8  ;;  %v820_v14 = vld [vmem:[%s1033_s28 + $0x28] sm:$0xf0]  ;;  %v877_v19 = vld [vmem:[%s1033_s28 + $0x4] sm:$0xf0]  ;;  %v818_v20 = vld [vmem:[%s1033_s28 + $0x20] sm:$0xf] }
  0x12   : > { %869 = vmatmul.msk.bf16.vlgmr.msra.gmra.mxu3 %vm445_vm0, %v815_v6  ;;  %v823_v15 = vor.u32 %v880_v13, %v820_v14  ;;  %v881_v21 = vld [vmem:[%s1033_s28 + $0x24] sm:$0xf0]  ;;  %v803_v22 = vor.u32 %v877_v19, %v802_v18  ;;  %v882_v24 = vld [vmem:[%s1033_s28 + $0x34] sm:$0xf]  ;;  %v828_v25 = vld [vmem:[%s1033_s28 + $0x38] sm:$0xf0] }
  0x13   : > { %868 = vmatmul.msk.bf16.vlgmr.msra.gmra.mxu1 %vm445_vm0, %v807_v10  ;;  %v819_v23 = vor.u32 %v881_v21, %v818_v20  ;;  %v831_v26 = vor.u32 %v882_v24, %v828_v25  ;;  %v810_v27 = vld [vmem:[%s1033_s28 + $0x10] sm:$0xf]  ;;  %v879_v28 = vld [vmem:[%s1033_s28 + $0x14] sm:$0xf0]  ;;  %521 = vst [vmem:[%s1083_s24] sm:$0x1] %v974_v38  ;;  %s875_s25 = sshll.u32 %s1120_s15, 5 }
  0x14   : > { %v826_v29 = vld [vmem:[%s1033_s28 + $0x30] sm:$0xf]  ;;  %v883_v30 = vld [vmem:[%s1033_s28 + $0x34] sm:$0xf0]  ;;  %v811_v31 = vor.u32 %v879_v28, %v810_v27  ;;  %s1091_s28 = scalar_lea.vmem %s1112_s2, %s875_s25 }
  0x15   : > { %460 = vmatpush.bf16.msra.mxu0 %v889_v3  ;;  %918 = vmatpush.bf16.msra.mxu2 %v889_v3  ;;  %v827_v32 = vor.u32 %v883_v30, %v826_v29  ;;  %v522_v29 = vld [vmem:[%s1077_s21] sm:$0x1] }
  0x19   : > { %461 = vmatpush.bf16.msra.mxu0 %v888_v9  ;;  %919 = vmatpush.bf16.msra.mxu2 %v888_v9 }
  0x1d   : > { %462 = vmatpush.bf16.msra.mxu0 %v887_v11  ;;  %920 = vmatpush.bf16.msra.mxu2 %v887_v11 }
  0x21   : > { %463 = vmatpush.bf16.msra.mxu0 %v886_v12  ;;  %921 = vmatpush.bf16.msra.mxu2 %v886_v12 }
  0x22   : > { %870 = vmatmul.msk.bf16.gmra.mxu3 %vm445_vm0, %v823_v15 }
  0x25   : > { %464 = vmatpush.bf16.msra.mxu0 %v885_v16  ;;  %922 = vmatpush.bf16.msra.mxu2 %v885_v16 }
  0x29   : > { %465 = vmatpush.bf16.msra.mxu0 %v884_v17  ;;  %923 = vmatpush.bf16.msra.mxu2 %v884_v17 }
  0x2c   : > { %466 = vmatmul.bf16.vlgmr.msra.gmra.mxu0 %v803_v22  ;;  %476 = vmatmul.bf16.vlgmr.msra.gmra.mxu2 %v819_v23 }
  0x32   : > { %871 = vmatmul.msk.bf16.gmra.mxu3 %vm445_vm0, %v831_v26 }
  0x3c   : > { %471 = vmatmul.bf16.gmra.mxu0 %v811_v31  ;;  %481 = vmatmul.bf16.gmra.mxu2 %v827_v32  ;;  %v538_v32 = vld [vmem:[%s1083_s24] sm:$0x1] }
  0x90   : > { %v496_v35 = vpop.f32.mrf.mxu1 }
  0x95   : > { %v501_v33 = vpop.f32.mrf.mxu3 }
  0x98   : > { %v498_v40 = vpop.f32.mrf.mxu1 }
  0x9d   : > { %v503_v34 = vpop.f32.mrf.mxu3 }
  0xa5   : > { %v506_v37 = vpop.f32.mrf.mxu3 }
  0xa9   : > { %v467_v36 = vpop.f32.mrf.mxu0 }
  0xaa   : > { %v497_v42 = vadd.f32 %v496_v35, %v467_v36 }
  0xac   : > { %v539_v55 = vmul.f32 %v497_v42, %v497_v42 }
  0xad   : > { %v508_v44 = vpop.f32.mrf.mxu3 }
  0xaf   : > { %v477_v39 = vpop.f32.mrf.mxu2 }
  0xb0   : > { %v507_v47 = vadd.f32 %v506_v37, %v477_v39 }
  0xb1   : > { %v469_v41 = vpop.f32.mrf.mxu0 }
  0xb2   : > { %v499_v43 = vadd.f32 %v498_v40, %v469_v41  ;;  %v543_v2 = vmul.f32 %v507_v47, %v507_v47 }
  0xb4   : > { %v896_v45 = vpack.c.bf16 %v499_v43, %v497_v42  ;;  %v540_v53 = vmul.f32 %v499_v43, %v499_v43  ;;  %v523_v56 = vadd.f32 %v499_v43, %v497_v42 }
  0xb5   : > { %v511_v52 = vpop.f32.mrf.mxu3 }
  0xb6   : > { %897 = vst [vmem:[%s1091_s28] sm:$0xff] %v896_v45   ;;  %v547_v59 = vadd.f32 %v540_v53, %v539_v55 }
  0xb7   : > { %v479_v46 = vpop.f32.mrf.mxu2 }
  0xb8   : > { %v509_v48 = vadd.f32 %v508_v44, %v479_v46 }
  0xb9   : > { %v472_v49 = vpop.f32.mrf.mxu0 }
  0xba   : > { %v906_v50 = vpack.c.bf16 %v509_v48, %v507_v47  ;;  %v502_v51 = vadd.f32 %v501_v33, %v472_v49  ;;  %v544_v8 = vmul.f32 %v509_v48, %v509_v48 }
  0xbc   : > { %914 = vst [vmem:[%s1091_s28 + $0x10] sm:$0xff] %v906_v50   ;;  %v541_v57 = vmul.f32 %v502_v51, %v502_v51  ;;  %v524_v60 = vadd.f32 %v523_v56, %v502_v51 }
  0xbd   : > { %v513_v6 = vpop.f32.mrf.mxu3 }
  0xbe   : > { %v548_v62 = vadd.f32 %v547_v59, %v541_v57 }
  0xbf   : > { %v482_v54 = vpop.f32.mrf.mxu2 }
  0xc0   : > { %v512_v3 = vadd.f32 %v511_v52, %v482_v54 }
  0xc1   : > { %v474_v58 = vpop.f32.mrf.mxu0 }
  0xc2   : > { %v504_v61 = vadd.f32 %v503_v34, %v474_v58  ;;  %v545_v12 = vmul.f32 %v512_v3, %v512_v3 }
  0xc4   : > { %v525_v63 = vadd.f32 %v524_v60, %v504_v61  ;;  %v542_v0 = vmul.f32 %v504_v61, %v504_v61  ;;  %v901_v1 = vpack.c.bf16 %v504_v61, %v502_v51 }
  0xc6   : > { %v526_v4 = vadd.f32 %v525_v63, %v507_v47  ;;  %v549_v5 = vadd.f32 %v548_v62, %v542_v0  ;;  %913 = vst [vmem:[%s1091_s28 + $0x8] sm:$0xff] %v901_v1  }
  0xc7   : > { %v484_v7 = vpop.f32.mrf.mxu2 }
  0xc8   : > { %v550_v9 = vadd.f32 %v549_v5, %v543_v2  ;;  %v514_v10 = vadd.f32 %v513_v6, %v484_v7  ;;  %v527_v11 = vadd.f32 %v526_v4, %v509_v48 }
  0xca   : > { %v528_v13 = vadd.f32 %v527_v11, %v512_v3  ;;  %v551_v14 = vadd.f32 %v550_v9, %v544_v8  ;;  %v911_v15 = vpack.c.bf16 %v514_v10, %v512_v3  ;;  %v546_v17 = vmul.f32 %v514_v10, %v514_v10 }
  0xcc   : > { %v529_v16 = vadd.f32 %v528_v13, %v514_v10  ;;  %v552_v18 = vadd.f32 %v551_v14, %v545_v12  ;;  %915 = vst [vmem:[%s1091_s28 + $0x18] sm:$0xff] %v911_v15  }
  0xce   : > { %v530_v19 = vrot.slane %v529_v16, 4  ;;  %v553_v20 = vadd.f32 %v552_v18, %v546_v17 }
  0xd0   : > { %v531_v21 = vadd.f32 %v530_v19, %v529_v16  ;;  %v554_v22 = vrot.slane %v553_v20, 4 }
  0xd2   : > { %v532_v23 = vrot.slane %v531_v21, 2  ;;  %v555_v24 = vadd.f32 %v554_v22, %v553_v20 }
  0xd4   : > { %v533_v25 = vadd.f32 %v532_v23, %v531_v21  ;;  %v556_v26 = vrot.slane %v555_v24, 2 }
  0xd6   : > { %v534_v27 = vrot.slane %v533_v25, 1  ;;  %v557_v28 = vadd.f32 %v556_v26, %v555_v24 }
  0xd8   : > { %v535_v30 = vadd.f32 %v534_v27, %v533_v25  ;;  %v558_v31 = vrot.slane %v557_v28, 1 }
  0xda   : > { %v536_v33 = vadd.f32 %v535_v30, %v522_v29  ;;  %v559_v34 = vadd.f32 %v558_v31, %v557_v28 }
  0xdc   : > { %537 = vst [vmem:[%s1077_s21] sm:$0x1] %v536_v33  ;;  %v560_v35 = vadd.f32 %v559_v34, %v538_v32 }
  0xde   : > { %561 = vst [vmem:[%s1083_s24] sm:$0x1] %v560_v35 }
  0xdf PF: > { %s15_s17 = sadd.s32 1, %s972_s17   ;;  %s1115_s15 = smov %s968_s16 }
  0xe0   : > { %p12_p5 = scmp.ge.s32.totalorder %s15_s17, 4   ;;  %s1116_s16 = smov %s1118_s18 }
  0xe2   :  { %14 = sbr.rel (!%p12_p5) target bundleno = 2 (0x2), region = 89 }

// kernel: autoencoder_forward.65
= control target key start
LH: loop header
LB: loop body
LE: loop exit
PB: predicated region body
PF: predicated region fallthrough
CT: control target
= control target key end

     0   :  { %s871_s15 = smov 0   ;;  %s873_s16 = smov 0   ;;  %s952_s0 = inlined_call_operand.vmem [shape: bf16[4,2,64,32], index: 0, kind: input, shape index: {}]   ;;  %s953_s1 = inlined_call_operand.vmem [shape: bf16[4,32,128], index: 1, kind: input, shape index: {}]   ;;  %s954_s2 = inlined_call_operand.vmem [shape: bf16[4,2,64,128], index: 2, kind: output, shape index: {0}]   ;;  %s955_s3 = inlined_call_operand.vmem [shape: f32[4,2,1,128], index: 3, kind: output, shape index: {1}]   ;;  %s956_s4 = inlined_call_operand.vmem [shape: f32[4,2,1,128], index: 4, kind: output, shape index: {2}]  }
   0x1   :  { %s875_s17 = smov 0   ;;  %s877_s18 = smov 0  }
   0x2   :  { %s879_s19 = smov 0  }
   0x3 LB: > { %s30_s20 = sadd.s32 1, %s835_s17  ;;  %s34_s21 = sadd.s32 1, %s839_s18  ;;  %s843_s19 = sphi %s879_s19, %s15_s19   ;;  %s839_s18 = sphi %s877_s18, %s960_s18   ;;  %s835_s17 = sphi %s875_s17, %s959_s17   ;;  %s831_s16 = sphi %s873_s16, %s958_s16   ;;  %s827_s15 = sphi %s871_s15, %s957_s15  }
   0x4   : > { %p32_p0 = scmp.ge.s32.totalorder %s30_s20, 2  ;;  %p687_p1 = scmp.ge.s32.totalorder %s843_s19, 1 }
   0x5   : > { %p217_p2 = scmp.lt.s32.totalorder %s843_s19, 9 }
   0x6   : > { %s962_s20 = smov (%p32_p0, %s30_s20), 0  ;;  %s964_s21 = smov (!%p32_p0, %s34_s21), %s839_s18 }
   0x7   : > { %p218_p3 = pnand %p687_p1, %p217_p2  ;;  %p36_p4 = scmp.ge.s32.totalorder %s964_s21, 4 }
   0x8   : > { %p279_p5 = scmp.lt.s32.totalorder (!%p218_p3), %s831_s16, 3  ;;  %p281_p6 = scmp.lt.s32.totalorder (!%p218_p3), %s827_s15, 1 }
   0x9   : > { %s966_s21 = smov (%p36_p4, %s964_s21), 0  ;;  %221 = sbr.rel (%p218_p3) target bundleno = 190 (0xbe), region = 28 }
   0xe   : > { %s968_s16 = smov (!%p279_p5, %s831_s16), 3  ;;  %s970_s15 = smov (!%p281_p6, %s827_s15), 1  ;;  %vm370_vm0 = vcmask 261120   ;;  %v845_v6 = vmov 0.0  }
   0xf   : > { %s689_s22 = sshll.u32 %s968_s16, 4  ;;  %s688_s23 = sshll.u32 %s970_s15, 3 }
  0x10   : > { %s296_s26 = scalar_lea.vmem %s953_s1, %s689_s22  ;;  %s907_s27 = sadd.s32 %s689_s22, %s688_s23 }
  0x11   : > { %v734_v0 = vld [vmem:[%s296_s26 + $0x8] sm:$0xff]  ;;  %s690_s28 = sshll.u32 %s907_s27, 2  ;;  %v733_v1 = vld [vmem:[%s296_s26] sm:$0xff]  ;;  %s696_s6 = sshll.u32 %s968_s16, 1 }
  0x12   : > { %s290_s5 = scalar_lea.vmem %s952_s0, %s690_s28  ;;  %389 = vmatpush.bf16.msra.mxu0 %v734_v0  ;;  %758 = vmatpush.bf16.msra.mxu1 %v734_v0  ;;  %s316_s7 = sadd.s32 %s696_s6, %s970_s15 }
  0x13   : > { %759 = vmatpush.bf16.msra.mxu2 %v734_v0  ;;  %760 = vmatpush.bf16.msra.mxu3 %v734_v0  ;;  %v729_v2 = vld [vmem:[%s290_s5] sm:$0xff]  ;;  %v730_v3 = vld [vmem:[%s290_s5 + $0x8] sm:$0xff]  ;;  %v731_v4 = vld [vmem:[%s290_s5 + $0x10] sm:$0xff]  ;;  %s919_s10 = scalar_lea.vmem %s955_s3, %s316_s7  ;;  %s924_s13 = scalar_lea.vmem %s956_s4, %s316_s7 }
  0x14   : > { %v732_v5 = vld [vmem:[%s290_s5 + $0x18] sm:$0xff]  ;;  %416 = vst [vmem:[%s919_s10] sm:$0x1] %v845_v6  ;;  %s309_s16 = scalar_lea.vmem %s954_s2, %s690_s28 }
  0x15   : > { %417 = vst [vmem:[%s924_s13] sm:$0x1] %v845_v6 }
  0x16   : > { %390 = vmatpush.bf16.msra.mxu0 %v733_v1  ;;  %761 = vmatpush.bf16.msra.mxu1 %v733_v1 }
  0x17   : > { %762 = vmatpush.bf16.msra.mxu2 %v733_v1  ;;  %763 = vmatpush.bf16.msra.mxu3 %v733_v1 }
  0x19   : > { %722 = vmatmul.msk.bf16.vlgmr.msra.gmra.mxu0 %vm370_vm0, %v729_v2  ;;  %723 = vmatmul.msk.bf16.vlgmr.msra.gmra.mxu1 %vm370_vm0, %v730_v3 }
  0x1a   : > { %724 = vmatmul.msk.bf16.vlgmr.msra.gmra.mxu2 %vm370_vm0, %v731_v4  ;;  %725 = vmatmul.msk.bf16.vlgmr.msra.gmra.mxu3 %vm370_vm0, %v732_v5 }
  0x1b   : > { %v418_v50 = vld [vmem:[%s919_s10] sm:$0x1] }
  0x1c   : > { %v434_v53 = vld [vmem:[%s924_s13] sm:$0x1] }
  0x96   : > { %v392_v7 = vpop.f32.mrf.mxu0  ;;  %v397_v8 = vpop.f32.mrf.mxu1 }
  0x97   : > { %v435_v13 = vmul.f32 %v392_v7, %v392_v7  ;;  %v437_v18 = vmul.f32 %v397_v8, %v397_v8 }
  0x9d   : > { %v402_v9 = vpop.f32.mrf.mxu2  ;;  %v407_v10 = vpop.f32.mrf.mxu3 }
  0x9e   : > { %v394_v11 = vpop.f32.mrf.mxu0  ;;  %v399_v12 = vpop.f32.mrf.mxu1  ;;  %v439_v24 = vmul.f32 %v402_v9, %v402_v9  ;;  %v441_v34 = vmul.f32 %v407_v10, %v407_v10 }
  0x9f   : > { %v419_v14 = vadd.f32 %v394_v11, %v392_v7  ;;  %v436_v15 = vmul.f32 %v394_v11, %v394_v11  ;;  %v738_v16 = vpack.c.bf16 %v394_v11, %v392_v7  ;;  %v743_v17 = vpack.c.bf16 %v399_v12, %v397_v8 }
  0xa0   : > { %v438_v22 = vmul.f32 %v399_v12, %v399_v12 }
  0xa1   : > { %v443_v19 = vadd.f32 %v436_v15, %v435_v13  ;;  %739 = vst [vmem:[%s309_s16] sm:$0xff] %v738_v16   ;;  %v420_v20 = vadd.f32 %v419_v14, %v397_v8 }
  0xa2   : > { %755 = vst [vmem:[%s309_s16 + $0x8] sm:$0xff] %v743_v17  }
  0xa3   : > { %v421_v21 = vadd.f32 %v420_v20, %v399_v12  ;;  %v444_v23 = vadd.f32 %v443_v19, %v437_v18 }
  0xa5   : > { %v445_v25 = vadd.f32 %v444_v23, %v438_v22  ;;  %v404_v26 = vpop.f32.mrf.mxu2  ;;  %v422_v27 = vadd.f32 %v421_v21, %v402_v9  ;;  %v409_v28 = vpop.f32.mrf.mxu3 }
  0xa6   : > { %v748_v29 = vpack.c.bf16 %v404_v26, %v402_v9  ;;  %v753_v30 = vpack.c.bf16 %v409_v28, %v407_v10  ;;  %v440_v32 = vmul.f32 %v404_v26, %v404_v26  ;;  %v442_v38 = vmul.f32 %v409_v28, %v409_v28 }
  0xa7   : > { %v423_v31 = vadd.f32 %v422_v27, %v404_v26  ;;  %v446_v33 = vadd.f32 %v445_v25, %v439_v24 }
  0xa8   : > { %756 = vst [vmem:[%s309_s16 + $0x10] sm:$0xff] %v748_v29  }
  0xa9   : > { %v447_v35 = vadd.f32 %v446_v33, %v440_v32  ;;  %v424_v36 = vadd.f32 %v423_v31, %v407_v10  ;;  %757 = vst [vmem:[%s309_s16 + $0x18] sm:$0xff] %v753_v30  }
  0xab   : > { %v425_v37 = vadd.f32 %v424_v36, %v409_v28  ;;  %v448_v39 = vadd.f32 %v447_v35, %v441_v34 }
  0xad   : > { %v426_v40 = vrot.slane %v425_v37, 4  ;;  %v449_v41 = vadd.f32 %v448_v39, %v442_v38 }
  0xaf   : > { %v427_v42 = vadd.f32 %v426_v40, %v425_v37  ;;  %v450_v43 = vrot.slane %v449_v41, 4 }
  0xb1   : > { %v428_v44 = vrot.slane %v427_v42, 2  ;;  %v451_v45 = vadd.f32 %v450_v43, %v449_v41 }
  0xb3   : > { %v429_v46 = vadd.f32 %v428_v44, %v427_v42  ;;  %v452_v47 = vrot.slane %v451_v45, 2 }
  0xb5   : > { %v430_v48 = vrot.slane %v429_v46, 1  ;;  %v453_v49 = vadd.f32 %v452_v47, %v451_v45 }
  0xb7   : > { %v431_v51 = vadd.f32 %v430_v48, %v429_v46  ;;  %v454_v52 = vrot.slane %v453_v49, 1 }
  0xb9   : > { %v432_v54 = vadd.f32 %v431_v51, %v418_v50  ;;  %v455_v55 = vadd.f32 %v454_v52, %v453_v49 }
  0xbb   : > { %433 = vst [vmem:[%s919_s10] sm:$0x1] %v432_v54  ;;  %v456_v56 = vadd.f32 %v455_v55, %v434_v53 }
  0xbd   : > { %457 = vst [vmem:[%s924_s13] sm:$0x1] %v456_v56 }
  0xbe PF: > { %s15_s19 = sadd.s32 1, %s843_s19   ;;  %s957_s15 = smov %s835_s17 }
  0xbf   : > { %p12_p7 = scmp.ge.s32.totalorder %s15_s19, 10   ;;  %s958_s16 = smov %s839_s18 }
  0xc0   : > { %s959_s17 = smov %s962_s20  ;;  %s960_s18 = smov %s966_s21 }
  0xc1   :  { %14 = sbr.rel (!%p12_p7) target bundleno = 3 (0x3), region = 89 }

// kernel: autoencoder_forward.66
= control target key start
LH: loop header
LB: loop body
LE: loop exit
PB: predicated region body
PF: predicated region fallthrough
CT: control target
= control target key end

     0   :  { %s623_s12 = smov 0   ;;  %s625_s13 = smov 0   ;;  %s687_s0 = inlined_call_operand.vmem [shape: bf16[4,2,64,128], index: 0, kind: input, shape index: {}]   ;;  %s688_s1 = inlined_call_operand.vmem [shape: f32[2,1,128], index: 1, kind: input, shape index: {}]   ;;  %s689_s2 = inlined_call_operand.vmem [shape: f32[2,1,128], index: 2, kind: input, shape index: {}]   ;;  %s690_s3 = inlined_call_operand.vmem [shape: bf16[4,2,64,128], index: 3, kind: output, shape index: {}]  }
   0x1   :  { %s627_s14 = smov 0   ;;  %s629_s15 = smov 0  }
   0x2   :  { %s631_s16 = smov 0  }
   0x3 LB: > { %s28_s17 = sadd.s32 1, %s593_s14  ;;  %s32_s18 = sadd.s32 1, %s597_s15  ;;  %s601_s16 = sphi %s631_s16, %s13_s16   ;;  %s597_s15 = sphi %s629_s15, %s694_s15   ;;  %s593_s14 = sphi %s627_s14, %s693_s14   ;;  %s589_s13 = sphi %s625_s13, %s692_s13   ;;  %s585_s12 = sphi %s623_s12, %s691_s12  }
   0x4   : > { %p30_p0 = scmp.ge.s32.totalorder %s28_s17, 2  ;;  %p470_p1 = scmp.ge.s32.totalorder %s601_s16, 1 }
   0x5   : > { %p189_p2 = scmp.lt.s32.totalorder %s601_s16, 9 }
   0x6   : > { %s696_s17 = smov (%p30_p0, %s28_s17), 0  ;;  %s698_s18 = smov (!%p30_p0, %s32_s18), %s597_s15 }
   0x7   : > { %p190_p3 = pnand %p470_p1, %p189_p2  ;;  %p34_p4 = scmp.ge.s32.totalorder %s698_s18, 4 }
   0x8   : > { %p236_p5 = scmp.lt.s32.totalorder (!%p190_p3), %s589_s13, 3  ;;  %p238_p6 = scmp.lt.s32.totalorder (!%p190_p3), %s585_s12, 1 }
   0x9   : > { %s700_s18 = smov (%p34_p4, %s698_s18), 0  ;;  %193 = sbr.rel (%p190_p3) target bundleno = 34 (0x22), region = 32 }
   0xe   : > { %s702_s13 = smov (!%p236_p5, %s589_s13), 3  ;;  %s704_s12 = smov (!%p238_p6, %s585_s12), 1 }
   0xf   : > { %s472_s19 = sshll.u32 %s702_s13, 4  ;;  %s471_s20 = sshll.u32 %s704_s12, 3 }
  0x10   : > { %s251_s23 = scalar_lea.vmem %s688_s1, %s704_s12  ;;  %s656_s24 = sadd.s32 %s472_s19, %s471_s20 }
  0x11   : > { %s254_s27 = scalar_lea.vmem %s689_s2, %s704_s12  ;;  %s473_s28 = sshll.u32 %s656_s24, 2  ;;  %v561_v0 = vld [vmem:[%s251_s23] ss:$0 sm:$0xff] }
  0x12   : > { %s247_s4 = scalar_lea.vmem %s687_s0, %s473_s28  ;;  %v562_v6 = vld [vmem:[%s254_s27] ss:$0 sm:$0xff]  ;;  %s267_s7 = scalar_lea.vmem %s690_s3, %s473_s28 }
  0x13   : > { %v480_v1 = vld [vmem:[%s247_s4] sm:$0xff]   ;;  %v515_v2 = vld [vmem:[%s247_s4 + $0x8] sm:$0xff]   ;;  %v516_v3 = vld [vmem:[%s247_s4 + $0x10] sm:$0xff]  }
  0x14   : > { %v481_v4 = vunpack.c.l.bf16 %v480_v1  ;;  %v482_v5 = vunpack.c.h.bf16 %v480_v1  ;;  %v485_v7 = vunpack.c.l.bf16 %v515_v2  ;;  %v486_v8 = vunpack.c.h.bf16 %v515_v2  ;;  %v517_v9 = vld [vmem:[%s247_s4 + $0x18] sm:$0xff]  }
  0x15   : > { %v489_v10 = vunpack.c.l.bf16 %v516_v3  ;;  %v490_v11 = vunpack.c.h.bf16 %v516_v3  ;;  %v493_v12 = vunpack.c.l.bf16 %v517_v9  ;;  %v494_v13 = vunpack.c.h.bf16 %v517_v9 }
  0x16   : > { %v289_v14 = vmul.f32 %v561_v0, %v481_v4  ;;  %v290_v15 = vmul.f32 %v561_v0, %v482_v5  ;;  %v291_v16 = vmul.f32 %v561_v0, %v485_v7  ;;  %v292_v17 = vmul.f32 %v561_v0, %v486_v8 }
  0x17   : > { %v293_v18 = vmul.f32 %v561_v0, %v489_v10  ;;  %v294_v19 = vmul.f32 %v561_v0, %v490_v11  ;;  %v295_v20 = vmul.f32 %v561_v0, %v493_v12  ;;  %v296_v21 = vmul.f32 %v561_v0, %v494_v13 }
  0x18   : > { %v301_v22 = vadd.f32 %v562_v6, %v289_v14  ;;  %v302_v23 = vadd.f32 %v562_v6, %v290_v15  ;;  %v303_v24 = vadd.f32 %v562_v6, %v291_v16  ;;  %v304_v25 = vadd.f32 %v562_v6, %v292_v17 }
  0x19   : > { %v305_v26 = vadd.f32 %v562_v6, %v293_v18  ;;  %v306_v27 = vadd.f32 %v562_v6, %v294_v19  ;;  %v307_v28 = vadd.f32 %v562_v6, %v295_v20  ;;  %v308_v29 = vadd.f32 %v562_v6, %v296_v21 }
  0x1a   : > { %v309_v30 = vmax.f32 %v301_v22, 0.0  ;;  %v310_v31 = vmax.f32 %v302_v23, 0.0  ;;  %v311_v32 = vmax.f32 %v303_v24, 0.0  ;;  %v312_v33 = vmax.f32 %v304_v25, 0.0 }
  0x1b   : > { %v313_v34 = vmax.f32 %v305_v26, 0.0  ;;  %v314_v35 = vmax.f32 %v306_v27, 0.0  ;;  %v315_v36 = vmax.f32 %v307_v28, 0.0  ;;  %v316_v37 = vmax.f32 %v308_v29, 0.0 }
  0x1c   : > { %v498_v38 = vpack.c.bf16 %v310_v31, %v309_v30  ;;  %v503_v39 = vpack.c.bf16 %v312_v33, %v311_v32 }
  0x1d   : > { %v508_v40 = vpack.c.bf16 %v314_v35, %v313_v34  ;;  %v513_v41 = vpack.c.bf16 %v316_v37, %v315_v36 }
  0x1e   : > { %499 = vst [vmem:[%s267_s7] sm:$0xff] %v498_v38  }
  0x1f   : > { %518 = vst [vmem:[%s267_s7 + $0x8] sm:$0xff] %v503_v39  }
  0x20   : > { %519 = vst [vmem:[%s267_s7 + $0x10] sm:$0xff] %v508_v40  }
  0x21   : > { %520 = vst [vmem:[%s267_s7 + $0x18] sm:$0xff] %v513_v41  }
  0x22 PF: > { %s13_s16 = sadd.s32 1, %s601_s16   ;;  %s691_s12 = smov %s593_s14 }
  0x23   : > { %p10_p7 = scmp.ge.s32.totalorder %s13_s16, 10   ;;  %s692_s13 = smov %s597_s15 }
  0x24   : > { %s693_s14 = smov %s696_s17  ;;  %s694_s15 = smov %s700_s18 }
  0x25   :  { %12 = sbr.rel (!%p10_p7) target bundleno = 3 (0x3), region = 68 }

// kernel: autoencoder_forward.67
= control target key start
LH: loop header
LB: loop body
LE: loop exit
PB: predicated region body
PF: predicated region fallthrough
CT: control target
= control target key end

     0   :  { %s1327_s15 = smov 0   ;;  %s1329_s16 = smov 0   ;;  %s1578_s0 = inlined_call_operand.vmem [shape: bf16[1,2,256,80], index: 0, kind: input, shape index: {}]   ;;  %s1579_s1 = inlined_call_operand.vmem [shape: bf16[1,80,128], index: 1, kind: input, shape index: {}]   ;;  %s1580_s2 = inlined_call_operand.vmem [shape: bf16[1,2,256,128], index: 2, kind: output, shape index: {0}]   ;;  %s1581_s3 = inlined_call_operand.vmem [shape: f32[1,2,1,128], index: 3, kind: output, shape index: {1}]   ;;  %s1582_s4 = inlined_call_operand.vmem [shape: f32[1,2,1,128], index: 4, kind: output, shape index: {2}]  }
   0x1   :  { %s1331_s17 = smov 0  }
   0x2 LB: > { %s30_s18 = sadd.s32 1, %s1295_s16  ;;  %p1012_p0 = scmp.ge.s32.totalorder %s1299_s17, 1  ;;  %s1299_s17 = sphi %s1331_s17, %s15_s17   ;;  %s1295_s16 = sphi %s1329_s16, %s1584_s16   ;;  %s1291_s15 = sphi %s1327_s15, %s1583_s15  }
   0x3   : > { %p32_p1 = scmp.ge.s32.totalorder %s30_s18, 2  ;;  %p217_p2 = scmp.lt.s32.totalorder %s1299_s17, 3 }
   0x5   : > { %s1586_s18 = smov (%p32_p1, %s30_s18), 0  ;;  %p218_p3 = pnand %p1012_p0, %p217_p2 }
   0x6   : > { %p281_p4 = scmp.lt.s32.totalorder (!%p218_p3), %s1291_s15, 1 }
   0x7   : > { %221 = sbr.rel (%p218_p3) target bundleno = 281 (0x119), region = 28 }
   0xc   : > { %v1141_v0 = vld [vmem:[%s1579_s1 + $0x20] sm:$0xff]  ;;  %v1140_v1 = vld [vmem:[%s1579_s1 + $0x18] sm:$0xff]  ;;  %v1139_v2 = vld [vmem:[%s1579_s1 + $0x10] sm:$0xff]  ;;  %s1588_s15 = smov (!%p281_p4, %s1291_s15), 1  ;;  %vm478_vm0 = vcmask 654336  }
   0xd   : > { %530 = vmatpush.bf16.msra.mxu0 %v1141_v0  ;;  %1237 = vmatpush.bf16.msra.mxu1 %v1141_v0  ;;  %v1138_v3 = vld [vmem:[%s1579_s1 + $0x8] sm:$0xff]  ;;  %s1119_s27 = sshll.u32 %s1588_s15, 7  ;;  %v1137_v4 = vld [vmem:[%s1579_s1] sm:$0xff]  ;;  %s1510_s12 = scalar_lea.vmem %s1581_s3, %s1588_s15 }
   0xe   : > { %1238 = vmatpush.bf16.msra.mxu2 %v1141_v0  ;;  %1239 = vmatpush.bf16.msra.mxu3 %v1141_v0  ;;  %s1368_s6 = scalar_lea.vmem %s1578_s0, %s1119_s27  ;;  %s1411_s9 = scalar_lea.vmem %s1580_s2, %s1119_s27 }
   0xf   : > { %v1121_v5 = vld [vmem:[%s1368_s6] sm:$0xff]  ;;  %v1122_v9 = vld [vmem:[%s1368_s6 + $0x8] sm:$0xff]  ;;  %v1123_v13 = vld [vmem:[%s1368_s6 + $0x10] sm:$0xff]  ;;  %s1516_s19 = scalar_lea.vmem %s1582_s4, %s1588_s15 }
  0x10   : > { %v1125_v6 = vld [vmem:[%s1368_s6 + $0x20] sm:$0xff]  ;;  %v1126_v10 = vld [vmem:[%s1368_s6 + $0x28] sm:$0xff]  ;;  %v1127_v14 = vld [vmem:[%s1368_s6 + $0x30] sm:$0xff] }
  0x11   : > { %531 = vmatpush.bf16.msra.mxu0 %v1140_v1  ;;  %1240 = vmatpush.bf16.msra.mxu1 %v1140_v1  ;;  %v1129_v7 = vld [vmem:[%s1368_s6 + $0x40] sm:$0xff]  ;;  %v1130_v11 = vld [vmem:[%s1368_s6 + $0x48] sm:$0xff]  ;;  %v1131_v15 = vld [vmem:[%s1368_s6 + $0x50] sm:$0xff] }
  0x12   : > { %1241 = vmatpush.bf16.msra.mxu2 %v1140_v1  ;;  %1242 = vmatpush.bf16.msra.mxu3 %v1140_v1  ;;  %v1133_v8 = vld [vmem:[%s1368_s6 + $0x60] sm:$0xff]  ;;  %v1134_v12 = vld [vmem:[%s1368_s6 + $0x68] sm:$0xff]  ;;  %v1135_v16 = vld [vmem:[%s1368_s6 + $0x70] sm:$0xff] }
  0x13   : > { %v1124_v17 = vld [vmem:[%s1368_s6 + $0x18] sm:$0xff] }
  0x14   : > { %v1128_v18 = vld [vmem:[%s1368_s6 + $0x38] sm:$0xff] }
  0x15   : > { %532 = vmatpush.bf16.msra.mxu0 %v1139_v2  ;;  %1243 = vmatpush.bf16.msra.mxu1 %v1139_v2  ;;  %v1132_v19 = vld [vmem:[%s1368_s6 + $0x58] sm:$0xff] }
  0x16   : > { %1244 = vmatpush.bf16.msra.mxu2 %v1139_v2  ;;  %1245 = vmatpush.bf16.msra.mxu3 %v1139_v2  ;;  %v1136_v20 = vld [vmem:[%s1368_s6 + $0x78] sm:$0xff] }
  0x19   : > { %533 = vmatpush.bf16.msra.mxu0 %v1138_v3  ;;  %1246 = vmatpush.bf16.msra.mxu1 %v1138_v3 }
  0x1a   : > { %1247 = vmatpush.bf16.msra.mxu2 %v1138_v3  ;;  %1248 = vmatpush.bf16.msra.mxu3 %v1138_v3 }
  0x1d   : > { %534 = vmatpush.bf16.msra.mxu0 %v1137_v4  ;;  %1249 = vmatpush.bf16.msra.mxu1 %v1137_v4 }
  0x1e   : > { %1250 = vmatpush.bf16.msra.mxu2 %v1137_v4  ;;  %1251 = vmatpush.bf16.msra.mxu3 %v1137_v4 }
  0x20   : > { %1101 = vmatmul.msk.bf16.vlgmr.msra.gmra.mxu0 %vm478_vm0, %v1121_v5  ;;  %1105 = vmatmul.msk.bf16.vlgmr.msra.gmra.mxu1 %vm478_vm0, %v1125_v6 }
  0x21   : > { %1109 = vmatmul.msk.bf16.vlgmr.msra.gmra.mxu2 %vm478_vm0, %v1129_v7  ;;  %1113 = vmatmul.msk.bf16.vlgmr.msra.gmra.mxu3 %vm478_vm0, %v1133_v8 }
  0x30   : > { %1102 = vmatmul.msk.bf16.gmra.mxu0 %vm478_vm0, %v1122_v9  ;;  %1106 = vmatmul.msk.bf16.gmra.mxu1 %vm478_vm0, %v1126_v10 }
  0x31   : > { %1110 = vmatmul.msk.bf16.gmra.mxu2 %vm478_vm0, %v1130_v11  ;;  %1114 = vmatmul.msk.bf16.gmra.mxu3 %vm478_vm0, %v1134_v12 }
  0x40   : > { %1103 = vmatmul.msk.bf16.gmra.mxu0 %vm478_vm0, %v1123_v13  ;;  %1107 = vmatmul.msk.bf16.gmra.mxu1 %vm478_vm0, %v1127_v14 }
  0x41   : > { %1111 = vmatmul.msk.bf16.gmra.mxu2 %vm478_vm0, %v1131_v15  ;;  %1115 = vmatmul.msk.bf16.gmra.mxu3 %vm478_vm0, %v1135_v16 }
  0x50   : > { %1104 = vmatmul.msk.bf16.gmra.mxu0 %vm478_vm0, %v1124_v17  ;;  %1108 = vmatmul.msk.bf16.gmra.mxu1 %vm478_vm0, %v1128_v18 }
  0x51   : > { %1112 = vmatmul.msk.bf16.gmra.mxu2 %vm478_vm0, %v1132_v19  ;;  %1116 = vmatmul.msk.bf16.gmra.mxu3 %vm478_vm0, %v1136_v20 }
  0x9d   : > { %v536_v21 = vpop.f32.mrf.mxu0  ;;  %v1402_v22 = vpop.f32.mrf.mxu1 }
  0x9e   : > { %v663_v54 = vmul.f32 %v536_v21, %v536_v21 }
  0xa4   : > { %v1404_v23 = vpop.f32.mrf.mxu2  ;;  %v1415_v27 = vpop.f32.mrf.mxu3 }
  0xa5   : > { %v538_v24 = vpop.f32.mrf.mxu0  ;;  %v1413_v25 = vpop.f32.mrf.mxu1 }
  0xa6   : > { %v1145_v26 = vpack.c.bf16 %v538_v24, %v536_v21  ;;  %v1165_v28 = vpack.c.bf16 %v1413_v25, %v1402_v22  ;;  %v664_v53 = vmul.f32 %v538_v24, %v538_v24  ;;  %v623_v55 = vadd.f32 %v538_v24, %v536_v21 }
  0xa7   : > { %v671_v24 = vmul.f32 %v1402_v22, %v1402_v22 }
  0xa8   : > { %1146 = vst [vmem:[%s1411_s9] sm:$0xff] %v1145_v26   ;;  %v695_v57 = vadd.f32 %v664_v53, %v663_v54 }
  0xa9   : > { %1225 = vst [vmem:[%s1411_s9 + $0x20] sm:$0xff] %v1165_v28  }
  0xac   : > { %v1421_v29 = vpop.f32.mrf.mxu2  ;;  %v1427_v33 = vpop.f32.mrf.mxu3 }
  0xad   : > { %v541_v30 = vpop.f32.mrf.mxu0  ;;  %v1423_v31 = vpop.f32.mrf.mxu1  ;;  %v1185_v32 = vpack.c.bf16 %v1421_v29, %v1404_v23  ;;  %v1205_v34 = vpack.c.bf16 %v1427_v33, %v1415_v27 }
  0xae   : > { %v665_v56 = vmul.f32 %v541_v30, %v541_v30  ;;  %v624_v58 = vadd.f32 %v623_v55, %v541_v30 }
  0xaf   : > { %1229 = vst [vmem:[%s1411_s9 + $0x40] sm:$0xff] %v1185_v32  }
  0xb0   : > { %1233 = vst [vmem:[%s1411_s9 + $0x60] sm:$0xff] %v1205_v34   ;;  %v696_v0 = vadd.f32 %v695_v57, %v665_v56 }
  0xb4   : > { %v1433_v35 = vpop.f32.mrf.mxu2  ;;  %v1437_v39 = vpop.f32.mrf.mxu3 }
  0xb5   : > { %v543_v36 = vpop.f32.mrf.mxu0  ;;  %v1435_v37 = vpop.f32.mrf.mxu1 }
  0xb6   : > { %v1150_v38 = vpack.c.bf16 %v543_v36, %v541_v30  ;;  %v1170_v40 = vpack.c.bf16 %v1435_v37, %v1423_v31  ;;  %v666_v59 = vmul.f32 %v543_v36, %v543_v36  ;;  %v625_v1 = vadd.f32 %v624_v58, %v543_v36 }
  0xb7   : > { %v672_v30 = vmul.f32 %v1413_v25, %v1413_v25  ;;  %v673_v36 = vmul.f32 %v1423_v31, %v1423_v31 }
  0xb8   : > { %1222 = vst [vmem:[%s1411_s9 + $0x8] sm:$0xff] %v1150_v38   ;;  %v697_v5 = vadd.f32 %v696_v0, %v666_v59 }
  0xb9   : > { %1226 = vst [vmem:[%s1411_s9 + $0x28] sm:$0xff] %v1170_v40  }
  0xbc   : > { %v1443_v41 = vpop.f32.mrf.mxu2  ;;  %v1449_v45 = vpop.f32.mrf.mxu3 }
  0xbd   : > { %v546_v42 = vpop.f32.mrf.mxu0  ;;  %v1445_v43 = vpop.f32.mrf.mxu1  ;;  %v1190_v44 = vpack.c.bf16 %v1443_v41, %v1433_v35  ;;  %v1210_v46 = vpack.c.bf16 %v1449_v45, %v1437_v39 }
  0xbe   : > { %v667_v2 = vmul.f32 %v546_v42, %v546_v42  ;;  %v626_v6 = vadd.f32 %v625_v1, %v546_v42  ;;  %v680_v1 = vmul.f32 %v1421_v29, %v1421_v29 }
  0xbf   : > { %1230 = vst [vmem:[%s1411_s9 + $0x48] sm:$0xff] %v1190_v44   ;;  %v674_v44 = vmul.f32 %v1435_v37, %v1435_v37 }
  0xc0   : > { %1234 = vst [vmem:[%s1411_s9 + $0x68] sm:$0xff] %v1210_v46   ;;  %v698_v8 = vadd.f32 %v697_v5, %v667_v2  ;;  %v681_v5 = vmul.f32 %v1433_v35, %v1433_v35 }
  0xc4   : > { %v1455_v47 = vpop.f32.mrf.mxu2  ;;  %v1459_v51 = vpop.f32.mrf.mxu3 }
  0xc5   : > { %v548_v48 = vpop.f32.mrf.mxu0  ;;  %v1457_v49 = vpop.f32.mrf.mxu1 }
  0xc6   : > { %v1155_v50 = vpack.c.bf16 %v548_v48, %v546_v42  ;;  %v1175_v52 = vpack.c.bf16 %v1457_v49, %v1445_v43  ;;  %v668_v7 = vmul.f32 %v548_v48, %v548_v48  ;;  %v627_v9 = vadd.f32 %v626_v6, %v548_v48 }
  0xc7   : > { %v676_v54 = vmul.f32 %v1457_v49, %v1457_v49 }
  0xc8   : > { %1223 = vst [vmem:[%s1411_s9 + $0x10] sm:$0xff] %v1155_v50   ;;  %v699_v11 = vadd.f32 %v698_v8, %v668_v7  ;;  %v682_v8 = vmul.f32 %v1443_v41, %v1443_v41 }
  0xc9   : > { %1227 = vst [vmem:[%s1411_s9 + $0x30] sm:$0xff] %v1175_v52  }
  0xcc   : > { %v1465_v60 = vpop.f32.mrf.mxu2  ;;  %v1469_v3 = vpop.f32.mrf.mxu3 }
  0xcd   : > { %v551_v61 = vpop.f32.mrf.mxu0  ;;  %v571_v62 = vpop.f32.mrf.mxu1  ;;  %v1195_v63 = vpack.c.bf16 %v1465_v60, %v1455_v47  ;;  %v1215_v4 = vpack.c.bf16 %v1469_v3, %v1459_v51 }
  0xce   : > { %v669_v10 = vmul.f32 %v551_v61, %v551_v61  ;;  %v628_v12 = vadd.f32 %v627_v9, %v551_v61  ;;  %v677_v57 = vmul.f32 %v571_v62, %v571_v62 }
  0xcf   : > { %1231 = vst [vmem:[%s1411_s9 + $0x50] sm:$0xff] %v1195_v63  }
  0xd0   : > { %1235 = vst [vmem:[%s1411_s9 + $0x70] sm:$0xff] %v1215_v4   ;;  %v700_v16 = vadd.f32 %v699_v11, %v669_v10  ;;  %v683_v10 = vmul.f32 %v1455_v47, %v1455_v47 }
  0xd4   : > { %v1475_v13 = vpop.f32.mrf.mxu2  ;;  %v1477_v20 = vpop.f32.mrf.mxu3 }
  0xd5   : > { %v553_v14 = vpop.f32.mrf.mxu0  ;;  %v573_v15 = vpop.f32.mrf.mxu1 }
  0xd6   : > { %v629_v17 = vadd.f32 %v628_v12, %v553_v14  ;;  %v670_v18 = vmul.f32 %v553_v14, %v553_v14  ;;  %v1160_v19 = vpack.c.bf16 %v553_v14, %v551_v61  ;;  %v1180_v21 = vpack.c.bf16 %v573_v15, %v571_v62 }
  0xd7   : > { %v678_v61 = vmul.f32 %v573_v15, %v573_v15  ;;  %v684_v14 = vmul.f32 %v1465_v60, %v1465_v60 }
  0xd8   : > { %v630_v26 = vadd.f32 %v629_v17, %v1402_v22  ;;  %v701_v28 = vadd.f32 %v700_v16, %v670_v18  ;;  %1224 = vst [vmem:[%s1411_s9 + $0x18] sm:$0xff] %v1160_v19   ;;  %v685_v17 = vmul.f32 %v1475_v13, %v1475_v13 }
  0xd9   : > { %1228 = vst [vmem:[%s1411_s9 + $0x38] sm:$0xff] %v1180_v21   ;;  %v687_v21 = vmul.f32 %v1415_v27, %v1415_v27 }
  0xda   : > { %v631_v32 = vadd.f32 %v630_v26, %v1413_v25  ;;  %v702_v34 = vadd.f32 %v701_v28, %v671_v24  ;;  %v688_v26 = vmul.f32 %v1427_v33, %v1427_v33 }
  0xdc   : > { %v632_v38 = vadd.f32 %v631_v32, %v1423_v31  ;;  %v703_v40 = vadd.f32 %v702_v34, %v672_v30  ;;  %v593_v42 = vpop.f32.mrf.mxu2  ;;  %v1494_v25 = vpop.f32.mrf.mxu3  ;;  %v675_v31 = vmul.f32 %v1445_v43, %v1445_v43  ;;  %v689_v30 = vmul.f32 %v1437_v39, %v1437_v39 }
  0xdd   : > { %v1200_v22 = vpack.c.bf16 %v593_v42, %v1475_v13  ;;  %v1220_v50 = vpack.c.bf16 %v1494_v25, %v1477_v20  ;;  %v686_v19 = vmul.f32 %v593_v42, %v593_v42  ;;  %v690_v34 = vmul.f32 %v1449_v45, %v1449_v45 }
  0xde   : > { %v704_v46 = vadd.f32 %v703_v40, %v673_v36  ;;  %v633_v48 = vadd.f32 %v632_v38, %v1435_v37 }
  0xdf   : > { %1232 = vst [vmem:[%s1411_s9 + $0x58] sm:$0xff] %v1200_v22   ;;  %v692_v22 = vmul.f32 %v1469_v3, %v1469_v3 }
  0xe0   : > { %v634_v52 = vadd.f32 %v633_v48, %v1445_v43  ;;  %v705_v53 = vadd.f32 %v704_v46, %v674_v44  ;;  %1236 = vst [vmem:[%s1411_s9 + $0x78] sm:$0xff] %v1220_v50   ;;  %v693_v48 = vmul.f32 %v1477_v20, %v1477_v20 }
  0xe2   : > { %v635_v55 = vadd.f32 %v634_v52, %v1457_v49  ;;  %v706_v56 = vadd.f32 %v705_v53, %v675_v31  ;;  %v1301_v49 = vmov 0.0  }
  0xe3   : > { %620 = vst [vmem:[%s1510_s12] sm:$0x1] %v1301_v49 }
  0xe4   : > { %v636_v37 = vadd.f32 %v635_v55, %v571_v62  ;;  %v707_v58 = vadd.f32 %v706_v56, %v676_v54  ;;  %v679_v62 = vmul.f32 %v1404_v23, %v1404_v23  ;;  %621 = vst [vmem:[%s1516_s19] sm:$0x1] %v1301_v49 }
  0xe6   : > { %v708_v43 = vadd.f32 %v707_v58, %v677_v57  ;;  %v637_v59 = vadd.f32 %v636_v37, %v573_v15 }
  0xe8   : > { %v638_v63 = vadd.f32 %v637_v59, %v1404_v23  ;;  %v709_v0 = vadd.f32 %v708_v43, %v678_v61 }
  0xea   : > { %v639_v2 = vadd.f32 %v638_v63, %v1421_v29  ;;  %v710_v4 = vadd.f32 %v709_v0, %v679_v62 }
  0xeb   : > { %v662_v61 = vld [vmem:[%s1516_s19] sm:$0x1] }
  0xec   : > { %v640_v6 = vadd.f32 %v639_v2, %v1433_v35  ;;  %v711_v7 = vadd.f32 %v710_v4, %v680_v1 }
  0xee   : > { %v712_v9 = vadd.f32 %v711_v7, %v681_v5  ;;  %v641_v23 = vadd.f32 %v640_v6, %v1443_v41 }
  0xf0   : > { %v642_v11 = vadd.f32 %v641_v23, %v1455_v47  ;;  %v713_v12 = vadd.f32 %v712_v9, %v682_v8 }
  0xf2   : > { %v643_v29 = vadd.f32 %v642_v11, %v1465_v60  ;;  %v714_v15 = vadd.f32 %v713_v12, %v683_v10 }
  0xf4   : > { %v715_v35 = vadd.f32 %v714_v15, %v684_v14  ;;  %v644_v16 = vadd.f32 %v643_v29, %v1475_v13 }
  0xf6   : > { %v716_v18 = vadd.f32 %v715_v35, %v685_v17  ;;  %v645_v41 = vadd.f32 %v644_v16, %v593_v42 }
  0xf8   : > { %v646_v47 = vadd.f32 %v645_v41, %v1415_v27  ;;  %v717_v24 = vadd.f32 %v716_v18, %v686_v19  ;;  %v691_v27 = vmul.f32 %v1459_v51, %v1459_v51 }
  0xfa   : > { %v647_v60 = vadd.f32 %v646_v47, %v1427_v33  ;;  %v718_v28 = vadd.f32 %v717_v24, %v687_v21 }
  0xfc   : > { %v648_v13 = vadd.f32 %v647_v60, %v1437_v39  ;;  %v719_v32 = vadd.f32 %v718_v28, %v688_v26 }
  0xfe   : > { %v720_v36 = vadd.f32 %v719_v32, %v689_v30  ;;  %v649_v38 = vadd.f32 %v648_v13, %v1449_v45 }
 0x100   : > { %v650_v40 = vadd.f32 %v649_v38, %v1459_v51  ;;  %v721_v42 = vadd.f32 %v720_v36, %v690_v34  ;;  %v694_v51 = vmul.f32 %v1494_v25, %v1494_v25 }
 0x102   : > { %v651_v33 = vadd.f32 %v650_v40, %v1469_v3  ;;  %v722_v44 = vadd.f32 %v721_v42, %v691_v27 }
 0x104   : > { %v723_v39 = vadd.f32 %v722_v44, %v692_v22  ;;  %v652_v46 = vadd.f32 %v651_v33, %v1477_v20  ;;  %v622_v20 = vld [vmem:[%s1510_s12] sm:$0x1] }
 0x106   : > { %v724_v45 = vadd.f32 %v723_v39, %v693_v48  ;;  %v653_v50 = vadd.f32 %v652_v46, %v1494_v25 }
 0x108   : > { %v654_v31 = vrot.slane %v653_v50, 4  ;;  %v725_v52 = vadd.f32 %v724_v45, %v694_v51 }
 0x10a   : > { %v655_v53 = vadd.f32 %v654_v31, %v653_v50  ;;  %v726_v3 = vrot.slane %v725_v52, 4 }
 0x10c   : > { %v656_v54 = vrot.slane %v655_v53, 2  ;;  %v727_v55 = vadd.f32 %v726_v3, %v725_v52 }
 0x10e   : > { %v657_v56 = vadd.f32 %v656_v54, %v655_v53  ;;  %v728_v37 = vrot.slane %v727_v55, 2 }
 0x110   : > { %v658_v57 = vrot.slane %v657_v56, 1  ;;  %v729_v58 = vadd.f32 %v728_v37, %v727_v55 }
 0x112   : > { %v659_v43 = vadd.f32 %v658_v57, %v657_v56  ;;  %v730_v59 = vrot.slane %v729_v58, 1 }
 0x114   : > { %v660_v49 = vadd.f32 %v659_v43, %v622_v20  ;;  %v731_v62 = vadd.f32 %v730_v59, %v729_v58 }
 0x116   : > { %661 = vst [vmem:[%s1510_s12] sm:$0x1] %v660_v49  ;;  %v732_v25 = vadd.f32 %v731_v62, %v662_v61 }
 0x118   : > { %733 = vst [vmem:[%s1516_s19] sm:$0x1] %v732_v25 }
 0x119 PF: > { %s15_s17 = sadd.s32 1, %s1299_s17   ;;  %s1583_s15 = smov %s1295_s16 }
 0x11a   : > { %p12_p5 = scmp.ge.s32.totalorder %s15_s17, 4   ;;  %s1584_s16 = smov %s1586_s18 }
 0x11c   :  { %14 = sbr.rel (!%p12_p5) target bundleno = 2 (0x2), region = 89 }

// kernel: autoencoder_forward.69
= control target key start
LH: loop header
LB: loop body
LE: loop exit
PB: predicated region body
PF: predicated region fallthrough
CT: control target
= control target key end

     0   :  { %s1088_s9 = smov 0   ;;  %s1090_s10 = smov 0   ;;  %s1189_s0 = inlined_call_operand.vmem [shape: bf16[1,2,256,48], index: 0, kind: input, shape index: {}]   ;;  %s1190_s1 = inlined_call_operand.vmem [shape: bf16[1,48,128], index: 1, kind: input, shape index: {}]   ;;  %s1191_s2 = inlined_call_operand.vmem [shape: bf16[1,2,256,128], index: 2, kind: output, shape index: {}]  }
   0x1   :  { %s1092_s11 = smov 0  }
   0x2 LB: > { %s27_s12 = sadd.s32 1, %s1067_s10  ;;  %p737_p0 = scmp.ge.s32.totalorder %s1071_s11, 1  ;;  %s1071_s11 = sphi %s1092_s11, %s12_s11   ;;  %s1067_s10 = sphi %s1090_s10, %s1193_s10   ;;  %s1063_s9 = sphi %s1088_s9, %s1192_s9  }
   0x3   : > { %p29_p1 = scmp.ge.s32.totalorder %s27_s12, 2  ;;  %p158_p2 = scmp.lt.s32.totalorder %s1071_s11, 3 }
   0x5   : > { %s1195_s12 = smov (%p29_p1, %s27_s12), 0  ;;  %p159_p3 = pnand %p737_p0, %p158_p2 }
   0x6   : > { %p204_p4 = scmp.lt.s32.totalorder (!%p159_p3), %s1063_s9, 1 }
   0x7   : > { %162 = sbr.rel (%p159_p3) target bundleno = 224 (0xe0), region = 28 }
   0xc   : > { %v856_v0 = vld [vmem:[%s1190_s1 + $0x10] sm:$0xff]  ;;  %v855_v1 = vld [vmem:[%s1190_s1 + $0x8] sm:$0xff]  ;;  %s1197_s9 = smov (!%p204_p4, %s1063_s9), 1  ;;  %v854_v2 = vld [vmem:[%s1190_s1] sm:$0xff]  ;;  %vm371_vm0 = vcmask 392192  }
   0xd   : > { %425 = vmatpush.bf16.msra.mxu0 %v856_v0  ;;  %952 = vmatpush.bf16.msra.mxu1 %v856_v0  ;;  %s836_s17 = sshll.u32 %s1197_s9, 7 }
   0xe   : > { %953 = vmatpush.bf16.msra.mxu2 %v856_v0  ;;  %954 = vmatpush.bf16.msra.mxu3 %v856_v0  ;;  %s1123_s22 = scalar_lea.vmem %s1189_s0, %s836_s17  ;;  %s1162_s25 = scalar_lea.vmem %s1191_s2, %s836_s17 }
   0xf   : > { %v838_v3 = vld [vmem:[%s1123_s22] sm:$0xff]  ;;  %v839_v7 = vld [vmem:[%s1123_s22 + $0x8] sm:$0xff]  ;;  %v840_v11 = vld [vmem:[%s1123_s22 + $0x10] sm:$0xff] }
  0x10   : > { %v842_v4 = vld [vmem:[%s1123_s22 + $0x20] sm:$0xff]  ;;  %v843_v8 = vld [vmem:[%s1123_s22 + $0x28] sm:$0xff]  ;;  %v844_v12 = vld [vmem:[%s1123_s22 + $0x30] sm:$0xff] }
  0x11   : > { %426 = vmatpush.bf16.msra.mxu0 %v855_v1  ;;  %955 = vmatpush.bf16.msra.mxu1 %v855_v1  ;;  %v846_v5 = vld [vmem:[%s1123_s22 + $0x40] sm:$0xff]  ;;  %v847_v9 = vld [vmem:[%s1123_s22 + $0x48] sm:$0xff]  ;;  %v848_v13 = vld [vmem:[%s1123_s22 + $0x50] sm:$0xff] }
  0x12   : > { %956 = vmatpush.bf16.msra.mxu2 %v855_v1  ;;  %957 = vmatpush.bf16.msra.mxu3 %v855_v1  ;;  %v850_v6 = vld [vmem:[%s1123_s22 + $0x60] sm:$0xff]  ;;  %v851_v10 = vld [vmem:[%s1123_s22 + $0x68] sm:$0xff]  ;;  %v852_v14 = vld [vmem:[%s1123_s22 + $0x70] sm:$0xff] }
  0x13   : > { %v841_v15 = vld [vmem:[%s1123_s22 + $0x18] sm:$0xff] }
  0x14   : > { %v845_v16 = vld [vmem:[%s1123_s22 + $0x38] sm:$0xff] }
  0x15   : > { %427 = vmatpush.bf16.msra.mxu0 %v854_v2  ;;  %958 = vmatpush.bf16.msra.mxu1 %v854_v2  ;;  %v849_v17 = vld [vmem:[%s1123_s22 + $0x58] sm:$0xff] }
  0x16   : > { %959 = vmatpush.bf16.msra.mxu2 %v854_v2  ;;  %960 = vmatpush.bf16.msra.mxu3 %v854_v2  ;;  %v853_v18 = vld [vmem:[%s1123_s22 + $0x78] sm:$0xff] }
  0x18   : > { %818 = vmatmul.msk.bf16.vlgmr.msra.gmra.mxu0 %vm371_vm0, %v838_v3  ;;  %822 = vmatmul.msk.bf16.vlgmr.msra.gmra.mxu1 %vm371_vm0, %v842_v4 }
  0x19   : > { %826 = vmatmul.msk.bf16.vlgmr.msra.gmra.mxu2 %vm371_vm0, %v846_v5  ;;  %830 = vmatmul.msk.bf16.vlgmr.msra.gmra.mxu3 %vm371_vm0, %v850_v6 }
  0x28   : > { %819 = vmatmul.msk.bf16.gmra.mxu0 %vm371_vm0, %v839_v7  ;;  %823 = vmatmul.msk.bf16.gmra.mxu1 %vm371_vm0, %v843_v8 }
  0x29   : > { %827 = vmatmul.msk.bf16.gmra.mxu2 %vm371_vm0, %v847_v9  ;;  %831 = vmatmul.msk.bf16.gmra.mxu3 %vm371_vm0, %v851_v10 }
  0x38   : > { %820 = vmatmul.msk.bf16.gmra.mxu0 %vm371_vm0, %v840_v11  ;;  %824 = vmatmul.msk.bf16.gmra.mxu1 %vm371_vm0, %v844_v12 }
  0x39   : > { %828 = vmatmul.msk.bf16.gmra.mxu2 %vm371_vm0, %v848_v13  ;;  %832 = vmatmul.msk.bf16.gmra.mxu3 %vm371_vm0, %v852_v14 }
  0x48   : > { %821 = vmatmul.msk.bf16.gmra.mxu0 %vm371_vm0, %v841_v15  ;;  %825 = vmatmul.msk.bf16.gmra.mxu1 %vm371_vm0, %v845_v16 }
  0x49   : > { %829 = vmatmul.msk.bf16.gmra.mxu2 %vm371_vm0, %v849_v17  ;;  %833 = vmatmul.msk.bf16.gmra.mxu3 %vm371_vm0, %v853_v18 }
  0x95   : > { %v429_v19 = vpop.f32.mrf.mxu0  ;;  %v449_v20 = vpop.f32.mrf.mxu1 }
  0x96   : > { %985 = vtanh.f32 %v429_v19 }
  0x97   : > { %987 = vtanh.f32 %v449_v20 }
  0x9c   : > { %v469_v21 = vpop.f32.mrf.mxu2  ;;  %v489_v22 = vpop.f32.mrf.mxu3 }
  0x9d   : > { %v431_v23 = vpop.f32.mrf.mxu0  ;;  %v451_v24 = vpop.f32.mrf.mxu1 }
  0x9e   : > { %989 = vtanh.f32 %v431_v23  ;;  %v986_v25 = vpop.eup %985 }
  0x9f   : > { %991 = vtanh.f32 %v451_v24  ;;  %v988_v26 = vpop.eup %987 }
  0xa0   : > { %993 = vtanh.f32 %v469_v21 }
  0xa1   : > { %995 = vtanh.f32 %v489_v22 }
  0xa4   : > { %v471_v27 = vpop.f32.mrf.mxu2  ;;  %v491_v28 = vpop.f32.mrf.mxu3 }
  0xa5   : > { %v990_v29 = vpop.eup %989  ;;  %997 = vtanh.f32 %v471_v27  ;;  %v434_v30 = vpop.f32.mrf.mxu0 }
  0xa6   : > { %v454_v31 = vpop.f32.mrf.mxu1  ;;  %v992_v32 = vpop.eup %991  ;;  %v860_v33 = vpack.c.bf16 %v990_v29, %v986_v25  ;;  %999 = vtanh.f32 %v491_v28 }
  0xa7   : > { %v880_v34 = vpack.c.bf16 %v992_v32, %v988_v26  ;;  %v994_v35 = vpop.eup %993  ;;  %1001 = vtanh.f32 %v434_v30 }
  0xa8   : > { %861 = vst [vmem:[%s1162_s25] sm:$0xff] %v860_v33   ;;  %v996_v36 = vpop.eup %995  ;;  %1003 = vtanh.f32 %v454_v31 }
  0xa9   : > { %940 = vst [vmem:[%s1162_s25 + $0x20] sm:$0xff] %v880_v34  }
  0xab   : > { %v998_v37 = vpop.eup %997 }
  0xac   : > { %v1000_v38 = vpop.eup %999  ;;  %v900_v39 = vpack.c.bf16 %v998_v37, %v994_v35  ;;  %v474_v40 = vpop.f32.mrf.mxu2 }
  0xad   : > { %v494_v41 = vpop.f32.mrf.mxu3  ;;  %v920_v42 = vpack.c.bf16 %v1000_v38, %v996_v36  ;;  %v436_v43 = vpop.f32.mrf.mxu0 }
  0xae   : > { %v456_v44 = vpop.f32.mrf.mxu1  ;;  %944 = vst [vmem:[%s1162_s25 + $0x40] sm:$0xff] %v900_v39   ;;  %1005 = vtanh.f32 %v436_v43  ;;  %v1002_v45 = vpop.eup %1001 }
  0xaf   : > { %948 = vst [vmem:[%s1162_s25 + $0x60] sm:$0xff] %v920_v42   ;;  %1007 = vtanh.f32 %v456_v44  ;;  %v1004_v46 = vpop.eup %1003 }
  0xb0   : > { %1009 = vtanh.f32 %v474_v40 }
  0xb1   : > { %1011 = vtanh.f32 %v494_v41 }
  0xb4   : > { %v476_v47 = vpop.f32.mrf.mxu2  ;;  %v1006_v49 = vpop.eup %1005 }
  0xb5   : > { %v496_v48 = vpop.f32.mrf.mxu3  ;;  %1013 = vtanh.f32 %v476_v47  ;;  %v439_v50 = vpop.f32.mrf.mxu0  ;;  %v865_v53 = vpack.c.bf16 %v1006_v49, %v1002_v45 }
  0xb6   : > { %v459_v51 = vpop.f32.mrf.mxu1  ;;  %v1008_v52 = vpop.eup %1007  ;;  %1015 = vtanh.f32 %v496_v48 }
  0xb7   : > { %v885_v54 = vpack.c.bf16 %v1008_v52, %v1004_v46  ;;  %937 = vst [vmem:[%s1162_s25 + $0x8] sm:$0xff] %v865_v53   ;;  %v1010_v55 = vpop.eup %1009  ;;  %1017 = vtanh.f32 %v439_v50 }
  0xb8   : > { %v1012_v56 = vpop.eup %1011  ;;  %1019 = vtanh.f32 %v459_v51 }
  0xb9   : > { %941 = vst [vmem:[%s1162_s25 + $0x28] sm:$0xff] %v885_v54  }
  0xbb   : > { %v1014_v57 = vpop.eup %1013 }
  0xbc   : > { %v1016_v58 = vpop.eup %1015  ;;  %v905_v59 = vpack.c.bf16 %v1014_v57, %v1010_v55  ;;  %v479_v60 = vpop.f32.mrf.mxu2 }
  0xbd   : > { %v499_v61 = vpop.f32.mrf.mxu3  ;;  %v925_v62 = vpack.c.bf16 %v1016_v58, %v1012_v56  ;;  %v441_v63 = vpop.f32.mrf.mxu0 }
  0xbe   : > { %v461_v0 = vpop.f32.mrf.mxu1  ;;  %945 = vst [vmem:[%s1162_s25 + $0x48] sm:$0xff] %v905_v59   ;;  %1021 = vtanh.f32 %v441_v63  ;;  %v1018_v1 = vpop.eup %1017 }
  0xbf   : > { %949 = vst [vmem:[%s1162_s25 + $0x68] sm:$0xff] %v925_v62   ;;  %1023 = vtanh.f32 %v461_v0  ;;  %v1020_v2 = vpop.eup %1019 }
  0xc0   : > { %1025 = vtanh.f32 %v479_v60 }
  0xc1   : > { %1027 = vtanh.f32 %v499_v61 }
  0xc4   : > { %v481_v3 = vpop.f32.mrf.mxu2  ;;  %v1022_v5 = vpop.eup %1021 }
  0xc5   : > { %v501_v4 = vpop.f32.mrf.mxu3  ;;  %1029 = vtanh.f32 %v481_v3  ;;  %v444_v6 = vpop.f32.mrf.mxu0  ;;  %v870_v9 = vpack.c.bf16 %v1022_v5, %v1018_v1 }
  0xc6   : > { %v464_v7 = vpop.f32.mrf.mxu1  ;;  %v1024_v8 = vpop.eup %1023  ;;  %1031 = vtanh.f32 %v501_v4 }
  0xc7   : > { %v890_v10 = vpack.c.bf16 %v1024_v8, %v1020_v2  ;;  %938 = vst [vmem:[%s1162_s25 + $0x10] sm:$0xff] %v870_v9   ;;  %v1026_v11 = vpop.eup %1025  ;;  %1033 = vtanh.f32 %v444_v6 }
  0xc8   : > { %v1028_v12 = vpop.eup %1027  ;;  %1035 = vtanh.f32 %v464_v7 }
  0xc9   : > { %942 = vst [vmem:[%s1162_s25 + $0x30] sm:$0xff] %v890_v10  }
  0xcb   : > { %v1030_v13 = vpop.eup %1029 }
  0xcc   : > { %v1032_v14 = vpop.eup %1031  ;;  %v910_v15 = vpack.c.bf16 %v1030_v13, %v1026_v11  ;;  %v484_v16 = vpop.f32.mrf.mxu2 }
  0xcd   : > { %v504_v17 = vpop.f32.mrf.mxu3  ;;  %v930_v18 = vpack.c.bf16 %v1032_v14, %v1028_v12  ;;  %v446_v19 = vpop.f32.mrf.mxu0 }
  0xce   : > { %v466_v20 = vpop.f32.mrf.mxu1  ;;  %946 = vst [vmem:[%s1162_s25 + $0x50] sm:$0xff] %v910_v15   ;;  %1037 = vtanh.f32 %v446_v19  ;;  %v1034_v21 = vpop.eup %1033 }
  0xcf   : > { %950 = vst [vmem:[%s1162_s25 + $0x70] sm:$0xff] %v930_v18   ;;  %1039 = vtanh.f32 %v466_v20  ;;  %v1036_v22 = vpop.eup %1035 }
  0xd0   : > { %1041 = vtanh.f32 %v484_v16 }
  0xd1   : > { %1043 = vtanh.f32 %v504_v17 }
  0xd4   : > { %v486_v23 = vpop.f32.mrf.mxu2  ;;  %v1038_v25 = vpop.eup %1037 }
  0xd5   : > { %v506_v24 = vpop.f32.mrf.mxu3  ;;  %1045 = vtanh.f32 %v486_v23  ;;  %v1040_v26 = vpop.eup %1039  ;;  %v875_v27 = vpack.c.bf16 %v1038_v25, %v1034_v21 }
  0xd6   : > { %1047 = vtanh.f32 %v506_v24  ;;  %v895_v28 = vpack.c.bf16 %v1040_v26, %v1036_v22  ;;  %v1042_v29 = vpop.eup %1041 }
  0xd7   : > { %939 = vst [vmem:[%s1162_s25 + $0x18] sm:$0xff] %v875_v27   ;;  %v1044_v30 = vpop.eup %1043 }
  0xd8   : > { %943 = vst [vmem:[%s1162_s25 + $0x38] sm:$0xff] %v895_v28  }
  0xdb   : > { %v1046_v31 = vpop.eup %1045 }
  0xdc   : > { %v1048_v32 = vpop.eup %1047  ;;  %v915_v33 = vpack.c.bf16 %v1046_v31, %v1042_v29 }
  0xdd   : > { %v935_v34 = vpack.c.bf16 %v1048_v32, %v1044_v30 }
  0xde   : > { %947 = vst [vmem:[%s1162_s25 + $0x58] sm:$0xff] %v915_v33  }
  0xdf   : > { %951 = vst [vmem:[%s1162_s25 + $0x78] sm:$0xff] %v935_v34  }
  0xe0 PF: > { %s12_s11 = sadd.s32 1, %s1071_s11   ;;  %s1192_s9 = smov %s1067_s10 }
  0xe1   : > { %p9_p5 = scmp.ge.s32.totalorder %s12_s11, 4   ;;  %s1193_s10 = smov %s1195_s12 }
  0xe3   :  { %11 = sbr.rel (!%p9_p5) target bundleno = 2 (0x2), region = 61 }

</bundles_post_ra>
